<compile_context>
chip_gen: v7x
topology: tpu7x:2x2x1
jax: 0.10.0
libtpu: 0.0.40
codegen_flags: <defaults>
</compile_context>

<pallas_src>
import math

import jax
import jax.numpy as jnp
from jax import lax
from jax.experimental import pallas as pl
from jax.experimental.pallas import tpu as pltpu

HIDDEN = 100          # PyTorch hidden_size
HP = 128              # lane-padded hidden size
GP = 4 * HP           # packed gate width (i, f, g, o) = 512
NUM_LAYERS = 3


def _round_up(n, m):
    return ((n + m - 1) // m) * m


# ----------------------------- fused kernel ---------------------------------

def _lstm_fused_kernel(len_ref, x_ref,
                       wih0_ref, whh0_ref, b0_ref,
                       wih1_ref, whh1_ref, b1_ref,
                       wih2_ref, whh2_ref, b2_ref,
                       fcw_ref, fcb_ref,
                       out_ref,
                       yseq_scr, xproj_scr, h_scr, c_scr):
    """Fused 3-layer LSTM + FC.

    len_ref  : (BP, 1)  int32   valid lengths (padded rows = 0)
    x_ref    : (T, BP, DP)      padded embedding sequence (time-major)
    wih*_ref : (DP|HP, 4*HP)    packed, padded input weights
    whh*_ref : (HP, 4*HP)       packed, padded recurrent weights
    b*_ref   : (1, 4*HP)        packed bias (b_ih + b_hh)
    fcw_ref  : (HP, OP)         padded FC weight (transposed)
    fcb_ref  : (1, OP)          padded FC bias
    out_ref  : (BP, OP)         logits (padded)
    """
    T, BP, _ = x_ref.shape
    len_v = len_ref[...]                       # hoisted: one load, loop-invariant

    def run_layer(inp_flat, wih_ref, whh_ref, b_ref):
        # Hoisted input projection: one big GEMM + bias, outside the recurrence.
        xp = jnp.dot(inp_flat, wih_ref[...],
                     preferred_element_type=jnp.float32) + b_ref[...]
        xproj_scr[...] = xp.reshape(T, BP, GP)

        h_scr[...] = jnp.zeros_like(h_scr)
        c_scr[...] = jnp.zeros_like(c_scr)

        def step(t, carry):
            h = h_scr[...]
            c = c_scr[...]
            # Single fused 4-gate recurrent matmul: (BP, HP) x (HP, 4*HP).
            gates = xproj_scr[t] + jnp.dot(
                h, whh_ref[...], preferred_element_type=jnp.float32)
            i_g = jax.nn.sigmoid(gates[:, 0 * HP:1 * HP])
            f_g = jax.nn.sigmoid(gates[:, 1 * HP:2 * HP])
            g_g = jnp.tanh(gates[:, 2 * HP:3 * HP])
            o_g = jax.nn.sigmoid(gates[:, 3 * HP:4 * HP])
            c_new = f_g * c + i_g * g_g
            h_new = o_g * jnp.tanh(c_new)
            # pack_padded_sequence semantics: freeze state once t >= length.
            mask = t < len_v                   # (BP, 1) -> broadcasts over HP
            h_u = jnp.where(mask, h_new, h)
            c_u = jnp.where(mask, c_new, c)
            h_scr[...] = h_u
            c_scr[...] = c_u
            yseq_scr[t] = h_u
            return carry

        lax.fori_loop(0, T, step, 0, unroll=True)   # T static -> fully unrolled

    # layer 0 consumes the (padded) embedding sequence
    run_layer(x_ref[...].reshape(T * BP, x_ref.shape[2]),
              wih0_ref, whh0_ref, b0_ref)
    # layers 1, 2 consume the previous layer's hidden sequence (VMEM-resident)
    run_layer(yseq_scr[...].reshape(T * BP, HP), wih1_ref, whh1_ref, b1_ref)
    run_layer(yseq_scr[...].reshape(T * BP, HP), wih2_ref, whh2_ref, b2_ref)

    # fused FC epilogue on the last layer's final hidden state
    out_ref[...] = (jnp.dot(h_scr[...], fcw_ref[...],
                            preferred_element_type=jnp.float32)
                    + fcb_ref[...])


# ------------------------------ weight packing -------------------------------

def _pack_w(w, in_dim, in_pad):
    """PyTorch gate-stacked (4*HIDDEN, in_dim) -> packed (in_pad, 4*HP)."""
    w4 = w.reshape(4, HIDDEN, in_dim)
    w4t = jnp.transpose(w4, (0, 2, 1))                                # (4, in, H)
    w4p = jnp.pad(w4t, ((0, 0), (0, in_pad - in_dim), (0, HP - HIDDEN)))
    return jnp.transpose(w4p, (1, 0, 2)).reshape(in_pad, GP)


def _pack_b(b_ih, b_hh):
    b = (b_ih + b_hh).reshape(4, HIDDEN)
    b = jnp.pad(b, ((0, 0), (0, HP - HIDDEN)))
    return b.reshape(1, GP)


def init_params(key, num_embeddings, emb_dim, output_size):
    keys = jax.random.split(key, 3 + 4 * NUM_LAYERS)
    params = {}
    # frozen pretrained-style embedding table
    params["emb"] = jax.random.normal(keys[0], (num_embeddings, emb_dim),
                                      jnp.float32)
    k = 1.0 / math.sqrt(HIDDEN)
    dp = _round_up(emb_dim, 128)
    layers = []
    in_dim, in_pad = emb_dim, dp
    idx = 1
    for _ in range(NUM_LAYERS):
        w_ih = jax.random.uniform(keys[idx], (4 * HIDDEN, in_dim),
                                  jnp.float32, -k, k); idx += 1
        w_hh = jax.random.uniform(keys[idx], (4 * HIDDEN, HIDDEN),
                                  jnp.float32, -k, k); idx += 1
        b_ih = jax.random.uniform(keys[idx], (4 * HIDDEN,),
                                  jnp.float32, -k, k); idx += 1
        b_hh = jax.random.uniform(keys[idx], (4 * HIDDEN,),
                                  jnp.float32, -k, k); idx += 1
        layers.append((_pack_w(w_ih, in_dim, in_pad),
                       _pack_w(w_hh, HIDDEN, HP),
                       _pack_b(b_ih, b_hh)))
        in_dim, in_pad = HIDDEN, HP
    params["layers"] = layers

    w_fc = jax.random.uniform(keys[idx], (output_size, HIDDEN),
                              jnp.float32, -k, k); idx += 1
    b_fc = jax.random.uniform(keys[idx], (output_size,),
                              jnp.float32, -k, k)
    op = _round_up(output_size, 128)
    params["fc_w_t"] = jnp.pad(jnp.transpose(w_fc),
                               ((0, HP - HIDDEN), (0, op - output_size)))
    params["fc_b"] = b_fc                       # kept unpadded (carries true O)
    return params


# ------------------------------ model forward --------------------------------

def lstm_model_forward(params, token_ids, lengths):
    B, T = token_ids.shape
    # embedding lookup (gather) is glue, done in plain JAX
    emb = jnp.take(params["emb"], token_ids, axis=0)            # (B, T, D)
    D = emb.shape[-1]
    DP = _round_up(D, 128)
    BP = _round_up(max(B, 8), 8)
    O = params["fc_b"].shape[0]
    OP = params["fc_w_t"].shape[1]

    x = jnp.transpose(emb, (1, 0, 2)).astype(jnp.float32)       # (T, B, D)
    x = jnp.pad(x, ((0, 0), (0, BP - B), (0, DP - D)))
    lens = jnp.pad(lengths.astype(jnp.int32), (0, BP - B)).reshape(BP, 1)
    fcb = jnp.pad(params["fc_b"], (0, OP - O)).reshape(1, OP)

    (w0i, w0h, b0), (w1i, w1h, b1), (w2i, w2h, b2) = params["layers"]

    # TODO(synk): if B grows, add a grid over batch tiles with
    # dimension_semantics=("parallel",) to use both v7x TensorCores.
    out = pl.pallas_call(
        _lstm_fused_kernel,
        out_shape=jax.ShapeDtypeStruct((BP, OP), jnp.float32),
        in_specs=[pl.BlockSpec(memory_space=pltpu.MemorySpace.VMEM)] * 13,
        out_specs=pl.BlockSpec(memory_space=pltpu.MemorySpace.VMEM),
        scratch_shapes=[pltpu.VMEM((T, BP, HP), jnp.float32),   # hidden seq
                        pltpu.VMEM((T, BP, GP), jnp.float32),   # hoisted x-proj
                        pltpu.VMEM((BP, HP), jnp.float32),      # h state
                        pltpu.VMEM((BP, HP), jnp.float32)],     # c state
    )(lens, x, w0i, w0h, b0, w1i, w1h, b1, w2i, w2h, b2,
      params["fc_w_t"], fcb)

    # dropout is identity at inference (p = 0.0)
    return out[:B, :O]


if __name__ == "__main__":
    key = jax.random.PRNGKey(0)
    k_param, k_tok = jax.random.split(key)

    B, T = 2, 8
    vocab, emb_dim = 20, 32
    output_size = 5

    params = init_params(k_param, vocab, emb_dim, output_size)

    token_ids = jax.random.randint(k_tok, (B, T), 0, vocab, dtype=jnp.int32)
    lengths = jnp.array([8, 5], dtype=jnp.int32)

    fwd = jax.jit(lstm_model_forward)
    logits = fwd(params, token_ids, lengths)
    jax.block_until_ready(logits)

    assert logits.shape == (B, output_size)
    assert logits.dtype == jnp.float32
    print("KERNEL_OK")
</pallas_src>

<mosaic_0001>
module attributes {stable_mosaic.version = 11 : i64} {
  func.func @_lstm_fused_kernel(%arg0: memref<8x1xi32, #tpu.memory_space<vmem>>, %arg1: memref<8x8x128xf32, #tpu.memory_space<vmem>>, %arg2: memref<128x512xf32, #tpu.memory_space<vmem>>, %arg3: memref<128x512xf32, #tpu.memory_space<vmem>>, %arg4: memref<1x512xf32, #tpu.memory_space<vmem>>, %arg5: memref<128x512xf32, #tpu.memory_space<vmem>>, %arg6: memref<128x512xf32, #tpu.memory_space<vmem>>, %arg7: memref<1x512xf32, #tpu.memory_space<vmem>>, %arg8: memref<128x512xf32, #tpu.memory_space<vmem>>, %arg9: memref<128x512xf32, #tpu.memory_space<vmem>>, %arg10: memref<1x512xf32, #tpu.memory_space<vmem>>, %arg11: memref<128x128xf32, #tpu.memory_space<vmem>>, %arg12: memref<1x128xf32, #tpu.memory_space<vmem>>, %arg13: memref<8x128xf32, #tpu.memory_space<vmem>>, %arg14: memref<8x8x128xf32, #tpu.memory_space<vmem>>, %arg15: memref<8x8x512xf32, #tpu.memory_space<vmem>>, %arg16: memref<8x128xf32, #tpu.memory_space<vmem>>, %arg17: memref<8x128xf32, #tpu.memory_space<vmem>>) attributes {dimension_semantics = [], scalar_prefetch = 0 : i64, scratch_operands = 4 : i64, tpu.core_type = #tpu.core_type<tc>} {
    %c0 = arith.constant 0 : index
    %c0_0 = arith.constant 0 : index
    %0 = vector.load %arg0[%c0, %c0_0] : memref<8x1xi32, #tpu.memory_space<vmem>>, vector<8x1xi32>
    %c0_1 = arith.constant 0 : index
    %c0_2 = arith.constant 0 : index
    %c0_3 = arith.constant 0 : index
    %1 = vector.load %arg1[%c0_1, %c0_2, %c0_3] : memref<8x8x128xf32, #tpu.memory_space<vmem>>, vector<8x8x128xf32>
    %2 = vector.shape_cast %1 : vector<8x8x128xf32> to vector<64x128xf32>
    %c0_4 = arith.constant 0 : index
    %c0_5 = arith.constant 0 : index
    %3 = vector.load %arg2[%c0_4, %c0_5] : memref<128x512xf32, #tpu.memory_space<vmem>>, vector<128x512xf32>
    %cst = arith.constant dense<0.000000e+00> : vector<64x512xf32>
    %4 = tpu.matmul %2, %3, %cst {dimension_numbers = #tpu.dot_dimension_numbers<[1], [0], [0], [1], [0, 0, 1, 1], [], []>} : vector<64x128xf32>, vector<128x512xf32>, vector<64x512xf32> -> vector<64x512xf32>
    %c0_6 = arith.constant 0 : index
    %c0_7 = arith.constant 0 : index
    %5 = vector.load %arg4[%c0_6, %c0_7] : memref<1x512xf32, #tpu.memory_space<vmem>>, vector<1x512xf32>
    %6 = vector.broadcast %5 : vector<1x512xf32> to vector<64x512xf32>
    %7 = arith.addf %4, %6 : vector<64x512xf32>
    %8 = vector.shape_cast %7 : vector<64x512xf32> to vector<8x8x512xf32>
    %c0_8 = arith.constant 0 : index
    %c0_9 = arith.constant 0 : index
    %c0_10 = arith.constant 0 : index
    %9 = vector.load %arg15[%c0_8, %c0_9, %c0_10] : memref<8x8x512xf32, #tpu.memory_space<vmem>>, vector<8x8x512xf32>
    tpu.vector_store %arg15[%c0_8, %c0_9, %c0_10], %8 {strides = array<i32>} : memref<8x8x512xf32, #tpu.memory_space<vmem>>, vector<8x8x512xf32>,
    %cst_11 = arith.constant 0.000000e+00 : f32
    %10 = vector.broadcast %cst_11 : f32 to vector<8x128xf32>
    %c0_12 = arith.constant 0 : index
    %c0_13 = arith.constant 0 : index
    %11 = vector.load %arg16[%c0_12, %c0_13] : memref<8x128xf32, #tpu.memory_space<vmem>>, vector<8x128xf32>
    tpu.vector_store %arg16[%c0_12, %c0_13], %10 {strides = array<i32>} : memref<8x128xf32, #tpu.memory_space<vmem>>, vector<8x128xf32>,
    %cst_14 = arith.constant 0.000000e+00 : f32
    %12 = vector.broadcast %cst_14 : f32 to vector<8x128xf32>
    %c0_15 = arith.constant 0 : index
    %c0_16 = arith.constant 0 : index
    %13 = vector.load %arg17[%c0_15, %c0_16] : memref<8x128xf32, #tpu.memory_space<vmem>>, vector<8x128xf32>
    tpu.vector_store %arg17[%c0_15, %c0_16], %12 {strides = array<i32>} : memref<8x128xf32, #tpu.memory_space<vmem>>, vector<8x128xf32>,
    %c0_i32 = arith.constant 0 : i32
    %c0_17 = arith.constant 0 : index
    %c0_18 = arith.constant 0 : index
    %14 = vector.load %arg16[%c0_17, %c0_18] : memref<8x128xf32, #tpu.memory_space<vmem>>, vector<8x128xf32>
    %c0_19 = arith.constant 0 : index
    %c0_20 = arith.constant 0 : index
    %15 = vector.load %arg17[%c0_19, %c0_20] : memref<8x128xf32, #tpu.memory_space<vmem>>, vector<8x128xf32>
    %16 = arith.index_cast %c0_i32 : i32 to index
    %c0_21 = arith.constant 0 : index
    %c0_22 = arith.constant 0 : index
    %17 = vector.load %arg15[%16, %c0_21, %c0_22] : memref<8x8x512xf32, #tpu.memory_space<vmem>>, vector<1x8x512xf32>
    %18 = vector.shape_cast %17 : vector<1x8x512xf32> to vector<8x512xf32>
    %c0_23 = arith.constant 0 : index
    %c0_24 = arith.constant 0 : index
    %19 = vector.load %arg3[%c0_23, %c0_24] : memref<128x512xf32, #tpu.memory_space<vmem>>, vector<128x512xf32>
    %cst_25 = arith.constant dense<0.000000e+00> : vector<8x512xf32>
    %20 = tpu.matmul %14, %19, %cst_25 {dimension_numbers = #tpu.dot_dimension_numbers<[1], [0], [0], [1], [0, 0, 1, 1], [], []>} : vector<8x128xf32>, vector<128x512xf32>, vector<8x512xf32> -> vector<8x512xf32>
    %21 = arith.addf %18, %20 : vector<8x512xf32>
    %22 = vector.extract_strided_slice %21 {offsets = [0, 0], sizes = [8, 128], strides = [1, 1]} : vector<8x512xf32> to vector<8x128xf32>
    %23 = arith.negf %22 : vector<8x128xf32>
    %24 = math.exp %23 : vector<8x128xf32>
    %cst_26 = arith.constant 1.000000e+00 : f32
    %25 = vector.broadcast %cst_26 : f32 to vector<8x128xf32>
    %26 = arith.addf %25, %24 : vector<8x128xf32>
    %27 = arith.divf %25, %26 : vector<8x128xf32>
    %28 = vector.extract_strided_slice %21 {offsets = [0, 128], sizes = [8, 128], strides = [1, 1]} : vector<8x512xf32> to vector<8x128xf32>
    %29 = arith.negf %28 : vector<8x128xf32>
    %30 = math.exp %29 : vector<8x128xf32>
    %cst_27 = arith.constant 1.000000e+00 : f32
    %31 = vector.broadcast %cst_27 : f32 to vector<8x128xf32>
    %32 = arith.addf %31, %30 : vector<8x128xf32>
    %33 = arith.divf %31, %32 : vector<8x128xf32>
    %34 = vector.extract_strided_slice %21 {offsets = [0, 256], sizes = [8, 128], strides = [1, 1]} : vector<8x512xf32> to vector<8x128xf32>
    %35 = math.tanh %34 : vector<8x128xf32>
    %36 = vector.extract_strided_slice %21 {offsets = [0, 384], sizes = [8, 128], strides = [1, 1]} : vector<8x512xf32> to vector<8x128xf32>
    %37 = arith.negf %36 : vector<8x128xf32>
    %38 = math.exp %37 : vector<8x128xf32>
    %cst_28 = arith.constant 1.000000e+00 : f32
    %39 = vector.broadcast %cst_28 : f32 to vector<8x128xf32>
    %40 = arith.addf %39, %38 : vector<8x128xf32>
    %41 = arith.divf %39, %40 : vector<8x128xf32>
    %42 = arith.mulf %33, %15 : vector<8x128xf32>
    %43 = arith.mulf %27, %35 : vector<8x128xf32>
    %44 = arith.addf %42, %43 : vector<8x128xf32>
    %45 = math.tanh %44 : vector<8x128xf32>
    %46 = arith.mulf %41, %45 : vector<8x128xf32>
    %47 = vector.broadcast %c0_i32 : i32 to vector<8x1xi32>
    %48 = arith.cmpi slt, %47, %0 : vector<8x1xi32>
    %49 = vector.shape_cast %48 : vector<8x1xi1> to vector<8x1xi1>
    %50 = vector.broadcast %49 : vector<8x1xi1> to vector<8x128xi1>
    %51 = arith.select %50, %46, %14 : vector<8x128xi1>, vector<8x128xf32>
    %52 = vector.shape_cast %48 : vector<8x1xi1> to vector<8x1xi1>
    %53 = vector.broadcast %52 : vector<8x1xi1> to vector<8x128xi1>
    %54 = arith.select %53, %44, %15 : vector<8x128xi1>, vector<8x128xf32>
    %c0_29 = arith.constant 0 : index
    %c0_30 = arith.constant 0 : index
    %55 = vector.load %arg16[%c0_29, %c0_30] : memref<8x128xf32, #tpu.memory_space<vmem>>, vector<8x128xf32>
    tpu.vector_store %arg16[%c0_29, %c0_30], %51 {strides = array<i32>} : memref<8x128xf32, #tpu.memory_space<vmem>>, vector<8x128xf32>,
    %c0_31 = arith.constant 0 : index
    %c0_32 = arith.constant 0 : index
    %56 = vector.load %arg17[%c0_31, %c0_32] : memref<8x128xf32, #tpu.memory_space<vmem>>, vector<8x128xf32>
    tpu.vector_store %arg17[%c0_31, %c0_32], %54 {strides = array<i32>} : memref<8x128xf32, #tpu.memory_space<vmem>>, vector<8x128xf32>,
    %57 = arith.index_cast %c0_i32 : i32 to index
    %c0_33 = arith.constant 0 : index
    %c0_34 = arith.constant 0 : index
    %58 = vector.load %arg14[%57, %c0_33, %c0_34] : memref<8x8x128xf32, #tpu.memory_space<vmem>>, vector<1x8x128xf32>
    %59 = vector.shape_cast %58 : vector<1x8x128xf32> to vector<8x128xf32>
    %60 = vector.shape_cast %51 : vector<8x128xf32> to vector<1x8x128xf32>
    tpu.vector_store %arg14[%57, %c0_33, %c0_34], %60 {strides = array<i32>} : memref<8x8x128xf32, #tpu.memory_space<vmem>>, vector<1x8x128xf32>,
    %c1_i32 = arith.constant 1 : i32
    %c0_35 = arith.constant 0 : index
    %c0_36 = arith.constant 0 : index
    %61 = vector.load %arg16[%c0_35, %c0_36] : memref<8x128xf32, #tpu.memory_space<vmem>>, vector<8x128xf32>
    %c0_37 = arith.constant 0 : index
    %c0_38 = arith.constant 0 : index
    %62 = vector.load %arg17[%c0_37, %c0_38] : memref<8x128xf32, #tpu.memory_space<vmem>>, vector<8x128xf32>
    %63 = arith.index_cast %c1_i32 : i32 to index
    %c0_39 = arith.constant 0 : index
    %c0_40 = arith.constant 0 : index
    %64 = vector.load %arg15[%63, %c0_39, %c0_40] : memref<8x8x512xf32, #tpu.memory_space<vmem>>, vector<1x8x512xf32>
    %65 = vector.shape_cast %64 : vector<1x8x512xf32> to vector<8x512xf32>
    %c0_41 = arith.constant 0 : index
    %c0_42 = arith.constant 0 : index
    %66 = vector.load %arg3[%c0_41, %c0_42] : memref<128x512xf32, #tpu.memory_space<vmem>>, vector<128x512xf32>
    %cst_43 = arith.constant dense<0.000000e+00> : vector<8x512xf32>
    %67 = tpu.matmul %61, %66, %cst_43 {dimension_numbers = #tpu.dot_dimension_numbers<[1], [0], [0], [1], [0, 0, 1, 1], [], []>} : vector<8x128xf32>, vector<128x512xf32>, vector<8x512xf32> -> vector<8x512xf32>
    %68 = arith.addf %65, %67 : vector<8x512xf32>
    %69 = vector.extract_strided_slice %68 {offsets = [0, 0], sizes = [8, 128], strides = [1, 1]} : vector<8x512xf32> to vector<8x128xf32>
    %70 = arith.negf %69 : vector<8x128xf32>
    %71 = math.exp %70 : vector<8x128xf32>
    %cst_44 = arith.constant 1.000000e+00 : f32
    %72 = vector.broadcast %cst_44 : f32 to vector<8x128xf32>
    %73 = arith.addf %72, %71 : vector<8x128xf32>
    %74 = arith.divf %72, %73 : vector<8x128xf32>
    %75 = vector.extract_strided_slice %68 {offsets = [0, 128], sizes = [8, 128], strides = [1, 1]} : vector<8x512xf32> to vector<8x128xf32>
    %76 = arith.negf %75 : vector<8x128xf32>
    %77 = math.exp %76 : vector<8x128xf32>
    %cst_45 = arith.constant 1.000000e+00 : f32
    %78 = vector.broadcast %cst_45 : f32 to vector<8x128xf32>
    %79 = arith.addf %78, %77 : vector<8x128xf32>
    %80 = arith.divf %78, %79 : vector<8x128xf32>
    %81 = vector.extract_strided_slice %68 {offsets = [0, 256], sizes = [8, 128], strides = [1, 1]} : vector<8x512xf32> to vector<8x128xf32>
    %82 = math.tanh %81 : vector<8x128xf32>
    %83 = vector.extract_strided_slice %68 {offsets = [0, 384], sizes = [8, 128], strides = [1, 1]} : vector<8x512xf32> to vector<8x128xf32>
    %84 = arith.negf %83 : vector<8x128xf32>
    %85 = math.exp %84 : vector<8x128xf32>
    %cst_46 = arith.constant 1.000000e+00 : f32
    %86 = vector.broadcast %cst_46 : f32 to vector<8x128xf32>
    %87 = arith.addf %86, %85 : vector<8x128xf32>
    %88 = arith.divf %86, %87 : vector<8x128xf32>
    %89 = arith.mulf %80, %62 : vector<8x128xf32>
    %90 = arith.mulf %74, %82 : vector<8x128xf32>
    %91 = arith.addf %89, %90 : vector<8x128xf32>
    %92 = math.tanh %91 : vector<8x128xf32>
    %93 = arith.mulf %88, %92 : vector<8x128xf32>
    %94 = vector.broadcast %c1_i32 : i32 to vector<8x1xi32>
    %95 = arith.cmpi slt, %94, %0 : vector<8x1xi32>
    %96 = vector.shape_cast %95 : vector<8x1xi1> to vector<8x1xi1>
    %97 = vector.broadcast %96 : vector<8x1xi1> to vector<8x128xi1>
    %98 = arith.select %97, %93, %61 : vector<8x128xi1>, vector<8x128xf32>
    %99 = vector.shape_cast %95 : vector<8x1xi1> to vector<8x1xi1>
    %100 = vector.broadcast %99 : vector<8x1xi1> to vector<8x128xi1>
    %101 = arith.select %100, %91, %62 : vector<8x128xi1>, vector<8x128xf32>
    %c0_47 = arith.constant 0 : index
    %c0_48 = arith.constant 0 : index
    %102 = vector.load %arg16[%c0_47, %c0_48] : memref<8x128xf32, #tpu.memory_space<vmem>>, vector<8x128xf32>
    tpu.vector_store %arg16[%c0_47, %c0_48], %98 {strides = array<i32>} : memref<8x128xf32, #tpu.memory_space<vmem>>, vector<8x128xf32>,
    %c0_49 = arith.constant 0 : index
    %c0_50 = arith.constant 0 : index
    %103 = vector.load %arg17[%c0_49, %c0_50] : memref<8x128xf32, #tpu.memory_space<vmem>>, vector<8x128xf32>
    tpu.vector_store %arg17[%c0_49, %c0_50], %101 {strides = array<i32>} : memref<8x128xf32, #tpu.memory_space<vmem>>, vector<8x128xf32>,
    %104 = arith.index_cast %c1_i32 : i32 to index
    %c0_51 = arith.constant 0 : index
    %c0_52 = arith.constant 0 : index
    %105 = vector.load %arg14[%104, %c0_51, %c0_52] : memref<8x8x128xf32, #tpu.memory_space<vmem>>, vector<1x8x128xf32>
    %106 = vector.shape_cast %105 : vector<1x8x128xf32> to vector<8x128xf32>
    %107 = vector.shape_cast %98 : vector<8x128xf32> to vector<1x8x128xf32>
    tpu.vector_store %arg14[%104, %c0_51, %c0_52], %107 {strides = array<i32>} : memref<8x8x128xf32, #tpu.memory_space<vmem>>, vector<1x8x128xf32>,
    %c2_i32 = arith.constant 2 : i32
    %c0_53 = arith.constant 0 : index
    %c0_54 = arith.constant 0 : index
    %108 = vector.load %arg16[%c0_53, %c0_54] : memref<8x128xf32, #tpu.memory_space<vmem>>, vector<8x128xf32>
    %c0_55 = arith.constant 0 : index
    %c0_56 = arith.constant 0 : index
    %109 = vector.load %arg17[%c0_55, %c0_56] : memref<8x128xf32, #tpu.memory_space<vmem>>, vector<8x128xf32>
    %110 = arith.index_cast %c2_i32 : i32 to index
    %c0_57 = arith.constant 0 : index
    %c0_58 = arith.constant 0 : index
    %111 = vector.load %arg15[%110, %c0_57, %c0_58] : memref<8x8x512xf32, #tpu.memory_space<vmem>>, vector<1x8x512xf32>
    %112 = vector.shape_cast %111 : vector<1x8x512xf32> to vector<8x512xf32>
    %c0_59 = arith.constant 0 : index
    %c0_60 = arith.constant 0 : index
    %113 = vector.load %arg3[%c0_59, %c0_60] : memref<128x512xf32, #tpu.memory_space<vmem>>, vector<128x512xf32>
    %cst_61 = arith.constant dense<0.000000e+00> : vector<8x512xf32>
    %114 = tpu.matmul %108, %113, %cst_61 {dimension_numbers = #tpu.dot_dimension_numbers<[1], [0], [0], [1], [0, 0, 1, 1], [], []>} : vector<8x128xf32>, vector<128x512xf32>, vector<8x512xf32> -> vector<8x512xf32>
    %115 = arith.addf %112, %114 : vector<8x512xf32>
    %116 = vector.extract_strided_slice %115 {offsets = [0, 0], sizes = [8, 128], strides = [1, 1]} : vector<8x512xf32> to vector<8x128xf32>
    %117 = arith.negf %116 : vector<8x128xf32>
    %118 = math.exp %117 : vector<8x128xf32>
    %cst_62 = arith.constant 1.000000e+00 : f32
    %119 = vector.broadcast %cst_62 : f32 to vector<8x128xf32>
    %120 = arith.addf %119, %118 : vector<8x128xf32>
    %121 = arith.divf %119, %120 : vector<8x128xf32>
    %122 = vector.extract_strided_slice %115 {offsets = [0, 128], sizes = [8, 128], strides = [1, 1]} : vector<8x512xf32> to vector<8x128xf32>
    %123 = arith.negf %122 : vector<8x128xf32>
    %124 = math.exp %123 : vector<8x128xf32>
    %cst_63 = arith.constant 1.000000e+00 : f32
    %125 = vector.broadcast %cst_63 : f32 to vector<8x128xf32>
    %126 = arith.addf %125, %124 : vector<8x128xf32>
    %127 = arith.divf %125, %126 : vector<8x128xf32>
    %128 = vector.extract_strided_slice %115 {offsets = [0, 256], sizes = [8, 128], strides = [1, 1]} : vector<8x512xf32> to vector<8x128xf32>
    %129 = math.tanh %128 : vector<8x128xf32>
    %130 = vector.extract_strided_slice %115 {offsets = [0, 384], sizes = [8, 128], strides = [1, 1]} : vector<8x512xf32> to vector<8x128xf32>
    %131 = arith.negf %130 : vector<8x128xf32>
    %132 = math.exp %131 : vector<8x128xf32>
    %cst_64 = arith.constant 1.000000e+00 : f32
    %133 = vector.broadcast %cst_64 : f32 to vector<8x128xf32>
    %134 = arith.addf %133, %132 : vector<8x128xf32>
    %135 = arith.divf %133, %134 : vector<8x128xf32>
    %136 = arith.mulf %127, %109 : vector<8x128xf32>
    %137 = arith.mulf %121, %129 : vector<8x128xf32>
    %138 = arith.addf %136, %137 : vector<8x128xf32>
    %139 = math.tanh %138 : vector<8x128xf32>
    %140 = arith.mulf %135, %139 : vector<8x128xf32>
    %141 = vector.broadcast %c2_i32 : i32 to vector<8x1xi32>
    %142 = arith.cmpi slt, %141, %0 : vector<8x1xi32>
    %143 = vector.shape_cast %142 : vector<8x1xi1> to vector<8x1xi1>
    %144 = vector.broadcast %143 : vector<8x1xi1> to vector<8x128xi1>
    %145 = arith.select %144, %140, %108 : vector<8x128xi1>, vector<8x128xf32>
    %146 = vector.shape_cast %142 : vector<8x1xi1> to vector<8x1xi1>
    %147 = vector.broadcast %146 : vector<8x1xi1> to vector<8x128xi1>
    %148 = arith.select %147, %138, %109 : vector<8x128xi1>, vector<8x128xf32>
    %c0_65 = arith.constant 0 : index
    %c0_66 = arith.constant 0 : index
    %149 = vector.load %arg16[%c0_65, %c0_66] : memref<8x128xf32, #tpu.memory_space<vmem>>, vector<8x128xf32>
    tpu.vector_store %arg16[%c0_65, %c0_66], %145 {strides = array<i32>} : memref<8x128xf32, #tpu.memory_space<vmem>>, vector<8x128xf32>,
    %c0_67 = arith.constant 0 : index
    %c0_68 = arith.constant 0 : index
    %150 = vector.load %arg17[%c0_67, %c0_68] : memref<8x128xf32, #tpu.memory_space<vmem>>, vector<8x128xf32>
    tpu.vector_store %arg17[%c0_67, %c0_68], %148 {strides = array<i32>} : memref<8x128xf32, #tpu.memory_space<vmem>>, vector<8x128xf32>,
    %151 = arith.index_cast %c2_i32 : i32 to index
    %c0_69 = arith.constant 0 : index
    %c0_70 = arith.constant 0 : index
    %152 = vector.load %arg14[%151, %c0_69, %c0_70] : memref<8x8x128xf32, #tpu.memory_space<vmem>>, vector<1x8x128xf32>
    %153 = vector.shape_cast %152 : vector<1x8x128xf32> to vector<8x128xf32>
    %154 = vector.shape_cast %145 : vector<8x128xf32> to vector<1x8x128xf32>
    tpu.vector_store %arg14[%151, %c0_69, %c0_70], %154 {strides = array<i32>} : memref<8x8x128xf32, #tpu.memory_space<vmem>>, vector<1x8x128xf32>,
    %c3_i32 = arith.constant 3 : i32
    %c0_71 = arith.constant 0 : index
    %c0_72 = arith.constant 0 : index
    %155 = vector.load %arg16[%c0_71, %c0_72] : memref<8x128xf32, #tpu.memory_space<vmem>>, vector<8x128xf32>
    %c0_73 = arith.constant 0 : index
    %c0_74 = arith.constant 0 : index
    %156 = vector.load %arg17[%c0_73, %c0_74] : memref<8x128xf32, #tpu.memory_space<vmem>>, vector<8x128xf32>
    %157 = arith.index_cast %c3_i32 : i32 to index
    %c0_75 = arith.constant 0 : index
    %c0_76 = arith.constant 0 : index
    %158 = vector.load %arg15[%157, %c0_75, %c0_76] : memref<8x8x512xf32, #tpu.memory_space<vmem>>, vector<1x8x512xf32>
    %159 = vector.shape_cast %158 : vector<1x8x512xf32> to vector<8x512xf32>
    %c0_77 = arith.constant 0 : index
    %c0_78 = arith.constant 0 : index
    %160 = vector.load %arg3[%c0_77, %c0_78] : memref<128x512xf32, #tpu.memory_space<vmem>>, vector<128x512xf32>
    %cst_79 = arith.constant dense<0.000000e+00> : vector<8x512xf32>
    %161 = tpu.matmul %155, %160, %cst_79 {dimension_numbers = #tpu.dot_dimension_numbers<[1], [0], [0], [1], [0, 0, 1, 1], [], []>} : vector<8x128xf32>, vector<128x512xf32>, vector<8x512xf32> -> vector<8x512xf32>
    %162 = arith.addf %159, %161 : vector<8x512xf32>
    %163 = vector.extract_strided_slice %162 {offsets = [0, 0], sizes = [8, 128], strides = [1, 1]} : vector<8x512xf32> to vector<8x128xf32>
    %164 = arith.negf %163 : vector<8x128xf32>
    %165 = math.exp %164 : vector<8x128xf32>
    %cst_80 = arith.constant 1.000000e+00 : f32
    %166 = vector.broadcast %cst_80 : f32 to vector<8x128xf32>
    %167 = arith.addf %166, %165 : vector<8x128xf32>
    %168 = arith.divf %166, %167 : vector<8x128xf32>
    %169 = vector.extract_strided_slice %162 {offsets = [0, 128], sizes = [8, 128], strides = [1, 1]} : vector<8x512xf32> to vector<8x128xf32>
    %170 = arith.negf %169 : vector<8x128xf32>
    %171 = math.exp %170 : vector<8x128xf32>
    %cst_81 = arith.constant 1.000000e+00 : f32
    %172 = vector.broadcast %cst_81 : f32 to vector<8x128xf32>
    %173 = arith.addf %172, %171 : vector<8x128xf32>
    %174 = arith.divf %172, %173 : vector<8x128xf32>
    %175 = vector.extract_strided_slice %162 {offsets = [0, 256], sizes = [8, 128], strides = [1, 1]} : vector<8x512xf32> to vector<8x128xf32>
    %176 = math.tanh %175 : vector<8x128xf32>
    %177 = vector.extract_strided_slice %162 {offsets = [0, 384], sizes = [8, 128], strides = [1, 1]} : vector<8x512xf32> to vector<8x128xf32>
    %178 = arith.negf %177 : vector<8x128xf32>
    %179 = math.exp %178 : vector<8x128xf32>
    %cst_82 = arith.constant 1.000000e+00 : f32
    %180 = vector.broadcast %cst_82 : f32 to vector<8x128xf32>
    %181 = arith.addf %180, %179 : vector<8x128xf32>
    %182 = arith.divf %180, %181 : vector<8x128xf32>
    %183 = arith.mulf %174, %156 : vector<8x128xf32>
    %184 = arith.mulf %168, %176 : vector<8x128xf32>
    %185 = arith.addf %183, %184 : vector<8x128xf32>
    %186 = math.tanh %185 : vector<8x128xf32>
    %187 = arith.mulf %182, %186 : vector<8x128xf32>
    %188 = vector.broadcast %c3_i32 : i32 to vector<8x1xi32>
    %189 = arith.cmpi slt, %188, %0 : vector<8x1xi32>
    %190 = vector.shape_cast %189 : vector<8x1xi1> to vector<8x1xi1>
    %191 = vector.broadcast %190 : vector<8x1xi1> to vector<8x128xi1>
    %192 = arith.select %191, %187, %155 : vector<8x128xi1>, vector<8x128xf32>
    %193 = vector.shape_cast %189 : vector<8x1xi1> to vector<8x1xi1>
    %194 = vector.broadcast %193 : vector<8x1xi1> to vector<8x128xi1>
    %195 = arith.select %194, %185, %156 : vector<8x128xi1>, vector<8x128xf32>
    %c0_83 = arith.constant 0 : index
    %c0_84 = arith.constant 0 : index
    %196 = vector.load %arg16[%c0_83, %c0_84] : memref<8x128xf32, #tpu.memory_space<vmem>>, vector<8x128xf32>
    tpu.vector_store %arg16[%c0_83, %c0_84], %192 {strides = array<i32>} : memref<8x128xf32, #tpu.memory_space<vmem>>, vector<8x128xf32>,
    %c0_85 = arith.constant 0 : index
    %c0_86 = arith.constant 0 : index
    %197 = vector.load %arg17[%c0_85, %c0_86] : memref<8x128xf32, #tpu.memory_space<vmem>>, vector<8x128xf32>
    tpu.vector_store %arg17[%c0_85, %c0_86], %195 {strides = array<i32>} : memref<8x128xf32, #tpu.memory_space<vmem>>, vector<8x128xf32>,
    %198 = arith.index_cast %c3_i32 : i32 to index
    %c0_87 = arith.constant 0 : index
    %c0_88 = arith.constant 0 : index
    %199 = vector.load %arg14[%198, %c0_87, %c0_88] : memref<8x8x128xf32, #tpu.memory_space<vmem>>, vector<1x8x128xf32>
    %200 = vector.shape_cast %199 : vector<1x8x128xf32> to vector<8x128xf32>
    %201 = vector.shape_cast %192 : vector<8x128xf32> to vector<1x8x128xf32>
    tpu.vector_store %arg14[%198, %c0_87, %c0_88], %201 {strides = array<i32>} : memref<8x8x128xf32, #tpu.memory_space<vmem>>, vector<1x8x128xf32>,
    %c4_i32 = arith.constant 4 : i32
    %c0_89 = arith.constant 0 : index
    %c0_90 = arith.constant 0 : index
    %202 = vector.load %arg16[%c0_89, %c0_90] : memref<8x128xf32, #tpu.memory_space<vmem>>, vector<8x128xf32>
    %c0_91 = arith.constant 0 : index
    %c0_92 = arith.constant 0 : index
    %203 = vector.load %arg17[%c0_91, %c0_92] : memref<8x128xf32, #tpu.memory_space<vmem>>, vector<8x128xf32>
    %204 = arith.index_cast %c4_i32 : i32 to index
    %c0_93 = arith.constant 0 : index
    %c0_94 = arith.constant 0 : index
    %205 = vector.load %arg15[%204, %c0_93, %c0_94] : memref<8x8x512xf32, #tpu.memory_space<vmem>>, vector<1x8x512xf32>
    %206 = vector.shape_cast %205 : vector<1x8x512xf32> to vector<8x512xf32>
    %c0_95 = arith.constant 0 : index
    %c0_96 = arith.constant 0 : index
    %207 = vector.load %arg3[%c0_95, %c0_96] : memref<128x512xf32, #tpu.memory_space<vmem>>, vector<128x512xf32>
    %cst_97 = arith.constant dense<0.000000e+00> : vector<8x512xf32>
    %208 = tpu.matmul %202, %207, %cst_97 {dimension_numbers = #tpu.dot_dimension_numbers<[1], [0], [0], [1], [0, 0, 1, 1], [], []>} : vector<8x128xf32>, vector<128x512xf32>, vector<8x512xf32> -> vector<8x512xf32>
    %209 = arith.addf %206, %208 : vector<8x512xf32>
    %210 = vector.extract_strided_slice %209 {offsets = [0, 0], sizes = [8, 128], strides = [1, 1]} : vector<8x512xf32> to vector<8x128xf32>
    %211 = arith.negf %210 : vector<8x128xf32>
    %212 = math.exp %211 : vector<8x128xf32>
    %cst_98 = arith.constant 1.000000e+00 : f32
    %213 = vector.broadcast %cst_98 : f32 to vector<8x128xf32>
    %214 = arith.addf %213, %212 : vector<8x128xf32>
    %215 = arith.divf %213, %214 : vector<8x128xf32>
    %216 = vector.extract_strided_slice %209 {offsets = [0, 128], sizes = [8, 128], strides = [1, 1]} : vector<8x512xf32> to vector<8x128xf32>
    %217 = arith.negf %216 : vector<8x128xf32>
    %218 = math.exp %217 : vector<8x128xf32>
    %cst_99 = arith.constant 1.000000e+00 : f32
    %219 = vector.broadcast %cst_99 : f32 to vector<8x128xf32>
    %220 = arith.addf %219, %218 : vector<8x128xf32>
    %221 = arith.divf %219, %220 : vector<8x128xf32>
    %222 = vector.extract_strided_slice %209 {offsets = [0, 256], sizes = [8, 128], strides = [1, 1]} : vector<8x512xf32> to vector<8x128xf32>
    %223 = math.tanh %222 : vector<8x128xf32>
    %224 = vector.extract_strided_slice %209 {offsets = [0, 384], sizes = [8, 128], strides = [1, 1]} : vector<8x512xf32> to vector<8x128xf32>
    %225 = arith.negf %224 : vector<8x128xf32>
    %226 = math.exp %225 : vector<8x128xf32>
    %cst_100 = arith.constant 1.000000e+00 : f32
    %227 = vector.broadcast %cst_100 : f32 to vector<8x128xf32>
    %228 = arith.addf %227, %226 : vector<8x128xf32>
    %229 = arith.divf %227, %228 : vector<8x128xf32>
    %230 = arith.mulf %221, %203 : vector<8x128xf32>
    %231 = arith.mulf %215, %223 : vector<8x128xf32>
    %232 = arith.addf %230, %231 : vector<8x128xf32>
    %233 = math.tanh %232 : vector<8x128xf32>
    %234 = arith.mulf %229, %233 : vector<8x128xf32>
    %235 = vector.broadcast %c4_i32 : i32 to vector<8x1xi32>
    %236 = arith.cmpi slt, %235, %0 : vector<8x1xi32>
    %237 = vector.shape_cast %236 : vector<8x1xi1> to vector<8x1xi1>
    %238 = vector.broadcast %237 : vector<8x1xi1> to vector<8x128xi1>
    %239 = arith.select %238, %234, %202 : vector<8x128xi1>, vector<8x128xf32>
    %240 = vector.shape_cast %236 : vector<8x1xi1> to vector<8x1xi1>
    %241 = vector.broadcast %240 : vector<8x1xi1> to vector<8x128xi1>
    %242 = arith.select %241, %232, %203 : vector<8x128xi1>, vector<8x128xf32>
    %c0_101 = arith.constant 0 : index
    %c0_102 = arith.constant 0 : index
    %243 = vector.load %arg16[%c0_101, %c0_102] : memref<8x128xf32, #tpu.memory_space<vmem>>, vector<8x128xf32>
    tpu.vector_store %arg16[%c0_101, %c0_102], %239 {strides = array<i32>} : memref<8x128xf32, #tpu.memory_space<vmem>>, vector<8x128xf32>,
    %c0_103 = arith.constant 0 : index
    %c0_104 = arith.constant 0 : index
    %244 = vector.load %arg17[%c0_103, %c0_104] : memref<8x128xf32, #tpu.memory_space<vmem>>, vector<8x128xf32>
    tpu.vector_store %arg17[%c0_103, %c0_104], %242 {strides = array<i32>} : memref<8x128xf32, #tpu.memory_space<vmem>>, vector<8x128xf32>,
    %245 = arith.index_cast %c4_i32 : i32 to index
    %c0_105 = arith.constant 0 : index
    %c0_106 = arith.constant 0 : index
    %246 = vector.load %arg14[%245, %c0_105, %c0_106] : memref<8x8x128xf32, #tpu.memory_space<vmem>>, vector<1x8x128xf32>
    %247 = vector.shape_cast %246 : vector<1x8x128xf32> to vector<8x128xf32>
    %248 = vector.shape_cast %239 : vector<8x128xf32> to vector<1x8x128xf32>
    tpu.vector_store %arg14[%245, %c0_105, %c0_106], %248 {strides = array<i32>} : memref<8x8x128xf32, #tpu.memory_space<vmem>>, vector<1x8x128xf32>,
    %c5_i32 = arith.constant 5 : i32
    %c0_107 = arith.constant 0 : index
    %c0_108 = arith.constant 0 : index
    %249 = vector.load %arg16[%c0_107, %c0_108] : memref<8x128xf32, #tpu.memory_space<vmem>>, vector<8x128xf32>
    %c0_109 = arith.constant 0 : index
    %c0_110 = arith.constant 0 : index
    %250 = vector.load %arg17[%c0_109, %c0_110] : memref<8x128xf32, #tpu.memory_space<vmem>>, vector<8x128xf32>
    %251 = arith.index_cast %c5_i32 : i32 to index
    %c0_111 = arith.constant 0 : index
    %c0_112 = arith.constant 0 : index
    %252 = vector.load %arg15[%251, %c0_111, %c0_112] : memref<8x8x512xf32, #tpu.memory_space<vmem>>, vector<1x8x512xf32>
    %253 = vector.shape_cast %252 : vector<1x8x512xf32> to vector<8x512xf32>
    %c0_113 = arith.constant 0 : index
    %c0_114 = arith.constant 0 : index
    %254 = vector.load %arg3[%c0_113, %c0_114] : memref<128x512xf32, #tpu.memory_space<vmem>>, vector<128x512xf32>
    %cst_115 = arith.constant dense<0.000000e+00> : vector<8x512xf32>
    %255 = tpu.matmul %249, %254, %cst_115 {dimension_numbers = #tpu.dot_dimension_numbers<[1], [0], [0], [1], [0, 0, 1, 1], [], []>} : vector<8x128xf32>, vector<128x512xf32>, vector<8x512xf32> -> vector<8x512xf32>
    %256 = arith.addf %253, %255 : vector<8x512xf32>
    %257 = vector.extract_strided_slice %256 {offsets = [0, 0], sizes = [8, 128], strides = [1, 1]} : vector<8x512xf32> to vector<8x128xf32>
    %258 = arith.negf %257 : vector<8x128xf32>
    %259 = math.exp %258 : vector<8x128xf32>
    %cst_116 = arith.constant 1.000000e+00 : f32
    %260 = vector.broadcast %cst_116 : f32 to vector<8x128xf32>
    %261 = arith.addf %260, %259 : vector<8x128xf32>
    %262 = arith.divf %260, %261 : vector<8x128xf32>
    %263 = vector.extract_strided_slice %256 {offsets = [0, 128], sizes = [8, 128], strides = [1, 1]} : vector<8x512xf32> to vector<8x128xf32>
    %264 = arith.negf %263 : vector<8x128xf32>
    %265 = math.exp %264 : vector<8x128xf32>
    %cst_117 = arith.constant 1.000000e+00 : f32
    %266 = vector.broadcast %cst_117 : f32 to vector<8x128xf32>
    %267 = arith.addf %266, %265 : vector<8x128xf32>
    %268 = arith.divf %266, %267 : vector<8x128xf32>
    %269 = vector.extract_strided_slice %256 {offsets = [0, 256], sizes = [8, 128], strides = [1, 1]} : vector<8x512xf32> to vector<8x128xf32>
    %270 = math.tanh %269 : vector<8x128xf32>
    %271 = vector.extract_strided_slice %256 {offsets = [0, 384], sizes = [8, 128], strides = [1, 1]} : vector<8x512xf32> to vector<8x128xf32>
    %272 = arith.negf %271 : vector<8x128xf32>
    %273 = math.exp %272 : vector<8x128xf32>
    %cst_118 = arith.constant 1.000000e+00 : f32
    %274 = vector.broadcast %cst_118 : f32 to vector<8x128xf32>
    %275 = arith.addf %274, %273 : vector<8x128xf32>
    %276 = arith.divf %274, %275 : vector<8x128xf32>
    %277 = arith.mulf %268, %250 : vector<8x128xf32>
    %278 = arith.mulf %262, %270 : vector<8x128xf32>
    %279 = arith.addf %277, %278 : vector<8x128xf32>
    %280 = math.tanh %279 : vector<8x128xf32>
    %281 = arith.mulf %276, %280 : vector<8x128xf32>
    %282 = vector.broadcast %c5_i32 : i32 to vector<8x1xi32>
    %283 = arith.cmpi slt, %282, %0 : vector<8x1xi32>
    %284 = vector.shape_cast %283 : vector<8x1xi1> to vector<8x1xi1>
    %285 = vector.broadcast %284 : vector<8x1xi1> to vector<8x128xi1>
    %286 = arith.select %285, %281, %249 : vector<8x128xi1>, vector<8x128xf32>
    %287 = vector.shape_cast %283 : vector<8x1xi1> to vector<8x1xi1>
    %288 = vector.broadcast %287 : vector<8x1xi1> to vector<8x128xi1>
    %289 = arith.select %288, %279, %250 : vector<8x128xi1>, vector<8x128xf32>
    %c0_119 = arith.constant 0 : index
    %c0_120 = arith.constant 0 : index
    %290 = vector.load %arg16[%c0_119, %c0_120] : memref<8x128xf32, #tpu.memory_space<vmem>>, vector<8x128xf32>
    tpu.vector_store %arg16[%c0_119, %c0_120], %286 {strides = array<i32>} : memref<8x128xf32, #tpu.memory_space<vmem>>, vector<8x128xf32>,
    %c0_121 = arith.constant 0 : index
    %c0_122 = arith.constant 0 : index
    %291 = vector.load %arg17[%c0_121, %c0_122] : memref<8x128xf32, #tpu.memory_space<vmem>>, vector<8x128xf32>
    tpu.vector_store %arg17[%c0_121, %c0_122], %289 {strides = array<i32>} : memref<8x128xf32, #tpu.memory_space<vmem>>, vector<8x128xf32>,
    %292 = arith.index_cast %c5_i32 : i32 to index
    %c0_123 = arith.constant 0 : index
    %c0_124 = arith.constant 0 : index
    %293 = vector.load %arg14[%292, %c0_123, %c0_124] : memref<8x8x128xf32, #tpu.memory_space<vmem>>, vector<1x8x128xf32>
    %294 = vector.shape_cast %293 : vector<1x8x128xf32> to vector<8x128xf32>
    %295 = vector.shape_cast %286 : vector<8x128xf32> to vector<1x8x128xf32>
    tpu.vector_store %arg14[%292, %c0_123, %c0_124], %295 {strides = array<i32>} : memref<8x8x128xf32, #tpu.memory_space<vmem>>, vector<1x8x128xf32>,
    %c6_i32 = arith.constant 6 : i32
    %c0_125 = arith.constant 0 : index
    %c0_126 = arith.constant 0 : index
    %296 = vector.load %arg16[%c0_125, %c0_126] : memref<8x128xf32, #tpu.memory_space<vmem>>, vector<8x128xf32>
    %c0_127 = arith.constant 0 : index
    %c0_128 = arith.constant 0 : index
    %297 = vector.load %arg17[%c0_127, %c0_128] : memref<8x128xf32, #tpu.memory_space<vmem>>, vector<8x128xf32>
    %298 = arith.index_cast %c6_i32 : i32 to index
    %c0_129 = arith.constant 0 : index
    %c0_130 = arith.constant 0 : index
    %299 = vector.load %arg15[%298, %c0_129, %c0_130] : memref<8x8x512xf32, #tpu.memory_space<vmem>>, vector<1x8x512xf32>
    %300 = vector.shape_cast %299 : vector<1x8x512xf32> to vector<8x512xf32>
    %c0_131 = arith.constant 0 : index
    %c0_132 = arith.constant 0 : index
    %301 = vector.load %arg3[%c0_131, %c0_132] : memref<128x512xf32, #tpu.memory_space<vmem>>, vector<128x512xf32>
    %cst_133 = arith.constant dense<0.000000e+00> : vector<8x512xf32>
    %302 = tpu.matmul %296, %301, %cst_133 {dimension_numbers = #tpu.dot_dimension_numbers<[1], [0], [0], [1], [0, 0, 1, 1], [], []>} : vector<8x128xf32>, vector<128x512xf32>, vector<8x512xf32> -> vector<8x512xf32>
    %303 = arith.addf %300, %302 : vector<8x512xf32>
    %304 = vector.extract_strided_slice %303 {offsets = [0, 0], sizes = [8, 128], strides = [1, 1]} : vector<8x512xf32> to vector<8x128xf32>
    %305 = arith.negf %304 : vector<8x128xf32>
    %306 = math.exp %305 : vector<8x128xf32>
    %cst_134 = arith.constant 1.000000e+00 : f32
    %307 = vector.broadcast %cst_134 : f32 to vector<8x128xf32>
    %308 = arith.addf %307, %306 : vector<8x128xf32>
    %309 = arith.divf %307, %308 : vector<8x128xf32>
    %310 = vector.extract_strided_slice %303 {offsets = [0, 128], sizes = [8, 128], strides = [1, 1]} : vector<8x512xf32> to vector<8x128xf32>
    %311 = arith.negf %310 : vector<8x128xf32>
    %312 = math.exp %311 : vector<8x128xf32>
    %cst_135 = arith.constant 1.000000e+00 : f32
    %313 = vector.broadcast %cst_135 : f32 to vector<8x128xf32>
    %314 = arith.addf %313, %312 : vector<8x128xf32>
    %315 = arith.divf %313, %314 : vector<8x128xf32>
    %316 = vector.extract_strided_slice %303 {offsets = [0, 256], sizes = [8, 128], strides = [1, 1]} : vector<8x512xf32> to vector<8x128xf32>
    %317 = math.tanh %316 : vector<8x128xf32>
    %318 = vector.extract_strided_slice %303 {offsets = [0, 384], sizes = [8, 128], strides = [1, 1]} : vector<8x512xf32> to vector<8x128xf32>
    %319 = arith.negf %318 : vector<8x128xf32>
    %320 = math.exp %319 : vector<8x128xf32>
    %cst_136 = arith.constant 1.000000e+00 : f32
    %321 = vector.broadcast %cst_136 : f32 to vector<8x128xf32>
    %322 = arith.addf %321, %320 : vector<8x128xf32>
    %323 = arith.divf %321, %322 : vector<8x128xf32>
    %324 = arith.mulf %315, %297 : vector<8x128xf32>
    %325 = arith.mulf %309, %317 : vector<8x128xf32>
    %326 = arith.addf %324, %325 : vector<8x128xf32>
    %327 = math.tanh %326 : vector<8x128xf32>
    %328 = arith.mulf %323, %327 : vector<8x128xf32>
    %329 = vector.broadcast %c6_i32 : i32 to vector<8x1xi32>
    %330 = arith.cmpi slt, %329, %0 : vector<8x1xi32>
    %331 = vector.shape_cast %330 : vector<8x1xi1> to vector<8x1xi1>
    %332 = vector.broadcast %331 : vector<8x1xi1> to vector<8x128xi1>
    %333 = arith.select %332, %328, %296 : vector<8x128xi1>, vector<8x128xf32>
    %334 = vector.shape_cast %330 : vector<8x1xi1> to vector<8x1xi1>
    %335 = vector.broadcast %334 : vector<8x1xi1> to vector<8x128xi1>
    %336 = arith.select %335, %326, %297 : vector<8x128xi1>, vector<8x128xf32>
    %c0_137 = arith.constant 0 : index
    %c0_138 = arith.constant 0 : index
    %337 = vector.load %arg16[%c0_137, %c0_138] : memref<8x128xf32, #tpu.memory_space<vmem>>, vector<8x128xf32>
    tpu.vector_store %arg16[%c0_137, %c0_138], %333 {strides = array<i32>} : memref<8x128xf32, #tpu.memory_space<vmem>>, vector<8x128xf32>,
    %c0_139 = arith.constant 0 : index
    %c0_140 = arith.constant 0 : index
    %338 = vector.load %arg17[%c0_139, %c0_140] : memref<8x128xf32, #tpu.memory_space<vmem>>, vector<8x128xf32>
    tpu.vector_store %arg17[%c0_139, %c0_140], %336 {strides = array<i32>} : memref<8x128xf32, #tpu.memory_space<vmem>>, vector<8x128xf32>,
    %339 = arith.index_cast %c6_i32 : i32 to index
    %c0_141 = arith.constant 0 : index
    %c0_142 = arith.constant 0 : index
    %340 = vector.load %arg14[%339, %c0_141, %c0_142] : memref<8x8x128xf32, #tpu.memory_space<vmem>>, vector<1x8x128xf32>
    %341 = vector.shape_cast %340 : vector<1x8x128xf32> to vector<8x128xf32>
    %342 = vector.shape_cast %333 : vector<8x128xf32> to vector<1x8x128xf32>
    tpu.vector_store %arg14[%339, %c0_141, %c0_142], %342 {strides = array<i32>} : memref<8x8x128xf32, #tpu.memory_space<vmem>>, vector<1x8x128xf32>,
    %c7_i32 = arith.constant 7 : i32
    %c0_143 = arith.constant 0 : index
    %c0_144 = arith.constant 0 : index
    %343 = vector.load %arg16[%c0_143, %c0_144] : memref<8x128xf32, #tpu.memory_space<vmem>>, vector<8x128xf32>
    %c0_145 = arith.constant 0 : index
    %c0_146 = arith.constant 0 : index
    %344 = vector.load %arg17[%c0_145, %c0_146] : memref<8x128xf32, #tpu.memory_space<vmem>>, vector<8x128xf32>
    %345 = arith.index_cast %c7_i32 : i32 to index
    %c0_147 = arith.constant 0 : index
    %c0_148 = arith.constant 0 : index
    %346 = vector.load %arg15[%345, %c0_147, %c0_148] : memref<8x8x512xf32, #tpu.memory_space<vmem>>, vector<1x8x512xf32>
    %347 = vector.shape_cast %346 : vector<1x8x512xf32> to vector<8x512xf32>
    %c0_149 = arith.constant 0 : index
    %c0_150 = arith.constant 0 : index
    %348 = vector.load %arg3[%c0_149, %c0_150] : memref<128x512xf32, #tpu.memory_space<vmem>>, vector<128x512xf32>
    %cst_151 = arith.constant dense<0.000000e+00> : vector<8x512xf32>
    %349 = tpu.matmul %343, %348, %cst_151 {dimension_numbers = #tpu.dot_dimension_numbers<[1], [0], [0], [1], [0, 0, 1, 1], [], []>} : vector<8x128xf32>, vector<128x512xf32>, vector<8x512xf32> -> vector<8x512xf32>
    %350 = arith.addf %347, %349 : vector<8x512xf32>
    %351 = vector.extract_strided_slice %350 {offsets = [0, 0], sizes = [8, 128], strides = [1, 1]} : vector<8x512xf32> to vector<8x128xf32>
    %352 = arith.negf %351 : vector<8x128xf32>
    %353 = math.exp %352 : vector<8x128xf32>
    %cst_152 = arith.constant 1.000000e+00 : f32
    %354 = vector.broadcast %cst_152 : f32 to vector<8x128xf32>
    %355 = arith.addf %354, %353 : vector<8x128xf32>
    %356 = arith.divf %354, %355 : vector<8x128xf32>
    %357 = vector.extract_strided_slice %350 {offsets = [0, 128], sizes = [8, 128], strides = [1, 1]} : vector<8x512xf32> to vector<8x128xf32>
    %358 = arith.negf %357 : vector<8x128xf32>
    %359 = math.exp %358 : vector<8x128xf32>
    %cst_153 = arith.constant 1.000000e+00 : f32
    %360 = vector.broadcast %cst_153 : f32 to vector<8x128xf32>
    %361 = arith.addf %360, %359 : vector<8x128xf32>
    %362 = arith.divf %360, %361 : vector<8x128xf32>
    %363 = vector.extract_strided_slice %350 {offsets = [0, 256], sizes = [8, 128], strides = [1, 1]} : vector<8x512xf32> to vector<8x128xf32>
    %364 = math.tanh %363 : vector<8x128xf32>
    %365 = vector.extract_strided_slice %350 {offsets = [0, 384], sizes = [8, 128], strides = [1, 1]} : vector<8x512xf32> to vector<8x128xf32>
    %366 = arith.negf %365 : vector<8x128xf32>
    %367 = math.exp %366 : vector<8x128xf32>
    %cst_154 = arith.constant 1.000000e+00 : f32
    %368 = vector.broadcast %cst_154 : f32 to vector<8x128xf32>
    %369 = arith.addf %368, %367 : vector<8x128xf32>
    %370 = arith.divf %368, %369 : vector<8x128xf32>
    %371 = arith.mulf %362, %344 : vector<8x128xf32>
    %372 = arith.mulf %356, %364 : vector<8x128xf32>
    %373 = arith.addf %371, %372 : vector<8x128xf32>
    %374 = math.tanh %373 : vector<8x128xf32>
    %375 = arith.mulf %370, %374 : vector<8x128xf32>
    %376 = vector.broadcast %c7_i32 : i32 to vector<8x1xi32>
    %377 = arith.cmpi slt, %376, %0 : vector<8x1xi32>
    %378 = vector.shape_cast %377 : vector<8x1xi1> to vector<8x1xi1>
    %379 = vector.broadcast %378 : vector<8x1xi1> to vector<8x128xi1>
    %380 = arith.select %379, %375, %343 : vector<8x128xi1>, vector<8x128xf32>
    %381 = vector.shape_cast %377 : vector<8x1xi1> to vector<8x1xi1>
    %382 = vector.broadcast %381 : vector<8x1xi1> to vector<8x128xi1>
    %383 = arith.select %382, %373, %344 : vector<8x128xi1>, vector<8x128xf32>
    %c0_155 = arith.constant 0 : index
    %c0_156 = arith.constant 0 : index
    %384 = vector.load %arg16[%c0_155, %c0_156] : memref<8x128xf32, #tpu.memory_space<vmem>>, vector<8x128xf32>
    tpu.vector_store %arg16[%c0_155, %c0_156], %380 {strides = array<i32>} : memref<8x128xf32, #tpu.memory_space<vmem>>, vector<8x128xf32>,
    %c0_157 = arith.constant 0 : index
    %c0_158 = arith.constant 0 : index
    %385 = vector.load %arg17[%c0_157, %c0_158] : memref<8x128xf32, #tpu.memory_space<vmem>>, vector<8x128xf32>
    tpu.vector_store %arg17[%c0_157, %c0_158], %383 {strides = array<i32>} : memref<8x128xf32, #tpu.memory_space<vmem>>, vector<8x128xf32>,
    %386 = arith.index_cast %c7_i32 : i32 to index
    %c0_159 = arith.constant 0 : index
    %c0_160 = arith.constant 0 : index
    %387 = vector.load %arg14[%386, %c0_159, %c0_160] : memref<8x8x128xf32, #tpu.memory_space<vmem>>, vector<1x8x128xf32>
    %388 = vector.shape_cast %387 : vector<1x8x128xf32> to vector<8x128xf32>
    %389 = vector.shape_cast %380 : vector<8x128xf32> to vector<1x8x128xf32>
    tpu.vector_store %arg14[%386, %c0_159, %c0_160], %389 {strides = array<i32>} : memref<8x8x128xf32, #tpu.memory_space<vmem>>, vector<1x8x128xf32>,
    %c8_i32 = arith.constant 8 : i32
    %c0_161 = arith.constant 0 : index
    %c0_162 = arith.constant 0 : index
    %c0_163 = arith.constant 0 : index
    %390 = vector.load %arg14[%c0_161, %c0_162, %c0_163] : memref<8x8x128xf32, #tpu.memory_space<vmem>>, vector<8x8x128xf32>
    %391 = vector.shape_cast %390 : vector<8x8x128xf32> to vector<64x128xf32>
    %c0_164 = arith.constant 0 : index
    %c0_165 = arith.constant 0 : index
    %392 = vector.load %arg5[%c0_164, %c0_165] : memref<128x512xf32, #tpu.memory_space<vmem>>, vector<128x512xf32>
    %cst_166 = arith.constant dense<0.000000e+00> : vector<64x512xf32>
    %393 = tpu.matmul %391, %392, %cst_166 {dimension_numbers = #tpu.dot_dimension_numbers<[1], [0], [0], [1], [0, 0, 1, 1], [], []>} : vector<64x128xf32>, vector<128x512xf32>, vector<64x512xf32> -> vector<64x512xf32>
    %c0_167 = arith.constant 0 : index
    %c0_168 = arith.constant 0 : index
    %394 = vector.load %arg7[%c0_167, %c0_168] : memref<1x512xf32, #tpu.memory_space<vmem>>, vector<1x512xf32>
    %395 = vector.broadcast %394 : vector<1x512xf32> to vector<64x512xf32>
    %396 = arith.addf %393, %395 : vector<64x512xf32>
    %397 = vector.shape_cast %396 : vector<64x512xf32> to vector<8x8x512xf32>
    %c0_169 = arith.constant 0 : index
    %c0_170 = arith.constant 0 : index
    %c0_171 = arith.constant 0 : index
    %398 = vector.load %arg15[%c0_169, %c0_170, %c0_171] : memref<8x8x512xf32, #tpu.memory_space<vmem>>, vector<8x8x512xf32>
    tpu.vector_store %arg15[%c0_169, %c0_170, %c0_171], %397 {strides = array<i32>} : memref<8x8x512xf32, #tpu.memory_space<vmem>>, vector<8x8x512xf32>,
    %cst_172 = arith.constant 0.000000e+00 : f32
    %399 = vector.broadcast %cst_172 : f32 to vector<8x128xf32>
    %c0_173 = arith.constant 0 : index
    %c0_174 = arith.constant 0 : index
    %400 = vector.load %arg16[%c0_173, %c0_174] : memref<8x128xf32, #tpu.memory_space<vmem>>, vector<8x128xf32>
    tpu.vector_store %arg16[%c0_173, %c0_174], %399 {strides = array<i32>} : memref<8x128xf32, #tpu.memory_space<vmem>>, vector<8x128xf32>,
    %cst_175 = arith.constant 0.000000e+00 : f32
    %401 = vector.broadcast %cst_175 : f32 to vector<8x128xf32>
    %c0_176 = arith.constant 0 : index
    %c0_177 = arith.constant 0 : index
    %402 = vector.load %arg17[%c0_176, %c0_177] : memref<8x128xf32, #tpu.memory_space<vmem>>, vector<8x128xf32>
    tpu.vector_store %arg17[%c0_176, %c0_177], %401 {strides = array<i32>} : memref<8x128xf32, #tpu.memory_space<vmem>>, vector<8x128xf32>,
    %c0_i32_178 = arith.constant 0 : i32
    %c0_179 = arith.constant 0 : index
    %c0_180 = arith.constant 0 : index
    %403 = vector.load %arg16[%c0_179, %c0_180] : memref<8x128xf32, #tpu.memory_space<vmem>>, vector<8x128xf32>
    %c0_181 = arith.constant 0 : index
    %c0_182 = arith.constant 0 : index
    %404 = vector.load %arg17[%c0_181, %c0_182] : memref<8x128xf32, #tpu.memory_space<vmem>>, vector<8x128xf32>
    %405 = arith.index_cast %c0_i32_178 : i32 to index
    %c0_183 = arith.constant 0 : index
    %c0_184 = arith.constant 0 : index
    %406 = vector.load %arg15[%405, %c0_183, %c0_184] : memref<8x8x512xf32, #tpu.memory_space<vmem>>, vector<1x8x512xf32>
    %407 = vector.shape_cast %406 : vector<1x8x512xf32> to vector<8x512xf32>
    %c0_185 = arith.constant 0 : index
    %c0_186 = arith.constant 0 : index
    %408 = vector.load %arg6[%c0_185, %c0_186] : memref<128x512xf32, #tpu.memory_space<vmem>>, vector<128x512xf32>
    %cst_187 = arith.constant dense<0.000000e+00> : vector<8x512xf32>
    %409 = tpu.matmul %403, %408, %cst_187 {dimension_numbers = #tpu.dot_dimension_numbers<[1], [0], [0], [1], [0, 0, 1, 1], [], []>} : vector<8x128xf32>, vector<128x512xf32>, vector<8x512xf32> -> vector<8x512xf32>
    %410 = arith.addf %407, %409 : vector<8x512xf32>
    %411 = vector.extract_strided_slice %410 {offsets = [0, 0], sizes = [8, 128], strides = [1, 1]} : vector<8x512xf32> to vector<8x128xf32>
    %412 = arith.negf %411 : vector<8x128xf32>
    %413 = math.exp %412 : vector<8x128xf32>
    %cst_188 = arith.constant 1.000000e+00 : f32
    %414 = vector.broadcast %cst_188 : f32 to vector<8x128xf32>
    %415 = arith.addf %414, %413 : vector<8x128xf32>
    %416 = arith.divf %414, %415 : vector<8x128xf32>
    %417 = vector.extract_strided_slice %410 {offsets = [0, 128], sizes = [8, 128], strides = [1, 1]} : vector<8x512xf32> to vector<8x128xf32>
    %418 = arith.negf %417 : vector<8x128xf32>
    %419 = math.exp %418 : vector<8x128xf32>
    %cst_189 = arith.constant 1.000000e+00 : f32
    %420 = vector.broadcast %cst_189 : f32 to vector<8x128xf32>
    %421 = arith.addf %420, %419 : vector<8x128xf32>
    %422 = arith.divf %420, %421 : vector<8x128xf32>
    %423 = vector.extract_strided_slice %410 {offsets = [0, 256], sizes = [8, 128], strides = [1, 1]} : vector<8x512xf32> to vector<8x128xf32>
    %424 = math.tanh %423 : vector<8x128xf32>
    %425 = vector.extract_strided_slice %410 {offsets = [0, 384], sizes = [8, 128], strides = [1, 1]} : vector<8x512xf32> to vector<8x128xf32>
    %426 = arith.negf %425 : vector<8x128xf32>
    %427 = math.exp %426 : vector<8x128xf32>
    %cst_190 = arith.constant 1.000000e+00 : f32
    %428 = vector.broadcast %cst_190 : f32 to vector<8x128xf32>
    %429 = arith.addf %428, %427 : vector<8x128xf32>
    %430 = arith.divf %428, %429 : vector<8x128xf32>
    %431 = arith.mulf %422, %404 : vector<8x128xf32>
    %432 = arith.mulf %416, %424 : vector<8x128xf32>
    %433 = arith.addf %431, %432 : vector<8x128xf32>
    %434 = math.tanh %433 : vector<8x128xf32>
    %435 = arith.mulf %430, %434 : vector<8x128xf32>
    %436 = vector.broadcast %c0_i32_178 : i32 to vector<8x1xi32>
    %437 = arith.cmpi slt, %436, %0 : vector<8x1xi32>
    %438 = vector.shape_cast %437 : vector<8x1xi1> to vector<8x1xi1>
    %439 = vector.broadcast %438 : vector<8x1xi1> to vector<8x128xi1>
    %440 = arith.select %439, %435, %403 : vector<8x128xi1>, vector<8x128xf32>
    %441 = vector.shape_cast %437 : vector<8x1xi1> to vector<8x1xi1>
    %442 = vector.broadcast %441 : vector<8x1xi1> to vector<8x128xi1>
    %443 = arith.select %442, %433, %404 : vector<8x128xi1>, vector<8x128xf32>
    %c0_191 = arith.constant 0 : index
    %c0_192 = arith.constant 0 : index
    %444 = vector.load %arg16[%c0_191, %c0_192] : memref<8x128xf32, #tpu.memory_space<vmem>>, vector<8x128xf32>
    tpu.vector_store %arg16[%c0_191, %c0_192], %440 {strides = array<i32>} : memref<8x128xf32, #tpu.memory_space<vmem>>, vector<8x128xf32>,
    %c0_193 = arith.constant 0 : index
    %c0_194 = arith.constant 0 : index
    %445 = vector.load %arg17[%c0_193, %c0_194] : memref<8x128xf32, #tpu.memory_space<vmem>>, vector<8x128xf32>
    tpu.vector_store %arg17[%c0_193, %c0_194], %443 {strides = array<i32>} : memref<8x128xf32, #tpu.memory_space<vmem>>, vector<8x128xf32>,
    %446 = arith.index_cast %c0_i32_178 : i32 to index
    %c0_195 = arith.constant 0 : index
    %c0_196 = arith.constant 0 : index
    %447 = vector.load %arg14[%446, %c0_195, %c0_196] : memref<8x8x128xf32, #tpu.memory_space<vmem>>, vector<1x8x128xf32>
    %448 = vector.shape_cast %447 : vector<1x8x128xf32> to vector<8x128xf32>
    %449 = vector.shape_cast %440 : vector<8x128xf32> to vector<1x8x128xf32>
    tpu.vector_store %arg14[%446, %c0_195, %c0_196], %449 {strides = array<i32>} : memref<8x8x128xf32, #tpu.memory_space<vmem>>, vector<1x8x128xf32>,
    %c1_i32_197 = arith.constant 1 : i32
    %c0_198 = arith.constant 0 : index
    %c0_199 = arith.constant 0 : index
    %450 = vector.load %arg16[%c0_198, %c0_199] : memref<8x128xf32, #tpu.memory_space<vmem>>, vector<8x128xf32>
    %c0_200 = arith.constant 0 : index
    %c0_201 = arith.constant 0 : index
    %451 = vector.load %arg17[%c0_200, %c0_201] : memref<8x128xf32, #tpu.memory_space<vmem>>, vector<8x128xf32>
    %452 = arith.index_cast %c1_i32_197 : i32 to index
    %c0_202 = arith.constant 0 : index
    %c0_203 = arith.constant 0 : index
    %453 = vector.load %arg15[%452, %c0_202, %c0_203] : memref<8x8x512xf32, #tpu.memory_space<vmem>>, vector<1x8x512xf32>
    %454 = vector.shape_cast %453 : vector<1x8x512xf32> to vector<8x512xf32>
    %c0_204 = arith.constant 0 : index
    %c0_205 = arith.constant 0 : index
    %455 = vector.load %arg6[%c0_204, %c0_205] : memref<128x512xf32, #tpu.memory_space<vmem>>, vector<128x512xf32>
    %cst_206 = arith.constant dense<0.000000e+00> : vector<8x512xf32>
    %456 = tpu.matmul %450, %455, %cst_206 {dimension_numbers = #tpu.dot_dimension_numbers<[1], [0], [0], [1], [0, 0, 1, 1], [], []>} : vector<8x128xf32>, vector<128x512xf32>, vector<8x512xf32> -> vector<8x512xf32>
    %457 = arith.addf %454, %456 : vector<8x512xf32>
    %458 = vector.extract_strided_slice %457 {offsets = [0, 0], sizes = [8, 128], strides = [1, 1]} : vector<8x512xf32> to vector<8x128xf32>
    %459 = arith.negf %458 : vector<8x128xf32>
    %460 = math.exp %459 : vector<8x128xf32>
    %cst_207 = arith.constant 1.000000e+00 : f32
    %461 = vector.broadcast %cst_207 : f32 to vector<8x128xf32>
    %462 = arith.addf %461, %460 : vector<8x128xf32>
    %463 = arith.divf %461, %462 : vector<8x128xf32>
    %464 = vector.extract_strided_slice %457 {offsets = [0, 128], sizes = [8, 128], strides = [1, 1]} : vector<8x512xf32> to vector<8x128xf32>
    %465 = arith.negf %464 : vector<8x128xf32>
    %466 = math.exp %465 : vector<8x128xf32>
    %cst_208 = arith.constant 1.000000e+00 : f32
    %467 = vector.broadcast %cst_208 : f32 to vector<8x128xf32>
    %468 = arith.addf %467, %466 : vector<8x128xf32>
    %469 = arith.divf %467, %468 : vector<8x128xf32>
    %470 = vector.extract_strided_slice %457 {offsets = [0, 256], sizes = [8, 128], strides = [1, 1]} : vector<8x512xf32> to vector<8x128xf32>
    %471 = math.tanh %470 : vector<8x128xf32>
    %472 = vector.extract_strided_slice %457 {offsets = [0, 384], sizes = [8, 128], strides = [1, 1]} : vector<8x512xf32> to vector<8x128xf32>
    %473 = arith.negf %472 : vector<8x128xf32>
    %474 = math.exp %473 : vector<8x128xf32>
    %cst_209 = arith.constant 1.000000e+00 : f32
    %475 = vector.broadcast %cst_209 : f32 to vector<8x128xf32>
    %476 = arith.addf %475, %474 : vector<8x128xf32>
    %477 = arith.divf %475, %476 : vector<8x128xf32>
    %478 = arith.mulf %469, %451 : vector<8x128xf32>
    %479 = arith.mulf %463, %471 : vector<8x128xf32>
    %480 = arith.addf %478, %479 : vector<8x128xf32>
    %481 = math.tanh %480 : vector<8x128xf32>
    %482 = arith.mulf %477, %481 : vector<8x128xf32>
    %483 = vector.broadcast %c1_i32_197 : i32 to vector<8x1xi32>
    %484 = arith.cmpi slt, %483, %0 : vector<8x1xi32>
    %485 = vector.shape_cast %484 : vector<8x1xi1> to vector<8x1xi1>
    %486 = vector.broadcast %485 : vector<8x1xi1> to vector<8x128xi1>
    %487 = arith.select %486, %482, %450 : vector<8x128xi1>, vector<8x128xf32>
    %488 = vector.shape_cast %484 : vector<8x1xi1> to vector<8x1xi1>
    %489 = vector.broadcast %488 : vector<8x1xi1> to vector<8x128xi1>
    %490 = arith.select %489, %480, %451 : vector<8x128xi1>, vector<8x128xf32>
    %c0_210 = arith.constant 0 : index
    %c0_211 = arith.constant 0 : index
    %491 = vector.load %arg16[%c0_210, %c0_211] : memref<8x128xf32, #tpu.memory_space<vmem>>, vector<8x128xf32>
    tpu.vector_store %arg16[%c0_210, %c0_211], %487 {strides = array<i32>} : memref<8x128xf32, #tpu.memory_space<vmem>>, vector<8x128xf32>,
    %c0_212 = arith.constant 0 : index
    %c0_213 = arith.constant 0 : index
    %492 = vector.load %arg17[%c0_212, %c0_213] : memref<8x128xf32, #tpu.memory_space<vmem>>, vector<8x128xf32>
    tpu.vector_store %arg17[%c0_212, %c0_213], %490 {strides = array<i32>} : memref<8x128xf32, #tpu.memory_space<vmem>>, vector<8x128xf32>,
    %493 = arith.index_cast %c1_i32_197 : i32 to index
    %c0_214 = arith.constant 0 : index
    %c0_215 = arith.constant 0 : index
    %494 = vector.load %arg14[%493, %c0_214, %c0_215] : memref<8x8x128xf32, #tpu.memory_space<vmem>>, vector<1x8x128xf32>
    %495 = vector.shape_cast %494 : vector<1x8x128xf32> to vector<8x128xf32>
    %496 = vector.shape_cast %487 : vector<8x128xf32> to vector<1x8x128xf32>
    tpu.vector_store %arg14[%493, %c0_214, %c0_215], %496 {strides = array<i32>} : memref<8x8x128xf32, #tpu.memory_space<vmem>>, vector<1x8x128xf32>,
    %c2_i32_216 = arith.constant 2 : i32
    %c0_217 = arith.constant 0 : index
    %c0_218 = arith.constant 0 : index
    %497 = vector.load %arg16[%c0_217, %c0_218] : memref<8x128xf32, #tpu.memory_space<vmem>>, vector<8x128xf32>
    %c0_219 = arith.constant 0 : index
    %c0_220 = arith.constant 0 : index
    %498 = vector.load %arg17[%c0_219, %c0_220] : memref<8x128xf32, #tpu.memory_space<vmem>>, vector<8x128xf32>
    %499 = arith.index_cast %c2_i32_216 : i32 to index
    %c0_221 = arith.constant 0 : index
    %c0_222 = arith.constant 0 : index
    %500 = vector.load %arg15[%499, %c0_221, %c0_222] : memref<8x8x512xf32, #tpu.memory_space<vmem>>, vector<1x8x512xf32>
    %501 = vector.shape_cast %500 : vector<1x8x512xf32> to vector<8x512xf32>
    %c0_223 = arith.constant 0 : index
    %c0_224 = arith.constant 0 : index
    %502 = vector.load %arg6[%c0_223, %c0_224] : memref<128x512xf32, #tpu.memory_space<vmem>>, vector<128x512xf32>
    %cst_225 = arith.constant dense<0.000000e+00> : vector<8x512xf32>
    %503 = tpu.matmul %497, %502, %cst_225 {dimension_numbers = #tpu.dot_dimension_numbers<[1], [0], [0], [1], [0, 0, 1, 1], [], []>} : vector<8x128xf32>, vector<128x512xf32>, vector<8x512xf32> -> vector<8x512xf32>
    %504 = arith.addf %501, %503 : vector<8x512xf32>
    %505 = vector.extract_strided_slice %504 {offsets = [0, 0], sizes = [8, 128], strides = [1, 1]} : vector<8x512xf32> to vector<8x128xf32>
    %506 = arith.negf %505 : vector<8x128xf32>
    %507 = math.exp %506 : vector<8x128xf32>
    %cst_226 = arith.constant 1.000000e+00 : f32
    %508 = vector.broadcast %cst_226 : f32 to vector<8x128xf32>
    %509 = arith.addf %508, %507 : vector<8x128xf32>
    %510 = arith.divf %508, %509 : vector<8x128xf32>
    %511 = vector.extract_strided_slice %504 {offsets = [0, 128], sizes = [8, 128], strides = [1, 1]} : vector<8x512xf32> to vector<8x128xf32>
    %512 = arith.negf %511 : vector<8x128xf32>
    %513 = math.exp %512 : vector<8x128xf32>
    %cst_227 = arith.constant 1.000000e+00 : f32
    %514 = vector.broadcast %cst_227 : f32 to vector<8x128xf32>
    %515 = arith.addf %514, %513 : vector<8x128xf32>
    %516 = arith.divf %514, %515 : vector<8x128xf32>
    %517 = vector.extract_strided_slice %504 {offsets = [0, 256], sizes = [8, 128], strides = [1, 1]} : vector<8x512xf32> to vector<8x128xf32>
    %518 = math.tanh %517 : vector<8x128xf32>
    %519 = vector.extract_strided_slice %504 {offsets = [0, 384], sizes = [8, 128], strides = [1, 1]} : vector<8x512xf32> to vector<8x128xf32>
    %520 = arith.negf %519 : vector<8x128xf32>
    %521 = math.exp %520 : vector<8x128xf32>
    %cst_228 = arith.constant 1.000000e+00 : f32
    %522 = vector.broadcast %cst_228 : f32 to vector<8x128xf32>
    %523 = arith.addf %522, %521 : vector<8x128xf32>
    %524 = arith.divf %522, %523 : vector<8x128xf32>
    %525 = arith.mulf %516, %498 : vector<8x128xf32>
    %526 = arith.mulf %510, %518 : vector<8x128xf32>
    %527 = arith.addf %525, %526 : vector<8x128xf32>
    %528 = math.tanh %527 : vector<8x128xf32>
    %529 = arith.mulf %524, %528 : vector<8x128xf32>
    %530 = vector.broadcast %c2_i32_216 : i32 to vector<8x1xi32>
    %531 = arith.cmpi slt, %530, %0 : vector<8x1xi32>
    %532 = vector.shape_cast %531 : vector<8x1xi1> to vector<8x1xi1>
    %533 = vector.broadcast %532 : vector<8x1xi1> to vector<8x128xi1>
    %534 = arith.select %533, %529, %497 : vector<8x128xi1>, vector<8x128xf32>
    %535 = vector.shape_cast %531 : vector<8x1xi1> to vector<8x1xi1>
    %536 = vector.broadcast %535 : vector<8x1xi1> to vector<8x128xi1>
    %537 = arith.select %536, %527, %498 : vector<8x128xi1>, vector<8x128xf32>
    %c0_229 = arith.constant 0 : index
    %c0_230 = arith.constant 0 : index
    %538 = vector.load %arg16[%c0_229, %c0_230] : memref<8x128xf32, #tpu.memory_space<vmem>>, vector<8x128xf32>
    tpu.vector_store %arg16[%c0_229, %c0_230], %534 {strides = array<i32>} : memref<8x128xf32, #tpu.memory_space<vmem>>, vector<8x128xf32>,
    %c0_231 = arith.constant 0 : index
    %c0_232 = arith.constant 0 : index
    %539 = vector.load %arg17[%c0_231, %c0_232] : memref<8x128xf32, #tpu.memory_space<vmem>>, vector<8x128xf32>
    tpu.vector_store %arg17[%c0_231, %c0_232], %537 {strides = array<i32>} : memref<8x128xf32, #tpu.memory_space<vmem>>, vector<8x128xf32>,
    %540 = arith.index_cast %c2_i32_216 : i32 to index
    %c0_233 = arith.constant 0 : index
    %c0_234 = arith.constant 0 : index
    %541 = vector.load %arg14[%540, %c0_233, %c0_234] : memref<8x8x128xf32, #tpu.memory_space<vmem>>, vector<1x8x128xf32>
    %542 = vector.shape_cast %541 : vector<1x8x128xf32> to vector<8x128xf32>
    %543 = vector.shape_cast %534 : vector<8x128xf32> to vector<1x8x128xf32>
    tpu.vector_store %arg14[%540, %c0_233, %c0_234], %543 {strides = array<i32>} : memref<8x8x128xf32, #tpu.memory_space<vmem>>, vector<1x8x128xf32>,
    %c3_i32_235 = arith.constant 3 : i32
    %c0_236 = arith.constant 0 : index
    %c0_237 = arith.constant 0 : index
    %544 = vector.load %arg16[%c0_236, %c0_237] : memref<8x128xf32, #tpu.memory_space<vmem>>, vector<8x128xf32>
    %c0_238 = arith.constant 0 : index
    %c0_239 = arith.constant 0 : index
    %545 = vector.load %arg17[%c0_238, %c0_239] : memref<8x128xf32, #tpu.memory_space<vmem>>, vector<8x128xf32>
    %546 = arith.index_cast %c3_i32_235 : i32 to index
    %c0_240 = arith.constant 0 : index
    %c0_241 = arith.constant 0 : index
    %547 = vector.load %arg15[%546, %c0_240, %c0_241] : memref<8x8x512xf32, #tpu.memory_space<vmem>>, vector<1x8x512xf32>
    %548 = vector.shape_cast %547 : vector<1x8x512xf32> to vector<8x512xf32>
    %c0_242 = arith.constant 0 : index
    %c0_243 = arith.constant 0 : index
    %549 = vector.load %arg6[%c0_242, %c0_243] : memref<128x512xf32, #tpu.memory_space<vmem>>, vector<128x512xf32>
    %cst_244 = arith.constant dense<0.000000e+00> : vector<8x512xf32>
    %550 = tpu.matmul %544, %549, %cst_244 {dimension_numbers = #tpu.dot_dimension_numbers<[1], [0], [0], [1], [0, 0, 1, 1], [], []>} : vector<8x128xf32>, vector<128x512xf32>, vector<8x512xf32> -> vector<8x512xf32>
    %551 = arith.addf %548, %550 : vector<8x512xf32>
    %552 = vector.extract_strided_slice %551 {offsets = [0, 0], sizes = [8, 128], strides = [1, 1]} : vector<8x512xf32> to vector<8x128xf32>
    %553 = arith.negf %552 : vector<8x128xf32>
    %554 = math.exp %553 : vector<8x128xf32>
    %cst_245 = arith.constant 1.000000e+00 : f32
    %555 = vector.broadcast %cst_245 : f32 to vector<8x128xf32>
    %556 = arith.addf %555, %554 : vector<8x128xf32>
    %557 = arith.divf %555, %556 : vector<8x128xf32>
    %558 = vector.extract_strided_slice %551 {offsets = [0, 128], sizes = [8, 128], strides = [1, 1]} : vector<8x512xf32> to vector<8x128xf32>
    %559 = arith.negf %558 : vector<8x128xf32>
    %560 = math.exp %559 : vector<8x128xf32>
    %cst_246 = arith.constant 1.000000e+00 : f32
    %561 = vector.broadcast %cst_246 : f32 to vector<8x128xf32>
    %562 = arith.addf %561, %560 : vector<8x128xf32>
    %563 = arith.divf %561, %562 : vector<8x128xf32>
    %564 = vector.extract_strided_slice %551 {offsets = [0, 256], sizes = [8, 128], strides = [1, 1]} : vector<8x512xf32> to vector<8x128xf32>
    %565 = math.tanh %564 : vector<8x128xf32>
    %566 = vector.extract_strided_slice %551 {offsets = [0, 384], sizes = [8, 128], strides = [1, 1]} : vector<8x512xf32> to vector<8x128xf32>
    %567 = arith.negf %566 : vector<8x128xf32>
    %568 = math.exp %567 : vector<8x128xf32>
    %cst_247 = arith.constant 1.000000e+00 : f32
    %569 = vector.broadcast %cst_247 : f32 to vector<8x128xf32>
    %570 = arith.addf %569, %568 : vector<8x128xf32>
    %571 = arith.divf %569, %570 : vector<8x128xf32>
    %572 = arith.mulf %563, %545 : vector<8x128xf32>
    %573 = arith.mulf %557, %565 : vector<8x128xf32>
    %574 = arith.addf %572, %573 : vector<8x128xf32>
    %575 = math.tanh %574 : vector<8x128xf32>
    %576 = arith.mulf %571, %575 : vector<8x128xf32>
    %577 = vector.broadcast %c3_i32_235 : i32 to vector<8x1xi32>
    %578 = arith.cmpi slt, %577, %0 : vector<8x1xi32>
    %579 = vector.shape_cast %578 : vector<8x1xi1> to vector<8x1xi1>
    %580 = vector.broadcast %579 : vector<8x1xi1> to vector<8x128xi1>
    %581 = arith.select %580, %576, %544 : vector<8x128xi1>, vector<8x128xf32>
    %582 = vector.shape_cast %578 : vector<8x1xi1> to vector<8x1xi1>
    %583 = vector.broadcast %582 : vector<8x1xi1> to vector<8x128xi1>
    %584 = arith.select %583, %574, %545 : vector<8x128xi1>, vector<8x128xf32>
    %c0_248 = arith.constant 0 : index
    %c0_249 = arith.constant 0 : index
    %585 = vector.load %arg16[%c0_248, %c0_249] : memref<8x128xf32, #tpu.memory_space<vmem>>, vector<8x128xf32>
    tpu.vector_store %arg16[%c0_248, %c0_249], %581 {strides = array<i32>} : memref<8x128xf32, #tpu.memory_space<vmem>>, vector<8x128xf32>,
    %c0_250 = arith.constant 0 : index
    %c0_251 = arith.constant 0 : index
    %586 = vector.load %arg17[%c0_250, %c0_251] : memref<8x128xf32, #tpu.memory_space<vmem>>, vector<8x128xf32>
    tpu.vector_store %arg17[%c0_250, %c0_251], %584 {strides = array<i32>} : memref<8x128xf32, #tpu.memory_space<vmem>>, vector<8x128xf32>,
    %587 = arith.index_cast %c3_i32_235 : i32 to index
    %c0_252 = arith.constant 0 : index
    %c0_253 = arith.constant 0 : index
    %588 = vector.load %arg14[%587, %c0_252, %c0_253] : memref<8x8x128xf32, #tpu.memory_space<vmem>>, vector<1x8x128xf32>
    %589 = vector.shape_cast %588 : vector<1x8x128xf32> to vector<8x128xf32>
    %590 = vector.shape_cast %581 : vector<8x128xf32> to vector<1x8x128xf32>
    tpu.vector_store %arg14[%587, %c0_252, %c0_253], %590 {strides = array<i32>} : memref<8x8x128xf32, #tpu.memory_space<vmem>>, vector<1x8x128xf32>,
    %c4_i32_254 = arith.constant 4 : i32
    %c0_255 = arith.constant 0 : index
    %c0_256 = arith.constant 0 : index
    %591 = vector.load %arg16[%c0_255, %c0_256] : memref<8x128xf32, #tpu.memory_space<vmem>>, vector<8x128xf32>
    %c0_257 = arith.constant 0 : index
    %c0_258 = arith.constant 0 : index
    %592 = vector.load %arg17[%c0_257, %c0_258] : memref<8x128xf32, #tpu.memory_space<vmem>>, vector<8x128xf32>
    %593 = arith.index_cast %c4_i32_254 : i32 to index
    %c0_259 = arith.constant 0 : index
    %c0_260 = arith.constant 0 : index
    %594 = vector.load %arg15[%593, %c0_259, %c0_260] : memref<8x8x512xf32, #tpu.memory_space<vmem>>, vector<1x8x512xf32>
    %595 = vector.shape_cast %594 : vector<1x8x512xf32> to vector<8x512xf32>
    %c0_261 = arith.constant 0 : index
    %c0_262 = arith.constant 0 : index
    %596 = vector.load %arg6[%c0_261, %c0_262] : memref<128x512xf32, #tpu.memory_space<vmem>>, vector<128x512xf32>
    %cst_263 = arith.constant dense<0.000000e+00> : vector<8x512xf32>
    %597 = tpu.matmul %591, %596, %cst_263 {dimension_numbers = #tpu.dot_dimension_numbers<[1], [0], [0], [1], [0, 0, 1, 1], [], []>} : vector<8x128xf32>, vector<128x512xf32>, vector<8x512xf32> -> vector<8x512xf32>
    %598 = arith.addf %595, %597 : vector<8x512xf32>
    %599 = vector.extract_strided_slice %598 {offsets = [0, 0], sizes = [8, 128], strides = [1, 1]} : vector<8x512xf32> to vector<8x128xf32>
    %600 = arith.negf %599 : vector<8x128xf32>
    %601 = math.exp %600 : vector<8x128xf32>
    %cst_264 = arith.constant 1.000000e+00 : f32
    %602 = vector.broadcast %cst_264 : f32 to vector<8x128xf32>
    %603 = arith.addf %602, %601 : vector<8x128xf32>
    %604 = arith.divf %602, %603 : vector<8x128xf32>
    %605 = vector.extract_strided_slice %598 {offsets = [0, 128], sizes = [8, 128], strides = [1, 1]} : vector<8x512xf32> to vector<8x128xf32>
    %606 = arith.negf %605 : vector<8x128xf32>
    %607 = math.exp %606 : vector<8x128xf32>
    %cst_265 = arith.constant 1.000000e+00 : f32
    %608 = vector.broadcast %cst_265 : f32 to vector<8x128xf32>
    %609 = arith.addf %608, %607 : vector<8x128xf32>
    %610 = arith.divf %608, %609 : vector<8x128xf32>
    %611 = vector.extract_strided_slice %598 {offsets = [0, 256], sizes = [8, 128], strides = [1, 1]} : vector<8x512xf32> to vector<8x128xf32>
    %612 = math.tanh %611 : vector<8x128xf32>
    %613 = vector.extract_strided_slice %598 {offsets = [0, 384], sizes = [8, 128], strides = [1, 1]} : vector<8x512xf32> to vector<8x128xf32>
    %614 = arith.negf %613 : vector<8x128xf32>
    %615 = math.exp %614 : vector<8x128xf32>
    %cst_266 = arith.constant 1.000000e+00 : f32
    %616 = vector.broadcast %cst_266 : f32 to vector<8x128xf32>
    %617 = arith.addf %616, %615 : vector<8x128xf32>
    %618 = arith.divf %616, %617 : vector<8x128xf32>
    %619 = arith.mulf %610, %592 : vector<8x128xf32>
    %620 = arith.mulf %604, %612 : vector<8x128xf32>
    %621 = arith.addf %619, %620 : vector<8x128xf32>
    %622 = math.tanh %621 : vector<8x128xf32>
    %623 = arith.mulf %618, %622 : vector<8x128xf32>
    %624 = vector.broadcast %c4_i32_254 : i32 to vector<8x1xi32>
    %625 = arith.cmpi slt, %624, %0 : vector<8x1xi32>
    %626 = vector.shape_cast %625 : vector<8x1xi1> to vector<8x1xi1>
    %627 = vector.broadcast %626 : vector<8x1xi1> to vector<8x128xi1>
    %628 = arith.select %627, %623, %591 : vector<8x128xi1>, vector<8x128xf32>
    %629 = vector.shape_cast %625 : vector<8x1xi1> to vector<8x1xi1>
    %630 = vector.broadcast %629 : vector<8x1xi1> to vector<8x128xi1>
    %631 = arith.select %630, %621, %592 : vector<8x128xi1>, vector<8x128xf32>
    %c0_267 = arith.constant 0 : index
    %c0_268 = arith.constant 0 : index
    %632 = vector.load %arg16[%c0_267, %c0_268] : memref<8x128xf32, #tpu.memory_space<vmem>>, vector<8x128xf32>
    tpu.vector_store %arg16[%c0_267, %c0_268], %628 {strides = array<i32>} : memref<8x128xf32, #tpu.memory_space<vmem>>, vector<8x128xf32>,
    %c0_269 = arith.constant 0 : index
    %c0_270 = arith.constant 0 : index
    %633 = vector.load %arg17[%c0_269, %c0_270] : memref<8x128xf32, #tpu.memory_space<vmem>>, vector<8x128xf32>
    tpu.vector_store %arg17[%c0_269, %c0_270], %631 {strides = array<i32>} : memref<8x128xf32, #tpu.memory_space<vmem>>, vector<8x128xf32>,
    %634 = arith.index_cast %c4_i32_254 : i32 to index
    %c0_271 = arith.constant 0 : index
    %c0_272 = arith.constant 0 : index
    %635 = vector.load %arg14[%634, %c0_271, %c0_272] : memref<8x8x128xf32, #tpu.memory_space<vmem>>, vector<1x8x128xf32>
    %636 = vector.shape_cast %635 : vector<1x8x128xf32> to vector<8x128xf32>
    %637 = vector.shape_cast %628 : vector<8x128xf32> to vector<1x8x128xf32>
    tpu.vector_store %arg14[%634, %c0_271, %c0_272], %637 {strides = array<i32>} : memref<8x8x128xf32, #tpu.memory_space<vmem>>, vector<1x8x128xf32>,
    %c5_i32_273 = arith.constant 5 : i32
    %c0_274 = arith.constant 0 : index
    %c0_275 = arith.constant 0 : index
    %638 = vector.load %arg16[%c0_274, %c0_275] : memref<8x128xf32, #tpu.memory_space<vmem>>, vector<8x128xf32>
    %c0_276 = arith.constant 0 : index
    %c0_277 = arith.constant 0 : index
    %639 = vector.load %arg17[%c0_276, %c0_277] : memref<8x128xf32, #tpu.memory_space<vmem>>, vector<8x128xf32>
    %640 = arith.index_cast %c5_i32_273 : i32 to index
    %c0_278 = arith.constant 0 : index
    %c0_279 = arith.constant 0 : index
    %641 = vector.load %arg15[%640, %c0_278, %c0_279] : memref<8x8x512xf32, #tpu.memory_space<vmem>>, vector<1x8x512xf32>
    %642 = vector.shape_cast %641 : vector<1x8x512xf32> to vector<8x512xf32>
    %c0_280 = arith.constant 0 : index
    %c0_281 = arith.constant 0 : index
    %643 = vector.load %arg6[%c0_280, %c0_281] : memref<128x512xf32, #tpu.memory_space<vmem>>, vector<128x512xf32>
    %cst_282 = arith.constant dense<0.000000e+00> : vector<8x512xf32>
    %644 = tpu.matmul %638, %643, %cst_282 {dimension_numbers = #tpu.dot_dimension_numbers<[1], [0], [0], [1], [0, 0, 1, 1], [], []>} : vector<8x128xf32>, vector<128x512xf32>, vector<8x512xf32> -> vector<8x512xf32>
    %645 = arith.addf %642, %644 : vector<8x512xf32>
    %646 = vector.extract_strided_slice %645 {offsets = [0, 0], sizes = [8, 128], strides = [1, 1]} : vector<8x512xf32> to vector<8x128xf32>
    %647 = arith.negf %646 : vector<8x128xf32>
    %648 = math.exp %647 : vector<8x128xf32>
    %cst_283 = arith.constant 1.000000e+00 : f32
    %649 = vector.broadcast %cst_283 : f32 to vector<8x128xf32>
    %650 = arith.addf %649, %648 : vector<8x128xf32>
    %651 = arith.divf %649, %650 : vector<8x128xf32>
    %652 = vector.extract_strided_slice %645 {offsets = [0, 128], sizes = [8, 128], strides = [1, 1]} : vector<8x512xf32> to vector<8x128xf32>
    %653 = arith.negf %652 : vector<8x128xf32>
    %654 = math.exp %653 : vector<8x128xf32>
    %cst_284 = arith.constant 1.000000e+00 : f32
    %655 = vector.broadcast %cst_284 : f32 to vector<8x128xf32>
    %656 = arith.addf %655, %654 : vector<8x128xf32>
    %657 = arith.divf %655, %656 : vector<8x128xf32>
    %658 = vector.extract_strided_slice %645 {offsets = [0, 256], sizes = [8, 128], strides = [1, 1]} : vector<8x512xf32> to vector<8x128xf32>
    %659 = math.tanh %658 : vector<8x128xf32>
    %660 = vector.extract_strided_slice %645 {offsets = [0, 384], sizes = [8, 128], strides = [1, 1]} : vector<8x512xf32> to vector<8x128xf32>
    %661 = arith.negf %660 : vector<8x128xf32>
    %662 = math.exp %661 : vector<8x128xf32>
    %cst_285 = arith.constant 1.000000e+00 : f32
    %663 = vector.broadcast %cst_285 : f32 to vector<8x128xf32>
    %664 = arith.addf %663, %662 : vector<8x128xf32>
    %665 = arith.divf %663, %664 : vector<8x128xf32>
    %666 = arith.mulf %657, %639 : vector<8x128xf32>
    %667 = arith.mulf %651, %659 : vector<8x128xf32>
    %668 = arith.addf %666, %667 : vector<8x128xf32>
    %669 = math.tanh %668 : vector<8x128xf32>
    %670 = arith.mulf %665, %669 : vector<8x128xf32>
    %671 = vector.broadcast %c5_i32_273 : i32 to vector<8x1xi32>
    %672 = arith.cmpi slt, %671, %0 : vector<8x1xi32>
    %673 = vector.shape_cast %672 : vector<8x1xi1> to vector<8x1xi1>
    %674 = vector.broadcast %673 : vector<8x1xi1> to vector<8x128xi1>
    %675 = arith.select %674, %670, %638 : vector<8x128xi1>, vector<8x128xf32>
    %676 = vector.shape_cast %672 : vector<8x1xi1> to vector<8x1xi1>
    %677 = vector.broadcast %676 : vector<8x1xi1> to vector<8x128xi1>
    %678 = arith.select %677, %668, %639 : vector<8x128xi1>, vector<8x128xf32>
    %c0_286 = arith.constant 0 : index
    %c0_287 = arith.constant 0 : index
    %679 = vector.load %arg16[%c0_286, %c0_287] : memref<8x128xf32, #tpu.memory_space<vmem>>, vector<8x128xf32>
    tpu.vector_store %arg16[%c0_286, %c0_287], %675 {strides = array<i32>} : memref<8x128xf32, #tpu.memory_space<vmem>>, vector<8x128xf32>,
    %c0_288 = arith.constant 0 : index
    %c0_289 = arith.constant 0 : index
    %680 = vector.load %arg17[%c0_288, %c0_289] : memref<8x128xf32, #tpu.memory_space<vmem>>, vector<8x128xf32>
    tpu.vector_store %arg17[%c0_288, %c0_289], %678 {strides = array<i32>} : memref<8x128xf32, #tpu.memory_space<vmem>>, vector<8x128xf32>,
    %681 = arith.index_cast %c5_i32_273 : i32 to index
    %c0_290 = arith.constant 0 : index
    %c0_291 = arith.constant 0 : index
    %682 = vector.load %arg14[%681, %c0_290, %c0_291] : memref<8x8x128xf32, #tpu.memory_space<vmem>>, vector<1x8x128xf32>
    %683 = vector.shape_cast %682 : vector<1x8x128xf32> to vector<8x128xf32>
    %684 = vector.shape_cast %675 : vector<8x128xf32> to vector<1x8x128xf32>
    tpu.vector_store %arg14[%681, %c0_290, %c0_291], %684 {strides = array<i32>} : memref<8x8x128xf32, #tpu.memory_space<vmem>>, vector<1x8x128xf32>,
    %c6_i32_292 = arith.constant 6 : i32
    %c0_293 = arith.constant 0 : index
    %c0_294 = arith.constant 0 : index
    %685 = vector.load %arg16[%c0_293, %c0_294] : memref<8x128xf32, #tpu.memory_space<vmem>>, vector<8x128xf32>
    %c0_295 = arith.constant 0 : index
    %c0_296 = arith.constant 0 : index
    %686 = vector.load %arg17[%c0_295, %c0_296] : memref<8x128xf32, #tpu.memory_space<vmem>>, vector<8x128xf32>
    %687 = arith.index_cast %c6_i32_292 : i32 to index
    %c0_297 = arith.constant 0 : index
    %c0_298 = arith.constant 0 : index
    %688 = vector.load %arg15[%687, %c0_297, %c0_298] : memref<8x8x512xf32, #tpu.memory_space<vmem>>, vector<1x8x512xf32>
    %689 = vector.shape_cast %688 : vector<1x8x512xf32> to vector<8x512xf32>
    %c0_299 = arith.constant 0 : index
    %c0_300 = arith.constant 0 : index
    %690 = vector.load %arg6[%c0_299, %c0_300] : memref<128x512xf32, #tpu.memory_space<vmem>>, vector<128x512xf32>
    %cst_301 = arith.constant dense<0.000000e+00> : vector<8x512xf32>
    %691 = tpu.matmul %685, %690, %cst_301 {dimension_numbers = #tpu.dot_dimension_numbers<[1], [0], [0], [1], [0, 0, 1, 1], [], []>} : vector<8x128xf32>, vector<128x512xf32>, vector<8x512xf32> -> vector<8x512xf32>
    %692 = arith.addf %689, %691 : vector<8x512xf32>
    %693 = vector.extract_strided_slice %692 {offsets = [0, 0], sizes = [8, 128], strides = [1, 1]} : vector<8x512xf32> to vector<8x128xf32>
    %694 = arith.negf %693 : vector<8x128xf32>
    %695 = math.exp %694 : vector<8x128xf32>
    %cst_302 = arith.constant 1.000000e+00 : f32
    %696 = vector.broadcast %cst_302 : f32 to vector<8x128xf32>
    %697 = arith.addf %696, %695 : vector<8x128xf32>
    %698 = arith.divf %696, %697 : vector<8x128xf32>
    %699 = vector.extract_strided_slice %692 {offsets = [0, 128], sizes = [8, 128], strides = [1, 1]} : vector<8x512xf32> to vector<8x128xf32>
    %700 = arith.negf %699 : vector<8x128xf32>
    %701 = math.exp %700 : vector<8x128xf32>
    %cst_303 = arith.constant 1.000000e+00 : f32
    %702 = vector.broadcast %cst_303 : f32 to vector<8x128xf32>
    %703 = arith.addf %702, %701 : vector<8x128xf32>
    %704 = arith.divf %702, %703 : vector<8x128xf32>
    %705 = vector.extract_strided_slice %692 {offsets = [0, 256], sizes = [8, 128], strides = [1, 1]} : vector<8x512xf32> to vector<8x128xf32>
    %706 = math.tanh %705 : vector<8x128xf32>
    %707 = vector.extract_strided_slice %692 {offsets = [0, 384], sizes = [8, 128], strides = [1, 1]} : vector<8x512xf32> to vector<8x128xf32>
    %708 = arith.negf %707 : vector<8x128xf32>
    %709 = math.exp %708 : vector<8x128xf32>
    %cst_304 = arith.constant 1.000000e+00 : f32
    %710 = vector.broadcast %cst_304 : f32 to vector<8x128xf32>
    %711 = arith.addf %710, %709 : vector<8x128xf32>
    %712 = arith.divf %710, %711 : vector<8x128xf32>
    %713 = arith.mulf %704, %686 : vector<8x128xf32>
    %714 = arith.mulf %698, %706 : vector<8x128xf32>
    %715 = arith.addf %713, %714 : vector<8x128xf32>
    %716 = math.tanh %715 : vector<8x128xf32>
    %717 = arith.mulf %712, %716 : vector<8x128xf32>
    %718 = vector.broadcast %c6_i32_292 : i32 to vector<8x1xi32>
    %719 = arith.cmpi slt, %718, %0 : vector<8x1xi32>
    %720 = vector.shape_cast %719 : vector<8x1xi1> to vector<8x1xi1>
    %721 = vector.broadcast %720 : vector<8x1xi1> to vector<8x128xi1>
    %722 = arith.select %721, %717, %685 : vector<8x128xi1>, vector<8x128xf32>
    %723 = vector.shape_cast %719 : vector<8x1xi1> to vector<8x1xi1>
    %724 = vector.broadcast %723 : vector<8x1xi1> to vector<8x128xi1>
    %725 = arith.select %724, %715, %686 : vector<8x128xi1>, vector<8x128xf32>
    %c0_305 = arith.constant 0 : index
    %c0_306 = arith.constant 0 : index
    %726 = vector.load %arg16[%c0_305, %c0_306] : memref<8x128xf32, #tpu.memory_space<vmem>>, vector<8x128xf32>
    tpu.vector_store %arg16[%c0_305, %c0_306], %722 {strides = array<i32>} : memref<8x128xf32, #tpu.memory_space<vmem>>, vector<8x128xf32>,
    %c0_307 = arith.constant 0 : index
    %c0_308 = arith.constant 0 : index
    %727 = vector.load %arg17[%c0_307, %c0_308] : memref<8x128xf32, #tpu.memory_space<vmem>>, vector<8x128xf32>
    tpu.vector_store %arg17[%c0_307, %c0_308], %725 {strides = array<i32>} : memref<8x128xf32, #tpu.memory_space<vmem>>, vector<8x128xf32>,
    %728 = arith.index_cast %c6_i32_292 : i32 to index
    %c0_309 = arith.constant 0 : index
    %c0_310 = arith.constant 0 : index
    %729 = vector.load %arg14[%728, %c0_309, %c0_310] : memref<8x8x128xf32, #tpu.memory_space<vmem>>, vector<1x8x128xf32>
    %730 = vector.shape_cast %729 : vector<1x8x128xf32> to vector<8x128xf32>
    %731 = vector.shape_cast %722 : vector<8x128xf32> to vector<1x8x128xf32>
    tpu.vector_store %arg14[%728, %c0_309, %c0_310], %731 {strides = array<i32>} : memref<8x8x128xf32, #tpu.memory_space<vmem>>, vector<1x8x128xf32>,
    %c7_i32_311 = arith.constant 7 : i32
    %c0_312 = arith.constant 0 : index
    %c0_313 = arith.constant 0 : index
    %732 = vector.load %arg16[%c0_312, %c0_313] : memref<8x128xf32, #tpu.memory_space<vmem>>, vector<8x128xf32>
    %c0_314 = arith.constant 0 : index
    %c0_315 = arith.constant 0 : index
    %733 = vector.load %arg17[%c0_314, %c0_315] : memref<8x128xf32, #tpu.memory_space<vmem>>, vector<8x128xf32>
    %734 = arith.index_cast %c7_i32_311 : i32 to index
    %c0_316 = arith.constant 0 : index
    %c0_317 = arith.constant 0 : index
    %735 = vector.load %arg15[%734, %c0_316, %c0_317] : memref<8x8x512xf32, #tpu.memory_space<vmem>>, vector<1x8x512xf32>
    %736 = vector.shape_cast %735 : vector<1x8x512xf32> to vector<8x512xf32>
    %c0_318 = arith.constant 0 : index
    %c0_319 = arith.constant 0 : index
    %737 = vector.load %arg6[%c0_318, %c0_319] : memref<128x512xf32, #tpu.memory_space<vmem>>, vector<128x512xf32>
    %cst_320 = arith.constant dense<0.000000e+00> : vector<8x512xf32>
    %738 = tpu.matmul %732, %737, %cst_320 {dimension_numbers = #tpu.dot_dimension_numbers<[1], [0], [0], [1], [0, 0, 1, 1], [], []>} : vector<8x128xf32>, vector<128x512xf32>, vector<8x512xf32> -> vector<8x512xf32>
    %739 = arith.addf %736, %738 : vector<8x512xf32>
    %740 = vector.extract_strided_slice %739 {offsets = [0, 0], sizes = [8, 128], strides = [1, 1]} : vector<8x512xf32> to vector<8x128xf32>
    %741 = arith.negf %740 : vector<8x128xf32>
    %742 = math.exp %741 : vector<8x128xf32>
    %cst_321 = arith.constant 1.000000e+00 : f32
    %743 = vector.broadcast %cst_321 : f32 to vector<8x128xf32>
    %744 = arith.addf %743, %742 : vector<8x128xf32>
    %745 = arith.divf %743, %744 : vector<8x128xf32>
    %746 = vector.extract_strided_slice %739 {offsets = [0, 128], sizes = [8, 128], strides = [1, 1]} : vector<8x512xf32> to vector<8x128xf32>
    %747 = arith.negf %746 : vector<8x128xf32>
    %748 = math.exp %747 : vector<8x128xf32>
    %cst_322 = arith.constant 1.000000e+00 : f32
    %749 = vector.broadcast %cst_322 : f32 to vector<8x128xf32>
    %750 = arith.addf %749, %748 : vector<8x128xf32>
    %751 = arith.divf %749, %750 : vector<8x128xf32>
    %752 = vector.extract_strided_slice %739 {offsets = [0, 256], sizes = [8, 128], strides = [1, 1]} : vector<8x512xf32> to vector<8x128xf32>
    %753 = math.tanh %752 : vector<8x128xf32>
    %754 = vector.extract_strided_slice %739 {offsets = [0, 384], sizes = [8, 128], strides = [1, 1]} : vector<8x512xf32> to vector<8x128xf32>
    %755 = arith.negf %754 : vector<8x128xf32>
    %756 = math.exp %755 : vector<8x128xf32>
    %cst_323 = arith.constant 1.000000e+00 : f32
    %757 = vector.broadcast %cst_323 : f32 to vector<8x128xf32>
    %758 = arith.addf %757, %756 : vector<8x128xf32>
    %759 = arith.divf %757, %758 : vector<8x128xf32>
    %760 = arith.mulf %751, %733 : vector<8x128xf32>
    %761 = arith.mulf %745, %753 : vector<8x128xf32>
    %762 = arith.addf %760, %761 : vector<8x128xf32>
    %763 = math.tanh %762 : vector<8x128xf32>
    %764 = arith.mulf %759, %763 : vector<8x128xf32>
    %765 = vector.broadcast %c7_i32_311 : i32 to vector<8x1xi32>
    %766 = arith.cmpi slt, %765, %0 : vector<8x1xi32>
    %767 = vector.shape_cast %766 : vector<8x1xi1> to vector<8x1xi1>
    %768 = vector.broadcast %767 : vector<8x1xi1> to vector<8x128xi1>
    %769 = arith.select %768, %764, %732 : vector<8x128xi1>, vector<8x128xf32>
    %770 = vector.shape_cast %766 : vector<8x1xi1> to vector<8x1xi1>
    %771 = vector.broadcast %770 : vector<8x1xi1> to vector<8x128xi1>
    %772 = arith.select %771, %762, %733 : vector<8x128xi1>, vector<8x128xf32>
    %c0_324 = arith.constant 0 : index
    %c0_325 = arith.constant 0 : index
    %773 = vector.load %arg16[%c0_324, %c0_325] : memref<8x128xf32, #tpu.memory_space<vmem>>, vector<8x128xf32>
    tpu.vector_store %arg16[%c0_324, %c0_325], %769 {strides = array<i32>} : memref<8x128xf32, #tpu.memory_space<vmem>>, vector<8x128xf32>,
    %c0_326 = arith.constant 0 : index
    %c0_327 = arith.constant 0 : index
    %774 = vector.load %arg17[%c0_326, %c0_327] : memref<8x128xf32, #tpu.memory_space<vmem>>, vector<8x128xf32>
    tpu.vector_store %arg17[%c0_326, %c0_327], %772 {strides = array<i32>} : memref<8x128xf32, #tpu.memory_space<vmem>>, vector<8x128xf32>,
    %775 = arith.index_cast %c7_i32_311 : i32 to index
    %c0_328 = arith.constant 0 : index
    %c0_329 = arith.constant 0 : index
    %776 = vector.load %arg14[%775, %c0_328, %c0_329] : memref<8x8x128xf32, #tpu.memory_space<vmem>>, vector<1x8x128xf32>
    %777 = vector.shape_cast %776 : vector<1x8x128xf32> to vector<8x128xf32>
    %778 = vector.shape_cast %769 : vector<8x128xf32> to vector<1x8x128xf32>
    tpu.vector_store %arg14[%775, %c0_328, %c0_329], %778 {strides = array<i32>} : memref<8x8x128xf32, #tpu.memory_space<vmem>>, vector<1x8x128xf32>,
    %c8_i32_330 = arith.constant 8 : i32
    %c0_331 = arith.constant 0 : index
    %c0_332 = arith.constant 0 : index
    %c0_333 = arith.constant 0 : index
    %779 = vector.load %arg14[%c0_331, %c0_332, %c0_333] : memref<8x8x128xf32, #tpu.memory_space<vmem>>, vector<8x8x128xf32>
    %780 = vector.shape_cast %779 : vector<8x8x128xf32> to vector<64x128xf32>
    %c0_334 = arith.constant 0 : index
    %c0_335 = arith.constant 0 : index
    %781 = vector.load %arg8[%c0_334, %c0_335] : memref<128x512xf32, #tpu.memory_space<vmem>>, vector<128x512xf32>
    %cst_336 = arith.constant dense<0.000000e+00> : vector<64x512xf32>
    %782 = tpu.matmul %780, %781, %cst_336 {dimension_numbers = #tpu.dot_dimension_numbers<[1], [0], [0], [1], [0, 0, 1, 1], [], []>} : vector<64x128xf32>, vector<128x512xf32>, vector<64x512xf32> -> vector<64x512xf32>
    %c0_337 = arith.constant 0 : index
    %c0_338 = arith.constant 0 : index
    %783 = vector.load %arg10[%c0_337, %c0_338] : memref<1x512xf32, #tpu.memory_space<vmem>>, vector<1x512xf32>
    %784 = vector.broadcast %783 : vector<1x512xf32> to vector<64x512xf32>
    %785 = arith.addf %782, %784 : vector<64x512xf32>
    %786 = vector.shape_cast %785 : vector<64x512xf32> to vector<8x8x512xf32>
    %c0_339 = arith.constant 0 : index
    %c0_340 = arith.constant 0 : index
    %c0_341 = arith.constant 0 : index
    %787 = vector.load %arg15[%c0_339, %c0_340, %c0_341] : memref<8x8x512xf32, #tpu.memory_space<vmem>>, vector<8x8x512xf32>
    tpu.vector_store %arg15[%c0_339, %c0_340, %c0_341], %786 {strides = array<i32>} : memref<8x8x512xf32, #tpu.memory_space<vmem>>, vector<8x8x512xf32>,
    %cst_342 = arith.constant 0.000000e+00 : f32
    %788 = vector.broadcast %cst_342 : f32 to vector<8x128xf32>
    %c0_343 = arith.constant 0 : index
    %c0_344 = arith.constant 0 : index
    %789 = vector.load %arg16[%c0_343, %c0_344] : memref<8x128xf32, #tpu.memory_space<vmem>>, vector<8x128xf32>
    tpu.vector_store %arg16[%c0_343, %c0_344], %788 {strides = array<i32>} : memref<8x128xf32, #tpu.memory_space<vmem>>, vector<8x128xf32>,
    %cst_345 = arith.constant 0.000000e+00 : f32
    %790 = vector.broadcast %cst_345 : f32 to vector<8x128xf32>
    %c0_346 = arith.constant 0 : index
    %c0_347 = arith.constant 0 : index
    %791 = vector.load %arg17[%c0_346, %c0_347] : memref<8x128xf32, #tpu.memory_space<vmem>>, vector<8x128xf32>
    tpu.vector_store %arg17[%c0_346, %c0_347], %790 {strides = array<i32>} : memref<8x128xf32, #tpu.memory_space<vmem>>, vector<8x128xf32>,
    %c0_i32_348 = arith.constant 0 : i32
    %c0_349 = arith.constant 0 : index
    %c0_350 = arith.constant 0 : index
    %792 = vector.load %arg16[%c0_349, %c0_350] : memref<8x128xf32, #tpu.memory_space<vmem>>, vector<8x128xf32>
    %c0_351 = arith.constant 0 : index
    %c0_352 = arith.constant 0 : index
    %793 = vector.load %arg17[%c0_351, %c0_352] : memref<8x128xf32, #tpu.memory_space<vmem>>, vector<8x128xf32>
    %794 = arith.index_cast %c0_i32_348 : i32 to index
    %c0_353 = arith.constant 0 : index
    %c0_354 = arith.constant 0 : index
    %795 = vector.load %arg15[%794, %c0_353, %c0_354] : memref<8x8x512xf32, #tpu.memory_space<vmem>>, vector<1x8x512xf32>
    %796 = vector.shape_cast %795 : vector<1x8x512xf32> to vector<8x512xf32>
    %c0_355 = arith.constant 0 : index
    %c0_356 = arith.constant 0 : index
    %797 = vector.load %arg9[%c0_355, %c0_356] : memref<128x512xf32, #tpu.memory_space<vmem>>, vector<128x512xf32>
    %cst_357 = arith.constant dense<0.000000e+00> : vector<8x512xf32>
    %798 = tpu.matmul %792, %797, %cst_357 {dimension_numbers = #tpu.dot_dimension_numbers<[1], [0], [0], [1], [0, 0, 1, 1], [], []>} : vector<8x128xf32>, vector<128x512xf32>, vector<8x512xf32> -> vector<8x512xf32>
    %799 = arith.addf %796, %798 : vector<8x512xf32>
    %800 = vector.extract_strided_slice %799 {offsets = [0, 0], sizes = [8, 128], strides = [1, 1]} : vector<8x512xf32> to vector<8x128xf32>
    %801 = arith.negf %800 : vector<8x128xf32>
    %802 = math.exp %801 : vector<8x128xf32>
    %cst_358 = arith.constant 1.000000e+00 : f32
    %803 = vector.broadcast %cst_358 : f32 to vector<8x128xf32>
    %804 = arith.addf %803, %802 : vector<8x128xf32>
    %805 = arith.divf %803, %804 : vector<8x128xf32>
    %806 = vector.extract_strided_slice %799 {offsets = [0, 128], sizes = [8, 128], strides = [1, 1]} : vector<8x512xf32> to vector<8x128xf32>
    %807 = arith.negf %806 : vector<8x128xf32>
    %808 = math.exp %807 : vector<8x128xf32>
    %cst_359 = arith.constant 1.000000e+00 : f32
    %809 = vector.broadcast %cst_359 : f32 to vector<8x128xf32>
    %810 = arith.addf %809, %808 : vector<8x128xf32>
    %811 = arith.divf %809, %810 : vector<8x128xf32>
    %812 = vector.extract_strided_slice %799 {offsets = [0, 256], sizes = [8, 128], strides = [1, 1]} : vector<8x512xf32> to vector<8x128xf32>
    %813 = math.tanh %812 : vector<8x128xf32>
    %814 = vector.extract_strided_slice %799 {offsets = [0, 384], sizes = [8, 128], strides = [1, 1]} : vector<8x512xf32> to vector<8x128xf32>
    %815 = arith.negf %814 : vector<8x128xf32>
    %816 = math.exp %815 : vector<8x128xf32>
    %cst_360 = arith.constant 1.000000e+00 : f32
    %817 = vector.broadcast %cst_360 : f32 to vector<8x128xf32>
    %818 = arith.addf %817, %816 : vector<8x128xf32>
    %819 = arith.divf %817, %818 : vector<8x128xf32>
    %820 = arith.mulf %811, %793 : vector<8x128xf32>
    %821 = arith.mulf %805, %813 : vector<8x128xf32>
    %822 = arith.addf %820, %821 : vector<8x128xf32>
    %823 = math.tanh %822 : vector<8x128xf32>
    %824 = arith.mulf %819, %823 : vector<8x128xf32>
    %825 = vector.broadcast %c0_i32_348 : i32 to vector<8x1xi32>
    %826 = arith.cmpi slt, %825, %0 : vector<8x1xi32>
    %827 = vector.shape_cast %826 : vector<8x1xi1> to vector<8x1xi1>
    %828 = vector.broadcast %827 : vector<8x1xi1> to vector<8x128xi1>
    %829 = arith.select %828, %824, %792 : vector<8x128xi1>, vector<8x128xf32>
    %830 = vector.shape_cast %826 : vector<8x1xi1> to vector<8x1xi1>
    %831 = vector.broadcast %830 : vector<8x1xi1> to vector<8x128xi1>
    %832 = arith.select %831, %822, %793 : vector<8x128xi1>, vector<8x128xf32>
    %c0_361 = arith.constant 0 : index
    %c0_362 = arith.constant 0 : index
    %833 = vector.load %arg16[%c0_361, %c0_362] : memref<8x128xf32, #tpu.memory_space<vmem>>, vector<8x128xf32>
    tpu.vector_store %arg16[%c0_361, %c0_362], %829 {strides = array<i32>} : memref<8x128xf32, #tpu.memory_space<vmem>>, vector<8x128xf32>,
    %c0_363 = arith.constant 0 : index
    %c0_364 = arith.constant 0 : index
    %834 = vector.load %arg17[%c0_363, %c0_364] : memref<8x128xf32, #tpu.memory_space<vmem>>, vector<8x128xf32>
    tpu.vector_store %arg17[%c0_363, %c0_364], %832 {strides = array<i32>} : memref<8x128xf32, #tpu.memory_space<vmem>>, vector<8x128xf32>,
    %835 = arith.index_cast %c0_i32_348 : i32 to index
    %c0_365 = arith.constant 0 : index
    %c0_366 = arith.constant 0 : index
    %836 = vector.load %arg14[%835, %c0_365, %c0_366] : memref<8x8x128xf32, #tpu.memory_space<vmem>>, vector<1x8x128xf32>
    %837 = vector.shape_cast %836 : vector<1x8x128xf32> to vector<8x128xf32>
    %838 = vector.shape_cast %829 : vector<8x128xf32> to vector<1x8x128xf32>
    tpu.vector_store %arg14[%835, %c0_365, %c0_366], %838 {strides = array<i32>} : memref<8x8x128xf32, #tpu.memory_space<vmem>>, vector<1x8x128xf32>,
    %c1_i32_367 = arith.constant 1 : i32
    %c0_368 = arith.constant 0 : index
    %c0_369 = arith.constant 0 : index
    %839 = vector.load %arg16[%c0_368, %c0_369] : memref<8x128xf32, #tpu.memory_space<vmem>>, vector<8x128xf32>
    %c0_370 = arith.constant 0 : index
    %c0_371 = arith.constant 0 : index
    %840 = vector.load %arg17[%c0_370, %c0_371] : memref<8x128xf32, #tpu.memory_space<vmem>>, vector<8x128xf32>
    %841 = arith.index_cast %c1_i32_367 : i32 to index
    %c0_372 = arith.constant 0 : index
    %c0_373 = arith.constant 0 : index
    %842 = vector.load %arg15[%841, %c0_372, %c0_373] : memref<8x8x512xf32, #tpu.memory_space<vmem>>, vector<1x8x512xf32>
    %843 = vector.shape_cast %842 : vector<1x8x512xf32> to vector<8x512xf32>
    %c0_374 = arith.constant 0 : index
    %c0_375 = arith.constant 0 : index
    %844 = vector.load %arg9[%c0_374, %c0_375] : memref<128x512xf32, #tpu.memory_space<vmem>>, vector<128x512xf32>
    %cst_376 = arith.constant dense<0.000000e+00> : vector<8x512xf32>
    %845 = tpu.matmul %839, %844, %cst_376 {dimension_numbers = #tpu.dot_dimension_numbers<[1], [0], [0], [1], [0, 0, 1, 1], [], []>} : vector<8x128xf32>, vector<128x512xf32>, vector<8x512xf32> -> vector<8x512xf32>
    %846 = arith.addf %843, %845 : vector<8x512xf32>
    %847 = vector.extract_strided_slice %846 {offsets = [0, 0], sizes = [8, 128], strides = [1, 1]} : vector<8x512xf32> to vector<8x128xf32>
    %848 = arith.negf %847 : vector<8x128xf32>
    %849 = math.exp %848 : vector<8x128xf32>
    %cst_377 = arith.constant 1.000000e+00 : f32
    %850 = vector.broadcast %cst_377 : f32 to vector<8x128xf32>
    %851 = arith.addf %850, %849 : vector<8x128xf32>
    %852 = arith.divf %850, %851 : vector<8x128xf32>
    %853 = vector.extract_strided_slice %846 {offsets = [0, 128], sizes = [8, 128], strides = [1, 1]} : vector<8x512xf32> to vector<8x128xf32>
    %854 = arith.negf %853 : vector<8x128xf32>
    %855 = math.exp %854 : vector<8x128xf32>
    %cst_378 = arith.constant 1.000000e+00 : f32
    %856 = vector.broadcast %cst_378 : f32 to vector<8x128xf32>
    %857 = arith.addf %856, %855 : vector<8x128xf32>
    %858 = arith.divf %856, %857 : vector<8x128xf32>
    %859 = vector.extract_strided_slice %846 {offsets = [0, 256], sizes = [8, 128], strides = [1, 1]} : vector<8x512xf32> to vector<8x128xf32>
    %860 = math.tanh %859 : vector<8x128xf32>
    %861 = vector.extract_strided_slice %846 {offsets = [0, 384], sizes = [8, 128], strides = [1, 1]} : vector<8x512xf32> to vector<8x128xf32>
    %862 = arith.negf %861 : vector<8x128xf32>
    %863 = math.exp %862 : vector<8x128xf32>
    %cst_379 = arith.constant 1.000000e+00 : f32
    %864 = vector.broadcast %cst_379 : f32 to vector<8x128xf32>
    %865 = arith.addf %864, %863 : vector<8x128xf32>
    %866 = arith.divf %864, %865 : vector<8x128xf32>
    %867 = arith.mulf %858, %840 : vector<8x128xf32>
    %868 = arith.mulf %852, %860 : vector<8x128xf32>
    %869 = arith.addf %867, %868 : vector<8x128xf32>
    %870 = math.tanh %869 : vector<8x128xf32>
    %871 = arith.mulf %866, %870 : vector<8x128xf32>
    %872 = vector.broadcast %c1_i32_367 : i32 to vector<8x1xi32>
    %873 = arith.cmpi slt, %872, %0 : vector<8x1xi32>
    %874 = vector.shape_cast %873 : vector<8x1xi1> to vector<8x1xi1>
    %875 = vector.broadcast %874 : vector<8x1xi1> to vector<8x128xi1>
    %876 = arith.select %875, %871, %839 : vector<8x128xi1>, vector<8x128xf32>
    %877 = vector.shape_cast %873 : vector<8x1xi1> to vector<8x1xi1>
    %878 = vector.broadcast %877 : vector<8x1xi1> to vector<8x128xi1>
    %879 = arith.select %878, %869, %840 : vector<8x128xi1>, vector<8x128xf32>
    %c0_380 = arith.constant 0 : index
    %c0_381 = arith.constant 0 : index
    %880 = vector.load %arg16[%c0_380, %c0_381] : memref<8x128xf32, #tpu.memory_space<vmem>>, vector<8x128xf32>
    tpu.vector_store %arg16[%c0_380, %c0_381], %876 {strides = array<i32>} : memref<8x128xf32, #tpu.memory_space<vmem>>, vector<8x128xf32>,
    %c0_382 = arith.constant 0 : index
    %c0_383 = arith.constant 0 : index
    %881 = vector.load %arg17[%c0_382, %c0_383] : memref<8x128xf32, #tpu.memory_space<vmem>>, vector<8x128xf32>
    tpu.vector_store %arg17[%c0_382, %c0_383], %879 {strides = array<i32>} : memref<8x128xf32, #tpu.memory_space<vmem>>, vector<8x128xf32>,
    %882 = arith.index_cast %c1_i32_367 : i32 to index
    %c0_384 = arith.constant 0 : index
    %c0_385 = arith.constant 0 : index
    %883 = vector.load %arg14[%882, %c0_384, %c0_385] : memref<8x8x128xf32, #tpu.memory_space<vmem>>, vector<1x8x128xf32>
    %884 = vector.shape_cast %883 : vector<1x8x128xf32> to vector<8x128xf32>
    %885 = vector.shape_cast %876 : vector<8x128xf32> to vector<1x8x128xf32>
    tpu.vector_store %arg14[%882, %c0_384, %c0_385], %885 {strides = array<i32>} : memref<8x8x128xf32, #tpu.memory_space<vmem>>, vector<1x8x128xf32>,
    %c2_i32_386 = arith.constant 2 : i32
    %c0_387 = arith.constant 0 : index
    %c0_388 = arith.constant 0 : index
    %886 = vector.load %arg16[%c0_387, %c0_388] : memref<8x128xf32, #tpu.memory_space<vmem>>, vector<8x128xf32>
    %c0_389 = arith.constant 0 : index
    %c0_390 = arith.constant 0 : index
    %887 = vector.load %arg17[%c0_389, %c0_390] : memref<8x128xf32, #tpu.memory_space<vmem>>, vector<8x128xf32>
    %888 = arith.index_cast %c2_i32_386 : i32 to index
    %c0_391 = arith.constant 0 : index
    %c0_392 = arith.constant 0 : index
    %889 = vector.load %arg15[%888, %c0_391, %c0_392] : memref<8x8x512xf32, #tpu.memory_space<vmem>>, vector<1x8x512xf32>
    %890 = vector.shape_cast %889 : vector<1x8x512xf32> to vector<8x512xf32>
    %c0_393 = arith.constant 0 : index
    %c0_394 = arith.constant 0 : index
    %891 = vector.load %arg9[%c0_393, %c0_394] : memref<128x512xf32, #tpu.memory_space<vmem>>, vector<128x512xf32>
    %cst_395 = arith.constant dense<0.000000e+00> : vector<8x512xf32>
    %892 = tpu.matmul %886, %891, %cst_395 {dimension_numbers = #tpu.dot_dimension_numbers<[1], [0], [0], [1], [0, 0, 1, 1], [], []>} : vector<8x128xf32>, vector<128x512xf32>, vector<8x512xf32> -> vector<8x512xf32>
    %893 = arith.addf %890, %892 : vector<8x512xf32>
    %894 = vector.extract_strided_slice %893 {offsets = [0, 0], sizes = [8, 128], strides = [1, 1]} : vector<8x512xf32> to vector<8x128xf32>
    %895 = arith.negf %894 : vector<8x128xf32>
    %896 = math.exp %895 : vector<8x128xf32>
    %cst_396 = arith.constant 1.000000e+00 : f32
    %897 = vector.broadcast %cst_396 : f32 to vector<8x128xf32>
    %898 = arith.addf %897, %896 : vector<8x128xf32>
    %899 = arith.divf %897, %898 : vector<8x128xf32>
    %900 = vector.extract_strided_slice %893 {offsets = [0, 128], sizes = [8, 128], strides = [1, 1]} : vector<8x512xf32> to vector<8x128xf32>
    %901 = arith.negf %900 : vector<8x128xf32>
    %902 = math.exp %901 : vector<8x128xf32>
    %cst_397 = arith.constant 1.000000e+00 : f32
    %903 = vector.broadcast %cst_397 : f32 to vector<8x128xf32>
    %904 = arith.addf %903, %902 : vector<8x128xf32>
    %905 = arith.divf %903, %904 : vector<8x128xf32>
    %906 = vector.extract_strided_slice %893 {offsets = [0, 256], sizes = [8, 128], strides = [1, 1]} : vector<8x512xf32> to vector<8x128xf32>
    %907 = math.tanh %906 : vector<8x128xf32>
    %908 = vector.extract_strided_slice %893 {offsets = [0, 384], sizes = [8, 128], strides = [1, 1]} : vector<8x512xf32> to vector<8x128xf32>
    %909 = arith.negf %908 : vector<8x128xf32>
    %910 = math.exp %909 : vector<8x128xf32>
    %cst_398 = arith.constant 1.000000e+00 : f32
    %911 = vector.broadcast %cst_398 : f32 to vector<8x128xf32>
    %912 = arith.addf %911, %910 : vector<8x128xf32>
    %913 = arith.divf %911, %912 : vector<8x128xf32>
    %914 = arith.mulf %905, %887 : vector<8x128xf32>
    %915 = arith.mulf %899, %907 : vector<8x128xf32>
    %916 = arith.addf %914, %915 : vector<8x128xf32>
    %917 = math.tanh %916 : vector<8x128xf32>
    %918 = arith.mulf %913, %917 : vector<8x128xf32>
    %919 = vector.broadcast %c2_i32_386 : i32 to vector<8x1xi32>
    %920 = arith.cmpi slt, %919, %0 : vector<8x1xi32>
    %921 = vector.shape_cast %920 : vector<8x1xi1> to vector<8x1xi1>
    %922 = vector.broadcast %921 : vector<8x1xi1> to vector<8x128xi1>
    %923 = arith.select %922, %918, %886 : vector<8x128xi1>, vector<8x128xf32>
    %924 = vector.shape_cast %920 : vector<8x1xi1> to vector<8x1xi1>
    %925 = vector.broadcast %924 : vector<8x1xi1> to vector<8x128xi1>
    %926 = arith.select %925, %916, %887 : vector<8x128xi1>, vector<8x128xf32>
    %c0_399 = arith.constant 0 : index
    %c0_400 = arith.constant 0 : index
    %927 = vector.load %arg16[%c0_399, %c0_400] : memref<8x128xf32, #tpu.memory_space<vmem>>, vector<8x128xf32>
    tpu.vector_store %arg16[%c0_399, %c0_400], %923 {strides = array<i32>} : memref<8x128xf32, #tpu.memory_space<vmem>>, vector<8x128xf32>,
    %c0_401 = arith.constant 0 : index
    %c0_402 = arith.constant 0 : index
    %928 = vector.load %arg17[%c0_401, %c0_402] : memref<8x128xf32, #tpu.memory_space<vmem>>, vector<8x128xf32>
    tpu.vector_store %arg17[%c0_401, %c0_402], %926 {strides = array<i32>} : memref<8x128xf32, #tpu.memory_space<vmem>>, vector<8x128xf32>,
    %929 = arith.index_cast %c2_i32_386 : i32 to index
    %c0_403 = arith.constant 0 : index
    %c0_404 = arith.constant 0 : index
    %930 = vector.load %arg14[%929, %c0_403, %c0_404] : memref<8x8x128xf32, #tpu.memory_space<vmem>>, vector<1x8x128xf32>
    %931 = vector.shape_cast %930 : vector<1x8x128xf32> to vector<8x128xf32>
    %932 = vector.shape_cast %923 : vector<8x128xf32> to vector<1x8x128xf32>
    tpu.vector_store %arg14[%929, %c0_403, %c0_404], %932 {strides = array<i32>} : memref<8x8x128xf32, #tpu.memory_space<vmem>>, vector<1x8x128xf32>,
    %c3_i32_405 = arith.constant 3 : i32
    %c0_406 = arith.constant 0 : index
    %c0_407 = arith.constant 0 : index
    %933 = vector.load %arg16[%c0_406, %c0_407] : memref<8x128xf32, #tpu.memory_space<vmem>>, vector<8x128xf32>
    %c0_408 = arith.constant 0 : index
    %c0_409 = arith.constant 0 : index
    %934 = vector.load %arg17[%c0_408, %c0_409] : memref<8x128xf32, #tpu.memory_space<vmem>>, vector<8x128xf32>
    %935 = arith.index_cast %c3_i32_405 : i32 to index
    %c0_410 = arith.constant 0 : index
    %c0_411 = arith.constant 0 : index
    %936 = vector.load %arg15[%935, %c0_410, %c0_411] : memref<8x8x512xf32, #tpu.memory_space<vmem>>, vector<1x8x512xf32>
    %937 = vector.shape_cast %936 : vector<1x8x512xf32> to vector<8x512xf32>
    %c0_412 = arith.constant 0 : index
    %c0_413 = arith.constant 0 : index
    %938 = vector.load %arg9[%c0_412, %c0_413] : memref<128x512xf32, #tpu.memory_space<vmem>>, vector<128x512xf32>
    %cst_414 = arith.constant dense<0.000000e+00> : vector<8x512xf32>
    %939 = tpu.matmul %933, %938, %cst_414 {dimension_numbers = #tpu.dot_dimension_numbers<[1], [0], [0], [1], [0, 0, 1, 1], [], []>} : vector<8x128xf32>, vector<128x512xf32>, vector<8x512xf32> -> vector<8x512xf32>
    %940 = arith.addf %937, %939 : vector<8x512xf32>
    %941 = vector.extract_strided_slice %940 {offsets = [0, 0], sizes = [8, 128], strides = [1, 1]} : vector<8x512xf32> to vector<8x128xf32>
    %942 = arith.negf %941 : vector<8x128xf32>
    %943 = math.exp %942 : vector<8x128xf32>
    %cst_415 = arith.constant 1.000000e+00 : f32
    %944 = vector.broadcast %cst_415 : f32 to vector<8x128xf32>
    %945 = arith.addf %944, %943 : vector<8x128xf32>
    %946 = arith.divf %944, %945 : vector<8x128xf32>
    %947 = vector.extract_strided_slice %940 {offsets = [0, 128], sizes = [8, 128], strides = [1, 1]} : vector<8x512xf32> to vector<8x128xf32>
    %948 = arith.negf %947 : vector<8x128xf32>
    %949 = math.exp %948 : vector<8x128xf32>
    %cst_416 = arith.constant 1.000000e+00 : f32
    %950 = vector.broadcast %cst_416 : f32 to vector<8x128xf32>
    %951 = arith.addf %950, %949 : vector<8x128xf32>
    %952 = arith.divf %950, %951 : vector<8x128xf32>
    %953 = vector.extract_strided_slice %940 {offsets = [0, 256], sizes = [8, 128], strides = [1, 1]} : vector<8x512xf32> to vector<8x128xf32>
    %954 = math.tanh %953 : vector<8x128xf32>
    %955 = vector.extract_strided_slice %940 {offsets = [0, 384], sizes = [8, 128], strides = [1, 1]} : vector<8x512xf32> to vector<8x128xf32>
    %956 = arith.negf %955 : vector<8x128xf32>
    %957 = math.exp %956 : vector<8x128xf32>
    %cst_417 = arith.constant 1.000000e+00 : f32
    %958 = vector.broadcast %cst_417 : f32 to vector<8x128xf32>
    %959 = arith.addf %958, %957 : vector<8x128xf32>
    %960 = arith.divf %958, %959 : vector<8x128xf32>
    %961 = arith.mulf %952, %934 : vector<8x128xf32>
    %962 = arith.mulf %946, %954 : vector<8x128xf32>
    %963 = arith.addf %961, %962 : vector<8x128xf32>
    %964 = math.tanh %963 : vector<8x128xf32>
    %965 = arith.mulf %960, %964 : vector<8x128xf32>
    %966 = vector.broadcast %c3_i32_405 : i32 to vector<8x1xi32>
    %967 = arith.cmpi slt, %966, %0 : vector<8x1xi32>
    %968 = vector.shape_cast %967 : vector<8x1xi1> to vector<8x1xi1>
    %969 = vector.broadcast %968 : vector<8x1xi1> to vector<8x128xi1>
    %970 = arith.select %969, %965, %933 : vector<8x128xi1>, vector<8x128xf32>
    %971 = vector.shape_cast %967 : vector<8x1xi1> to vector<8x1xi1>
    %972 = vector.broadcast %971 : vector<8x1xi1> to vector<8x128xi1>
    %973 = arith.select %972, %963, %934 : vector<8x128xi1>, vector<8x128xf32>
    %c0_418 = arith.constant 0 : index
    %c0_419 = arith.constant 0 : index
    %974 = vector.load %arg16[%c0_418, %c0_419] : memref<8x128xf32, #tpu.memory_space<vmem>>, vector<8x128xf32>
    tpu.vector_store %arg16[%c0_418, %c0_419], %970 {strides = array<i32>} : memref<8x128xf32, #tpu.memory_space<vmem>>, vector<8x128xf32>,
    %c0_420 = arith.constant 0 : index
    %c0_421 = arith.constant 0 : index
    %975 = vector.load %arg17[%c0_420, %c0_421] : memref<8x128xf32, #tpu.memory_space<vmem>>, vector<8x128xf32>
    tpu.vector_store %arg17[%c0_420, %c0_421], %973 {strides = array<i32>} : memref<8x128xf32, #tpu.memory_space<vmem>>, vector<8x128xf32>,
    %976 = arith.index_cast %c3_i32_405 : i32 to index
    %c0_422 = arith.constant 0 : index
    %c0_423 = arith.constant 0 : index
    %977 = vector.load %arg14[%976, %c0_422, %c0_423] : memref<8x8x128xf32, #tpu.memory_space<vmem>>, vector<1x8x128xf32>
    %978 = vector.shape_cast %977 : vector<1x8x128xf32> to vector<8x128xf32>
    %979 = vector.shape_cast %970 : vector<8x128xf32> to vector<1x8x128xf32>
    tpu.vector_store %arg14[%976, %c0_422, %c0_423], %979 {strides = array<i32>} : memref<8x8x128xf32, #tpu.memory_space<vmem>>, vector<1x8x128xf32>,
    %c4_i32_424 = arith.constant 4 : i32
    %c0_425 = arith.constant 0 : index
    %c0_426 = arith.constant 0 : index
    %980 = vector.load %arg16[%c0_425, %c0_426] : memref<8x128xf32, #tpu.memory_space<vmem>>, vector<8x128xf32>
    %c0_427 = arith.constant 0 : index
    %c0_428 = arith.constant 0 : index
    %981 = vector.load %arg17[%c0_427, %c0_428] : memref<8x128xf32, #tpu.memory_space<vmem>>, vector<8x128xf32>
    %982 = arith.index_cast %c4_i32_424 : i32 to index
    %c0_429 = arith.constant 0 : index
    %c0_430 = arith.constant 0 : index
    %983 = vector.load %arg15[%982, %c0_429, %c0_430] : memref<8x8x512xf32, #tpu.memory_space<vmem>>, vector<1x8x512xf32>
    %984 = vector.shape_cast %983 : vector<1x8x512xf32> to vector<8x512xf32>
    %c0_431 = arith.constant 0 : index
    %c0_432 = arith.constant 0 : index
    %985 = vector.load %arg9[%c0_431, %c0_432] : memref<128x512xf32, #tpu.memory_space<vmem>>, vector<128x512xf32>
    %cst_433 = arith.constant dense<0.000000e+00> : vector<8x512xf32>
    %986 = tpu.matmul %980, %985, %cst_433 {dimension_numbers = #tpu.dot_dimension_numbers<[1], [0], [0], [1], [0, 0, 1, 1], [], []>} : vector<8x128xf32>, vector<128x512xf32>, vector<8x512xf32> -> vector<8x512xf32>
    %987 = arith.addf %984, %986 : vector<8x512xf32>
    %988 = vector.extract_strided_slice %987 {offsets = [0, 0], sizes = [8, 128], strides = [1, 1]} : vector<8x512xf32> to vector<8x128xf32>
    %989 = arith.negf %988 : vector<8x128xf32>
    %990 = math.exp %989 : vector<8x128xf32>
    %cst_434 = arith.constant 1.000000e+00 : f32
    %991 = vector.broadcast %cst_434 : f32 to vector<8x128xf32>
    %992 = arith.addf %991, %990 : vector<8x128xf32>
    %993 = arith.divf %991, %992 : vector<8x128xf32>
    %994 = vector.extract_strided_slice %987 {offsets = [0, 128], sizes = [8, 128], strides = [1, 1]} : vector<8x512xf32> to vector<8x128xf32>
    %995 = arith.negf %994 : vector<8x128xf32>
    %996 = math.exp %995 : vector<8x128xf32>
    %cst_435 = arith.constant 1.000000e+00 : f32
    %997 = vector.broadcast %cst_435 : f32 to vector<8x128xf32>
    %998 = arith.addf %997, %996 : vector<8x128xf32>
    %999 = arith.divf %997, %998 : vector<8x128xf32>
    %1000 = vector.extract_strided_slice %987 {offsets = [0, 256], sizes = [8, 128], strides = [1, 1]} : vector<8x512xf32> to vector<8x128xf32>
    %1001 = math.tanh %1000 : vector<8x128xf32>
    %1002 = vector.extract_strided_slice %987 {offsets = [0, 384], sizes = [8, 128], strides = [1, 1]} : vector<8x512xf32> to vector<8x128xf32>
    %1003 = arith.negf %1002 : vector<8x128xf32>
    %1004 = math.exp %1003 : vector<8x128xf32>
    %cst_436 = arith.constant 1.000000e+00 : f32
    %1005 = vector.broadcast %cst_436 : f32 to vector<8x128xf32>
    %1006 = arith.addf %1005, %1004 : vector<8x128xf32>
    %1007 = arith.divf %1005, %1006 : vector<8x128xf32>
    %1008 = arith.mulf %999, %981 : vector<8x128xf32>
    %1009 = arith.mulf %993, %1001 : vector<8x128xf32>
    %1010 = arith.addf %1008, %1009 : vector<8x128xf32>
    %1011 = math.tanh %1010 : vector<8x128xf32>
    %1012 = arith.mulf %1007, %1011 : vector<8x128xf32>
    %1013 = vector.broadcast %c4_i32_424 : i32 to vector<8x1xi32>
    %1014 = arith.cmpi slt, %1013, %0 : vector<8x1xi32>
    %1015 = vector.shape_cast %1014 : vector<8x1xi1> to vector<8x1xi1>
    %1016 = vector.broadcast %1015 : vector<8x1xi1> to vector<8x128xi1>
    %1017 = arith.select %1016, %1012, %980 : vector<8x128xi1>, vector<8x128xf32>
    %1018 = vector.shape_cast %1014 : vector<8x1xi1> to vector<8x1xi1>
    %1019 = vector.broadcast %1018 : vector<8x1xi1> to vector<8x128xi1>
    %1020 = arith.select %1019, %1010, %981 : vector<8x128xi1>, vector<8x128xf32>
    %c0_437 = arith.constant 0 : index
    %c0_438 = arith.constant 0 : index
    %1021 = vector.load %arg16[%c0_437, %c0_438] : memref<8x128xf32, #tpu.memory_space<vmem>>, vector<8x128xf32>
    tpu.vector_store %arg16[%c0_437, %c0_438], %1017 {strides = array<i32>} : memref<8x128xf32, #tpu.memory_space<vmem>>, vector<8x128xf32>,
    %c0_439 = arith.constant 0 : index
    %c0_440 = arith.constant 0 : index
    %1022 = vector.load %arg17[%c0_439, %c0_440] : memref<8x128xf32, #tpu.memory_space<vmem>>, vector<8x128xf32>
    tpu.vector_store %arg17[%c0_439, %c0_440], %1020 {strides = array<i32>} : memref<8x128xf32, #tpu.memory_space<vmem>>, vector<8x128xf32>,
    %1023 = arith.index_cast %c4_i32_424 : i32 to index
    %c0_441 = arith.constant 0 : index
    %c0_442 = arith.constant 0 : index
    %1024 = vector.load %arg14[%1023, %c0_441, %c0_442] : memref<8x8x128xf32, #tpu.memory_space<vmem>>, vector<1x8x128xf32>
    %1025 = vector.shape_cast %1024 : vector<1x8x128xf32> to vector<8x128xf32>
    %1026 = vector.shape_cast %1017 : vector<8x128xf32> to vector<1x8x128xf32>
    tpu.vector_store %arg14[%1023, %c0_441, %c0_442], %1026 {strides = array<i32>} : memref<8x8x128xf32, #tpu.memory_space<vmem>>, vector<1x8x128xf32>,
    %c5_i32_443 = arith.constant 5 : i32
    %c0_444 = arith.constant 0 : index
    %c0_445 = arith.constant 0 : index
    %1027 = vector.load %arg16[%c0_444, %c0_445] : memref<8x128xf32, #tpu.memory_space<vmem>>, vector<8x128xf32>
    %c0_446 = arith.constant 0 : index
    %c0_447 = arith.constant 0 : index
    %1028 = vector.load %arg17[%c0_446, %c0_447] : memref<8x128xf32, #tpu.memory_space<vmem>>, vector<8x128xf32>
    %1029 = arith.index_cast %c5_i32_443 : i32 to index
    %c0_448 = arith.constant 0 : index
    %c0_449 = arith.constant 0 : index
    %1030 = vector.load %arg15[%1029, %c0_448, %c0_449] : memref<8x8x512xf32, #tpu.memory_space<vmem>>, vector<1x8x512xf32>
    %1031 = vector.shape_cast %1030 : vector<1x8x512xf32> to vector<8x512xf32>
    %c0_450 = arith.constant 0 : index
    %c0_451 = arith.constant 0 : index
    %1032 = vector.load %arg9[%c0_450, %c0_451] : memref<128x512xf32, #tpu.memory_space<vmem>>, vector<128x512xf32>
    %cst_452 = arith.constant dense<0.000000e+00> : vector<8x512xf32>
    %1033 = tpu.matmul %1027, %1032, %cst_452 {dimension_numbers = #tpu.dot_dimension_numbers<[1], [0], [0], [1], [0, 0, 1, 1], [], []>} : vector<8x128xf32>, vector<128x512xf32>, vector<8x512xf32> -> vector<8x512xf32>
    %1034 = arith.addf %1031, %1033 : vector<8x512xf32>
    %1035 = vector.extract_strided_slice %1034 {offsets = [0, 0], sizes = [8, 128], strides = [1, 1]} : vector<8x512xf32> to vector<8x128xf32>
    %1036 = arith.negf %1035 : vector<8x128xf32>
    %1037 = math.exp %1036 : vector<8x128xf32>
    %cst_453 = arith.constant 1.000000e+00 : f32
    %1038 = vector.broadcast %cst_453 : f32 to vector<8x128xf32>
    %1039 = arith.addf %1038, %1037 : vector<8x128xf32>
    %1040 = arith.divf %1038, %1039 : vector<8x128xf32>
    %1041 = vector.extract_strided_slice %1034 {offsets = [0, 128], sizes = [8, 128], strides = [1, 1]} : vector<8x512xf32> to vector<8x128xf32>
    %1042 = arith.negf %1041 : vector<8x128xf32>
    %1043 = math.exp %1042 : vector<8x128xf32>
    %cst_454 = arith.constant 1.000000e+00 : f32
    %1044 = vector.broadcast %cst_454 : f32 to vector<8x128xf32>
    %1045 = arith.addf %1044, %1043 : vector<8x128xf32>
    %1046 = arith.divf %1044, %1045 : vector<8x128xf32>
    %1047 = vector.extract_strided_slice %1034 {offsets = [0, 256], sizes = [8, 128], strides = [1, 1]} : vector<8x512xf32> to vector<8x128xf32>
    %1048 = math.tanh %1047 : vector<8x128xf32>
    %1049 = vector.extract_strided_slice %1034 {offsets = [0, 384], sizes = [8, 128], strides = [1, 1]} : vector<8x512xf32> to vector<8x128xf32>
    %1050 = arith.negf %1049 : vector<8x128xf32>
    %1051 = math.exp %1050 : vector<8x128xf32>
    %cst_455 = arith.constant 1.000000e+00 : f32
    %1052 = vector.broadcast %cst_455 : f32 to vector<8x128xf32>
    %1053 = arith.addf %1052, %1051 : vector<8x128xf32>
    %1054 = arith.divf %1052, %1053 : vector<8x128xf32>
    %1055 = arith.mulf %1046, %1028 : vector<8x128xf32>
    %1056 = arith.mulf %1040, %1048 : vector<8x128xf32>
    %1057 = arith.addf %1055, %1056 : vector<8x128xf32>
    %1058 = math.tanh %1057 : vector<8x128xf32>
    %1059 = arith.mulf %1054, %1058 : vector<8x128xf32>
    %1060 = vector.broadcast %c5_i32_443 : i32 to vector<8x1xi32>
    %1061 = arith.cmpi slt, %1060, %0 : vector<8x1xi32>
    %1062 = vector.shape_cast %1061 : vector<8x1xi1> to vector<8x1xi1>
    %1063 = vector.broadcast %1062 : vector<8x1xi1> to vector<8x128xi1>
    %1064 = arith.select %1063, %1059, %1027 : vector<8x128xi1>, vector<8x128xf32>
    %1065 = vector.shape_cast %1061 : vector<8x1xi1> to vector<8x1xi1>
    %1066 = vector.broadcast %1065 : vector<8x1xi1> to vector<8x128xi1>
    %1067 = arith.select %1066, %1057, %1028 : vector<8x128xi1>, vector<8x128xf32>
    %c0_456 = arith.constant 0 : index
    %c0_457 = arith.constant 0 : index
    %1068 = vector.load %arg16[%c0_456, %c0_457] : memref<8x128xf32, #tpu.memory_space<vmem>>, vector<8x128xf32>
    tpu.vector_store %arg16[%c0_456, %c0_457], %1064 {strides = array<i32>} : memref<8x128xf32, #tpu.memory_space<vmem>>, vector<8x128xf32>,
    %c0_458 = arith.constant 0 : index
    %c0_459 = arith.constant 0 : index
    %1069 = vector.load %arg17[%c0_458, %c0_459] : memref<8x128xf32, #tpu.memory_space<vmem>>, vector<8x128xf32>
    tpu.vector_store %arg17[%c0_458, %c0_459], %1067 {strides = array<i32>} : memref<8x128xf32, #tpu.memory_space<vmem>>, vector<8x128xf32>,
    %1070 = arith.index_cast %c5_i32_443 : i32 to index
    %c0_460 = arith.constant 0 : index
    %c0_461 = arith.constant 0 : index
    %1071 = vector.load %arg14[%1070, %c0_460, %c0_461] : memref<8x8x128xf32, #tpu.memory_space<vmem>>, vector<1x8x128xf32>
    %1072 = vector.shape_cast %1071 : vector<1x8x128xf32> to vector<8x128xf32>
    %1073 = vector.shape_cast %1064 : vector<8x128xf32> to vector<1x8x128xf32>
    tpu.vector_store %arg14[%1070, %c0_460, %c0_461], %1073 {strides = array<i32>} : memref<8x8x128xf32, #tpu.memory_space<vmem>>, vector<1x8x128xf32>,
    %c6_i32_462 = arith.constant 6 : i32
    %c0_463 = arith.constant 0 : index
    %c0_464 = arith.constant 0 : index
    %1074 = vector.load %arg16[%c0_463, %c0_464] : memref<8x128xf32, #tpu.memory_space<vmem>>, vector<8x128xf32>
    %c0_465 = arith.constant 0 : index
    %c0_466 = arith.constant 0 : index
    %1075 = vector.load %arg17[%c0_465, %c0_466] : memref<8x128xf32, #tpu.memory_space<vmem>>, vector<8x128xf32>
    %1076 = arith.index_cast %c6_i32_462 : i32 to index
    %c0_467 = arith.constant 0 : index
    %c0_468 = arith.constant 0 : index
    %1077 = vector.load %arg15[%1076, %c0_467, %c0_468] : memref<8x8x512xf32, #tpu.memory_space<vmem>>, vector<1x8x512xf32>
    %1078 = vector.shape_cast %1077 : vector<1x8x512xf32> to vector<8x512xf32>
    %c0_469 = arith.constant 0 : index
    %c0_470 = arith.constant 0 : index
    %1079 = vector.load %arg9[%c0_469, %c0_470] : memref<128x512xf32, #tpu.memory_space<vmem>>, vector<128x512xf32>
    %cst_471 = arith.constant dense<0.000000e+00> : vector<8x512xf32>
    %1080 = tpu.matmul %1074, %1079, %cst_471 {dimension_numbers = #tpu.dot_dimension_numbers<[1], [0], [0], [1], [0, 0, 1, 1], [], []>} : vector<8x128xf32>, vector<128x512xf32>, vector<8x512xf32> -> vector<8x512xf32>
    %1081 = arith.addf %1078, %1080 : vector<8x512xf32>
    %1082 = vector.extract_strided_slice %1081 {offsets = [0, 0], sizes = [8, 128], strides = [1, 1]} : vector<8x512xf32> to vector<8x128xf32>
    %1083 = arith.negf %1082 : vector<8x128xf32>
    %1084 = math.exp %1083 : vector<8x128xf32>
    %cst_472 = arith.constant 1.000000e+00 : f32
    %1085 = vector.broadcast %cst_472 : f32 to vector<8x128xf32>
    %1086 = arith.addf %1085, %1084 : vector<8x128xf32>
    %1087 = arith.divf %1085, %1086 : vector<8x128xf32>
    %1088 = vector.extract_strided_slice %1081 {offsets = [0, 128], sizes = [8, 128], strides = [1, 1]} : vector<8x512xf32> to vector<8x128xf32>
    %1089 = arith.negf %1088 : vector<8x128xf32>
    %1090 = math.exp %1089 : vector<8x128xf32>
    %cst_473 = arith.constant 1.000000e+00 : f32
    %1091 = vector.broadcast %cst_473 : f32 to vector<8x128xf32>
    %1092 = arith.addf %1091, %1090 : vector<8x128xf32>
    %1093 = arith.divf %1091, %1092 : vector<8x128xf32>
    %1094 = vector.extract_strided_slice %1081 {offsets = [0, 256], sizes = [8, 128], strides = [1, 1]} : vector<8x512xf32> to vector<8x128xf32>
    %1095 = math.tanh %1094 : vector<8x128xf32>
    %1096 = vector.extract_strided_slice %1081 {offsets = [0, 384], sizes = [8, 128], strides = [1, 1]} : vector<8x512xf32> to vector<8x128xf32>
    %1097 = arith.negf %1096 : vector<8x128xf32>
    %1098 = math.exp %1097 : vector<8x128xf32>
    %cst_474 = arith.constant 1.000000e+00 : f32
    %1099 = vector.broadcast %cst_474 : f32 to vector<8x128xf32>
    %1100 = arith.addf %1099, %1098 : vector<8x128xf32>
    %1101 = arith.divf %1099, %1100 : vector<8x128xf32>
    %1102 = arith.mulf %1093, %1075 : vector<8x128xf32>
    %1103 = arith.mulf %1087, %1095 : vector<8x128xf32>
    %1104 = arith.addf %1102, %1103 : vector<8x128xf32>
    %1105 = math.tanh %1104 : vector<8x128xf32>
    %1106 = arith.mulf %1101, %1105 : vector<8x128xf32>
    %1107 = vector.broadcast %c6_i32_462 : i32 to vector<8x1xi32>
    %1108 = arith.cmpi slt, %1107, %0 : vector<8x1xi32>
    %1109 = vector.shape_cast %1108 : vector<8x1xi1> to vector<8x1xi1>
    %1110 = vector.broadcast %1109 : vector<8x1xi1> to vector<8x128xi1>
    %1111 = arith.select %1110, %1106, %1074 : vector<8x128xi1>, vector<8x128xf32>
    %1112 = vector.shape_cast %1108 : vector<8x1xi1> to vector<8x1xi1>
    %1113 = vector.broadcast %1112 : vector<8x1xi1> to vector<8x128xi1>
    %1114 = arith.select %1113, %1104, %1075 : vector<8x128xi1>, vector<8x128xf32>
    %c0_475 = arith.constant 0 : index
    %c0_476 = arith.constant 0 : index
    %1115 = vector.load %arg16[%c0_475, %c0_476] : memref<8x128xf32, #tpu.memory_space<vmem>>, vector<8x128xf32>
    tpu.vector_store %arg16[%c0_475, %c0_476], %1111 {strides = array<i32>} : memref<8x128xf32, #tpu.memory_space<vmem>>, vector<8x128xf32>,
    %c0_477 = arith.constant 0 : index
    %c0_478 = arith.constant 0 : index
    %1116 = vector.load %arg17[%c0_477, %c0_478] : memref<8x128xf32, #tpu.memory_space<vmem>>, vector<8x128xf32>
    tpu.vector_store %arg17[%c0_477, %c0_478], %1114 {strides = array<i32>} : memref<8x128xf32, #tpu.memory_space<vmem>>, vector<8x128xf32>,
    %1117 = arith.index_cast %c6_i32_462 : i32 to index
    %c0_479 = arith.constant 0 : index
    %c0_480 = arith.constant 0 : index
    %1118 = vector.load %arg14[%1117, %c0_479, %c0_480] : memref<8x8x128xf32, #tpu.memory_space<vmem>>, vector<1x8x128xf32>
    %1119 = vector.shape_cast %1118 : vector<1x8x128xf32> to vector<8x128xf32>
    %1120 = vector.shape_cast %1111 : vector<8x128xf32> to vector<1x8x128xf32>
    tpu.vector_store %arg14[%1117, %c0_479, %c0_480], %1120 {strides = array<i32>} : memref<8x8x128xf32, #tpu.memory_space<vmem>>, vector<1x8x128xf32>,
    %c7_i32_481 = arith.constant 7 : i32
    %c0_482 = arith.constant 0 : index
    %c0_483 = arith.constant 0 : index
    %1121 = vector.load %arg16[%c0_482, %c0_483] : memref<8x128xf32, #tpu.memory_space<vmem>>, vector<8x128xf32>
    %c0_484 = arith.constant 0 : index
    %c0_485 = arith.constant 0 : index
    %1122 = vector.load %arg17[%c0_484, %c0_485] : memref<8x128xf32, #tpu.memory_space<vmem>>, vector<8x128xf32>
    %1123 = arith.index_cast %c7_i32_481 : i32 to index
    %c0_486 = arith.constant 0 : index
    %c0_487 = arith.constant 0 : index
    %1124 = vector.load %arg15[%1123, %c0_486, %c0_487] : memref<8x8x512xf32, #tpu.memory_space<vmem>>, vector<1x8x512xf32>
    %1125 = vector.shape_cast %1124 : vector<1x8x512xf32> to vector<8x512xf32>
    %c0_488 = arith.constant 0 : index
    %c0_489 = arith.constant 0 : index
    %1126 = vector.load %arg9[%c0_488, %c0_489] : memref<128x512xf32, #tpu.memory_space<vmem>>, vector<128x512xf32>
    %cst_490 = arith.constant dense<0.000000e+00> : vector<8x512xf32>
    %1127 = tpu.matmul %1121, %1126, %cst_490 {dimension_numbers = #tpu.dot_dimension_numbers<[1], [0], [0], [1], [0, 0, 1, 1], [], []>} : vector<8x128xf32>, vector<128x512xf32>, vector<8x512xf32> -> vector<8x512xf32>
    %1128 = arith.addf %1125, %1127 : vector<8x512xf32>
    %1129 = vector.extract_strided_slice %1128 {offsets = [0, 0], sizes = [8, 128], strides = [1, 1]} : vector<8x512xf32> to vector<8x128xf32>
    %1130 = arith.negf %1129 : vector<8x128xf32>
    %1131 = math.exp %1130 : vector<8x128xf32>
    %cst_491 = arith.constant 1.000000e+00 : f32
    %1132 = vector.broadcast %cst_491 : f32 to vector<8x128xf32>
    %1133 = arith.addf %1132, %1131 : vector<8x128xf32>
    %1134 = arith.divf %1132, %1133 : vector<8x128xf32>
    %1135 = vector.extract_strided_slice %1128 {offsets = [0, 128], sizes = [8, 128], strides = [1, 1]} : vector<8x512xf32> to vector<8x128xf32>
    %1136 = arith.negf %1135 : vector<8x128xf32>
    %1137 = math.exp %1136 : vector<8x128xf32>
    %cst_492 = arith.constant 1.000000e+00 : f32
    %1138 = vector.broadcast %cst_492 : f32 to vector<8x128xf32>
    %1139 = arith.addf %1138, %1137 : vector<8x128xf32>
    %1140 = arith.divf %1138, %1139 : vector<8x128xf32>
    %1141 = vector.extract_strided_slice %1128 {offsets = [0, 256], sizes = [8, 128], strides = [1, 1]} : vector<8x512xf32> to vector<8x128xf32>
    %1142 = math.tanh %1141 : vector<8x128xf32>
    %1143 = vector.extract_strided_slice %1128 {offsets = [0, 384], sizes = [8, 128], strides = [1, 1]} : vector<8x512xf32> to vector<8x128xf32>
    %1144 = arith.negf %1143 : vector<8x128xf32>
    %1145 = math.exp %1144 : vector<8x128xf32>
    %cst_493 = arith.constant 1.000000e+00 : f32
    %1146 = vector.broadcast %cst_493 : f32 to vector<8x128xf32>
    %1147 = arith.addf %1146, %1145 : vector<8x128xf32>
    %1148 = arith.divf %1146, %1147 : vector<8x128xf32>
    %1149 = arith.mulf %1140, %1122 : vector<8x128xf32>
    %1150 = arith.mulf %1134, %1142 : vector<8x128xf32>
    %1151 = arith.addf %1149, %1150 : vector<8x128xf32>
    %1152 = math.tanh %1151 : vector<8x128xf32>
    %1153 = arith.mulf %1148, %1152 : vector<8x128xf32>
    %1154 = vector.broadcast %c7_i32_481 : i32 to vector<8x1xi32>
    %1155 = arith.cmpi slt, %1154, %0 : vector<8x1xi32>
    %1156 = vector.shape_cast %1155 : vector<8x1xi1> to vector<8x1xi1>
    %1157 = vector.broadcast %1156 : vector<8x1xi1> to vector<8x128xi1>
    %1158 = arith.select %1157, %1153, %1121 : vector<8x128xi1>, vector<8x128xf32>
    %1159 = vector.shape_cast %1155 : vector<8x1xi1> to vector<8x1xi1>
    %1160 = vector.broadcast %1159 : vector<8x1xi1> to vector<8x128xi1>
    %1161 = arith.select %1160, %1151, %1122 : vector<8x128xi1>, vector<8x128xf32>
    %c0_494 = arith.constant 0 : index
    %c0_495 = arith.constant 0 : index
    %1162 = vector.load %arg16[%c0_494, %c0_495] : memref<8x128xf32, #tpu.memory_space<vmem>>, vector<8x128xf32>
    tpu.vector_store %arg16[%c0_494, %c0_495], %1158 {strides = array<i32>} : memref<8x128xf32, #tpu.memory_space<vmem>>, vector<8x128xf32>,
    %c0_496 = arith.constant 0 : index
    %c0_497 = arith.constant 0 : index
    %1163 = vector.load %arg17[%c0_496, %c0_497] : memref<8x128xf32, #tpu.memory_space<vmem>>, vector<8x128xf32>
    tpu.vector_store %arg17[%c0_496, %c0_497], %1161 {strides = array<i32>} : memref<8x128xf32, #tpu.memory_space<vmem>>, vector<8x128xf32>,
    %1164 = arith.index_cast %c7_i32_481 : i32 to index
    %c0_498 = arith.constant 0 : index
    %c0_499 = arith.constant 0 : index
    %1165 = vector.load %arg14[%1164, %c0_498, %c0_499] : memref<8x8x128xf32, #tpu.memory_space<vmem>>, vector<1x8x128xf32>
    %1166 = vector.shape_cast %1165 : vector<1x8x128xf32> to vector<8x128xf32>
    %1167 = vector.shape_cast %1158 : vector<8x128xf32> to vector<1x8x128xf32>
    tpu.vector_store %arg14[%1164, %c0_498, %c0_499], %1167 {strides = array<i32>} : memref<8x8x128xf32, #tpu.memory_space<vmem>>, vector<1x8x128xf32>,
    %c8_i32_500 = arith.constant 8 : i32
    %c0_501 = arith.constant 0 : index
    %c0_502 = arith.constant 0 : index
    %1168 = vector.load %arg16[%c0_501, %c0_502] : memref<8x128xf32, #tpu.memory_space<vmem>>, vector<8x128xf32>
    %c0_503 = arith.constant 0 : index
    %c0_504 = arith.constant 0 : index
    %1169 = vector.load %arg11[%c0_503, %c0_504] : memref<128x128xf32, #tpu.memory_space<vmem>>, vector<128x128xf32>
    %cst_505 = arith.constant dense<0.000000e+00> : vector<8x128xf32>
    %1170 = tpu.matmul %1168, %1169, %cst_505 {dimension_numbers = #tpu.dot_dimension_numbers<[1], [0], [0], [1], [0, 0, 1, 1], [], []>} : vector<8x128xf32>, vector<128x128xf32>, vector<8x128xf32> -> vector<8x128xf32>
    %c0_506 = arith.constant 0 : index
    %c0_507 = arith.constant 0 : index
    %1171 = vector.load %arg12[%c0_506, %c0_507] : memref<1x128xf32, #tpu.memory_space<vmem>>, vector<1x128xf32>
    %1172 = vector.broadcast %1171 : vector<1x128xf32> to vector<8x128xf32>
    %1173 = arith.addf %1170, %1172 : vector<8x128xf32>
    %c0_508 = arith.constant 0 : index
    %c0_509 = arith.constant 0 : index
    %1174 = vector.load %arg13[%c0_508, %c0_509] : memref<8x128xf32, #tpu.memory_space<vmem>>, vector<8x128xf32>
    tpu.vector_store %arg13[%c0_508, %c0_509], %1173 {strides = array<i32>} : memref<8x128xf32, #tpu.memory_space<vmem>>, vector<8x128xf32>,
    return
  }
}

</mosaic_0001>

<bundles_post_ra>
// kernel: lstm_model_forward.1
= control target key start
LH: loop header
LB: loop body
LE: loop exit
PB: predicated region body
PF: predicated region fallthrough
CT: control target
= control target key end

     0   :  { %18 = vsyncpa [#allocation7], 0  ;;  %s11865_s0 = inlined_call_operand.vmem [shape: s32[8,1], index: 0, kind: input, shape index: {}]   ;;  %s11866_s1 = inlined_call_operand.vmem [shape: f32[8,8,128], index: 1, kind: input, shape index: {}]   ;;  %s11867_s2 = inlined_call_operand.hbm [shape: f32[128,512], index: 2, kind: input, shape index: {}]   ;;  %s11868_s3 = inlined_call_operand.hbm [shape: f32[128,512], index: 3, kind: input, shape index: {}]   ;;  %s11869_s4 = inlined_call_operand.vmem [shape: f32[1,512], index: 4, kind: input, shape index: {}]   ;;  %s11870_s5 = inlined_call_operand.hbm [shape: f32[128,512], index: 5, kind: input, shape index: {}]   ;;  %s11871_s6 = inlined_call_operand.hbm [shape: f32[128,512], index: 6, kind: input, shape index: {}]   ;;  %s11872_s7 = inlined_call_operand.vmem [shape: f32[1,512], index: 7, kind: input, shape index: {}]   ;;  %s11873_s8 = inlined_call_operand.hbm [shape: f32[128,512], index: 8, kind: input, shape index: {}]   ;;  %s11874_s9 = inlined_call_operand.hbm [shape: f32[128,512], index: 9, kind: input, shape index: {}]   ;;  %s11875_s10 = inlined_call_operand.vmem [shape: f32[1,512], index: 10, kind: input, shape index: {}]   ;;  %s11876_s11 = inlined_call_operand.vmem [shape: f32[128,128], index: 11, kind: input, shape index: {}]   ;;  %s11877_s12 = inlined_call_operand.vmem [shape: f32[1,128], index: 12, kind: input, shape index: {}]   ;;  %s11878_s13 = inlined_call_operand.vmem [shape: f32[8,128], index: 13, kind: output, shape index: {}]  }
   0x1   :  { %19 = vsyncpa [#allocation9], 0 }
   0x2   :  { %20 = vsyncpa [#allocation12], 0 }
   0x3   :  { %21 = vsyncpa [#allocation15], 0  ;;  %s9851_s25 = smov [#allocation8]   ;;  %s9852_s27 = smov [#allocation11]  }
   0x4   :  { %s43_s26 = sshll.u32 %s9851_s25, 4  ;;  %s69_s28 = sshll.u32 %s9852_s27, 4  ;;  %s44_s26 = int_to_ptr.vmem [resolvable:$true] %s43_s26  ;;  %s9933_s28 = int_to_ptr.vmem [resolvable:$true] %s69_s28 }
   0x5   :  { %s9711_s14 = scalar_lea.hbm %s11868_s3, 8192 }
   0x6   :  { %p9712_p0 = scmp.ne.s32.totalorder %s11868_s3, %s9711_s14  ;;  %p9715_p1 = scmp.lt.u32.totalorder %s9711_s14, %s11868_s3 }
   0x8   :  { %p9717_p2 = pnand %p9715_p1, %p9712_p0 }
   0xa   :  { %9720 = shalt.err (!%p9717_p2)
}
   0xb   :  { %s9721_s19 = scalar_lea.vmem %s44_s26, 8192  ;;  %p9726_p4 = scmp.lt.s32.totalorder %s44_s26, %s44_s26 }
   0xc   :  { %p9722_p3 = scmp.ne.s32.totalorder %s44_s26, %s9721_s19  ;;  %p9727_p5 = scmp.lt.s32.totalorder %s9721_s19, %s9721_s19 }
   0xe   :  { %p9728_p6 = por %p9727_p5, %p9726_p4 }
  0x10   :  { %p9729_p7 = pnand %p9728_p6, %p9722_p3 }
  0x12   :  { %9732 = shalt.err (!%p9729_p7)
}
  0x13   :  { %s9853_s20 = smov 512   ;;  %s9854_s21 = smov 32  }
  0x14   :  { %49 = dma.hbm_to_vmem [thread:$0]  %s11868_s3, 8192, %s44_s26, [#allocation9], %s9853_s20, %s9853_s20, %s9854_s21  }
  0x15   :  { %s9733_s27 = scalar_lea.hbm %s11871_s6, 8192 }
  0x16   :  { %p9734_p8 = scmp.ne.s32.totalorder %s11871_s6, %s9733_s27  ;;  %p9737_p9 = scmp.lt.u32.totalorder %s9733_s27, %s11871_s6 }
  0x18   :  { %p9739_p10 = pnand %p9737_p9, %p9734_p8 }
  0x1a   :  { %9742 = shalt.err (!%p9739_p10)
}
  0x1b   :  { %s9743_s16 = scalar_lea.vmem %s9933_s28, 8192  ;;  %p9748_p12 = scmp.lt.s32.totalorder %s9933_s28, %s9933_s28 }
  0x1c   :  { %p9744_p11 = scmp.ne.s32.totalorder %s9933_s28, %s9743_s16  ;;  %p9749_p13 = scmp.lt.s32.totalorder %s9743_s16, %s9743_s16 }
  0x1e   :  { %p9750_p0 = por %p9749_p13, %p9748_p12 }
  0x20   :  { %p9751_p1 = pnand %p9750_p0, %p9744_p11 }
  0x22   :  { %9754 = shalt.err (!%p9751_p1)
}
  0x23   :  { %75 = dma.hbm_to_vmem [thread:$0]  %s11871_s6, 8192, %s9933_s28, [#allocation12], %s9853_s20, %s9853_s20, %s9854_s21  }
  0x24   :  { %s9855_s17 = smov [#allocation6]   ;;  %s9856_s19 = smov [#allocation10]  }
  0x25   :  { %s31_s18 = sshll.u32 %s9855_s17, 4  ;;  %s57_s22 = sshll.u32 %s9856_s19, 4  ;;  %s32_s18 = int_to_ptr.vmem [resolvable:$true] %s31_s18  ;;  %s9970_s22 = int_to_ptr.vmem [resolvable:$true] %s57_s22 }
  0x26   :  { %s9755_s25 = scalar_lea.hbm %s11867_s2, 8192 }
  0x27   :  { %p9756_p2 = scmp.ne.s32.totalorder %s11867_s2, %s9755_s25  ;;  %p9759_p3 = scmp.lt.u32.totalorder %s9755_s25, %s11867_s2 }
  0x29   :  { %p9761_p4 = pnand %p9759_p3, %p9756_p2 }
  0x2b   :  { %9764 = shalt.err (!%p9761_p4)
}
  0x2c   :  { %s9765_s6 = scalar_lea.vmem %s32_s18, 8192  ;;  %p9770_p6 = scmp.lt.s32.totalorder %s32_s18, %s32_s18 }
  0x2d   :  { %p9766_p5 = scmp.ne.s32.totalorder %s32_s18, %s9765_s6  ;;  %p9771_p7 = scmp.lt.s32.totalorder %s9765_s6, %s9765_s6 }
  0x2f   :  { %p9772_p8 = por %p9771_p7, %p9770_p6 }
  0x31   :  { %p9773_p9 = pnand %p9772_p8, %p9766_p5 }
  0x33   :  { %9776 = shalt.err (!%p9773_p9)
}
  0x34   :  { %37 = dma.hbm_to_vmem [thread:$0]  %s11867_s2, 8192, %s32_s18, [#allocation7], %s9853_s20, %s9853_s20, %s9854_s21  }
  0x35   :  { %s9777_s26 = scalar_lea.hbm %s11870_s5, 8192 }
  0x36   :  { %p9778_p10 = scmp.ne.s32.totalorder %s11870_s5, %s9777_s26  ;;  %p9781_p11 = scmp.lt.u32.totalorder %s9777_s26, %s11870_s5 }
  0x38   :  { %p9783_p12 = pnand %p9781_p11, %p9778_p10 }
  0x3a   :  { %9786 = shalt.err (!%p9783_p12)
}
  0x3b   :  { %s9787_s25 = scalar_lea.vmem %s9970_s22, 8192  ;;  %p9792_p0 = scmp.lt.s32.totalorder %s9970_s22, %s9970_s22 }
  0x3c   :  { %p9788_p13 = scmp.ne.s32.totalorder %s9970_s22, %s9787_s25  ;;  %p9793_p1 = scmp.lt.s32.totalorder %s9787_s25, %s9787_s25 }
  0x3e   :  { %p9794_p2 = por %p9793_p1, %p9792_p0 }
  0x40   :  { %p9795_p3 = pnand %p9794_p2, %p9788_p13 }
  0x42   :  { %9798 = shalt.err (!%p9795_p3)
}
  0x43   :  { %63 = dma.hbm_to_vmem [thread:$0]  %s11870_s5, 8192, %s9970_s22, [#allocation9], %s9853_s20, %s9853_s20, %s9854_s21  }
  0x44   :  { %s9857_s27 = smov [#allocation13]   ;;  %s9858_s30 = smov [#allocation14]  }
  0x45   :  { %s83_s29 = sshll.u32 %s9857_s27, 4  ;;  %s95_s14 = sshll.u32 %s9858_s30, 4  ;;  %s84_s29 = int_to_ptr.vmem [resolvable:$true] %s83_s29  ;;  %s10007_s14 = int_to_ptr.vmem [resolvable:$true] %s95_s14 }
  0x46   :  { %s9799_s15 = scalar_lea.hbm %s11873_s8, 8192 }
  0x47   :  { %p9800_p4 = scmp.ne.s32.totalorder %s11873_s8, %s9799_s15  ;;  %p9803_p5 = scmp.lt.u32.totalorder %s9799_s15, %s11873_s8 }
  0x49   :  { %p9805_p6 = pnand %p9803_p5, %p9800_p4 }
  0x4b   :  { %9808 = shalt.err (!%p9805_p6)
}
  0x4c   :  { %s9809_s5 = scalar_lea.vmem %s84_s29, 8192  ;;  %p9814_p8 = scmp.lt.s32.totalorder %s84_s29, %s84_s29 }
  0x4d   :  { %p9810_p7 = scmp.ne.s32.totalorder %s84_s29, %s9809_s5  ;;  %p9815_p9 = scmp.lt.s32.totalorder %s9809_s5, %s9809_s5 }
  0x4f   :  { %p9816_p10 = por %p9815_p9, %p9814_p8 }
  0x51   :  { %p9817_p11 = pnand %p9816_p10, %p9810_p7 }
  0x53   :  { %9820 = shalt.err (!%p9817_p11)
}
  0x54   :  { %89 = dma.hbm_to_vmem [thread:$0]  %s11873_s8, 8192, %s84_s29, [#allocation12], %s9853_s20, %s9853_s20, %s9854_s21  }
  0x55   :  { %s9821_s25 = scalar_lea.hbm %s11874_s9, 8192 }
  0x56   :  { %p9822_p12 = scmp.ne.s32.totalorder %s11874_s9, %s9821_s25  ;;  %p9825_p13 = scmp.lt.u32.totalorder %s9821_s25, %s11874_s9 }
  0x58   :  { %p9827_p0 = pnand %p9825_p13, %p9822_p12 }
  0x5a   :  { %9830 = shalt.err (!%p9827_p0)
}
  0x5b   :  { %s9831_s6 = scalar_lea.vmem %s10007_s14, 8192  ;;  %p9836_p2 = scmp.lt.s32.totalorder %s10007_s14, %s10007_s14 }
  0x5c   :  { %p9832_p1 = scmp.ne.s32.totalorder %s10007_s14, %s9831_s6  ;;  %p9837_p3 = scmp.lt.s32.totalorder %s9831_s6, %s9831_s6 }
  0x5e   :  { %p9838_p4 = por %p9837_p3, %p9836_p2 }
  0x60   :  { %p9839_p5 = pnand %p9838_p4, %p9832_p1 }
  0x62   :  { %9842 = shalt.err (!%p9839_p5)
}
  0x63   :  { %101 = dma.hbm_to_vmem [thread:$0]  %s11874_s9, 8192, %s10007_s14, [#allocation15], %s9853_s20, %s9853_s20, %s9854_s21  }
  0x64   :  { %9843 = dma.done.wait [#allocation7], 8192  }
  0x65   :  { %9844 = vsyncadd [#allocation7], 4294959104 }
  0x66   :  { %9845 = dma.done.wait [#allocation9], 16384  }
  0x67   :  { %9846 = vsyncadd [#allocation9], 4294950912 }
  0x68   :  { %9847 = dma.done.wait [#allocation12], 16384  }
  0x69   :  { %9848 = vsyncadd [#allocation12], 4294950912 }
  0x6a   :  { %9849 = dma.done.wait [#allocation15], 8192  }
  0x6b   :  { %9850 = vsyncadd [#allocation15], 4294959104  ;;  %v11879_v0 = vmov 0.0   ;;  %v9860_v1 = vmov 0   ;;  %v136_v2 = vld [vmem:[#allocation6 + $0x8] sm:$0xff]  ;;  %v138_v4 = vld [vmem:[#allocation6 + $0x18] sm:$0xff] }
  0x6c   :  { %285 = vmatprep.mubr.f32.mxu0 %v11879_v0  ;;  %398 = vmatprep.mubr.f32.mxu1 %v11879_v0  ;;  %v140_v3 = vld [vmem:[#allocation6 + $0x28] sm:$0xff]  ;;  %v142_v6 = vld [vmem:[#allocation6 + $0x38] sm:$0xff]  ;;  %v135_v7 = vld [vmem:[#allocation6] sm:$0xff] }
  0x6d   :  { %9325 = vset.pattern.permute.xlu0 %v9860_v1  ;;  %9326 = vset.pattern.permute.xlu1 %v9860_v1  ;;  %v7369_v5 = vpack.c.bf16 %v140_v3, %v136_v2  ;;  %v139_v8 = vld [vmem:[#allocation6 + $0x20] sm:$0xff]  ;;  %v7401_v9 = vpack.c.bf16 %v142_v6, %v138_v4  ;;  %v137_v11 = vld [vmem:[#allocation6 + $0x10] sm:$0xff]  ;;  %v144_v13 = vld [vmem:[#allocation6 + $0x48] sm:$0xff] }
  0x6e   :  { %v7371_v10 = vpack.c.bf16 %v139_v8, %v135_v7  ;;  %v141_v12 = vld [vmem:[#allocation6 + $0x30] sm:$0xff]  ;;  %v148_v15 = vld [vmem:[#allocation6 + $0x68] sm:$0xff]  ;;  %v146_v16 = vld [vmem:[#allocation6 + $0x58] sm:$0xff] }
  0x6f   :  { %7370 = vmatprep.subr.bf16.mxu0 %v7369_v5  ;;  %v7403_v14 = vpack.c.bf16 %v141_v12, %v137_v11  ;;  %v150_v17 = vld [vmem:[#allocation6 + $0x78] sm:$0xff]  ;;  %7402 = vmatprep.subr.bf16.mxu1 %v7401_v9  ;;  %v7373_v18 = vpack.c.bf16 %v148_v15, %v144_v13  ;;  %v143_v20 = vld [vmem:[#allocation6 + $0x40] sm:$0xff]  ;;  %v145_v22 = vld [vmem:[#allocation6 + $0x50] sm:$0xff] }
  0x70   :  { %7372 = vmatpush1.bf16.msra.mxu0 %v7371_v10  ;;  %v7405_v19 = vpack.c.bf16 %v150_v17, %v146_v16  ;;  %v147_v21 = vld [vmem:[#allocation6 + $0x60] sm:$0xff]  ;;  %v149_v24 = vld [vmem:[#allocation6 + $0x70] sm:$0xff]  ;;  %v152_v25 = vld [vmem:[#allocation6 + $0x88] sm:$0xff] }
  0x71   :  { %7404 = vmatpush1.bf16.msra.mxu1 %v7403_v14  ;;  %v7375_v23 = vpack.c.bf16 %v147_v21, %v143_v20  ;;  %v156_v26 = vld [vmem:[#allocation6 + $0xa8] sm:$0xff]  ;;  %7374 = vmatprep.subr.bf16.mxu0 %v7373_v18  ;;  %v7407_v27 = vpack.c.bf16 %v149_v24, %v145_v22  ;;  %v154_v29 = vld [vmem:[#allocation6 + $0x98] sm:$0xff]  ;;  %v151_v31 = vld [vmem:[#allocation6 + $0x80] sm:$0xff] }
  0x72   :  { %7406 = vmatprep.subr.bf16.mxu1 %v7405_v19  ;;  %v7377_v28 = vpack.c.bf16 %v156_v26, %v152_v25  ;;  %v158_v30 = vld [vmem:[#allocation6 + $0xb8] sm:$0xff]  ;;  %v155_v33 = vld [vmem:[#allocation6 + $0xa0] sm:$0xff]  ;;  %v153_v34 = vld [vmem:[#allocation6 + $0x90] sm:$0xff] }
  0x73   :  { %v7409_v32 = vpack.c.bf16 %v158_v30, %v154_v29  ;;  %v157_v35 = vld [vmem:[#allocation6 + $0xb0] sm:$0xff]  ;;  %v7379_v36 = vpack.c.bf16 %v155_v33, %v151_v31  ;;  %v160_v37 = vld [vmem:[#allocation6 + $0xc8] sm:$0xff]  ;;  %v162_v39 = vld [vmem:[#allocation6 + $0xd8] sm:$0xff] }
  0x74   :  { %7376 = vmatpush1.bf16.msra.mxu0 %v7375_v23  ;;  %v164_v38 = vld [vmem:[#allocation6 + $0xe8] sm:$0xff]  ;;  %v7411_v40 = vpack.c.bf16 %v157_v35, %v153_v34  ;;  %v166_v42 = vld [vmem:[#allocation6 + $0xf8] sm:$0xff]  ;;  %v159_v43 = vld [vmem:[#allocation6 + $0xc0] sm:$0xff] }
  0x75   :  { %7408 = vmatpush1.bf16.msra.mxu1 %v7407_v27  ;;  %7378 = vmatprep.subr.bf16.mxu0 %v7377_v28  ;;  %v7381_v41 = vpack.c.bf16 %v164_v38, %v160_v37  ;;  %v163_v44 = vld [vmem:[#allocation6 + $0xe0] sm:$0xff]  ;;  %v7413_v45 = vpack.c.bf16 %v166_v42, %v162_v39  ;;  %v161_v46 = vld [vmem:[#allocation6 + $0xd0] sm:$0xff]  ;;  %v168_v48 = vld [vmem:[#allocation6 + $0x108] sm:$0xff] }
  0x76   :  { %7410 = vmatprep.subr.bf16.mxu1 %v7409_v32  ;;  %v165_v47 = vld [vmem:[#allocation6 + $0xf0] sm:$0xff]  ;;  %v172_v49 = vld [vmem:[#allocation6 + $0x128] sm:$0xff]  ;;  %v170_v50 = vld [vmem:[#allocation6 + $0x118] sm:$0xff]  ;;  %v7383_v52 = vpack.c.bf16 %v163_v44, %v159_v43 }
  0x77   :  { %v174_v51 = vld [vmem:[#allocation6 + $0x138] sm:$0xff]  ;;  %v7415_v53 = vpack.c.bf16 %v165_v47, %v161_v46  ;;  %v7385_v54 = vpack.c.bf16 %v172_v49, %v168_v48  ;;  %v167_v55 = vld [vmem:[#allocation6 + $0x100] sm:$0xff]  ;;  %v169_v57 = vld [vmem:[#allocation6 + $0x110] sm:$0xff] }
  0x78   :  { %7380 = vmatpush1.bf16.msra.mxu0 %v7379_v36  ;;  %v171_v56 = vld [vmem:[#allocation6 + $0x120] sm:$0xff]  ;;  %v7417_v58 = vpack.c.bf16 %v174_v51, %v170_v50  ;;  %v173_v59 = vld [vmem:[#allocation6 + $0x130] sm:$0xff]  ;;  %v176_v60 = vld [vmem:[#allocation6 + $0x148] sm:$0xff] }
  0x79   :  { %7412 = vmatpush1.bf16.msra.mxu1 %v7411_v40  ;;  %7382 = vmatprep.subr.bf16.mxu0 %v7381_v41  ;;  %v180_v61 = vld [vmem:[#allocation6 + $0x168] sm:$0xff]  ;;  %v178_v62 = vld [vmem:[#allocation6 + $0x158] sm:$0xff]  ;;  %v7387_v2 = vpack.c.bf16 %v171_v56, %v167_v55  ;;  %v7419_v3 = vpack.c.bf16 %v173_v59, %v169_v57  ;;  %v175_v5 = vld [vmem:[#allocation6 + $0x140] sm:$0xff] }
  0x7a   :  { %7414 = vmatprep.subr.bf16.mxu1 %v7413_v45  ;;  %v182_v63 = vld [vmem:[#allocation6 + $0x178] sm:$0xff]  ;;  %v7389_v4 = vpack.c.bf16 %v180_v61, %v176_v60  ;;  %v179_v6 = vld [vmem:[#allocation6 + $0x160] sm:$0xff]  ;;  %v177_v7 = vld [vmem:[#allocation6 + $0x150] sm:$0xff] }
  0x7b   :  { %v7421_v8 = vpack.c.bf16 %v182_v63, %v178_v62  ;;  %v181_v9 = vld [vmem:[#allocation6 + $0x170] sm:$0xff]  ;;  %v184_v10 = vld [vmem:[#allocation6 + $0x188] sm:$0xff]  ;;  %v186_v12 = vld [vmem:[#allocation6 + $0x198] sm:$0xff]  ;;  %v7391_v14 = vpack.c.bf16 %v179_v6, %v175_v5 }
  0x7c   :  { %7384 = vmatpush1.bf16.msra.mxu0 %v7383_v52  ;;  %v188_v11 = vld [vmem:[#allocation6 + $0x1a8] sm:$0xff]  ;;  %v190_v13 = vld [vmem:[#allocation6 + $0x1b8] sm:$0xff]  ;;  %v7423_v15 = vpack.c.bf16 %v181_v9, %v177_v7  ;;  %v183_v17 = vld [vmem:[#allocation6 + $0x180] sm:$0xff] }
  0x7d   :  { %7416 = vmatpush1.bf16.msra.mxu1 %v7415_v53  ;;  %7386 = vmatprep.subr.bf16.mxu0 %v7385_v54  ;;  %v7393_v16 = vpack.c.bf16 %v188_v11, %v184_v10  ;;  %v187_v18 = vld [vmem:[#allocation6 + $0x1a0] sm:$0xff]  ;;  %v185_v19 = vld [vmem:[#allocation6 + $0x190] sm:$0xff]  ;;  %v7425_v20 = vpack.c.bf16 %v190_v13, %v186_v12  ;;  %v192_v22 = vld [vmem:[#allocation6 + $0x1c8] sm:$0xff] }
  0x7e   :  { %7418 = vmatprep.subr.bf16.mxu1 %v7417_v58  ;;  %v189_v21 = vld [vmem:[#allocation6 + $0x1b0] sm:$0xff]  ;;  %v196_v23 = vld [vmem:[#allocation6 + $0x1e8] sm:$0xff]  ;;  %v194_v24 = vld [vmem:[#allocation6 + $0x1d8] sm:$0xff]  ;;  %v7395_v26 = vpack.c.bf16 %v187_v18, %v183_v17 }
  0x7f   :  { %v198_v25 = vld [vmem:[#allocation6 + $0x1f8] sm:$0xff]  ;;  %v7427_v27 = vpack.c.bf16 %v189_v21, %v185_v19  ;;  %v7397_v28 = vpack.c.bf16 %v196_v23, %v192_v22  ;;  %v191_v29 = vld [vmem:[#allocation6 + $0x1c0] sm:$0xff]  ;;  %v193_v31 = vld [vmem:[#allocation6 + $0x1d0] sm:$0xff] }
  0x80   :  { %7388 = vmatpush1.bf16.msra.mxu0 %v7387_v2  ;;  %v195_v30 = vld [vmem:[#allocation6 + $0x1e0] sm:$0xff]  ;;  %v7429_v32 = vpack.c.bf16 %v198_v25, %v194_v24  ;;  %v197_v33 = vld [vmem:[#allocation6 + $0x1f0] sm:$0xff]  ;;  %v488_v34 = vld [vmem:[#allocation8 + $0x8] sm:$0xff] }
  0x81   :  { %7420 = vmatpush1.bf16.msra.mxu1 %v7419_v3  ;;  %7390 = vmatprep.subr.bf16.mxu0 %v7389_v4  ;;  %v492_v35 = vld [vmem:[#allocation8 + $0x28] sm:$0xff]  ;;  %v490_v36 = vld [vmem:[#allocation8 + $0x18] sm:$0xff]  ;;  %v7399_v38 = vpack.c.bf16 %v195_v30, %v191_v29  ;;  %v7431_v39 = vpack.c.bf16 %v197_v33, %v193_v31  ;;  %v487_v41 = vld [vmem:[#allocation8] sm:$0xff] }
  0x82   :  { %7422 = vmatprep.subr.bf16.mxu1 %v7421_v8  ;;  %v494_v37 = vld [vmem:[#allocation8 + $0x38] sm:$0xff]  ;;  %v10048_v40 = vpack.c.bf16 %v492_v35, %v488_v34  ;;  %v491_v42 = vld [vmem:[#allocation8 + $0x20] sm:$0xff]  ;;  %v489_v44 = vld [vmem:[#allocation8 + $0x10] sm:$0xff] }
  0x83   :  { %v10050_v43 = vpack.c.bf16 %v494_v37, %v490_v36  ;;  %v493_v45 = vld [vmem:[#allocation8 + $0x30] sm:$0xff]  ;;  %v496_v46 = vld [vmem:[#allocation8 + $0x48] sm:$0xff]  ;;  %v127_v48 = vld [vmem:[%s11866_s1] sm:$0xff]  ;;  %v10055_v49 = vpack.c.bf16 %v491_v42, %v487_v41 }
  0x84   :  { %7392 = vmatpush1.bf16.msra.mxu0 %v7391_v14  ;;  %v500_v47 = vld [vmem:[#allocation8 + $0x68] sm:$0xff]  ;;  %v498_v50 = vld [vmem:[#allocation8 + $0x58] sm:$0xff]  ;;  %v10058_v52 = vpack.c.bf16 %v493_v45, %v489_v44  ;;  %v495_v53 = vld [vmem:[#allocation8 + $0x40] sm:$0xff] }
  0x85   :  { %7424 = vmatpush1.bf16.msra.mxu1 %v7423_v15  ;;  %7394 = vmatprep.subr.bf16.mxu0 %v7393_v16  ;;  %v502_v51 = vld [vmem:[#allocation8 + $0x78] sm:$0xff]  ;;  %v499_v54 = vld [vmem:[#allocation8 + $0x60] sm:$0xff]  ;;  %v10061_v55 = vpack.c.bf16 %v500_v47, %v496_v46  ;;  %v497_v56 = vld [vmem:[#allocation8 + $0x50] sm:$0xff] }
  0x86   :  { %7426 = vmatprep.subr.bf16.mxu1 %v7425_v20  ;;  %v501_v57 = vld [vmem:[#allocation8 + $0x70] sm:$0xff]  ;;  %v10063_v58 = vpack.c.bf16 %v502_v51, %v498_v50  ;;  %v504_v59 = vld [vmem:[#allocation8 + $0x88] sm:$0xff]  ;;  %v10069_v62 = vpack.c.bf16 %v499_v54, %v495_v53  ;;  %v506_v63 = vld [vmem:[#allocation8 + $0x98] sm:$0xff] }
  0x87   :  { %v508_v60 = vld [vmem:[#allocation8 + $0xa8] sm:$0xff]  ;;  %v510_v2 = vld [vmem:[#allocation8 + $0xb8] sm:$0xff]  ;;  %v10073_v3 = vpack.c.bf16 %v501_v57, %v497_v56  ;;  %v503_v4 = vld [vmem:[#allocation8 + $0x80] sm:$0xff] }
  0x88   :  { %7396 = vmatpush1.bf16.msra.mxu0 %v7395_v26  ;;  %v128_v61 = vld [vmem:[%s11866_s1 + $0x8] sm:$0xff]  ;;  %v507_v5 = vld [vmem:[#allocation8 + $0xa0] sm:$0xff]  ;;  %v10077_v6 = vpack.c.bf16 %v508_v60, %v504_v59  ;;  %v505_v7 = vld [vmem:[#allocation8 + $0x90] sm:$0xff]  ;;  %v10080_v9 = vpack.c.bf16 %v510_v2, %v506_v63 }
  0x89   :  { %7428 = vmatpush1.bf16.msra.mxu1 %v7427_v27  ;;  %7398 = vmatprep.subr.bf16.mxu0 %v7397_v28  ;;  %v509_v8 = vld [vmem:[#allocation8 + $0xb0] sm:$0xff]  ;;  %v512_v10 = vld [vmem:[#allocation8 + $0xc8] sm:$0xff]  ;;  %v10086_v13 = vpack.c.bf16 %v507_v5, %v503_v4  ;;  %v514_v14 = vld [vmem:[#allocation8 + $0xd8] sm:$0xff] }
  0x8a   :  { %7430 = vmatprep.subr.bf16.mxu1 %v7429_v32  ;;  %v516_v11 = vld [vmem:[#allocation8 + $0xe8] sm:$0xff]  ;;  %v129_v12 = vld [vmem:[%s11866_s1 + $0x10] sm:$0xff]  ;;  %v518_v15 = vld [vmem:[#allocation8 + $0xf8] sm:$0xff]  ;;  %v10090_v16 = vpack.c.bf16 %v509_v8, %v505_v7 }
  0x8b   :  { %v511_v17 = vld [vmem:[#allocation8 + $0xc0] sm:$0xff]  ;;  %v10094_v19 = vpack.c.bf16 %v516_v11, %v512_v10  ;;  %v513_v20 = vld [vmem:[#allocation8 + $0xd0] sm:$0xff]  ;;  %v10097_v22 = vpack.c.bf16 %v518_v15, %v514_v14  ;;  %v520_v23 = vld [vmem:[#allocation8 + $0x108] sm:$0xff] }
  0x8c   :  { %7400 = vmatpush1.bf16.msra.mxu0 %v7399_v38  ;;  %v515_v18 = vld [vmem:[#allocation8 + $0xe0] sm:$0xff]  ;;  %v517_v21 = vld [vmem:[#allocation8 + $0xf0] sm:$0xff]  ;;  %v524_v24 = vld [vmem:[#allocation8 + $0x128] sm:$0xff] }
  0x8d   :  { %7432 = vmatpush1.bf16.msra.mxu1 %v7431_v39  ;;  %7434 = vmatprep.subr.bf16.mxu0 %v10048_v40  ;;  %v130_v25 = vld [vmem:[%s11866_s1 + $0x18] sm:$0xff]  ;;  %v10103_v26 = vpack.c.bf16 %v515_v18, %v511_v17  ;;  %v10107_v29 = vpack.c.bf16 %v517_v21, %v513_v20  ;;  %v519_v30 = vld [vmem:[#allocation8 + $0x100] sm:$0xff]  ;;  %v10111_v32 = vpack.c.bf16 %v524_v24, %v520_v23  ;;  %v521_v33 = vld [vmem:[#allocation8 + $0x110] sm:$0xff] }
  0x8e   :  { %7466 = vmatprep.subr.bf16.mxu1 %v10050_v43  ;;  %v522_v27 = vld [vmem:[#allocation8 + $0x118] sm:$0xff]  ;;  %v523_v31 = vld [vmem:[#allocation8 + $0x120] sm:$0xff]  ;;  %v525_v34 = vld [vmem:[#allocation8 + $0x130] sm:$0xff] }
  0x8f   :  { %286 = vmatmul.mubr.f32.vlgmr.msra.gmra.mrb[0].mxu0 %v127_v48  ;;  %v526_v28 = vld [vmem:[#allocation8 + $0x138] sm:$0xff]  ;;  %v528_v36 = vld [vmem:[#allocation8 + $0x148] sm:$0xff]  ;;  %v131_v38 = vld [vmem:[%s11866_s1 + $0x20] sm:$0xff]  ;;  %v10120_v39 = vpack.c.bf16 %v523_v31, %v519_v30  ;;  %v10124_v44 = vpack.c.bf16 %v525_v34, %v521_v33 }
  0x90   :  { %399 = vmatmul.mubr.f32.vlgmr.msra.gmra.mrb[0].mxu1 %v127_v48  ;;  %7436 = vmatpush1.bf16.msra.mxu0 %v10055_v49  ;;  %v10114_v35 = vpack.c.bf16 %v526_v28, %v522_v27  ;;  %v532_v37 = vld [vmem:[#allocation8 + $0x168] sm:$0xff]  ;;  %v530_v41 = vld [vmem:[#allocation8 + $0x158] sm:$0xff]  ;;  %v527_v45 = vld [vmem:[#allocation8 + $0x140] sm:$0xff] }
  0x91   :  { %7468 = vmatpush1.bf16.msra.mxu1 %v10058_v52  ;;  %291 = vmatprep.mubr.f32.mxu0 %v11879_v0  ;;  %v534_v42 = vld [vmem:[#allocation8 + $0x178] sm:$0xff]  ;;  %v531_v46 = vld [vmem:[#allocation8 + $0x160] sm:$0xff]  ;;  %v10128_v47 = vpack.c.bf16 %v532_v37, %v528_v36  ;;  %v529_v48 = vld [vmem:[#allocation8 + $0x150] sm:$0xff] }
  0x92   :  { %404 = vmatprep.mubr.f32.mxu1 %v11879_v0  ;;  %7438 = vmatprep.subr.bf16.mxu0 %v10061_v55  ;;  %v533_v50 = vld [vmem:[#allocation8 + $0x170] sm:$0xff]  ;;  %v10131_v51 = vpack.c.bf16 %v534_v42, %v530_v41  ;;  %v536_v53 = vld [vmem:[#allocation8 + $0x188] sm:$0xff]  ;;  %v10137_v57 = vpack.c.bf16 %v531_v46, %v527_v45  ;;  %v538_v59 = vld [vmem:[#allocation8 + $0x198] sm:$0xff]  ;;  %v201_v41 = vlaneseq }
  0x93   :  { %292 = vmatmul.mubr.f32.gmra.mrb[2].mxu0 %v128_v61  ;;  %7470 = vmatprep.subr.bf16.mxu1 %v10063_v58  ;;  %v540_v54 = vld [vmem:[#allocation8 + $0x1a8] sm:$0xff]  ;;  %v542_v60 = vld [vmem:[#allocation8 + $0x1b8] sm:$0xff]  ;;  %v535_v63 = vld [vmem:[#allocation8 + $0x180] sm:$0xff] }
  0x94   :  { %405 = vmatmul.mubr.f32.gmra.mrb[2].mxu1 %v128_v61  ;;  %7440 = vmatpush1.bf16.msra.mxu0 %v10069_v62  ;;  %v132_v56 = vld [vmem:[%s11866_s1 + $0x28] sm:$0xff]  ;;  %v10141_v61 = vpack.c.bf16 %v533_v50, %v529_v48  ;;  %v539_v2 = vld [vmem:[#allocation8 + $0x1a0] sm:$0xff]  ;;  %v10145_v4 = vpack.c.bf16 %v540_v54, %v536_v53  ;;  %v537_v5 = vld [vmem:[#allocation8 + $0x190] sm:$0xff]  ;;  %v10148_v8 = vpack.c.bf16 %v542_v60, %v538_v59  ;;  %v202_v42 = vshrl.u32 %v201_v41, 7 }
  0x95   :  { %7472 = vmatpush1.bf16.msra.mxu1 %v10073_v3  ;;  %297 = vmatprep.mubr.f32.mxu0 %v11879_v0  ;;  %v541_v7 = vld [vmem:[#allocation8 + $0x1b0] sm:$0xff]  ;;  %v544_v10 = vld [vmem:[#allocation8 + $0x1c8] sm:$0xff]  ;;  %v10154_v14 = vpack.c.bf16 %v539_v2, %v535_v63  ;;  %v546_v15 = vld [vmem:[#allocation8 + $0x1d8] sm:$0xff] }
  0x96   :  { %410 = vmatprep.mubr.f32.mxu1 %v11879_v0  ;;  %7442 = vmatprep.subr.bf16.mxu0 %v10077_v6  ;;  %v548_v11 = vld [vmem:[#allocation8 + $0x1e8] sm:$0xff]  ;;  %v550_v17 = vld [vmem:[#allocation8 + $0x1f8] sm:$0xff]  ;;  %v10158_v18 = vpack.c.bf16 %v541_v7, %v537_v5  ;;  %v543_v20 = vld [vmem:[#allocation8 + $0x1c0] sm:$0xff]  ;;  %v10235_v45 = vsub.s32 0, %v202_v42  ;;  %v10240_v48 = vsub.s32 1, %v202_v42 }
  0x97   :  { %298 = vmatmul.mubr.f32.gmra.mrb[4].mxu0 %v129_v12  ;;  %7474 = vmatprep.subr.bf16.mxu1 %v10080_v9  ;;  %v547_v21 = vld [vmem:[#allocation8 + $0x1e0] sm:$0xff]  ;;  %v10167_v24 = vpack.c.bf16 %v548_v11, %v544_v10  ;;  %v549_v27 = vld [vmem:[#allocation8 + $0x1f0] sm:$0xff]  ;;  %v10170_v28 = vpack.c.bf16 %v550_v17, %v546_v15  ;;  %v134_v30 = vld [vmem:[%s11866_s1 + $0x38] sm:$0xff]  ;;  %v10255_v10 = vsub.s32 2, %v202_v42 }
  0x98   :  { %411 = vmatmul.mubr.f32.gmra.mrb[4].mxu1 %v129_v12  ;;  %7444 = vmatpush1.bf16.msra.mxu0 %v10086_v13  ;;  %v133_v12 = vld [vmem:[%s11866_s1 + $0x30] sm:$0xff]  ;;  %v10163_v23 = vld [vmem:[%s11865_s0] sm:$0xff]  ;;  %v10176_v31 = vpack.c.bf16 %v547_v21, %v543_v20  ;;  %11890 = vst [vmem:[#allocation20_spill] sm:$0xff] %v10240_v48 }
  0x99   :  { %7476 = vmatpush1.bf16.msra.mxu1 %v10090_v16  ;;  %303 = vmatprep.mubr.f32.mxu0 %v11879_v0  ;;  %vm721_vm0 = vcmp.gt.s32.totalorder %v10163_v23, 0  ;;  %vm973_vm1 = vcmp.gt.s32.totalorder %v10163_v23, 1  ;;  %vm1732_vm2 = vcmp.gt.s32.totalorder %v10163_v23, 4  ;;  %vm2238_vm3 = vcmp.gt.s32.totalorder %v10163_v23, 6  ;;  %v199_v46 = vld [vmem:[%s11869_s4] sm:$0xf] }
  0x9a   :  { %416 = vmatprep.mubr.f32.mxu1 %v11879_v0  ;;  %7446 = vmatprep.subr.bf16.mxu0 %v10094_v19  ;;  %v722_v34 = vsel %vm721_vm0, 1, %v9860_v1  ;;  %v974_v36 = vsel %vm973_vm1, 1, %v9860_v1  ;;  %v1733_v37 = vsel %vm1732_vm2, 1, %v9860_v1  ;;  %v10243_v50 = vrot.slane %v199_v46, %v10235_v45  ;;  %11892 = vst [vmem:[#allocation22_spill] sm:$0xff] %v10255_v10 }
  0x9b   :  { %304 = vmatmul.mubr.f32.gmra.mrb[6].mxu0 %v130_v25  ;;  %7478 = vmatprep.subr.bf16.mxu1 %v10097_v22  ;;  %v10246_v53 = vrot.slane %v199_v46, %v10240_v48  ;;  %vm1226_vm5 = vcmp.gt.s32.totalorder %v10163_v23, 2  ;;  %vm1479_vm6 = vcmp.gt.s32.totalorder %v10163_v23, 3  ;;  %vm1985_vm7 = vcmp.gt.s32.totalorder %v10163_v23, 5 }
  0x9c   :  { %417 = vmatmul.mubr.f32.gmra.mrb[6].mxu1 %v130_v25  ;;  %7448 = vmatpush1.bf16.msra.mxu0 %v10103_v26  ;;  %v545_v25 = vld [vmem:[#allocation8 + $0x1d0] sm:$0xff]  ;;  %vm2491_vm8 = vcmp.gt.s32.totalorder %v10163_v23, 7  ;;  %vm9862_vm0 = vmmov 0  }
  0x9d   :  { %7480 = vmatpush1.bf16.msra.mxu1 %v10107_v29  ;;  %309 = vmatprep.mubr.f32.mxu0 %v11879_v0  ;;  %v10181_v33 = vpack.c.bf16 %v549_v27, %v545_v25 }
  0x9e   :  { %422 = vmatprep.mubr.f32.mxu1 %v11879_v0  ;;  %7450 = vmatprep.subr.bf16.mxu0 %v10111_v32 }
  0x9f   :  { %310 = vmatmul.mubr.f32.gmra.mrb[8].mxu0 %v131_v38  ;;  %7482 = vmatprep.subr.bf16.mxu1 %v10114_v35 }
  0xa0   :  { %423 = vmatmul.mubr.f32.gmra.mrb[8].mxu1 %v131_v38  ;;  %7452 = vmatpush1.bf16.msra.mxu0 %v10120_v39  ;;  %v2239_v38 = vsel %vm2238_vm3, 1, %v9860_v1 }
  0xa1   :  { %7484 = vmatpush1.bf16.msra.mxu1 %v10124_v44  ;;  %315 = vmatprep.mubr.f32.mxu0 %v11879_v0 }
  0xa2   :  { %428 = vmatprep.mubr.f32.mxu1 %v11879_v0  ;;  %7454 = vmatprep.subr.bf16.mxu0 %v10128_v47 }
  0xa3   :  { %316 = vmatmul.mubr.f32.gmra.mrb[10].mxu0 %v132_v56  ;;  %7486 = vmatprep.subr.bf16.mxu1 %v10131_v51 }
  0xa4   :  { %429 = vmatmul.mubr.f32.gmra.mrb[10].mxu1 %v132_v56  ;;  %7456 = vmatpush1.bf16.msra.mxu0 %v10137_v57 }
  0xa5   :  { %7488 = vmatpush1.bf16.msra.mxu1 %v10141_v61  ;;  %321 = vmatprep.mubr.f32.mxu0 %v11879_v0 }
  0xa6   :  { %434 = vmatprep.mubr.f32.mxu1 %v11879_v0  ;;  %7458 = vmatprep.subr.bf16.mxu0 %v10145_v4 }
  0xa7   :  { %322 = vmatmul.mubr.f32.gmra.mrb[12].mxu0 %v133_v12  ;;  %7490 = vmatprep.subr.bf16.mxu1 %v10148_v8 }
  0xa8   :  { %435 = vmatmul.mubr.f32.gmra.mrb[12].mxu1 %v133_v12  ;;  %7460 = vmatpush1.bf16.msra.mxu0 %v10154_v14  ;;  %v10259_v12 = vrot.slane %v199_v46, %v10255_v10 }
  0xa9   :  { %7492 = vmatpush1.bf16.msra.mxu1 %v10158_v18  ;;  %327 = vmatprep.mubr.f32.mxu0 %v11879_v0 }
  0xaa   :  { %440 = vmatprep.mubr.f32.mxu1 %v11879_v0  ;;  %7462 = vmatprep.subr.bf16.mxu0 %v10167_v24 }
  0xab   :  { %328 = vmatmul.mubr.f32.gmra.mrb[14].mxu0 %v134_v30  ;;  %7494 = vmatprep.subr.bf16.mxu1 %v10170_v28 }
  0xac   :  { %441 = vmatmul.mubr.f32.gmra.mrb[14].mxu1 %v134_v30  ;;  %7464 = vmatpush1.bf16.msra.mxu0 %v10176_v31 }
  0xad   :  { %7496 = vmatpush1.bf16.msra.mxu1 %v10181_v33  ;;  %615 = vmatprep.mubr.f32.mxu0 %v11879_v0 }
  0xae   :  { %686 = vmatprep.mubr.f32.mxu1 %v11879_v0  ;;  %724 = vperm.xlu0 %9325, %v722_v34  }
  0xaf   :  { %616 = vmatmul.mubr.f32.vlgmr.msra.gmra.mrb[0].mxu0 %v11879_v0  ;;  %7498 = vmatprep.subr.bf16.mxu0 %v10048_v40 }
  0xb0   :  { %687 = vmatmul.mubr.f32.vlgmr.msra.gmra.mrb[0].mxu1 %v11879_v0  ;;  %7530 = vmatprep.subr.bf16.mxu1 %v10050_v43 }
  0xb1   :  { %7500 = vmatpush1.bf16.msra.mxu0 %v10055_v49  ;;  %7532 = vmatpush1.bf16.msra.mxu1 %v10058_v52 }
  0xb2   :  { %976 = vperm.xlu0 %9325, %v974_v36   ;;  %7502 = vmatprep.subr.bf16.mxu0 %v10061_v55 }
  0xb3   :  { %7534 = vmatprep.subr.bf16.mxu1 %v10063_v58  ;;  %867 = vmatprep.mubr.f32.mxu0 %v11879_v0 }
  0xb4   :  { %938 = vmatprep.mubr.f32.mxu1 %v11879_v0 }
  0xb5   :  { %7504 = vmatpush1.bf16.msra.mxu0 %v10069_v62  ;;  %7536 = vmatpush1.bf16.msra.mxu1 %v10073_v3 }
  0xb6   :  { %1735 = vperm.xlu0 %9325, %v1733_v37   ;;  %7506 = vmatprep.subr.bf16.mxu0 %v10077_v6 }
  0xb7   :  { %7538 = vmatprep.subr.bf16.mxu1 %v10080_v9 }
  0xb9   :  { %7508 = vmatpush1.bf16.msra.mxu0 %v10086_v13  ;;  %7540 = vmatpush1.bf16.msra.mxu1 %v10090_v16 }
  0xba   :  { %2241 = vperm.xlu0 %9325, %v2239_v38   ;;  %7510 = vmatprep.subr.bf16.mxu0 %v10094_v19 }
  0xbb   :  { %7542 = vmatprep.subr.bf16.mxu1 %v10097_v22 }
  0xbd   :  { %7512 = vmatpush1.bf16.msra.mxu0 %v10103_v26  ;;  %7544 = vmatpush1.bf16.msra.mxu1 %v10107_v29 }
  0xbe   :  { %7514 = vmatprep.subr.bf16.mxu0 %v10111_v32  ;;  %7546 = vmatprep.subr.bf16.mxu1 %v10114_v35 }
  0xc1   :  { %7516 = vmatpush1.bf16.msra.mxu0 %v10120_v39  ;;  %7548 = vmatpush1.bf16.msra.mxu1 %v10124_v44 }
  0xc2   :  { %7518 = vmatprep.subr.bf16.mxu0 %v10128_v47  ;;  %7550 = vmatprep.subr.bf16.mxu1 %v10131_v51 }
  0xc5   :  { %7520 = vmatpush1.bf16.msra.mxu0 %v10137_v57  ;;  %7552 = vmatpush1.bf16.msra.mxu1 %v10141_v61 }
  0xc6   :  { %7522 = vmatprep.subr.bf16.mxu0 %v10145_v4  ;;  %7554 = vmatprep.subr.bf16.mxu1 %v10148_v8 }
  0xc9   :  { %7524 = vmatpush1.bf16.msra.mxu0 %v10154_v14  ;;  %7556 = vmatpush1.bf16.msra.mxu1 %v10158_v18 }
  0xca   :  { %7526 = vmatprep.subr.bf16.mxu0 %v10167_v24  ;;  %7558 = vmatprep.subr.bf16.mxu1 %v10170_v28 }
  0xcd   :  { %7528 = vmatpush1.bf16.msra.mxu0 %v10176_v31  ;;  %7560 = vmatpush1.bf16.msra.mxu1 %v10181_v33 }
  0xce   :  { %7562 = vmatprep.subr.bf16.mxu0 %v10048_v40  ;;  %7594 = vmatprep.subr.bf16.mxu1 %v10050_v43  ;;  %v10248_v40 = vsub.s32 3, %v202_v42 }
  0xd0   :  { %11891 = vst [vmem:[#allocation21_spill] sm:$0xff] %v10248_v40  ;;  %v10253_v7 = vrot.slane %v199_v46, %v10248_v40 }
 0x182   :  { %v617_v54 = vpop.f32.mrb[0].mxu0 }
 0x183   :  { %v9121_v43 = vadd.f32 %v617_v54, %v10243_v50  ;;  %v688_v56 = vpop.f32.mrb[0].mxu1  ;;  %v619_v59 = vpop.f32.mrb[1].mxu0 }
 0x184   :  { %v9122_v60 = vadd.f32 %v619_v59, %v10246_v53  ;;  %v690_v63 = vpop.f32.mrb[1].mxu1  ;;  %v9137_v17 = vadd.f32 %v688_v56, %v10259_v12 }
 0x185   :  { %v7234_v2 = vmul.f32 -1.442695, %v9121_v43  ;;  %v9138_v11 = vadd.f32 %v690_v63, %v10253_v7  ;;  %v10265_v43 = vpop.permute.xlu0 %724 }
 0x186   :  { %v7235_v5 = vmul.f32 -1.442695, %v9122_v60  ;;  %vm726_vm4 = vcmp.eq.s32.totalorder %v10265_v43, 1 }
 0x187   :  { %9327 = vpow2.f32 %v7234_v2  ;;  %v7236_v15 = vmul.f32 -1.442695, %v9138_v11  ;;  %v1250_v11 = vld [vmem:[#allocation8 + $0x28] sm:$0xff] }
 0x188   :  { %9329 = vpow2.f32 %v7235_v5  ;;  %v1246_v5 = vld [vmem:[#allocation8 + $0x8] sm:$0xff] }
 0x189   :  { %9331 = vpow2.f32 %v7236_v15  ;;  %v10323_v23 = vpop.permute.xlu0 %976  ;;  %v1248_v15 = vld [vmem:[#allocation8 + $0x18] sm:$0xff] }
 0x18a   :  { %9333 = vtanh.f32 %v9137_v17  ;;  %11893 = vst [vmem:[#allocation23_spill] sm:$0xff] %v10323_v23  ;;  %vm978_vm9 = vcmp.eq.s32.totalorder %v10323_v23, 1  ;;  %v10341_v17 = vpack.c.bf16 %v1250_v11, %v1246_v5  ;;  %v1280_v5 = vld [vmem:[#allocation8 + $0x118] sm:$0xff] }
 0x191   :  { %v9328_v20 = vpop.eup %9327 }
 0x192   :  { %v9330_v21 = vpop.eup %9329  ;;  %v700_v25 = vadd.f32 1.0, %v9328_v20  ;;  %v1252_v20 = vld [vmem:[#allocation8 + $0x38] sm:$0xff] }
 0x193   :  { %v706_v27 = vadd.f32 1.0, %v9330_v21  ;;  %v9332_v30 = vpop.eup %9331  ;;  %v1245_v21 = vld [vmem:[#allocation8] sm:$0xff] }
 0x194   :  { %9335 = vrcp.f32 %v700_v25  ;;  %v9334_v34 = vpop.eup %9333  ;;  %v713_v41 = vadd.f32 1.0, %v9332_v30  ;;  %v1249_v25 = vld [vmem:[#allocation8 + $0x20] sm:$0xff] }
 0x195   :  { %9337 = vrcp.f32 %v706_v27  ;;  %v10343_v27 = vpack.c.bf16 %v1252_v20, %v1248_v15  ;;  %v10345_v30 = vpack.c.bf16 %v1249_v25, %v1245_v21  ;;  %v1284_v15 = vld [vmem:[#allocation8 + $0x138] sm:$0xff]  ;;  %v1277_v20 = vld [vmem:[#allocation8 + $0x100] sm:$0xff] }
 0x196   :  { %9339 = vrcp.f32 %v713_v41  ;;  %v1258_v41 = vld [vmem:[#allocation8 + $0x68] sm:$0xff]  ;;  %v1281_v21 = vld [vmem:[#allocation8 + $0x120] sm:$0xff]  ;;  %v10391_v25 = vpack.c.bf16 %v1284_v15, %v1280_v5 }
 0x197   :  { %v1306_v5 = vld [vmem:[#allocation8 + $0x1e8] sm:$0xff] }
 0x19e   :  { %v9336_v36 = vpop.eup %9335 }
 0x19f   :  { %v9338_v37 = vpop.eup %9337  ;;  %v717_v38 = vmul.f32 %v9336_v36, %v9334_v34  ;;  %v1247_v34 = vld [vmem:[#allocation8 + $0x10] sm:$0xff] }
 0x1a0   :  { %v716_v42 = vmul.f32 0.0, %v9338_v37  ;;  %v9340_v54 = vpop.eup %9339  ;;  %v1251_v36 = vld [vmem:[#allocation8 + $0x30] sm:$0xff] }
 0x1a1   :  { %v10348_v37 = vpack.c.bf16 %v1251_v36, %v1247_v34  ;;  %v10393_v34 = vpack.c.bf16 %v1281_v21, %v1277_v20  ;;  %v1279_v36 = vld [vmem:[#allocation8 + $0x110] sm:$0xff]  ;;  %v1304_v21 = vld [vmem:[#allocation8 + $0x1d8] sm:$0xff] }
 0x1a2   :  { %v10262_v46 = vadd.f32 %v717_v38, %v716_v42  ;;  %v1254_v38 = vld [vmem:[#allocation8 + $0x48] sm:$0xff]  ;;  %v1256_v42 = vld [vmem:[#allocation8 + $0x58] sm:$0xff] }
 0x1a4   :  { %9341 = vtanh.f32 %v10262_v46 }
 0x1ae   :  { %v9342_v56 = vpop.eup %9341 }
 0x1af   :  { %v10267_v59 = vmul.f32 %v9342_v56, %v9340_v54  ;;  %v1260_v54 = vld [vmem:[#allocation8 + $0x78] sm:$0xff]  ;;  %v1253_v56 = vld [vmem:[#allocation8 + $0x40] sm:$0xff] }
 0x1b1   :  { %7307 = vmatmul.mubr.msk.f32.vlgmr.msra.gmra.mrb[2].mxu0 %vm726_vm4, %v10267_v59  ;;  %7308 = vmatmul.mubr.msk.f32.vlgmr.msra.gmra.mrb[2].mxu1 %vm726_vm4, %v10267_v59  ;;  %v727_v63 = vsel %vm726_vm4, %v10267_v59, 0.0 }
 0x1b2   :  { %7564 = vmatpush1.bf16.msra.mxu0 %v10055_v49  ;;  %7596 = vmatpush1.bf16.msra.mxu1 %v10058_v52  ;;  %v1227_v49 = vsel %vm1226_vm5, 1, %v9860_v1  ;;  %v1480_v52 = vsel %vm1479_vm6, 1, %v9860_v1 }
 0x1b3   :  { %7566 = vmatprep.subr.bf16.mxu0 %v10061_v55  ;;  %7598 = vmatprep.subr.bf16.mxu1 %v10063_v58  ;;  %v1986_v55 = vsel %vm1985_vm7, 1, %v9860_v1  ;;  %v2492_v58 = vsel %vm2491_vm8, 1, %v9860_v1 }
 0x1b4   :  { %1120 = vmatprep.mubr.f32.mxu0 %v11879_v0  ;;  %1191 = vmatprep.mubr.f32.mxu1 %v11879_v0 }
 0x1b5   :  { %1229 = vperm.xlu1 %9326, %v1227_v49   ;;  %v1257_v49 = vld [vmem:[#allocation8 + $0x60] sm:$0xff] }
 0x1b6   :  { %7568 = vmatpush1.bf16.msra.mxu0 %v10069_v62  ;;  %7600 = vmatpush1.bf16.msra.mxu1 %v10073_v3 }
 0x1b7   :  { %7570 = vmatprep.subr.bf16.mxu0 %v10077_v6  ;;  %7602 = vmatprep.subr.bf16.mxu1 %v10080_v9 }
 0x1b9   :  { %1482 = vperm.xlu1 %9326, %v1480_v52   ;;  %v10355_v52 = vpack.c.bf16 %v1260_v54, %v1256_v42  ;;  %v1286_v42 = vld [vmem:[#allocation8 + $0x148] sm:$0xff] }
 0x1ba   :  { %7572 = vmatpush1.bf16.msra.mxu0 %v10086_v13  ;;  %7604 = vmatpush1.bf16.msra.mxu1 %v10090_v16  ;;  %v1290_v54 = vld [vmem:[#allocation8 + $0x168] sm:$0xff] }
 0x1bb   :  { %7574 = vmatprep.subr.bf16.mxu0 %v10094_v19  ;;  %7606 = vmatprep.subr.bf16.mxu1 %v10097_v22 }
 0x1bd   :  { %1988 = vperm.xlu1 %9326, %v1986_v55   ;;  %v10357_v55 = vpack.c.bf16 %v1257_v49, %v1253_v56  ;;  %v1288_v56 = vld [vmem:[#allocation8 + $0x158] sm:$0xff]  ;;  %v10401_v49 = vpack.c.bf16 %v1290_v54, %v1286_v42  ;;  %v1305_v54 = vld [vmem:[#allocation8 + $0x1e0] sm:$0xff] }
 0x1be   :  { %7576 = vmatpush1.bf16.msra.mxu0 %v10103_v26  ;;  %7608 = vmatpush1.bf16.msra.mxu1 %v10107_v29 }
 0x1bf   :  { %7578 = vmatprep.subr.bf16.mxu0 %v10111_v32  ;;  %7610 = vmatprep.subr.bf16.mxu1 %v10114_v35 }
 0x1c1   :  { %2494 = vperm.xlu1 %9326, %v2492_v58   ;;  %v1255_v58 = vld [vmem:[#allocation8 + $0x50] sm:$0xff] }
 0x1c2   :  { %7580 = vmatpush1.bf16.msra.mxu0 %v10120_v39  ;;  %7612 = vmatpush1.bf16.msra.mxu1 %v10124_v44 }
 0x1c3   :  { %7582 = vmatprep.subr.bf16.mxu0 %v10128_v47  ;;  %7614 = vmatprep.subr.bf16.mxu1 %v10131_v51 }
 0x1c6   :  { %7584 = vmatpush1.bf16.msra.mxu0 %v10137_v57  ;;  %7616 = vmatpush1.bf16.msra.mxu1 %v10141_v61 }
 0x1c7   :  { %7586 = vmatprep.subr.bf16.mxu0 %v10145_v4  ;;  %7618 = vmatprep.subr.bf16.mxu1 %v10148_v8  ;;  %v728_v8 = vsel %vm726_vm4, %v10262_v46, 0.0  ;;  %v10353_v46 = vpack.c.bf16 %v1258_v41, %v1254_v38  ;;  %v1283_v38 = vld [vmem:[#allocation8 + $0x130] sm:$0xff] }
 0x1c8   :  { %v10396_v41 = vpack.c.bf16 %v1283_v38, %v1279_v36  ;;  %v1308_v36 = vld [vmem:[#allocation8 + $0x1f8] sm:$0xff]  ;;  %v1301_v38 = vld [vmem:[#allocation8 + $0x1c0] sm:$0xff] }
 0x1c9   :  { %v10425_v42 = vpack.c.bf16 %v1308_v36, %v1304_v21 }
 0x1ca   :  { %7588 = vmatpush1.bf16.msra.mxu0 %v10154_v14  ;;  %7620 = vmatpush1.bf16.msra.mxu1 %v10158_v18 }
 0x1cb   :  { %7590 = vmatprep.subr.bf16.mxu0 %v10167_v24  ;;  %7622 = vmatprep.subr.bf16.mxu1 %v10170_v28 }
 0x1ce   :  { %7592 = vmatpush1.bf16.msra.mxu0 %v10176_v31  ;;  %7624 = vmatpush1.bf16.msra.mxu1 %v10181_v33 }
 0x1cf   :  { %7626 = vmatprep.subr.bf16.mxu0 %v10341_v17  ;;  %7658 = vmatprep.subr.bf16.mxu1 %v10343_v27 }
 0x284   :  { %v869_v62 = vpop.f32.mrb[2].mxu0  ;;  %v940_v3 = vpop.f32.mrb[2].mxu1 }
 0x285   :  { %v9123_v6 = vadd.f32 %v869_v62, %v10243_v50  ;;  %v871_v9 = vpop.f32.mrb[3].mxu0  ;;  %v942_v13 = vpop.f32.mrb[3].mxu1  ;;  %v9139_v32 = vadd.f32 %v940_v3, %v10259_v12  ;;  %v1259_v62 = vld [vmem:[#allocation8 + $0x70] sm:$0xff] }
 0x286   :  { %v9124_v16 = vadd.f32 %v871_v9, %v10246_v53  ;;  %v9140_v26 = vadd.f32 %v942_v13, %v10253_v7  ;;  %v10360_v3 = vpack.c.bf16 %v1259_v62, %v1255_v58  ;;  %v1266_v9 = vld [vmem:[#allocation8 + $0xa8] sm:$0xff]  ;;  %v1264_v13 = vld [vmem:[#allocation8 + $0x98] sm:$0xff]  ;;  %v1285_v62 = vld [vmem:[#allocation8 + $0x140] sm:$0xff] }
 0x287   :  { %v7237_v19 = vmul.f32 -1.442695, %v9123_v6  ;;  %v1262_v6 = vld [vmem:[#allocation8 + $0x88] sm:$0xff]  ;;  %v1292_v58 = vld [vmem:[#allocation8 + $0x178] sm:$0xff] }
 0x288   :  { %v7238_v22 = vmul.f32 -1.442695, %v9124_v16  ;;  %v7239_v29 = vmul.f32 -1.442695, %v9140_v26  ;;  %v10365_v16 = vpack.c.bf16 %v1266_v9, %v1262_v6  ;;  %v1265_v26 = vld [vmem:[#allocation8 + $0xa0] sm:$0xff]  ;;  %v10403_v9 = vpack.c.bf16 %v1292_v58, %v1288_v56  ;;  %v1303_v56 = vld [vmem:[#allocation8 + $0x1d0] sm:$0xff] }
 0x289   :  { %9343 = vpow2.f32 %v7237_v19  ;;  %v1268_v19 = vld [vmem:[#allocation8 + $0xb8] sm:$0xff]  ;;  %v1289_v6 = vld [vmem:[#allocation8 + $0x160] sm:$0xff]  ;;  %v1307_v58 = vld [vmem:[#allocation8 + $0x1f0] sm:$0xff] }
 0x28a   :  { %9345 = vpow2.f32 %v7238_v22  ;;  %v1261_v22 = vld [vmem:[#allocation8 + $0x80] sm:$0xff] }
 0x28b   :  { %9347 = vpow2.f32 %v7239_v29  ;;  %v10367_v29 = vpack.c.bf16 %v1268_v19, %v1264_v13  ;;  %v10405_v13 = vpack.c.bf16 %v1289_v6, %v1285_v62  ;;  %v1287_v19 = vld [vmem:[#allocation8 + $0x150] sm:$0xff]  ;;  %v10428_v62 = vpack.c.bf16 %v1305_v54, %v1301_v38 }
 0x28c   :  { %9349 = vtanh.f32 %v9139_v32  ;;  %v10369_v32 = vpack.c.bf16 %v1265_v26, %v1261_v22  ;;  %v1291_v22 = vld [vmem:[#allocation8 + $0x170] sm:$0xff]  ;;  %v1294_v26 = vld [vmem:[#allocation8 + $0x188] sm:$0xff]  ;;  %v10432_v6 = vpack.c.bf16 %v1307_v58, %v1303_v56 }
 0x293   :  { %v9344_v35 = vpop.eup %9343 }
 0x294   :  { %v9346_v1 = vpop.eup %9345  ;;  %v952_v39 = vadd.f32 1.0, %v9344_v35  ;;  %v1263_v35 = vld [vmem:[#allocation8 + $0x90] sm:$0xff] }
 0x295   :  { %v958_v44 = vadd.f32 1.0, %v9346_v1  ;;  %v9348_v47 = vpop.eup %9347  ;;  %v1267_v1 = vld [vmem:[#allocation8 + $0xb0] sm:$0xff] }
 0x296   :  { %9351 = vrcp.f32 %v952_v39  ;;  %v9350_v51 = vpop.eup %9349  ;;  %v965_v14 = vadd.f32 1.0, %v9348_v47  ;;  %v10372_v39 = vpack.c.bf16 %v1267_v1, %v1263_v35  ;;  %v1274_v47 = vld [vmem:[#allocation8 + $0xe8] sm:$0xff]  ;;  %v10408_v35 = vpack.c.bf16 %v1291_v22, %v1287_v19 }
 0x297   :  { %9353 = vrcp.f32 %v958_v44  ;;  %v1270_v44 = vld [vmem:[#allocation8 + $0xc8] sm:$0xff] }
 0x298   :  { %9355 = vrcp.f32 %v965_v14  ;;  %v1298_v1 = vld [vmem:[#allocation8 + $0x1a8] sm:$0xff] }
 0x2a0   :  { %v9352_v57 = vpop.eup %9351 }
 0x2a1   :  { %v9354_v61 = vpop.eup %9353  ;;  %v969_v4 = vmul.f32 %v9352_v57, %v9350_v51  ;;  %v1272_v51 = vld [vmem:[#allocation8 + $0xd8] sm:$0xff]  ;;  %v10377_v57 = vpack.c.bf16 %v1274_v47, %v1270_v44 }
 0x2a2   :  { %v968_v18 = vmul.f32 %v9354_v61, %v728_v8  ;;  %v9356_v31 = vpop.eup %9355  ;;  %v1276_v61 = vld [vmem:[#allocation8 + $0xf8] sm:$0xff] }
 0x2a3   :  { %v10379_v14 = vpack.c.bf16 %v1276_v61, %v1272_v51  ;;  %v1296_v44 = vld [vmem:[#allocation8 + $0x198] sm:$0xff]  ;;  %v10412_v51 = vpack.c.bf16 %v1298_v1, %v1294_v26 }
 0x2a4   :  { %v970_v24 = vadd.f32 %v969_v4, %v968_v18  ;;  %v1269_v4 = vld [vmem:[#allocation8 + $0xc0] sm:$0xff]  ;;  %v1300_v47 = vld [vmem:[#allocation8 + $0x1b8] sm:$0xff] }
 0x2a5   :  { %v10414_v61 = vpack.c.bf16 %v1300_v47, %v1296_v44 }
 0x2a6   :  { %9357 = vtanh.f32 %v970_v24  ;;  %v10328_v28 = vsel %vm978_vm9, %v970_v24, %v728_v8  ;;  %v1273_v8 = vld [vmem:[#allocation8 + $0xe0] sm:$0xff]  ;;  %v1271_v24 = vld [vmem:[#allocation8 + $0xd0] sm:$0xff] }
 0x2a7   :  { %v10381_v18 = vpack.c.bf16 %v1273_v8, %v1269_v4  ;;  %v1293_v4 = vld [vmem:[#allocation8 + $0x180] sm:$0xff] }
 0x2a8   :  { %v1297_v8 = vld [vmem:[#allocation8 + $0x1a0] sm:$0xff] }
 0x2b0   :  { %v9358_v33 = vpop.eup %9357 }
 0x2b1   :  { %v972_v60 = vmul.f32 %v9358_v33, %v9356_v31  ;;  %v1275_v31 = vld [vmem:[#allocation8 + $0xf0] sm:$0xff] }
 0x2b2   :  { %v10384_v33 = vpack.c.bf16 %v1275_v31, %v1271_v24  ;;  %v1295_v24 = vld [vmem:[#allocation8 + $0x190] sm:$0xff]  ;;  %v10417_v31 = vpack.c.bf16 %v1297_v8, %v1293_v4 }
 0x2b3   :  { %v10335_v2 = vsel %vm978_vm9, %v972_v60, %v727_v63  ;;  %v1278_v60 = vld [vmem:[#allocation8 + $0x108] sm:$0xff] }
 0x2b4   :  { %1121 = vmatmul.mubr.f32.vlgmr.msra.gmra.mrb[4].mxu0 %v10335_v2  ;;  %1192 = vmatmul.mubr.f32.vlgmr.msra.gmra.mrb[4].mxu1 %v10335_v2  ;;  %v1282_v63 = vld [vmem:[#allocation8 + $0x128] sm:$0xff] }
 0x2b5   :  { %1373 = vmatprep.mubr.f32.mxu0 %v11879_v0  ;;  %1444 = vmatprep.mubr.f32.mxu1 %v11879_v0  ;;  %v10389_v11 = vpack.c.bf16 %v1282_v63, %v1278_v60  ;;  %v1299_v60 = vld [vmem:[#allocation8 + $0x1b0] sm:$0xff]  ;;  %v1302_v63 = vld [vmem:[#allocation8 + $0x1c8] sm:$0xff] }
 0x2b6   :  { %7628 = vmatpush1.bf16.msra.mxu0 %v10345_v30  ;;  %7660 = vmatpush1.bf16.msra.mxu1 %v10348_v37  ;;  %v10421_v15 = vpack.c.bf16 %v1299_v60, %v1295_v24  ;;  %v10423_v20 = vpack.c.bf16 %v1306_v5, %v1302_v63 }
 0x2b7   :  { %7630 = vmatprep.subr.bf16.mxu0 %v10353_v46  ;;  %7662 = vmatprep.subr.bf16.mxu1 %v10355_v52 }
 0x2ba   :  { %7632 = vmatpush1.bf16.msra.mxu0 %v10357_v55  ;;  %7664 = vmatpush1.bf16.msra.mxu1 %v10360_v3 }
 0x2bb   :  { %7634 = vmatprep.subr.bf16.mxu0 %v10365_v16  ;;  %7666 = vmatprep.subr.bf16.mxu1 %v10367_v29 }
 0x2be   :  { %7636 = vmatpush1.bf16.msra.mxu0 %v10369_v32  ;;  %7668 = vmatpush1.bf16.msra.mxu1 %v10372_v39 }
 0x2bf   :  { %7638 = vmatprep.subr.bf16.mxu0 %v10377_v57  ;;  %7670 = vmatprep.subr.bf16.mxu1 %v10379_v14 }
 0x2c2   :  { %7640 = vmatpush1.bf16.msra.mxu0 %v10381_v18  ;;  %7672 = vmatpush1.bf16.msra.mxu1 %v10384_v33 }
 0x2c3   :  { %7642 = vmatprep.subr.bf16.mxu0 %v10389_v11  ;;  %7674 = vmatprep.subr.bf16.mxu1 %v10391_v25 }
 0x2c6   :  { %7644 = vmatpush1.bf16.msra.mxu0 %v10393_v34  ;;  %7676 = vmatpush1.bf16.msra.mxu1 %v10396_v41 }
 0x2c7   :  { %7646 = vmatprep.subr.bf16.mxu0 %v10401_v49  ;;  %7678 = vmatprep.subr.bf16.mxu1 %v10403_v9 }
 0x2ca   :  { %7648 = vmatpush1.bf16.msra.mxu0 %v10405_v13  ;;  %7680 = vmatpush1.bf16.msra.mxu1 %v10408_v35 }
 0x2cb   :  { %7650 = vmatprep.subr.bf16.mxu0 %v10412_v51  ;;  %7682 = vmatprep.subr.bf16.mxu1 %v10414_v61 }
 0x2ce   :  { %7652 = vmatpush1.bf16.msra.mxu0 %v10417_v31  ;;  %7684 = vmatpush1.bf16.msra.mxu1 %v10421_v15 }
 0x2cf   :  { %7654 = vmatprep.subr.bf16.mxu0 %v10423_v20  ;;  %7686 = vmatprep.subr.bf16.mxu1 %v10425_v42 }
 0x2d2   :  { %7656 = vmatpush1.bf16.msra.mxu0 %v10428_v62  ;;  %7688 = vmatpush1.bf16.msra.mxu1 %v10432_v6 }
 0x2d3   :  { %7690 = vmatprep.subr.bf16.mxu0 %v10341_v17  ;;  %7722 = vmatprep.subr.bf16.mxu1 %v10343_v27 }
 0x387   :  { %v1122_v19 = vpop.f32.mrb[4].mxu0  ;;  %v1193_v22 = vpop.f32.mrb[4].mxu1 }
 0x388   :  { %v9125_v26 = vadd.f32 %v1122_v19, %v10243_v50  ;;  %v1124_v1 = vpop.f32.mrb[5].mxu0  ;;  %v1195_v44 = vpop.f32.mrb[5].mxu1  ;;  %v9141_v63 = vadd.f32 %v1193_v22, %v10259_v12 }
 0x389   :  { %v9126_v47 = vadd.f32 %v1124_v1, %v10246_v53  ;;  %v9142_v24 = vadd.f32 %v1195_v44, %v10253_v7  ;;  %v10443_v19 = vpop.permute.xlu1 %1229 }
 0x38a   :  { %v7240_v4 = vmul.f32 -1.442695, %v9125_v26  ;;  %11894 = vst [vmem:[#allocation24_spill] sm:$0xff] %v10443_v19  ;;  %vm1231_vm10 = vcmp.eq.s32.totalorder %v10443_v19, 1 }
 0x38b   :  { %v7241_v8 = vmul.f32 -1.442695, %v9126_v47  ;;  %v7242_v60 = vmul.f32 -1.442695, %v9142_v24 }
 0x38c   :  { %9359 = vpow2.f32 %v7240_v4 }
 0x38d   :  { %9361 = vpow2.f32 %v7241_v8 }
 0x38e   :  { %9363 = vpow2.f32 %v7242_v60 }
 0x38f   :  { %9365 = vtanh.f32 %v9141_v63 }
 0x396   :  { %v9360_v5 = vpop.eup %9359 }
 0x397   :  { %v9362_v21 = vpop.eup %9361  ;;  %v1205_v36 = vadd.f32 1.0, %v9360_v5 }
 0x398   :  { %v1211_v38 = vadd.f32 1.0, %v9362_v21  ;;  %v9364_v54 = vpop.eup %9363 }
 0x399   :  { %9367 = vrcp.f32 %v1205_v36  ;;  %v9366_v56 = vpop.eup %9365  ;;  %v1218_v47 = vadd.f32 1.0, %v9364_v54 }
 0x39a   :  { %9369 = vrcp.f32 %v1211_v38 }
 0x39b   :  { %9371 = vrcp.f32 %v1218_v47 }
 0x3a3   :  { %v9368_v58 = vpop.eup %9367 }
 0x3a4   :  { %v9370_v26 = vpop.eup %9369  ;;  %v1222_v1 = vmul.f32 %v9368_v58, %v9366_v56 }
 0x3a5   :  { %v1221_v44 = vmul.f32 %v9370_v26, %v10328_v28  ;;  %v9372_v8 = vpop.eup %9371 }
 0x3a7   :  { %v1223_v22 = vadd.f32 %v1222_v1, %v1221_v44 }
 0x3a9   :  { %9373 = vtanh.f32 %v1223_v22  ;;  %v10450_v4 = vsel %vm1231_vm10, %v1223_v22, %v10328_v28 }
 0x3b3   :  { %v9374_v24 = vpop.eup %9373 }
 0x3b4   :  { %v1225_v60 = vmul.f32 %v9374_v24, %v9372_v8 }
 0x3b6   :  { %v10455_v63 = vsel %vm1231_vm10, %v1225_v60, %v10335_v2 }
 0x3b7   :  { %1374 = vmatmul.mubr.f32.vlgmr.msra.gmra.mrb[6].mxu0 %v10455_v63  ;;  %1445 = vmatmul.mubr.f32.vlgmr.msra.gmra.mrb[6].mxu1 %v10455_v63 }
 0x3b8   :  { %7692 = vmatpush1.bf16.msra.mxu0 %v10345_v30  ;;  %7724 = vmatpush1.bf16.msra.mxu1 %v10348_v37 }
 0x3b9   :  { %7694 = vmatprep.subr.bf16.mxu0 %v10353_v46  ;;  %7726 = vmatprep.subr.bf16.mxu1 %v10355_v52 }
 0x3ba   :  { %1626 = vmatprep.mubr.f32.mxu0 %v11879_v0  ;;  %1697 = vmatprep.mubr.f32.mxu1 %v11879_v0 }
 0x3bc   :  { %7696 = vmatpush1.bf16.msra.mxu0 %v10357_v55  ;;  %7728 = vmatpush1.bf16.msra.mxu1 %v10360_v3 }
 0x3bd   :  { %7698 = vmatprep.subr.bf16.mxu0 %v10365_v16  ;;  %7730 = vmatprep.subr.bf16.mxu1 %v10367_v29 }
 0x3c0   :  { %7700 = vmatpush1.bf16.msra.mxu0 %v10369_v32  ;;  %7732 = vmatpush1.bf16.msra.mxu1 %v10372_v39 }
 0x3c1   :  { %7702 = vmatprep.subr.bf16.mxu0 %v10377_v57  ;;  %7734 = vmatprep.subr.bf16.mxu1 %v10379_v14 }
 0x3c4   :  { %7704 = vmatpush1.bf16.msra.mxu0 %v10381_v18  ;;  %7736 = vmatpush1.bf16.msra.mxu1 %v10384_v33 }
 0x3c5   :  { %7706 = vmatprep.subr.bf16.mxu0 %v10389_v11  ;;  %7738 = vmatprep.subr.bf16.mxu1 %v10391_v25 }
 0x3c8   :  { %7708 = vmatpush1.bf16.msra.mxu0 %v10393_v34  ;;  %7740 = vmatpush1.bf16.msra.mxu1 %v10396_v41 }
 0x3c9   :  { %7710 = vmatprep.subr.bf16.mxu0 %v10401_v49  ;;  %7742 = vmatprep.subr.bf16.mxu1 %v10403_v9 }
 0x3cc   :  { %7712 = vmatpush1.bf16.msra.mxu0 %v10405_v13  ;;  %7744 = vmatpush1.bf16.msra.mxu1 %v10408_v35 }
 0x3cd   :  { %7714 = vmatprep.subr.bf16.mxu0 %v10412_v51  ;;  %7746 = vmatprep.subr.bf16.mxu1 %v10414_v61 }
 0x3d0   :  { %7716 = vmatpush1.bf16.msra.mxu0 %v10417_v31  ;;  %7748 = vmatpush1.bf16.msra.mxu1 %v10421_v15 }
 0x3d1   :  { %7718 = vmatprep.subr.bf16.mxu0 %v10423_v20  ;;  %7750 = vmatprep.subr.bf16.mxu1 %v10425_v42 }
 0x3d4   :  { %7720 = vmatpush1.bf16.msra.mxu0 %v10428_v62  ;;  %7752 = vmatpush1.bf16.msra.mxu1 %v10432_v6 }
 0x3d5   :  { %7754 = vmatprep.subr.bf16.mxu0 %v10341_v17  ;;  %7786 = vmatprep.subr.bf16.mxu1 %v10343_v27 }
 0x48a   :  { %v1375_v28 = vpop.f32.mrb[6].mxu0  ;;  %v1446_v5 = vpop.f32.mrb[6].mxu1 }
 0x48b   :  { %v9127_v21 = vadd.f32 %v1375_v28, %v10243_v50  ;;  %v1377_v36 = vpop.f32.mrb[7].mxu0  ;;  %v1448_v38 = vpop.f32.mrb[7].mxu1  ;;  %v9143_v47 = vadd.f32 %v1446_v5, %v10259_v12 }
 0x48c   :  { %v9128_v54 = vadd.f32 %v1377_v36, %v10246_v53  ;;  %v9144_v26 = vadd.f32 %v1448_v38, %v10253_v7  ;;  %v10498_v38 = vpop.permute.xlu1 %1482 }
 0x48d   :  { %v7243_v56 = vmul.f32 -1.442695, %v9127_v21  ;;  %11895 = vst [vmem:[#allocation25_spill] sm:$0xff] %v10498_v38  ;;  %vm1484_vm11 = vcmp.eq.s32.totalorder %v10498_v38, 1 }
 0x48e   :  { %v7244_v58 = vmul.f32 -1.442695, %v9128_v54  ;;  %v7245_v1 = vmul.f32 -1.442695, %v9144_v26 }
 0x48f   :  { %9375 = vpow2.f32 %v7243_v56 }
 0x490   :  { %9377 = vpow2.f32 %v7244_v58 }
 0x491   :  { %9379 = vpow2.f32 %v7245_v1 }
 0x492   :  { %9381 = vtanh.f32 %v9143_v47 }
 0x499   :  { %v9376_v44 = vpop.eup %9375 }
 0x49a   :  { %v9378_v22 = vpop.eup %9377  ;;  %v1458_v8 = vadd.f32 1.0, %v9376_v44 }
 0x49b   :  { %v1464_v24 = vadd.f32 1.0, %v9378_v22  ;;  %v9380_v60 = vpop.eup %9379 }
 0x49c   :  { %9383 = vrcp.f32 %v1458_v8  ;;  %v9382_v28 = vpop.eup %9381  ;;  %v1471_v56 = vadd.f32 1.0, %v9380_v60 }
 0x49d   :  { %9385 = vrcp.f32 %v1464_v24 }
 0x49e   :  { %9387 = vrcp.f32 %v1471_v56 }
 0x4a6   :  { %v9384_v36 = vpop.eup %9383 }
 0x4a7   :  { %v9386_v21 = vpop.eup %9385  ;;  %v1475_v54 = vmul.f32 %v9384_v36, %v9382_v28 }
 0x4a8   :  { %v1474_v58 = vmul.f32 %v9386_v21, %v10450_v4  ;;  %v9388_v1 = vpop.eup %9387 }
 0x4aa   :  { %v1476_v26 = vadd.f32 %v1475_v54, %v1474_v58 }
 0x4ac   :  { %9389 = vtanh.f32 %v1476_v26  ;;  %v10504_v5 = vsel %vm1484_vm11, %v1476_v26, %v10450_v4 }
 0x4b6   :  { %v9390_v47 = vpop.eup %9389 }
 0x4b7   :  { %v1478_v44 = vmul.f32 %v9390_v47, %v9388_v1 }
 0x4b9   :  { %v10509_v22 = vsel %vm1484_vm11, %v1478_v44, %v10455_v63 }
 0x4ba   :  { %1627 = vmatmul.mubr.f32.vlgmr.msra.gmra.mrb[8].mxu0 %v10509_v22  ;;  %1698 = vmatmul.mubr.f32.vlgmr.msra.gmra.mrb[8].mxu1 %v10509_v22 }
 0x4bb   :  { %7756 = vmatpush1.bf16.msra.mxu0 %v10345_v30  ;;  %7788 = vmatpush1.bf16.msra.mxu1 %v10348_v37 }
 0x4bc   :  { %7758 = vmatprep.subr.bf16.mxu0 %v10353_v46  ;;  %7790 = vmatprep.subr.bf16.mxu1 %v10355_v52 }
 0x4bd   :  { %1879 = vmatprep.mubr.f32.mxu0 %v11879_v0  ;;  %1950 = vmatprep.mubr.f32.mxu1 %v11879_v0 }
 0x4bf   :  { %7760 = vmatpush1.bf16.msra.mxu0 %v10357_v55  ;;  %7792 = vmatpush1.bf16.msra.mxu1 %v10360_v3 }
 0x4c0   :  { %7762 = vmatprep.subr.bf16.mxu0 %v10365_v16  ;;  %7794 = vmatprep.subr.bf16.mxu1 %v10367_v29 }
 0x4c3   :  { %7764 = vmatpush1.bf16.msra.mxu0 %v10369_v32  ;;  %7796 = vmatpush1.bf16.msra.mxu1 %v10372_v39 }
 0x4c4   :  { %7766 = vmatprep.subr.bf16.mxu0 %v10377_v57  ;;  %7798 = vmatprep.subr.bf16.mxu1 %v10379_v14 }
 0x4c7   :  { %7768 = vmatpush1.bf16.msra.mxu0 %v10381_v18  ;;  %7800 = vmatpush1.bf16.msra.mxu1 %v10384_v33 }
 0x4c8   :  { %7770 = vmatprep.subr.bf16.mxu0 %v10389_v11  ;;  %7802 = vmatprep.subr.bf16.mxu1 %v10391_v25 }
 0x4cb   :  { %7772 = vmatpush1.bf16.msra.mxu0 %v10393_v34  ;;  %7804 = vmatpush1.bf16.msra.mxu1 %v10396_v41 }
 0x4cc   :  { %7774 = vmatprep.subr.bf16.mxu0 %v10401_v49  ;;  %7806 = vmatprep.subr.bf16.mxu1 %v10403_v9 }
 0x4cf   :  { %7776 = vmatpush1.bf16.msra.mxu0 %v10405_v13  ;;  %7808 = vmatpush1.bf16.msra.mxu1 %v10408_v35 }
 0x4d0   :  { %7778 = vmatprep.subr.bf16.mxu0 %v10412_v51  ;;  %7810 = vmatprep.subr.bf16.mxu1 %v10414_v61 }
 0x4d3   :  { %7780 = vmatpush1.bf16.msra.mxu0 %v10417_v31  ;;  %7812 = vmatpush1.bf16.msra.mxu1 %v10421_v15 }
 0x4d4   :  { %7782 = vmatprep.subr.bf16.mxu0 %v10423_v20  ;;  %7814 = vmatprep.subr.bf16.mxu1 %v10425_v42 }
 0x4d7   :  { %7784 = vmatpush1.bf16.msra.mxu0 %v10428_v62  ;;  %7816 = vmatpush1.bf16.msra.mxu1 %v10432_v6 }
 0x4d8   :  { %7818 = vmatprep.subr.bf16.mxu0 %v10341_v17  ;;  %7850 = vmatprep.subr.bf16.mxu1 %v10343_v27 }
 0x58d   :  { %v1628_v4 = vpop.f32.mrb[8].mxu0  ;;  %v1699_v8 = vpop.f32.mrb[8].mxu1 }
 0x58e   :  { %v9129_v24 = vadd.f32 %v1628_v4, %v10243_v50  ;;  %v1630_v60 = vpop.f32.mrb[9].mxu0  ;;  %v1701_v28 = vpop.f32.mrb[9].mxu1  ;;  %v9145_v26 = vadd.f32 %v1699_v8, %v10259_v12 }
 0x58f   :  { %v9130_v36 = vadd.f32 %v1630_v60, %v10246_v53  ;;  %v9146_v56 = vadd.f32 %v1701_v28, %v10253_v7  ;;  %v10552_v28 = vpop.permute.xlu0 %1735 }
 0x590   :  { %v7246_v21 = vmul.f32 -1.442695, %v9129_v24  ;;  %vm1737_vm12 = vcmp.eq.s32.totalorder %v10552_v28, 1 }
 0x591   :  { %v7247_v54 = vmul.f32 -1.442695, %v9130_v36  ;;  %v7248_v58 = vmul.f32 -1.442695, %v9146_v56 }
 0x592   :  { %9391 = vpow2.f32 %v7246_v21 }
 0x593   :  { %9393 = vpow2.f32 %v7247_v54 }
 0x594   :  { %9395 = vpow2.f32 %v7248_v58 }
 0x595   :  { %9397 = vtanh.f32 %v9145_v26 }
 0x59c   :  { %v9392_v17 = vpop.eup %9391 }
 0x59d   :  { %v9394_v1 = vpop.eup %9393  ;;  %v1711_v27 = vadd.f32 1.0, %v9392_v17 }
 0x59e   :  { %v1717_v47 = vadd.f32 1.0, %v9394_v1  ;;  %v9396_v44 = vpop.eup %9395 }
 0x59f   :  { %9399 = vrcp.f32 %v1711_v27  ;;  %v9398_v4 = vpop.eup %9397  ;;  %v1724_v21 = vadd.f32 1.0, %v9396_v44  ;;  %v2260_v27 = vld [vmem:[#allocation8 + $0x18] sm:$0xff] }
 0x5a0   :  { %9401 = vrcp.f32 %v1717_v47  ;;  %v2264_v44 = vld [vmem:[#allocation8 + $0x38] sm:$0xff] }
 0x5a1   :  { %9403 = vrcp.f32 %v1724_v21  ;;  %v2259_v21 = vld [vmem:[#allocation8 + $0x10] sm:$0xff] }
 0x5a9   :  { %v9400_v60 = vpop.eup %9399 }
 0x5aa   :  { %v9402_v24 = vpop.eup %9401  ;;  %v1728_v36 = vmul.f32 %v9400_v60, %v9398_v4  ;;  %v2257_v4 = vld [vmem:[#allocation8] sm:$0xff] }
 0x5ab   :  { %v1727_v54 = vmul.f32 %v9402_v24, %v10504_v5  ;;  %v9404_v58 = vpop.eup %9403  ;;  %v2261_v60 = vld [vmem:[#allocation8 + $0x20] sm:$0xff]  ;;  %v7913_v24 = vpack.c.bf16 %v2264_v44, %v2260_v27  ;;  %v2287_v44 = vld [vmem:[#allocation8 + $0xf0] sm:$0xff] }
 0x5ad   :  { %v1729_v56 = vadd.f32 %v1728_v36, %v1727_v54  ;;  %v7883_v36 = vpack.c.bf16 %v2261_v60, %v2257_v4  ;;  %v2263_v54 = vld [vmem:[#allocation8 + $0x30] sm:$0xff]  ;;  %v2290_v60 = vld [vmem:[#allocation8 + $0x108] sm:$0xff] }
 0x5af   :  { %9405 = vtanh.f32 %v1729_v56  ;;  %v10558_v8 = vsel %vm1737_vm12, %v1729_v56, %v10504_v5  ;;  %v2262_v5 = vld [vmem:[#allocation8 + $0x28] sm:$0xff]  ;;  %v7915_v56 = vpack.c.bf16 %v2263_v54, %v2259_v21  ;;  %v2296_v54 = vld [vmem:[#allocation8 + $0x138] sm:$0xff] }
 0x5b9   :  { %v9406_v26 = vpop.eup %9405 }
 0x5ba   :  { %v1731_v17 = vmul.f32 %v9406_v26, %v9404_v58  ;;  %v2270_v58 = vld [vmem:[#allocation8 + $0x68] sm:$0xff]  ;;  %v2268_v26 = vld [vmem:[#allocation8 + $0x58] sm:$0xff] }
 0x5bc   :  { %v10563_v1 = vsel %vm1737_vm12, %v1731_v17, %v10509_v22 }
 0x5bd   :  { %1880 = vmatmul.mubr.f32.vlgmr.msra.gmra.mrb[10].mxu0 %v10563_v1  ;;  %1951 = vmatmul.mubr.f32.vlgmr.msra.gmra.mrb[10].mxu1 %v10563_v1 }
 0x5be   :  { %7820 = vmatpush1.bf16.msra.mxu0 %v10345_v30  ;;  %7852 = vmatpush1.bf16.msra.mxu1 %v10348_v37 }
 0x5bf   :  { %7822 = vmatprep.subr.bf16.mxu0 %v10353_v46  ;;  %7854 = vmatprep.subr.bf16.mxu1 %v10355_v52 }
 0x5c0   :  { %2132 = vmatprep.mubr.f32.mxu0 %v11879_v0  ;;  %2203 = vmatprep.mubr.f32.mxu1 %v11879_v0 }
 0x5c2   :  { %7824 = vmatpush1.bf16.msra.mxu0 %v10357_v55  ;;  %7856 = vmatpush1.bf16.msra.mxu1 %v10360_v3 }
 0x5c3   :  { %7826 = vmatprep.subr.bf16.mxu0 %v10365_v16  ;;  %7858 = vmatprep.subr.bf16.mxu1 %v10367_v29 }
 0x5c6   :  { %7828 = vmatpush1.bf16.msra.mxu0 %v10369_v32  ;;  %7860 = vmatpush1.bf16.msra.mxu1 %v10372_v39 }
 0x5c7   :  { %7830 = vmatprep.subr.bf16.mxu0 %v10377_v57  ;;  %7862 = vmatprep.subr.bf16.mxu1 %v10379_v14 }
 0x5ca   :  { %7832 = vmatpush1.bf16.msra.mxu0 %v10381_v18  ;;  %7864 = vmatpush1.bf16.msra.mxu1 %v10384_v33 }
 0x5cb   :  { %7834 = vmatprep.subr.bf16.mxu0 %v10389_v11  ;;  %7866 = vmatprep.subr.bf16.mxu1 %v10391_v25 }
 0x5ce   :  { %7836 = vmatpush1.bf16.msra.mxu0 %v10393_v34  ;;  %7868 = vmatpush1.bf16.msra.mxu1 %v10396_v41 }
 0x5cf   :  { %7838 = vmatprep.subr.bf16.mxu0 %v10401_v49  ;;  %7870 = vmatprep.subr.bf16.mxu1 %v10403_v9 }
 0x5d2   :  { %7840 = vmatpush1.bf16.msra.mxu0 %v10405_v13  ;;  %7872 = vmatpush1.bf16.msra.mxu1 %v10408_v35 }
 0x5d3   :  { %7842 = vmatprep.subr.bf16.mxu0 %v10412_v51  ;;  %7874 = vmatprep.subr.bf16.mxu1 %v10414_v61  ;;  %v10604_v51 = vpop.permute.xlu1 %1988 }
 0x5d4   :  { %vm1990_vm13 = vcmp.eq.s32.totalorder %v10604_v51, 1 }
 0x5d6   :  { %7844 = vmatpush1.bf16.msra.mxu0 %v10417_v31  ;;  %7876 = vmatpush1.bf16.msra.mxu1 %v10421_v15 }
 0x5d7   :  { %7846 = vmatprep.subr.bf16.mxu0 %v10423_v20  ;;  %7878 = vmatprep.subr.bf16.mxu1 %v10425_v42 }
 0x5da   :  { %7848 = vmatpush1.bf16.msra.mxu0 %v10428_v62  ;;  %7880 = vmatpush1.bf16.msra.mxu1 %v10432_v6  ;;  %v2258_v6 = vld [vmem:[#allocation8 + $0x8] sm:$0xff] }
 0x5db   :  { %v7881_v47 = vpack.c.bf16 %v2262_v5, %v2258_v6  ;;  %7914 = vmatprep.subr.bf16.mxu1 %v7913_v24  ;;  %v2285_v6 = vld [vmem:[#allocation8 + $0xe0] sm:$0xff]  ;;  %v2294_v24 = vld [vmem:[#allocation8 + $0x128] sm:$0xff] }
 0x5dc   :  { %v7897_v21 = vpack.c.bf16 %v2294_v24, %v2290_v60  ;;  %v2317_v24 = vld [vmem:[#allocation8 + $0x1e0] sm:$0xff] }
 0x5dd   :  { %7882 = vmatprep.subr.bf16.mxu0 %v7881_v47  ;;  %v2283_v47 = vld [vmem:[#allocation8 + $0xd0] sm:$0xff] }
 0x5de   :  { %v7927_v4 = vpack.c.bf16 %v2287_v44, %v2283_v47  ;;  %v2316_v47 = vld [vmem:[#allocation8 + $0x1d8] sm:$0xff] }
 0x5df   :  { %v2320_v44 = vld [vmem:[#allocation8 + $0x1f8] sm:$0xff] }
 0x5e0   :  { %v7941_v60 = vpack.c.bf16 %v2320_v44, %v2316_v47  ;;  %v2513_v47 = vld [vmem:[#allocation10 + $0x10] sm:$0xff] }
 0x5e1   :  { %v2517_v44 = vld [vmem:[#allocation10 + $0x30] sm:$0xff] }
 0x690   :  { %v1881_v30 = vpop.f32.mrb[10].mxu0  ;;  %v1952_v37 = vpop.f32.mrb[10].mxu1 }
 0x691   :  { %v9131_v46 = vadd.f32 %v1881_v30, %v10243_v50  ;;  %v1883_v52 = vpop.f32.mrb[11].mxu0  ;;  %v1954_v55 = vpop.f32.mrb[11].mxu1  ;;  %v9147_v57 = vadd.f32 %v1952_v37, %v10259_v12  ;;  %v2272_v30 = vld [vmem:[#allocation8 + $0x78] sm:$0xff]  ;;  %v2265_v37 = vld [vmem:[#allocation8 + $0x40] sm:$0xff] }
 0x692   :  { %v9132_v3 = vadd.f32 %v1883_v52, %v10246_v53  ;;  %v9148_v32 = vadd.f32 %v1954_v55, %v10253_v7  ;;  %v7917_v52 = vpack.c.bf16 %v2272_v30, %v2268_v26  ;;  %v2295_v30 = vld [vmem:[#allocation8 + $0x130] sm:$0xff] }
 0x693   :  { %v7249_v16 = vmul.f32 -1.442695, %v9131_v46  ;;  %v2269_v46 = vld [vmem:[#allocation8 + $0x60] sm:$0xff] }
 0x694   :  { %v7250_v29 = vmul.f32 -1.442695, %v9132_v3  ;;  %v7251_v39 = vmul.f32 -1.442695, %v9148_v32  ;;  %v7887_v55 = vpack.c.bf16 %v2269_v46, %v2265_v37  ;;  %v2267_v3 = vld [vmem:[#allocation8 + $0x50] sm:$0xff]  ;;  %v2274_v32 = vld [vmem:[#allocation8 + $0x88] sm:$0xff] }
 0x695   :  { %9407 = vpow2.f32 %v7249_v16  ;;  %v2271_v16 = vld [vmem:[#allocation8 + $0x70] sm:$0xff]  ;;  %v2298_v46 = vld [vmem:[#allocation8 + $0x148] sm:$0xff] }
 0x696   :  { %9409 = vpow2.f32 %v7250_v29  ;;  %v7919_v29 = vpack.c.bf16 %v2271_v16, %v2267_v3  ;;  %v2304_v16 = vld [vmem:[#allocation8 + $0x178] sm:$0xff] }
 0x697   :  { %9411 = vpow2.f32 %v7251_v39  ;;  %v2278_v39 = vld [vmem:[#allocation8 + $0xa8] sm:$0xff] }
 0x698   :  { %9413 = vtanh.f32 %v9147_v57  ;;  %v2276_v57 = vld [vmem:[#allocation8 + $0x98] sm:$0xff] }
 0x69f   :  { %v9408_v14 = vpop.eup %9407 }
 0x6a0   :  { %v9410_v18 = vpop.eup %9409  ;;  %v1964_v33 = vadd.f32 1.0, %v9408_v14  ;;  %v7889_v14 = vpack.c.bf16 %v2278_v39, %v2274_v32  ;;  %v2301_v32 = vld [vmem:[#allocation8 + $0x160] sm:$0xff] }
 0x6a1   :  { %v1970_v11 = vadd.f32 1.0, %v9410_v18  ;;  %v9412_v25 = vpop.eup %9411  ;;  %v2280_v18 = vld [vmem:[#allocation8 + $0xb8] sm:$0xff] }
 0x6a2   :  { %9415 = vrcp.f32 %v1964_v33  ;;  %v9414_v34 = vpop.eup %9413  ;;  %v1977_v13 = vadd.f32 1.0, %v9412_v25  ;;  %v2273_v33 = vld [vmem:[#allocation8 + $0x80] sm:$0xff]  ;;  %v7921_v25 = vpack.c.bf16 %v2280_v18, %v2276_v57  ;;  %v2303_v18 = vld [vmem:[#allocation8 + $0x170] sm:$0xff] }
 0x6a3   :  { %9417 = vrcp.f32 %v1970_v11  ;;  %v2277_v11 = vld [vmem:[#allocation8 + $0xa0] sm:$0xff] }
 0x6a4   :  { %9419 = vrcp.f32 %v1977_v13  ;;  %v2282_v13 = vld [vmem:[#allocation8 + $0xc8] sm:$0xff] }
 0x6ac   :  { %v9416_v41 = vpop.eup %9415 }
 0x6ad   :  { %v9418_v49 = vpop.eup %9417  ;;  %v1981_v9 = vmul.f32 %v9416_v41, %v9414_v34  ;;  %v7891_v34 = vpack.c.bf16 %v2277_v11, %v2273_v33  ;;  %v2275_v41 = vld [vmem:[#allocation8 + $0x90] sm:$0xff]  ;;  %v2306_v33 = vld [vmem:[#allocation8 + $0x188] sm:$0xff] }
 0x6ae   :  { %v1980_v35 = vmul.f32 %v9418_v49, %v10558_v8  ;;  %v9420_v15 = vpop.eup %9419  ;;  %v2279_v49 = vld [vmem:[#allocation8 + $0xb0] sm:$0xff] }
 0x6b0   :  { %v1982_v61 = vadd.f32 %v1981_v9, %v1980_v35  ;;  %v7923_v9 = vpack.c.bf16 %v2279_v49, %v2275_v41  ;;  %v2286_v35 = vld [vmem:[#allocation8 + $0xe8] sm:$0xff]  ;;  %v2312_v41 = vld [vmem:[#allocation8 + $0x1b8] sm:$0xff] }
 0x6b2   :  { %9421 = vtanh.f32 %v1982_v61  ;;  %v10610_v31 = vsel %vm1990_vm13, %v1982_v61, %v10558_v8  ;;  %v2266_v8 = vld [vmem:[#allocation8 + $0x48] sm:$0xff]  ;;  %v2284_v61 = vld [vmem:[#allocation8 + $0xd8] sm:$0xff] }
 0x6b3   :  { %v7885_v17 = vpack.c.bf16 %v2270_v58, %v2266_v8  ;;  %v2293_v8 = vld [vmem:[#allocation8 + $0x120] sm:$0xff] }
 0x6bc   :  { %v9422_v20 = vpop.eup %9421 }
 0x6bd   :  { %v1984_v42 = vmul.f32 %v9422_v20, %v9420_v15  ;;  %v7893_v15 = vpack.c.bf16 %v2286_v35, %v2282_v13  ;;  %v2288_v20 = vld [vmem:[#allocation8 + $0xf8] sm:$0xff]  ;;  %v2305_v13 = vld [vmem:[#allocation8 + $0x180] sm:$0xff] }
 0x6be   :  { %v7925_v5 = vpack.c.bf16 %v2288_v20, %v2284_v61  ;;  %v2309_v35 = vld [vmem:[#allocation8 + $0x1a0] sm:$0xff]  ;;  %v2307_v61 = vld [vmem:[#allocation8 + $0x190] sm:$0xff] }
 0x6bf   :  { %v10615_v62 = vsel %vm1990_vm13, %v1984_v42, %v10563_v1  ;;  %v2281_v42 = vld [vmem:[#allocation8 + $0xc0] sm:$0xff]  ;;  %v2311_v20 = vld [vmem:[#allocation8 + $0x1b0] sm:$0xff] }
 0x6c0   :  { %2133 = vmatmul.mubr.f32.vlgmr.msra.gmra.mrb[12].mxu0 %v10615_v62  ;;  %2204 = vmatmul.mubr.f32.vlgmr.msra.gmra.mrb[12].mxu1 %v10615_v62  ;;  %v7895_v27 = vpack.c.bf16 %v2285_v6, %v2281_v42  ;;  %v2314_v42 = vld [vmem:[#allocation8 + $0x1c8] sm:$0xff] }
 0x6c1   :  { %2385 = vmatprep.mubr.f32.mxu0 %v11879_v0  ;;  %2456 = vmatprep.mubr.f32.mxu1 %v11879_v0  ;;  %v2318_v6 = vld [vmem:[#allocation8 + $0x1e8] sm:$0xff] }
 0x6c2   :  { %7884 = vmatpush1.bf16.msra.mxu0 %v7883_v36  ;;  %7916 = vmatpush1.bf16.msra.mxu1 %v7915_v56  ;;  %v2292_v36 = vld [vmem:[#allocation8 + $0x118] sm:$0xff]  ;;  %v2289_v56 = vld [vmem:[#allocation8 + $0x100] sm:$0xff] }
 0x6c3   :  { %7886 = vmatprep.subr.bf16.mxu0 %v7885_v17  ;;  %7918 = vmatprep.subr.bf16.mxu1 %v7917_v52  ;;  %v7929_v58 = vpack.c.bf16 %v2296_v54, %v2292_v36  ;;  %v7899_v26 = vpack.c.bf16 %v2293_v8, %v2289_v56  ;;  %v2291_v17 = vld [vmem:[#allocation8 + $0x110] sm:$0xff]  ;;  %v2302_v52 = vld [vmem:[#allocation8 + $0x168] sm:$0xff] }
 0x6c4   :  { %v7931_v37 = vpack.c.bf16 %v2295_v30, %v2291_v17  ;;  %v7901_v3 = vpack.c.bf16 %v2302_v52, %v2298_v46  ;;  %v2315_v36 = vld [vmem:[#allocation8 + $0x1d0] sm:$0xff]  ;;  %v2512_v56 = vld [vmem:[#allocation10 + $0x8] sm:$0xff]  ;;  %v2518_v30 = vld [vmem:[#allocation10 + $0x38] sm:$0xff] }
 0x6c5   :  { %v2516_v8 = vld [vmem:[#allocation10 + $0x28] sm:$0xff] }
 0x6c6   :  { %7888 = vmatpush1.bf16.msra.mxu0 %v7887_v55  ;;  %7920 = vmatpush1.bf16.msra.mxu1 %v7919_v29  ;;  %v2300_v55 = vld [vmem:[#allocation8 + $0x158] sm:$0xff]  ;;  %v2297_v29 = vld [vmem:[#allocation8 + $0x140] sm:$0xff]  ;;  %v7945_v17 = vpack.c.bf16 %v2516_v8, %v2512_v56 }
 0x6c7   :  { %7890 = vmatprep.subr.bf16.mxu0 %v7889_v14  ;;  %7922 = vmatprep.subr.bf16.mxu1 %v7921_v25  ;;  %v7933_v39 = vpack.c.bf16 %v2304_v16, %v2300_v55  ;;  %v7903_v57 = vpack.c.bf16 %v2301_v32, %v2297_v29  ;;  %v2299_v14 = vld [vmem:[#allocation8 + $0x150] sm:$0xff]  ;;  %v2310_v25 = vld [vmem:[#allocation8 + $0x1a8] sm:$0xff] }
 0x6c8   :  { %v7935_v11 = vpack.c.bf16 %v2303_v18, %v2299_v14  ;;  %v7905_v49 = vpack.c.bf16 %v2310_v25, %v2306_v33 }
 0x6ca   :  { %7892 = vmatpush1.bf16.msra.mxu0 %v7891_v34  ;;  %7924 = vmatpush1.bf16.msra.mxu1 %v7923_v9  ;;  %v2308_v34 = vld [vmem:[#allocation8 + $0x198] sm:$0xff] }
 0x6cb   :  { %7894 = vmatprep.subr.bf16.mxu0 %v7893_v15  ;;  %7926 = vmatprep.subr.bf16.mxu1 %v7925_v5  ;;  %v7937_v9 = vpack.c.bf16 %v2312_v41, %v2308_v34  ;;  %v7907_v15 = vpack.c.bf16 %v2309_v35, %v2305_v13  ;;  %v7939_v5 = vpack.c.bf16 %v2311_v20, %v2307_v61 }
 0x6ce   :  { %7896 = vmatpush1.bf16.msra.mxu0 %v7895_v27  ;;  %7928 = vmatpush1.bf16.msra.mxu1 %v7927_v4  ;;  %v7909_v27 = vpack.c.bf16 %v2318_v6, %v2314_v42  ;;  %v2313_v4 = vld [vmem:[#allocation8 + $0x1c0] sm:$0xff] }
 0x6cf   :  { %7898 = vmatprep.subr.bf16.mxu0 %v7897_v21  ;;  %7930 = vmatprep.subr.bf16.mxu1 %v7929_v58  ;;  %v2319_v21 = vld [vmem:[#allocation8 + $0x1f0] sm:$0xff]  ;;  %v7911_v54 = vpack.c.bf16 %v2317_v24, %v2313_v4  ;;  %v2514_v58 = vld [vmem:[#allocation10 + $0x18] sm:$0xff]  ;;  %v2520_v4 = vld [vmem:[#allocation10 + $0x48] sm:$0xff] }
 0x6d0   :  { %v2524_v24 = vld [vmem:[#allocation10 + $0x68] sm:$0xff] }
 0x6d2   :  { %7900 = vmatpush1.bf16.msra.mxu0 %v7899_v26  ;;  %7932 = vmatpush1.bf16.msra.mxu1 %v7931_v37  ;;  %v7943_v26 = vpack.c.bf16 %v2319_v21, %v2315_v36  ;;  %v7977_v37 = vpack.c.bf16 %v2518_v30, %v2514_v58  ;;  %v2522_v36 = vld [vmem:[#allocation10 + $0x58] sm:$0xff]  ;;  %v7979_v58 = vpack.c.bf16 %v2517_v44, %v2513_v47  ;;  %v2541_v47 = vld [vmem:[#allocation10 + $0xf0] sm:$0xff]  ;;  %v2544_v44 = vld [vmem:[#allocation10 + $0x108] sm:$0xff] }
 0x6d3   :  { %7902 = vmatprep.subr.bf16.mxu0 %v7901_v3  ;;  %7934 = vmatprep.subr.bf16.mxu1 %v7933_v39  ;;  %v2526_v21 = vld [vmem:[#allocation10 + $0x78] sm:$0xff]  ;;  %v7949_v30 = vpack.c.bf16 %v2524_v24, %v2520_v4  ;;  %v2548_v4 = vld [vmem:[#allocation10 + $0x128] sm:$0xff] }
 0x6d4   :  { %v2550_v24 = vld [vmem:[#allocation10 + $0x138] sm:$0xff] }
 0x6d6   :  { %7904 = vmatpush1.bf16.msra.mxu0 %v7903_v57  ;;  %7936 = vmatpush1.bf16.msra.mxu1 %v7935_v11 }
 0x6d7   :  { %7906 = vmatprep.subr.bf16.mxu0 %v7905_v49  ;;  %7938 = vmatprep.subr.bf16.mxu1 %v7937_v9 }
 0x6da   :  { %7908 = vmatpush1.bf16.msra.mxu0 %v7907_v15  ;;  %7940 = vmatpush1.bf16.msra.mxu1 %v7939_v5  ;;  %v10625_v15 = vpop.permute.xlu0 %2241  ;;  %v2511_v5 = vld [vmem:[#allocation10] sm:$0xff] }
 0x6db   :  { %7910 = vmatprep.subr.bf16.mxu0 %v7909_v27  ;;  %7942 = vmatprep.subr.bf16.mxu1 %v7941_v60  ;;  %vm2243_vm14 = vcmp.eq.s32.totalorder %v10625_v15, 1  ;;  %v2515_v27 = vld [vmem:[#allocation10 + $0x20] sm:$0xff]  ;;  %v7134_v15 = vld [vmem:[%s11876_s11 + $0x10] sm:$0xff] }
 0x6dc   :  { %v7947_v8 = vpack.c.bf16 %v2515_v27, %v2511_v5  ;;  %v2537_v27 = vld [vmem:[#allocation10 + $0xd0] sm:$0xff] }
 0x6de   :  { %7912 = vmatpush1.bf16.msra.mxu0 %v7911_v54  ;;  %7944 = vmatpush1.bf16.msra.mxu1 %v7943_v26  ;;  %v2519_v26 = vld [vmem:[#allocation10 + $0x40] sm:$0xff] }
 0x6df   :  { %7946 = vmatprep.subr.bf16.mxu0 %v7945_v17  ;;  %7978 = vmatprep.subr.bf16.mxu1 %v7977_v37  ;;  %v2523_v17 = vld [vmem:[#allocation10 + $0x60] sm:$0xff]  ;;  %v7981_v37 = vpack.c.bf16 %v2526_v21, %v2522_v36  ;;  %v7991_v21 = vpack.c.bf16 %v2541_v47, %v2537_v27  ;;  %v2570_v27 = vld [vmem:[#allocation10 + $0x1d8] sm:$0xff] }
 0x6e0   :  { %v2574_v47 = vld [vmem:[#allocation10 + $0x1f8] sm:$0xff] }
 0x793   :  { %v2134_v46 = vpop.f32.mrb[12].mxu0  ;;  %v2205_v52 = vpop.f32.mrb[12].mxu1 }
 0x794   :  { %v9133_v55 = vadd.f32 %v2134_v46, %v10243_v50  ;;  %v2136_v3 = vpop.f32.mrb[13].mxu0  ;;  %v2207_v16 = vpop.f32.mrb[13].mxu1  ;;  %v9149_v18 = vadd.f32 %v2205_v52, %v10259_v12  ;;  %v2521_v46 = vld [vmem:[#allocation10 + $0x50] sm:$0xff]  ;;  %v2528_v52 = vld [vmem:[#allocation10 + $0x88] sm:$0xff] }
 0x795   :  { %v9134_v29 = vadd.f32 %v2136_v3, %v10246_v53  ;;  %v9150_v57 = vadd.f32 %v2207_v16, %v10253_v7  ;;  %v2532_v3 = vld [vmem:[#allocation10 + $0xa8] sm:$0xff]  ;;  %v2530_v16 = vld [vmem:[#allocation10 + $0x98] sm:$0xff] }
 0x796   :  { %v7252_v32 = vmul.f32 -1.442695, %v9133_v55 }
 0x797   :  { %v7253_v39 = vmul.f32 -1.442695, %v9134_v29  ;;  %v7254_v14 = vmul.f32 -1.442695, %v9150_v57  ;;  %v2534_v29 = vld [vmem:[#allocation10 + $0xb8] sm:$0xff]  ;;  %v2527_v57 = vld [vmem:[#allocation10 + $0x80] sm:$0xff] }
 0x798   :  { %9423 = vpow2.f32 %v7252_v32  ;;  %v7951_v32 = vpack.c.bf16 %v2523_v17, %v2519_v26  ;;  %v2545_v26 = vld [vmem:[#allocation10 + $0x110] sm:$0xff] }
 0x799   :  { %9425 = vpow2.f32 %v7253_v39  ;;  %v2549_v17 = vld [vmem:[#allocation10 + $0x130] sm:$0xff] }
 0x79a   :  { %9427 = vpow2.f32 %v7254_v14  ;;  %v2531_v14 = vld [vmem:[#allocation10 + $0xa0] sm:$0xff] }
 0x79b   :  { %9429 = vtanh.f32 %v9149_v18  ;;  %v7953_v18 = vpack.c.bf16 %v2532_v3, %v2528_v52  ;;  %v7995_v3 = vpack.c.bf16 %v2549_v17, %v2545_v26  ;;  %v2863_v26 = vld [vmem:[#allocation11] sm:$0xff] }
 0x7a2   :  { %v9424_v33 = vpop.eup %9423 }
 0x7a3   :  { %v9426_v11 = vpop.eup %9425  ;;  %v2217_v25 = vadd.f32 1.0, %v9424_v33  ;;  %v7985_v33 = vpack.c.bf16 %v2534_v29, %v2530_v16  ;;  %v2551_v16 = vld [vmem:[#allocation10 + $0x140] sm:$0xff] }
 0x7a4   :  { %v2223_v34 = vadd.f32 1.0, %v9426_v11  ;;  %v9428_v41 = vpop.eup %9427  ;;  %v2529_v11 = vld [vmem:[#allocation10 + $0x90] sm:$0xff]  ;;  %v2555_v29 = vld [vmem:[#allocation10 + $0x160] sm:$0xff] }
 0x7a5   :  { %9431 = vrcp.f32 %v2217_v25  ;;  %v9430_v49 = vpop.eup %9429  ;;  %v2230_v61 = vadd.f32 1.0, %v9428_v41  ;;  %v2533_v25 = vld [vmem:[#allocation10 + $0xb0] sm:$0xff]  ;;  %v2540_v41 = vld [vmem:[#allocation10 + $0xe8] sm:$0xff] }
 0x7a6   :  { %9433 = vrcp.f32 %v2223_v34  ;;  %v2536_v34 = vld [vmem:[#allocation10 + $0xc8] sm:$0xff] }
 0x7a7   :  { %9435 = vrcp.f32 %v2230_v61  ;;  %v2535_v61 = vld [vmem:[#allocation10 + $0xc0] sm:$0xff] }
 0x7af   :  { %v9432_v9 = vpop.eup %9431 }
 0x7b0   :  { %v9434_v13 = vpop.eup %9433  ;;  %v2234_v35 = vmul.f32 %v9432_v9, %v9430_v49  ;;  %v2538_v49 = vld [vmem:[#allocation10 + $0xd8] sm:$0xff] }
 0x7b1   :  { %v2233_v20 = vmul.f32 %v9434_v13, %v10610_v31  ;;  %v9436_v60 = vpop.eup %9435  ;;  %v2542_v9 = vld [vmem:[#allocation10 + $0xf8] sm:$0xff]  ;;  %v7955_v13 = vpack.c.bf16 %v2531_v14, %v2527_v57  ;;  %v2553_v57 = vld [vmem:[#allocation10 + $0x150] sm:$0xff] }
 0x7b2   :  { %v7989_v5 = vpack.c.bf16 %v2542_v9, %v2538_v49  ;;  %v2557_v14 = vld [vmem:[#allocation10 + $0x170] sm:$0xff]  ;;  %v2559_v49 = vld [vmem:[#allocation10 + $0x180] sm:$0xff] }
 0x7b3   :  { %v2235_v42 = vadd.f32 %v2234_v35, %v2233_v20  ;;  %v7987_v35 = vpack.c.bf16 %v2533_v25, %v2529_v11  ;;  %v2539_v20 = vld [vmem:[#allocation10 + $0xe0] sm:$0xff]  ;;  %v2562_v11 = vld [vmem:[#allocation10 + $0x198] sm:$0xff] }
 0x7b4   :  { %v7959_v36 = vpack.c.bf16 %v2539_v20, %v2535_v61  ;;  %v2566_v25 = vld [vmem:[#allocation10 + $0x1b8] sm:$0xff]  ;;  %v2563_v9 = vld [vmem:[#allocation10 + $0x1a0] sm:$0xff]  ;;  %v2561_v61 = vld [vmem:[#allocation10 + $0x190] sm:$0xff] }
 0x7b5   :  { %9437 = vtanh.f32 %v2235_v42  ;;  %v10632_v6 = vsel %vm2243_vm14, %v2235_v42, %v10610_v31  ;;  %v2525_v31 = vld [vmem:[#allocation10 + $0x70] sm:$0xff]  ;;  %v7957_v42 = vpack.c.bf16 %v2540_v41, %v2536_v34  ;;  %v7967_v34 = vpack.c.bf16 %v2555_v29, %v2551_v16  ;;  %v2874_v16 = vld [vmem:[#allocation11 + $0x58] sm:$0xff] }
 0x7b6   :  { %v7983_v39 = vpack.c.bf16 %v2525_v31, %v2521_v46  ;;  %v2554_v46 = vld [vmem:[#allocation10 + $0x158] sm:$0xff]  ;;  %v7999_v41 = vpack.c.bf16 %v2557_v14, %v2553_v57  ;;  %v2565_v20 = vld [vmem:[#allocation10 + $0x1b0] sm:$0xff]  ;;  %v2875_v57 = vld [vmem:[#allocation11 + $0x60] sm:$0xff] }
 0x7b7   :  { %v2558_v31 = vld [vmem:[#allocation10 + $0x178] sm:$0xff] }
 0x7bf   :  { %v9438_v54 = vpop.eup %9437 }
 0x7c0   :  { %v2237_v56 = vmul.f32 %v9438_v54, %v9436_v60  ;;  %v2546_v60 = vld [vmem:[#allocation10 + $0x118] sm:$0xff]  ;;  %v2543_v54 = vld [vmem:[#allocation10 + $0x100] sm:$0xff] }
 0x7c2   :  { %v10637_v55 = vsel %vm2243_vm14, %v2237_v56, %v10615_v62  ;;  %v2547_v56 = vld [vmem:[#allocation10 + $0x120] sm:$0xff] }
 0x7c3   :  { %2386 = vmatmul.mubr.f32.vlgmr.msra.gmra.mrb[14].mxu0 %v10637_v55  ;;  %2457 = vmatmul.mubr.f32.vlgmr.msra.gmra.mrb[14].mxu1 %v10637_v55  ;;  %v7963_v52 = vpack.c.bf16 %v2547_v56, %v2543_v54  ;;  %v2569_v54 = vld [vmem:[#allocation10 + $0x1d0] sm:$0xff] }
 0x7c4   :  { %7948 = vmatpush1.bf16.msra.mxu0 %v7947_v8  ;;  %7980 = vmatpush1.bf16.msra.mxu1 %v7979_v58  ;;  %v7961_v8 = vpack.c.bf16 %v2548_v4, %v2544_v44  ;;  %v7993_v58 = vpack.c.bf16 %v2550_v24, %v2546_v60  ;;  %v7971_v44 = vpack.c.bf16 %v2563_v9, %v2559_v49  ;;  %v2567_v60 = vld [vmem:[#allocation10 + $0x1c0] sm:$0xff]  ;;  %v2573_v56 = vld [vmem:[#allocation10 + $0x1f0] sm:$0xff]  ;;  %v2882_v49 = vld [vmem:[#allocation11 + $0x98] sm:$0xff] }
 0x7c5   :  { %7950 = vmatprep.subr.bf16.mxu0 %v7949_v30  ;;  %7982 = vmatprep.subr.bf16.mxu1 %v7981_v37  ;;  %v2552_v30 = vld [vmem:[#allocation10 + $0x148] sm:$0xff]  ;;  %v8003_v4 = vpack.c.bf16 %v2565_v20, %v2561_v61  ;;  %v2883_v61 = vld [vmem:[#allocation11 + $0xa0] sm:$0xff] }
 0x7c6   :  { %2661 = vmatprep.mubr.f32.mxu0 %v11879_v0  ;;  %2774 = vmatprep.mubr.f32.mxu1 %v11879_v0  ;;  %v2556_v37 = vld [vmem:[#allocation10 + $0x168] sm:$0xff] }
 0x7c8   :  { %7952 = vmatpush1.bf16.msra.mxu0 %v7951_v32  ;;  %7984 = vmatpush1.bf16.msra.mxu1 %v7983_v39  ;;  %v7965_v32 = vpack.c.bf16 %v2556_v37, %v2552_v30  ;;  %v7997_v39 = vpack.c.bf16 %v2558_v31, %v2554_v46  ;;  %v2865_v37 = vld [vmem:[#allocation11 + $0x10] sm:$0xff] }
 0x7c9   :  { %7954 = vmatprep.subr.bf16.mxu0 %v7953_v18  ;;  %7986 = vmatprep.subr.bf16.mxu1 %v7985_v33  ;;  %v2560_v18 = vld [vmem:[#allocation10 + $0x188] sm:$0xff]  ;;  %v2869_v46 = vld [vmem:[#allocation11 + $0x30] sm:$0xff] }
 0x7ca   :  { %v2564_v33 = vld [vmem:[#allocation10 + $0x1a8] sm:$0xff]  ;;  %v10682_v31 = vpack.c.bf16 %v2869_v46, %v2865_v37 }
 0x7cc   :  { %7956 = vmatpush1.bf16.msra.mxu0 %v7955_v13  ;;  %7988 = vmatpush1.bf16.msra.mxu1 %v7987_v35  ;;  %v7969_v13 = vpack.c.bf16 %v2564_v33, %v2560_v18  ;;  %v8001_v35 = vpack.c.bf16 %v2566_v25, %v2562_v11  ;;  %v2873_v33 = vld [vmem:[#allocation11 + $0x50] sm:$0xff] }
 0x7cd   :  { %7958 = vmatprep.subr.bf16.mxu0 %v7957_v42  ;;  %7990 = vmatprep.subr.bf16.mxu1 %v7989_v5  ;;  %v2568_v42 = vld [vmem:[#allocation10 + $0x1c8] sm:$0xff]  ;;  %v2877_v11 = vld [vmem:[#allocation11 + $0x70] sm:$0xff] }
 0x7ce   :  { %v2572_v5 = vld [vmem:[#allocation10 + $0x1e8] sm:$0xff]  ;;  %v10694_v25 = vpack.c.bf16 %v2877_v11, %v2873_v33 }
 0x7cf   :  { %v7973_v24 = vpack.c.bf16 %v2572_v5, %v2568_v42  ;;  %v2881_v5 = vld [vmem:[#allocation11 + $0x90] sm:$0xff]  ;;  %v2908_v33 = vld [vmem:[#allocation11 + $0x168] sm:$0xff] }
 0x7d0   :  { %7960 = vmatpush1.bf16.msra.mxu0 %v7959_v36  ;;  %7992 = vmatpush1.bf16.msra.mxu1 %v7991_v21  ;;  %v8005_v36 = vpack.c.bf16 %v2574_v47, %v2570_v27  ;;  %v2571_v21 = vld [vmem:[#allocation10 + $0x1e0] sm:$0xff]  ;;  %v2885_v27 = vld [vmem:[#allocation11 + $0xb0] sm:$0xff] }
 0x7d1   :  { %7962 = vmatprep.subr.bf16.mxu0 %v7961_v8  ;;  %7994 = vmatprep.subr.bf16.mxu1 %v7993_v58  ;;  %v7975_v8 = vpack.c.bf16 %v2571_v21, %v2567_v60  ;;  %v8007_v58 = vpack.c.bf16 %v2573_v56, %v2569_v54  ;;  %v10706_v47 = vpack.c.bf16 %v2885_v27, %v2881_v5  ;;  %v2890_v60 = vld [vmem:[#allocation11 + $0xd8] sm:$0xff]  ;;  %v2887_v21 = vld [vmem:[#allocation11 + $0xc0] sm:$0xff]  ;;  %v2905_v5 = vld [vmem:[#allocation11 + $0x150] sm:$0xff] }
 0x7d2   :  { %v2891_v54 = vld [vmem:[#allocation11 + $0xe0] sm:$0xff]  ;;  %v2909_v27 = vld [vmem:[#allocation11 + $0x170] sm:$0xff] }
 0x7d4   :  { %7964 = vmatpush1.bf16.msra.mxu0 %v7963_v52  ;;  %7996 = vmatpush1.bf16.msra.mxu1 %v7995_v3  ;;  %v2872_v52 = vld [vmem:[#allocation11 + $0x48] sm:$0xff] }
 0x7d5   :  { %7966 = vmatprep.subr.bf16.mxu0 %v7965_v32  ;;  %7998 = vmatprep.subr.bf16.mxu1 %v7997_v39  ;;  %v2876_v3 = vld [vmem:[#allocation11 + $0x68] sm:$0xff]  ;;  %v2878_v32 = vld [vmem:[#allocation11 + $0x78] sm:$0xff]  ;;  %v2871_v39 = vld [vmem:[#allocation11 + $0x40] sm:$0xff] }
 0x7d6   :  { %v10687_v29 = vpack.c.bf16 %v2876_v3, %v2872_v52  ;;  %v10689_v14 = vpack.c.bf16 %v2878_v32, %v2874_v16  ;;  %v10691_v18 = vpack.c.bf16 %v2875_v57, %v2871_v39  ;;  %v2895_v52 = vld [vmem:[#allocation11 + $0x100] sm:$0xff]  ;;  %v2897_v16 = vld [vmem:[#allocation11 + $0x110] sm:$0xff]  ;;  %v2904_v57 = vld [vmem:[#allocation11 + $0x148] sm:$0xff] }
 0x7d7   :  { %v2899_v3 = vld [vmem:[#allocation11 + $0x120] sm:$0xff]  ;;  %v2901_v39 = vld [vmem:[#allocation11 + $0x130] sm:$0xff] }
 0x7d8   :  { %7968 = vmatpush1.bf16.msra.mxu0 %v7967_v34  ;;  %8000 = vmatpush1.bf16.msra.mxu1 %v7999_v41  ;;  %v2880_v34 = vld [vmem:[#allocation11 + $0x88] sm:$0xff]  ;;  %v10727_v32 = vpack.c.bf16 %v2899_v3, %v2895_v52  ;;  %v10731_v11 = vpack.c.bf16 %v2901_v39, %v2897_v16 }
 0x7d9   :  { %7970 = vmatprep.subr.bf16.mxu0 %v7969_v13  ;;  %8002 = vmatprep.subr.bf16.mxu1 %v8001_v35  ;;  %v2884_v41 = vld [vmem:[#allocation11 + $0xa8] sm:$0xff]  ;;  %v2886_v13 = vld [vmem:[#allocation11 + $0xb8] sm:$0xff]  ;;  %v2879_v35 = vld [vmem:[#allocation11 + $0x80] sm:$0xff] }
 0x7da   :  { %v10699_v9 = vpack.c.bf16 %v2884_v41, %v2880_v34  ;;  %v10701_v20 = vpack.c.bf16 %v2886_v13, %v2882_v49  ;;  %v10703_v42 = vpack.c.bf16 %v2883_v61, %v2879_v35  ;;  %v10733_v34 = vpack.c.bf16 %v2908_v33, %v2904_v57  ;;  %v2906_v41 = vld [vmem:[#allocation11 + $0x158] sm:$0xff]  ;;  %v2903_v13 = vld [vmem:[#allocation11 + $0x140] sm:$0xff]  ;;  %v2920_v16 = vld [vmem:[#allocation11 + $0x1c8] sm:$0xff] }
 0x7db   :  { %v2910_v49 = vld [vmem:[#allocation11 + $0x178] sm:$0xff]  ;;  %v2907_v61 = vld [vmem:[#allocation11 + $0x160] sm:$0xff]  ;;  %v2924_v39 = vld [vmem:[#allocation11 + $0x1e8] sm:$0xff] }
 0x7dc   :  { %7972 = vmatpush1.bf16.msra.mxu0 %v7971_v44  ;;  %8004 = vmatpush1.bf16.msra.mxu1 %v8003_v4  ;;  %v2888_v44 = vld [vmem:[#allocation11 + $0xc8] sm:$0xff]  ;;  %v10735_v35 = vpack.c.bf16 %v2910_v49, %v2906_v41  ;;  %v2922_v57 = vld [vmem:[#allocation11 + $0x1d8] sm:$0xff]  ;;  %v10759_v33 = vpack.c.bf16 %v2924_v39, %v2920_v16  ;;  %v2919_v49 = vld [vmem:[#allocation11 + $0x1c0] sm:$0xff] }
 0x7dd   :  { %7974 = vmatprep.subr.bf16.mxu0 %v7973_v24  ;;  %8006 = vmatprep.subr.bf16.mxu1 %v8005_v36  ;;  %v2892_v4 = vld [vmem:[#allocation11 + $0xe8] sm:$0xff]  ;;  %v2894_v36 = vld [vmem:[#allocation11 + $0xf8] sm:$0xff] }
 0x7de   :  { %v10711_v24 = vpack.c.bf16 %v2892_v4, %v2888_v44  ;;  %v10713_v56 = vpack.c.bf16 %v2894_v36, %v2890_v60  ;;  %v10738_v44 = vpack.c.bf16 %v2907_v61, %v2903_v13  ;;  %v2912_v4 = vld [vmem:[#allocation11 + $0x188] sm:$0xff]  ;;  %v2914_v36 = vld [vmem:[#allocation11 + $0x198] sm:$0xff]  ;;  %v2923_v13 = vld [vmem:[#allocation11 + $0x1e0] sm:$0xff] }
 0x7df   :  { %v2916_v60 = vld [vmem:[#allocation11 + $0x1a8] sm:$0xff]  ;;  %v2926_v41 = vld [vmem:[#allocation11 + $0x1f8] sm:$0xff] }
 0x7e0   :  { %7976 = vmatpush1.bf16.msra.mxu0 %v7975_v8  ;;  %8008 = vmatpush1.bf16.msra.mxu1 %v8007_v58  ;;  %v10715_v8 = vpack.c.bf16 %v2891_v54, %v2887_v21  ;;  %v2889_v58 = vld [vmem:[#allocation11 + $0xd0] sm:$0xff]  ;;  %v10742_v21 = vpack.c.bf16 %v2909_v27, %v2905_v5  ;;  %v10744_v54 = vpack.c.bf16 %v2916_v60, %v2912_v4 }
 0x7e1   :  { %v10761_v61 = vpack.c.bf16 %v2926_v41, %v2922_v57  ;;  %v10763_v5 = vpack.c.bf16 %v2923_v13, %v2919_v49  ;;  %v2921_v27 = vld [vmem:[#allocation11 + $0x1d0] sm:$0xff] }
 0x7e2   :  { %v2925_v4 = vld [vmem:[#allocation11 + $0x1f0] sm:$0xff] }
 0x7e3   :  { %7309 = vmatmul.mubr.msk.f32.vlgmr.msra.gmra.mrb[16].mxu0 %vm726_vm4, %v10267_v59  ;;  %7310 = vmatmul.mubr.msk.f32.vlgmr.msra.gmra.mrb[16].mxu1 %vm726_vm4, %v10267_v59  ;;  %v2864_v59 = vld [vmem:[#allocation11 + $0x8] sm:$0xff]  ;;  %v10766_v60 = vpack.c.bf16 %v2925_v4, %v2921_v27 }
 0x7e4   :  { %2667 = vmatprep.mubr.f32.mxu0 %v11879_v0  ;;  %2780 = vmatprep.mubr.f32.mxu1 %v11879_v0 }
 0x7e7   :  { %2668 = vmatmul.mubr.f32.gmra.mrb[18].mxu0 %v10335_v2  ;;  %2781 = vmatmul.mubr.f32.gmra.mrb[18].mxu1 %v10335_v2  ;;  %v2868_v2 = vld [vmem:[#allocation11 + $0x28] sm:$0xff] }
 0x7e8   :  { %2673 = vmatprep.mubr.f32.mxu0 %v11879_v0  ;;  %2786 = vmatprep.mubr.f32.mxu1 %v11879_v0 }
 0x7eb   :  { %2674 = vmatmul.mubr.f32.gmra.mrb[20].mxu0 %v10455_v63  ;;  %2787 = vmatmul.mubr.f32.gmra.mrb[20].mxu1 %v10455_v63  ;;  %v2866_v63 = vld [vmem:[#allocation11 + $0x18] sm:$0xff] }
 0x7ec   :  { %2679 = vmatprep.mubr.f32.mxu0 %v11879_v0  ;;  %2792 = vmatprep.mubr.f32.mxu1 %v11879_v0 }
 0x7ef   :  { %2680 = vmatmul.mubr.f32.gmra.mrb[22].mxu0 %v10509_v22  ;;  %2793 = vmatmul.mubr.f32.gmra.mrb[22].mxu1 %v10509_v22  ;;  %v10675_v22 = vpack.c.bf16 %v2868_v2, %v2864_v59  ;;  %v2893_v59 = vld [vmem:[#allocation11 + $0xf0] sm:$0xff]  ;;  %v2896_v2 = vld [vmem:[#allocation11 + $0x108] sm:$0xff] }
 0x7f0   :  { %2685 = vmatprep.mubr.f32.mxu0 %v11879_v0  ;;  %2798 = vmatprep.mubr.f32.mxu1 %v11879_v0 }
 0x7f1   :  { %8010 = vmatprep.subr.bf16.mxu0 %v10675_v22 }
 0x7f3   :  { %2686 = vmatmul.mubr.f32.gmra.mrb[24].mxu0 %v10563_v1  ;;  %2799 = vmatmul.mubr.f32.gmra.mrb[24].mxu1 %v10563_v1  ;;  %v2870_v1 = vld [vmem:[#allocation11 + $0x38] sm:$0xff] }
 0x7f4   :  { %2691 = vmatprep.mubr.f32.mxu0 %v11879_v0  ;;  %2804 = vmatprep.mubr.f32.mxu1 %v11879_v0  ;;  %v10677_v17 = vpack.c.bf16 %v2870_v1, %v2866_v63  ;;  %v10718_v63 = vpack.c.bf16 %v2893_v59, %v2889_v58  ;;  %v2900_v1 = vld [vmem:[#allocation11 + $0x128] sm:$0xff]  ;;  %v2918_v58 = vld [vmem:[#allocation11 + $0x1b8] sm:$0xff]  ;;  %v2911_v59 = vld [vmem:[#allocation11 + $0x180] sm:$0xff] }
 0x7f5   :  { %v10722_v37 = vpack.c.bf16 %v2900_v1, %v2896_v2  ;;  %v2915_v2 = vld [vmem:[#allocation11 + $0x1a0] sm:$0xff]  ;;  %v10747_v1 = vpack.c.bf16 %v2918_v58, %v2914_v36 }
 0x7f6   :  { %8042 = vmatprep.subr.bf16.mxu1 %v10677_v17  ;;  %v10750_v52 = vpack.c.bf16 %v2915_v2, %v2911_v59 }
 0x7f7   :  { %2692 = vmatmul.mubr.f32.gmra.mrb[26].mxu0 %v10615_v62  ;;  %2805 = vmatmul.mubr.f32.gmra.mrb[26].mxu1 %v10615_v62  ;;  %v2867_v62 = vld [vmem:[#allocation11 + $0x20] sm:$0xff] }
 0x7f8   :  { %2697 = vmatprep.mubr.f32.mxu0 %v11879_v0  ;;  %2810 = vmatprep.mubr.f32.mxu1 %v11879_v0  ;;  %v10679_v30 = vpack.c.bf16 %v2867_v62, %v2863_v26  ;;  %v2898_v26 = vld [vmem:[#allocation11 + $0x118] sm:$0xff] }
 0x7f9   :  { %8044 = vmatpush1.bf16.msra.mxu1 %v10682_v31  ;;  %v2902_v62 = vld [vmem:[#allocation11 + $0x138] sm:$0xff] }
 0x7fa   :  { %8012 = vmatpush1.bf16.msra.mxu0 %v10679_v30  ;;  %8046 = vmatprep.subr.bf16.mxu1 %v10689_v14  ;;  %v10724_v46 = vpack.c.bf16 %v2902_v62, %v2898_v26  ;;  %v2913_v26 = vld [vmem:[#allocation11 + $0x190] sm:$0xff] }
 0x7fb   :  { %2698 = vmatmul.mubr.f32.gmra.mrb[28].mxu0 %v10637_v55  ;;  %2811 = vmatmul.mubr.f32.gmra.mrb[28].mxu1 %v10637_v55  ;;  %v2917_v62 = vld [vmem:[#allocation11 + $0x1b0] sm:$0xff] }
 0x7fc   :  { %2703 = vmatprep.mubr.f32.mxu0 %v11879_v0  ;;  %2816 = vmatprep.mubr.f32.mxu1 %v11879_v0  ;;  %v10754_v3 = vpack.c.bf16 %v2917_v62, %v2913_v26 }
 0x7fd   :  { %8014 = vmatprep.subr.bf16.mxu0 %v10687_v29  ;;  %8048 = vmatpush1.bf16.msra.mxu1 %v10694_v25 }
 0x7fe   :  { %8016 = vmatpush1.bf16.msra.mxu0 %v10691_v18  ;;  %8050 = vmatprep.subr.bf16.mxu1 %v10701_v20 }
 0x7ff   :  { %8018 = vmatprep.subr.bf16.mxu0 %v10699_v9 }
 0x801   :  { %8052 = vmatpush1.bf16.msra.mxu1 %v10706_v47 }
 0x802   :  { %8020 = vmatpush1.bf16.msra.mxu0 %v10703_v42  ;;  %8054 = vmatprep.subr.bf16.mxu1 %v10713_v56 }
 0x803   :  { %8022 = vmatprep.subr.bf16.mxu0 %v10711_v24 }
 0x805   :  { %8056 = vmatpush1.bf16.msra.mxu1 %v10718_v63 }
 0x806   :  { %8024 = vmatpush1.bf16.msra.mxu0 %v10715_v8  ;;  %8058 = vmatprep.subr.bf16.mxu1 %v10724_v46 }
 0x807   :  { %8026 = vmatprep.subr.bf16.mxu0 %v10722_v37 }
 0x809   :  { %8060 = vmatpush1.bf16.msra.mxu1 %v10731_v11 }
 0x80a   :  { %8028 = vmatpush1.bf16.msra.mxu0 %v10727_v32  ;;  %8062 = vmatprep.subr.bf16.mxu1 %v10735_v35 }
 0x80b   :  { %8030 = vmatprep.subr.bf16.mxu0 %v10733_v34 }
 0x80d   :  { %8064 = vmatpush1.bf16.msra.mxu1 %v10742_v21 }
 0x80e   :  { %8032 = vmatpush1.bf16.msra.mxu0 %v10738_v44  ;;  %8066 = vmatprep.subr.bf16.mxu1 %v10747_v1 }
 0x80f   :  { %8034 = vmatprep.subr.bf16.mxu0 %v10744_v54 }
 0x811   :  { %8068 = vmatpush1.bf16.msra.mxu1 %v10754_v3 }
 0x812   :  { %8036 = vmatpush1.bf16.msra.mxu0 %v10750_v52  ;;  %8070 = vmatprep.subr.bf16.mxu1 %v10761_v61 }
 0x813   :  { %8038 = vmatprep.subr.bf16.mxu0 %v10759_v33 }
 0x815   :  { %8072 = vmatpush1.bf16.msra.mxu1 %v10766_v60 }
 0x816   :  { %8040 = vmatpush1.bf16.msra.mxu0 %v10763_v5  ;;  %8106 = vmatprep.subr.bf16.mxu1 %v10677_v17 }
 0x817   :  { %8074 = vmatprep.subr.bf16.mxu0 %v10675_v22 }
 0x896   :  { %v2387_v36 = vpop.f32.mrb[14].mxu0  ;;  %v2458_v58 = vpop.f32.mrb[14].mxu1 }
 0x897   :  { %v9135_v59 = vadd.f32 %v2387_v36, %v10243_v50  ;;  %v2389_v2 = vpop.f32.mrb[15].mxu0  ;;  %v2460_v26 = vpop.f32.mrb[15].mxu1  ;;  %v9151_v49 = vadd.f32 %v2458_v58, %v10259_v12 }
 0x898   :  { %v9136_v62 = vadd.f32 %v2389_v2, %v10246_v53  ;;  %v9152_v57 = vadd.f32 %v2460_v26, %v10253_v7  ;;  %v10778_v58 = vpop.permute.xlu1 %2494 }
 0x899   :  { %v7255_v16 = vmul.f32 -1.442695, %v9135_v59  ;;  %vm2496_vm15 = vcmp.eq.s32.totalorder %v10778_v58, 1 }
 0x89a   :  { %v7256_v39 = vmul.f32 -1.442695, %v9136_v62  ;;  %v7257_v41 = vmul.f32 -1.442695, %v9152_v57  ;;  %v11896_v57 = vmov 0.0  }
 0x89b   :  { %9439 = vpow2.f32 %v7255_v16 }
 0x89c   :  { %9441 = vpow2.f32 %v7256_v39 }
 0x89d   :  { %9443 = vpow2.f32 %v7257_v41 }
 0x89e   :  { %9445 = vtanh.f32 %v9151_v49 }
 0x8a5   :  { %v9440_v13 = vpop.eup %9439 }
 0x8a6   :  { %v9442_v27 = vpop.eup %9441  ;;  %v2470_v4 = vadd.f32 1.0, %v9440_v13 }
 0x8a7   :  { %v2476_v0 = vadd.f32 1.0, %v9442_v27  ;;  %v9444_v50 = vpop.eup %9443 }
 0x8a8   :  { %9447 = vrcp.f32 %v2470_v4  ;;  %v9446_v36 = vpop.eup %9445  ;;  %v2483_v62 = vadd.f32 1.0, %v9444_v50 }
 0x8a9   :  { %9449 = vrcp.f32 %v2476_v0 }
 0x8aa   :  { %9451 = vrcp.f32 %v2483_v62 }
 0x8b2   :  { %v9448_v53 = vpop.eup %9447 }
 0x8b3   :  { %v9450_v59 = vpop.eup %9449  ;;  %v2487_v2 = vmul.f32 %v9448_v53, %v9446_v36 }
 0x8b4   :  { %v2486_v16 = vmul.f32 %v9450_v59, %v10632_v6  ;;  %v9452_v12 = vpop.eup %9451  ;;  %v2575_v6 = vld [vmem:[%s11872_s7] sm:$0xf] }
 0x8b5   :  { %v10829_v41 = vrot.slane %v2575_v6, %v10240_v48 }
 0x8b6   :  { %v2488_v7 = vadd.f32 %v2487_v2, %v2486_v16  ;;  %v10834_v2 = vrot.slane %v2575_v6, %v10248_v40  ;;  %v10838_v16 = vrot.slane %v2575_v6, %v10255_v10 }
 0x8b8   :  { %9453 = vtanh.f32 %v2488_v7 }
 0x8c2   :  { %v9454_v26 = vpop.eup %9453 }
 0x8c3   :  { %v2490_v39 = vmul.f32 %v9454_v26, %v9452_v12 }
 0x8c5   :  { %v2497_v0 = vsel %vm2496_vm15, %v2490_v39, %v10637_v55  ;;  %v10826_v55 = vrot.slane %v2575_v6, %v10235_v45 }
 0x8c6   :  { %2704 = vmatmul.mubr.f32.gmra.mrb[30].mxu0 %v2497_v0  ;;  %2817 = vmatmul.mubr.f32.gmra.mrb[30].mxu1 %v2497_v0 }
 0x8c7   :  { %2991 = vmatprep.mubr.f32.mxu0 %v11896_v57  ;;  %3062 = vmatprep.mubr.f32.mxu1 %v11896_v57 }
 0x8ca   :  { %2992 = vmatmul.mubr.f32.vlgmr.msra.gmra.mrb[16].mxu0 %v11896_v57  ;;  %3063 = vmatmul.mubr.f32.vlgmr.msra.gmra.mrb[16].mxu1 %v11896_v57 }
 0x8cb   :  { %8076 = vmatpush1.bf16.msra.mxu0 %v10679_v30  ;;  %8108 = vmatpush1.bf16.msra.mxu1 %v10682_v31 }
 0x8cc   :  { %8078 = vmatprep.subr.bf16.mxu0 %v10687_v29  ;;  %8110 = vmatprep.subr.bf16.mxu1 %v10689_v14 }
 0x8cd   :  { %3236 = vmatprep.mubr.f32.mxu0 %v11896_v57  ;;  %3307 = vmatprep.mubr.f32.mxu1 %v11896_v57 }
 0x8cf   :  { %8080 = vmatpush1.bf16.msra.mxu0 %v10691_v18  ;;  %8112 = vmatpush1.bf16.msra.mxu1 %v10694_v25 }
 0x8d0   :  { %8082 = vmatprep.subr.bf16.mxu0 %v10699_v9  ;;  %8114 = vmatprep.subr.bf16.mxu1 %v10701_v20 }
 0x8d3   :  { %8084 = vmatpush1.bf16.msra.mxu0 %v10703_v42  ;;  %8116 = vmatpush1.bf16.msra.mxu1 %v10706_v47 }
 0x8d4   :  { %8086 = vmatprep.subr.bf16.mxu0 %v10711_v24  ;;  %8118 = vmatprep.subr.bf16.mxu1 %v10713_v56 }
 0x8d7   :  { %8088 = vmatpush1.bf16.msra.mxu0 %v10715_v8  ;;  %8120 = vmatpush1.bf16.msra.mxu1 %v10718_v63 }
 0x8d8   :  { %8090 = vmatprep.subr.bf16.mxu0 %v10722_v37  ;;  %8122 = vmatprep.subr.bf16.mxu1 %v10724_v46 }
 0x8db   :  { %8092 = vmatpush1.bf16.msra.mxu0 %v10727_v32  ;;  %8124 = vmatpush1.bf16.msra.mxu1 %v10731_v11 }
 0x8dc   :  { %8094 = vmatprep.subr.bf16.mxu0 %v10733_v34  ;;  %8126 = vmatprep.subr.bf16.mxu1 %v10735_v35 }
 0x8df   :  { %8096 = vmatpush1.bf16.msra.mxu0 %v10738_v44  ;;  %8128 = vmatpush1.bf16.msra.mxu1 %v10742_v21 }
 0x8e0   :  { %8098 = vmatprep.subr.bf16.mxu0 %v10744_v54  ;;  %8130 = vmatprep.subr.bf16.mxu1 %v10747_v1 }
 0x8e3   :  { %8100 = vmatpush1.bf16.msra.mxu0 %v10750_v52  ;;  %8132 = vmatpush1.bf16.msra.mxu1 %v10754_v3 }
 0x8e4   :  { %8102 = vmatprep.subr.bf16.mxu0 %v10759_v33  ;;  %8134 = vmatprep.subr.bf16.mxu1 %v10761_v61 }
 0x8e7   :  { %8104 = vmatpush1.bf16.msra.mxu0 %v10763_v5  ;;  %8136 = vmatpush1.bf16.msra.mxu1 %v10766_v60 }
 0x8e8   :  { %8138 = vmatprep.subr.bf16.mxu0 %v10675_v22  ;;  %8170 = vmatprep.subr.bf16.mxu1 %v10677_v17 }
 0x99d   :  { %v2993_v49 = vpop.f32.mrb[16].mxu0  ;;  %v3064_v13 = vpop.f32.mrb[16].mxu1 }
 0x99e   :  { %v9153_v27 = vadd.f32 %v2993_v49, %v10826_v55  ;;  %v2995_v4 = vpop.f32.mrb[17].mxu0  ;;  %v3066_v50 = vpop.f32.mrb[17].mxu1  ;;  %v9169_v12 = vadd.f32 %v3064_v13, %v10838_v16 }
 0x99f   :  { %v9154_v36 = vadd.f32 %v2995_v4, %v10829_v41  ;;  %v9170_v62 = vadd.f32 %v3066_v50, %v10834_v2 }
 0x9a0   :  { %v7258_v53 = vmul.f32 -1.442695, %v9153_v27 }
 0x9a1   :  { %v7259_v59 = vmul.f32 -1.442695, %v9154_v36  ;;  %v7260_v7 = vmul.f32 -1.442695, %v9170_v62 }
 0x9a2   :  { %9455 = vpow2.f32 %v7258_v53 }
 0x9a3   :  { %9457 = vpow2.f32 %v7259_v59 }
 0x9a4   :  { %9459 = vpow2.f32 %v7260_v7 }
 0x9a5   :  { %9461 = vtanh.f32 %v9169_v12 }
 0x9ac   :  { %v9456_v26 = vpop.eup %9455 }
 0x9ad   :  { %v9458_v39 = vpop.eup %9457  ;;  %v3076_v0 = vadd.f32 1.0, %v9456_v26 }
 0x9ae   :  { %v3082_v49 = vadd.f32 1.0, %v9458_v39  ;;  %v9460_v27 = vpop.eup %9459 }
 0x9af   :  { %9463 = vrcp.f32 %v3076_v0  ;;  %v9462_v4 = vpop.eup %9461  ;;  %v3089_v50 = vadd.f32 1.0, %v9460_v27 }
 0x9b0   :  { %9465 = vrcp.f32 %v3082_v49 }
 0x9b1   :  { %9467 = vrcp.f32 %v3089_v50 }
 0x9b9   :  { %v9464_v36 = vpop.eup %9463 }
 0x9ba   :  { %v9466_v53 = vpop.eup %9465  ;;  %v3093_v59 = vmul.f32 %v9464_v36, %v9462_v4 }
 0x9bb   :  { %v3092_v40 = vmul.f32 0.0, %v9466_v53  ;;  %v9468_v13 = vpop.eup %9467 }
 0x9bd   :  { %v10841_v6 = vadd.f32 %v3093_v59, %v3092_v40 }
 0x9bf   :  { %9469 = vtanh.f32 %v10841_v6 }
 0x9c9   :  { %v9470_v62 = vpop.eup %9469 }
 0x9ca   :  { %v10844_v26 = vmul.f32 %v9470_v62, %v9468_v13 }
 0x9cc   :  { %7311 = vmatmul.mubr.msk.f32.vlgmr.msra.gmra.mrb[18].mxu0 %vm726_vm4, %v10844_v26  ;;  %7312 = vmatmul.mubr.msk.f32.vlgmr.msra.gmra.mrb[18].mxu1 %vm726_vm4, %v10844_v26 }
 0x9cd   :  { %8140 = vmatpush1.bf16.msra.mxu0 %v10679_v30  ;;  %8172 = vmatpush1.bf16.msra.mxu1 %v10682_v31 }
 0x9ce   :  { %8142 = vmatprep.subr.bf16.mxu0 %v10687_v29  ;;  %8174 = vmatprep.subr.bf16.mxu1 %v10689_v14 }
 0x9cf   :  { %3481 = vmatprep.mubr.f32.mxu0 %v11896_v57  ;;  %3552 = vmatprep.mubr.f32.mxu1 %v11896_v57 }
 0x9d1   :  { %8144 = vmatpush1.bf16.msra.mxu0 %v10691_v18  ;;  %8176 = vmatpush1.bf16.msra.mxu1 %v10694_v25 }
 0x9d2   :  { %8146 = vmatprep.subr.bf16.mxu0 %v10699_v9  ;;  %8178 = vmatprep.subr.bf16.mxu1 %v10701_v20 }
 0x9d5   :  { %8148 = vmatpush1.bf16.msra.mxu0 %v10703_v42  ;;  %8180 = vmatpush1.bf16.msra.mxu1 %v10706_v47 }
 0x9d6   :  { %8150 = vmatprep.subr.bf16.mxu0 %v10711_v24  ;;  %8182 = vmatprep.subr.bf16.mxu1 %v10713_v56 }
 0x9d9   :  { %8152 = vmatpush1.bf16.msra.mxu0 %v10715_v8  ;;  %8184 = vmatpush1.bf16.msra.mxu1 %v10718_v63 }
 0x9da   :  { %8154 = vmatprep.subr.bf16.mxu0 %v10722_v37  ;;  %8186 = vmatprep.subr.bf16.mxu1 %v10724_v46 }
 0x9dd   :  { %8156 = vmatpush1.bf16.msra.mxu0 %v10727_v32  ;;  %8188 = vmatpush1.bf16.msra.mxu1 %v10731_v11 }
 0x9de   :  { %8158 = vmatprep.subr.bf16.mxu0 %v10733_v34  ;;  %8190 = vmatprep.subr.bf16.mxu1 %v10735_v35 }
 0x9e1   :  { %8160 = vmatpush1.bf16.msra.mxu0 %v10738_v44  ;;  %8192 = vmatpush1.bf16.msra.mxu1 %v10742_v21 }
 0x9e2   :  { %8162 = vmatprep.subr.bf16.mxu0 %v10744_v54  ;;  %8194 = vmatprep.subr.bf16.mxu1 %v10747_v1 }
 0x9e5   :  { %8164 = vmatpush1.bf16.msra.mxu0 %v10750_v52  ;;  %8196 = vmatpush1.bf16.msra.mxu1 %v10754_v3 }
 0x9e6   :  { %8166 = vmatprep.subr.bf16.mxu0 %v10759_v33  ;;  %8198 = vmatprep.subr.bf16.mxu1 %v10761_v61 }
 0x9e9   :  { %8168 = vmatpush1.bf16.msra.mxu0 %v10763_v5  ;;  %8200 = vmatpush1.bf16.msra.mxu1 %v10766_v60 }
 0x9ea   :  { %8202 = vmatprep.subr.bf16.mxu0 %v10675_v22  ;;  %8234 = vmatprep.subr.bf16.mxu1 %v10677_v17 }
 0xa9f   :  { %v3238_v40 = vpop.f32.mrb[18].mxu0  ;;  %v3309_v7 = vpop.f32.mrb[18].mxu1 }
 0xaa0   :  { %v9155_v12 = vadd.f32 %v3238_v40, %v10826_v55  ;;  %v3240_v39 = vpop.f32.mrb[19].mxu0  ;;  %v3311_v0 = vpop.f32.mrb[19].mxu1  ;;  %v9171_v59 = vadd.f32 %v3309_v7, %v10838_v16 }
 0xaa1   :  { %v9156_v49 = vadd.f32 %v3240_v39, %v10829_v41  ;;  %v9172_v36 = vadd.f32 %v3311_v0, %v10834_v2 }
 0xaa2   :  { %v7261_v27 = vmul.f32 -1.442695, %v9155_v12 }
 0xaa3   :  { %v7262_v4 = vmul.f32 -1.442695, %v9156_v49  ;;  %v7263_v53 = vmul.f32 -1.442695, %v9172_v36  ;;  %v3098_v49 = vsel %vm726_vm4, %v10841_v6, 0.0 }
 0xaa4   :  { %9471 = vpow2.f32 %v7261_v27 }
 0xaa5   :  { %9473 = vpow2.f32 %v7262_v4 }
 0xaa6   :  { %9475 = vpow2.f32 %v7263_v53 }
 0xaa7   :  { %9477 = vtanh.f32 %v9171_v59 }
 0xaae   :  { %v9472_v22 = vpop.eup %9471 }
 0xaaf   :  { %v9474_v50 = vpop.eup %9473  ;;  %v3321_v17 = vadd.f32 1.0, %v9472_v22 }
 0xab0   :  { %v3327_v13 = vadd.f32 1.0, %v9474_v50  ;;  %v9476_v62 = vpop.eup %9475  ;;  %v3097_v50 = vsel %vm726_vm4, %v10844_v26, 0.0 }
 0xab1   :  { %9479 = vrcp.f32 %v3321_v17  ;;  %v9478_v40 = vpop.eup %9477  ;;  %v3334_v27 = vadd.f32 1.0, %v9476_v62  ;;  %v3846_v17 = vld [vmem:[#allocation11 + $0x18] sm:$0xff] }
 0xab2   :  { %9481 = vrcp.f32 %v3327_v13  ;;  %v3850_v62 = vld [vmem:[#allocation11 + $0x38] sm:$0xff] }
 0xab3   :  { %9483 = vrcp.f32 %v3334_v27  ;;  %v3849_v27 = vld [vmem:[#allocation11 + $0x30] sm:$0xff] }
 0xabb   :  { %v9480_v39 = vpop.eup %9479 }
 0xabc   :  { %v9482_v12 = vpop.eup %9481  ;;  %v3338_v0 = vmul.f32 %v9480_v39, %v9478_v40  ;;  %v3843_v40 = vld [vmem:[#allocation11] sm:$0xff] }
 0xabd   :  { %v3337_v4 = vmul.f32 %v9482_v12, %v3098_v49  ;;  %v9484_v53 = vpop.eup %9483  ;;  %v3847_v39 = vld [vmem:[#allocation11 + $0x20] sm:$0xff]  ;;  %v10959_v12 = vpack.c.bf16 %v3850_v62, %v3846_v17  ;;  %v3873_v17 = vld [vmem:[#allocation11 + $0xf0] sm:$0xff] }
 0xabf   :  { %v3339_v7 = vadd.f32 %v3338_v0, %v3337_v4  ;;  %v3845_v0 = vld [vmem:[#allocation11 + $0x10] sm:$0xff] }
 0xac0   :  { %v10964_v4 = vpack.c.bf16 %v3849_v27, %v3845_v0  ;;  %v3878_v0 = vld [vmem:[#allocation11 + $0x118] sm:$0xff] }
 0xac1   :  { %9485 = vtanh.f32 %v3339_v7  ;;  %v10895_v36 = vsel %vm978_vm9, %v3339_v7, %v3098_v49  ;;  %v10961_v49 = vpack.c.bf16 %v3847_v39, %v3843_v40  ;;  %v3852_v7 = vld [vmem:[#allocation11 + $0x48] sm:$0xff] }
 0xac2   :  { %v3876_v40 = vld [vmem:[#allocation11 + $0x108] sm:$0xff] }
 0xac3   :  { %v3880_v39 = vld [vmem:[#allocation11 + $0x128] sm:$0xff] }
 0xac4   :  { %v11005_v27 = vpack.c.bf16 %v3880_v39, %v3876_v40 }
 0xacb   :  { %v9486_v59 = vpop.eup %9485 }
 0xacc   :  { %v3341_v22 = vmul.f32 %v9486_v59, %v9484_v53  ;;  %v3854_v53 = vld [vmem:[#allocation11 + $0x58] sm:$0xff] }
 0xace   :  { %v10902_v6 = vsel %vm978_vm9, %v3341_v22, %v3097_v50  ;;  %v3858_v22 = vld [vmem:[#allocation11 + $0x78] sm:$0xff]  ;;  %v3851_v50 = vld [vmem:[#allocation11 + $0x40] sm:$0xff] }
 0xacf   :  { %3482 = vmatmul.mubr.f32.vlgmr.msra.gmra.mrb[20].mxu0 %v10902_v6  ;;  %3553 = vmatmul.mubr.f32.vlgmr.msra.gmra.mrb[20].mxu1 %v10902_v6 }
 0xad0   :  { %8204 = vmatpush1.bf16.msra.mxu0 %v10679_v30  ;;  %8236 = vmatpush1.bf16.msra.mxu1 %v10682_v31 }
 0xad1   :  { %8206 = vmatprep.subr.bf16.mxu0 %v10687_v29  ;;  %8238 = vmatprep.subr.bf16.mxu1 %v10689_v14 }
 0xad2   :  { %3726 = vmatprep.mubr.f32.mxu0 %v11896_v57  ;;  %3797 = vmatprep.mubr.f32.mxu1 %v11896_v57 }
 0xad4   :  { %8208 = vmatpush1.bf16.msra.mxu0 %v10691_v18  ;;  %8240 = vmatpush1.bf16.msra.mxu1 %v10694_v25 }
 0xad5   :  { %8210 = vmatprep.subr.bf16.mxu0 %v10699_v9  ;;  %8242 = vmatprep.subr.bf16.mxu1 %v10701_v20 }
 0xad8   :  { %8212 = vmatpush1.bf16.msra.mxu0 %v10703_v42  ;;  %8244 = vmatpush1.bf16.msra.mxu1 %v10706_v47 }
 0xad9   :  { %8214 = vmatprep.subr.bf16.mxu0 %v10711_v24  ;;  %8246 = vmatprep.subr.bf16.mxu1 %v10713_v56 }
 0xadc   :  { %8216 = vmatpush1.bf16.msra.mxu0 %v10715_v8  ;;  %8248 = vmatpush1.bf16.msra.mxu1 %v10718_v63 }
 0xadd   :  { %8218 = vmatprep.subr.bf16.mxu0 %v10722_v37  ;;  %8250 = vmatprep.subr.bf16.mxu1 %v10724_v46 }
 0xae0   :  { %8220 = vmatpush1.bf16.msra.mxu0 %v10727_v32  ;;  %8252 = vmatpush1.bf16.msra.mxu1 %v10731_v11 }
 0xae1   :  { %8222 = vmatprep.subr.bf16.mxu0 %v10733_v34  ;;  %8254 = vmatprep.subr.bf16.mxu1 %v10735_v35 }
 0xae4   :  { %8224 = vmatpush1.bf16.msra.mxu0 %v10738_v44  ;;  %8256 = vmatpush1.bf16.msra.mxu1 %v10742_v21 }
 0xae5   :  { %8226 = vmatprep.subr.bf16.mxu0 %v10744_v54  ;;  %8258 = vmatprep.subr.bf16.mxu1 %v10747_v1 }
 0xae8   :  { %8228 = vmatpush1.bf16.msra.mxu0 %v10750_v52  ;;  %8260 = vmatpush1.bf16.msra.mxu1 %v10754_v3 }
 0xae9   :  { %8230 = vmatprep.subr.bf16.mxu0 %v10759_v33  ;;  %8262 = vmatprep.subr.bf16.mxu1 %v10761_v61 }
 0xaec   :  { %8232 = vmatpush1.bf16.msra.mxu0 %v10763_v5  ;;  %8264 = vmatpush1.bf16.msra.mxu1 %v10766_v60  ;;  %v3844_v5 = vld [vmem:[#allocation11 + $0x8] sm:$0xff] }
 0xaed   :  { %v3848_v60 = vld [vmem:[#allocation11 + $0x28] sm:$0xff]  ;;  %8298 = vmatprep.subr.bf16.mxu1 %v10959_v12 }
 0xaee   :  { %v10957_v13 = vpack.c.bf16 %v3848_v60, %v3844_v5  ;;  %v3869_v60 = vld [vmem:[#allocation11 + $0xd0] sm:$0xff] }
 0xaef   :  { %v11000_v62 = vpack.c.bf16 %v3873_v17, %v3869_v60  ;;  %v3894_v60 = vld [vmem:[#allocation11 + $0x198] sm:$0xff] }
 0xaf0   :  { %8266 = vmatprep.subr.bf16.mxu0 %v10957_v13  ;;  %v3898_v17 = vld [vmem:[#allocation11 + $0x1b8] sm:$0xff] }
 0xaf1   :  { %v11030_v39 = vpack.c.bf16 %v3898_v17, %v3894_v60 }
 0xba2   :  { %v3483_v30 = vpop.f32.mrb[20].mxu0  ;;  %v3554_v31 = vpop.f32.mrb[20].mxu1 }
 0xba3   :  { %v9157_v29 = vadd.f32 %v3483_v30, %v10826_v55  ;;  %v3485_v14 = vpop.f32.mrb[21].mxu0  ;;  %v3556_v18 = vpop.f32.mrb[21].mxu1  ;;  %v9173_v24 = vadd.f32 %v3554_v31, %v10838_v16  ;;  %v3855_v30 = vld [vmem:[#allocation11 + $0x60] sm:$0xff]  ;;  %v10971_v31 = vpack.c.bf16 %v3858_v22, %v3854_v53 }
 0xba4   :  { %v9158_v25 = vadd.f32 %v3485_v14, %v10829_v41  ;;  %v9174_v42 = vadd.f32 %v3556_v18, %v10834_v2  ;;  %v3853_v14 = vld [vmem:[#allocation11 + $0x50] sm:$0xff]  ;;  %v3879_v53 = vld [vmem:[#allocation11 + $0x120] sm:$0xff] }
 0xba5   :  { %v7264_v9 = vmul.f32 -1.442695, %v9157_v29  ;;  %v10973_v29 = vpack.c.bf16 %v3855_v30, %v3851_v50  ;;  %v3857_v18 = vld [vmem:[#allocation11 + $0x70] sm:$0xff] }
 0xba6   :  { %v7265_v20 = vmul.f32 -1.442695, %v9158_v25  ;;  %v7266_v47 = vmul.f32 -1.442695, %v9174_v42  ;;  %v10976_v25 = vpack.c.bf16 %v3857_v18, %v3853_v14  ;;  %v3862_v42 = vld [vmem:[#allocation11 + $0x98] sm:$0xff]  ;;  %v3877_v30 = vld [vmem:[#allocation11 + $0x110] sm:$0xff] }
 0xba7   :  { %9487 = vpow2.f32 %v7264_v9  ;;  %v3860_v9 = vld [vmem:[#allocation11 + $0x88] sm:$0xff]  ;;  %v3881_v14 = vld [vmem:[#allocation11 + $0x130] sm:$0xff] }
 0xba8   :  { %9489 = vpow2.f32 %v7265_v20  ;;  %v3864_v20 = vld [vmem:[#allocation11 + $0xa8] sm:$0xff]  ;;  %v11012_v18 = vpack.c.bf16 %v3881_v14, %v3877_v30  ;;  %v3897_v30 = vld [vmem:[#allocation11 + $0x1b0] sm:$0xff] }
 0xba9   :  { %9491 = vpow2.f32 %v7266_v47  ;;  %v10981_v47 = vpack.c.bf16 %v3864_v20, %v3860_v9  ;;  %v3884_v9 = vld [vmem:[#allocation11 + $0x148] sm:$0xff] }
 0xbaa   :  { %9493 = vtanh.f32 %v9173_v24  ;;  %v3866_v24 = vld [vmem:[#allocation11 + $0xb8] sm:$0xff]  ;;  %v3888_v20 = vld [vmem:[#allocation11 + $0x168] sm:$0xff] }
 0xbab   :  { %v3900_v14 = vld [vmem:[#allocation11 + $0x1c8] sm:$0xff] }
 0xbb1   :  { %v9488_v56 = vpop.eup %9487 }
 0xbb2   :  { %v9490_v8 = vpop.eup %9489  ;;  %v3566_v63 = vadd.f32 1.0, %v9488_v56  ;;  %v3859_v56 = vld [vmem:[#allocation11 + $0x80] sm:$0xff] }
 0xbb3   :  { %v3572_v37 = vadd.f32 1.0, %v9490_v8  ;;  %v9492_v46 = vpop.eup %9491  ;;  %v3863_v8 = vld [vmem:[#allocation11 + $0xa0] sm:$0xff] }
 0xbb4   :  { %9495 = vrcp.f32 %v3566_v63  ;;  %v9494_v32 = vpop.eup %9493  ;;  %v3579_v44 = vadd.f32 1.0, %v9492_v46  ;;  %v10983_v63 = vpack.c.bf16 %v3866_v24, %v3862_v42  ;;  %v3861_v46 = vld [vmem:[#allocation11 + $0x90] sm:$0xff]  ;;  %v3886_v42 = vld [vmem:[#allocation11 + $0x158] sm:$0xff]  ;;  %v11017_v24 = vpack.c.bf16 %v3888_v20, %v3884_v9  ;;  %v3904_v9 = vld [vmem:[#allocation11 + $0x1e8] sm:$0xff] }
 0xbb5   :  { %9497 = vrcp.f32 %v3572_v37  ;;  %v10985_v37 = vpack.c.bf16 %v3863_v8, %v3859_v56  ;;  %v3890_v56 = vld [vmem:[#allocation11 + $0x178] sm:$0xff]  ;;  %v3883_v8 = vld [vmem:[#allocation11 + $0x140] sm:$0xff] }
 0xbb6   :  { %9499 = vrcp.f32 %v3579_v44  ;;  %v3870_v44 = vld [vmem:[#allocation11 + $0xd8] sm:$0xff] }
 0xbbe   :  { %v9496_v11 = vpop.eup %9495 }
 0xbbf   :  { %v9498_v34 = vpop.eup %9497  ;;  %v3583_v35 = vmul.f32 %v9496_v11, %v9494_v32  ;;  %v3865_v32 = vld [vmem:[#allocation11 + $0xb0] sm:$0xff] }
 0xbc0   :  { %v3582_v21 = vmul.f32 %v9498_v34, %v10895_v36  ;;  %v9500_v52 = vpop.eup %9499  ;;  %v10988_v11 = vpack.c.bf16 %v3865_v32, %v3861_v46  ;;  %v3868_v34 = vld [vmem:[#allocation11 + $0xc8] sm:$0xff]  ;;  %v3887_v46 = vld [vmem:[#allocation11 + $0x160] sm:$0xff]  ;;  %v11019_v32 = vpack.c.bf16 %v3890_v56, %v3886_v42  ;;  %v11039_v42 = vpack.c.bf16 %v3904_v9, %v3900_v14  ;;  %v3902_v56 = vld [vmem:[#allocation11 + $0x1d8] sm:$0xff] }
 0xbc2   :  { %v3584_v54 = vadd.f32 %v3583_v35, %v3582_v21  ;;  %v3872_v35 = vld [vmem:[#allocation11 + $0xe8] sm:$0xff] }
 0xbc3   :  { %v10993_v21 = vpack.c.bf16 %v3872_v35, %v3868_v34  ;;  %v11021_v34 = vpack.c.bf16 %v3887_v46, %v3883_v8  ;;  %v3885_v35 = vld [vmem:[#allocation11 + $0x150] sm:$0xff]  ;;  %v3906_v8 = vld [vmem:[#allocation11 + $0x1f8] sm:$0xff]  ;;  %v3899_v46 = vld [vmem:[#allocation11 + $0x1c0] sm:$0xff] }
 0xbc4   :  { %9501 = vtanh.f32 %v3584_v54  ;;  %v10946_v1 = vsel %vm1231_vm10, %v3584_v54, %v10895_v36  ;;  %v3856_v36 = vld [vmem:[#allocation11 + $0x68] sm:$0xff]  ;;  %v3874_v54 = vld [vmem:[#allocation11 + $0xf8] sm:$0xff] }
 0xbc5   :  { %v10969_v59 = vpack.c.bf16 %v3856_v36, %v3852_v7  ;;  %v3882_v7 = vld [vmem:[#allocation11 + $0x138] sm:$0xff]  ;;  %v3875_v36 = vld [vmem:[#allocation11 + $0x100] sm:$0xff] }
 0xbc6   :  { %v11007_v22 = vpack.c.bf16 %v3882_v7, %v3878_v0  ;;  %v11009_v50 = vpack.c.bf16 %v3879_v53, %v3875_v36  ;;  %v3891_v0 = vld [vmem:[#allocation11 + $0x180] sm:$0xff]  ;;  %v3893_v36 = vld [vmem:[#allocation11 + $0x190] sm:$0xff] }
 0xbc7   :  { %v3895_v7 = vld [vmem:[#allocation11 + $0x1a0] sm:$0xff]  ;;  %v11037_v20 = vpack.c.bf16 %v3897_v30, %v3893_v36 }
 0xbc8   :  { %v11033_v53 = vpack.c.bf16 %v3895_v7, %v3891_v0 }
 0xbce   :  { %v9502_v3 = vpop.eup %9501 }
 0xbcf   :  { %v3586_v33 = vmul.f32 %v9502_v3, %v9500_v52  ;;  %v3867_v52 = vld [vmem:[#allocation11 + $0xc0] sm:$0xff] }
 0xbd0   :  { %v3871_v3 = vld [vmem:[#allocation11 + $0xe0] sm:$0xff] }
 0xbd1   :  { %v10951_v61 = vsel %vm1231_vm10, %v3586_v33, %v10902_v6  ;;  %v10995_v33 = vpack.c.bf16 %v3874_v54, %v3870_v44  ;;  %v10997_v5 = vpack.c.bf16 %v3871_v3, %v3867_v52  ;;  %v3889_v44 = vld [vmem:[#allocation11 + $0x170] sm:$0xff]  ;;  %v3892_v54 = vld [vmem:[#allocation11 + $0x188] sm:$0xff] }
 0xbd2   :  { %3727 = vmatmul.mubr.f32.vlgmr.msra.gmra.mrb[22].mxu0 %v10951_v61  ;;  %3798 = vmatmul.mubr.f32.vlgmr.msra.gmra.mrb[22].mxu1 %v10951_v61  ;;  %v11024_v52 = vpack.c.bf16 %v3889_v44, %v3885_v35  ;;  %v3896_v3 = vld [vmem:[#allocation11 + $0x1a8] sm:$0xff]  ;;  %v11041_v35 = vpack.c.bf16 %v3906_v8, %v3902_v56  ;;  %v3903_v44 = vld [vmem:[#allocation11 + $0x1e0] sm:$0xff] }
 0xbd3   :  { %3971 = vmatprep.mubr.f32.mxu0 %v11896_v57  ;;  %4042 = vmatprep.mubr.f32.mxu1 %v11896_v57  ;;  %v11028_v40 = vpack.c.bf16 %v3896_v3, %v3892_v54  ;;  %v3901_v54 = vld [vmem:[#allocation11 + $0x1d0] sm:$0xff]  ;;  %v11044_v60 = vpack.c.bf16 %v3903_v44, %v3899_v46 }
 0xbd4   :  { %8268 = vmatpush1.bf16.msra.mxu0 %v10961_v49  ;;  %8300 = vmatpush1.bf16.msra.mxu1 %v10964_v4  ;;  %v3905_v3 = vld [vmem:[#allocation11 + $0x1f0] sm:$0xff] }
 0xbd5   :  { %8270 = vmatprep.subr.bf16.mxu0 %v10969_v59  ;;  %8302 = vmatprep.subr.bf16.mxu1 %v10971_v31  ;;  %v11048_v17 = vpack.c.bf16 %v3905_v3, %v3901_v54 }
 0xbd8   :  { %8272 = vmatpush1.bf16.msra.mxu0 %v10973_v29  ;;  %8304 = vmatpush1.bf16.msra.mxu1 %v10976_v25 }
 0xbd9   :  { %8274 = vmatprep.subr.bf16.mxu0 %v10981_v47  ;;  %8306 = vmatprep.subr.bf16.mxu1 %v10983_v63 }
 0xbdc   :  { %8276 = vmatpush1.bf16.msra.mxu0 %v10985_v37  ;;  %8308 = vmatpush1.bf16.msra.mxu1 %v10988_v11 }
 0xbdd   :  { %8278 = vmatprep.subr.bf16.mxu0 %v10993_v21  ;;  %8310 = vmatprep.subr.bf16.mxu1 %v10995_v33 }
 0xbe0   :  { %8280 = vmatpush1.bf16.msra.mxu0 %v10997_v5  ;;  %8312 = vmatpush1.bf16.msra.mxu1 %v11000_v62 }
 0xbe1   :  { %8282 = vmatprep.subr.bf16.mxu0 %v11005_v27  ;;  %8314 = vmatprep.subr.bf16.mxu1 %v11007_v22 }
 0xbe4   :  { %8284 = vmatpush1.bf16.msra.mxu0 %v11009_v50  ;;  %8316 = vmatpush1.bf16.msra.mxu1 %v11012_v18 }
 0xbe5   :  { %8286 = vmatprep.subr.bf16.mxu0 %v11017_v24  ;;  %8318 = vmatprep.subr.bf16.mxu1 %v11019_v32 }
 0xbe8   :  { %8288 = vmatpush1.bf16.msra.mxu0 %v11021_v34  ;;  %8320 = vmatpush1.bf16.msra.mxu1 %v11024_v52 }
 0xbe9   :  { %8290 = vmatprep.subr.bf16.mxu0 %v11028_v40  ;;  %8322 = vmatprep.subr.bf16.mxu1 %v11030_v39 }
 0xbec   :  { %8292 = vmatpush1.bf16.msra.mxu0 %v11033_v53  ;;  %8324 = vmatpush1.bf16.msra.mxu1 %v11037_v20 }
 0xbed   :  { %8294 = vmatprep.subr.bf16.mxu0 %v11039_v42  ;;  %8326 = vmatprep.subr.bf16.mxu1 %v11041_v35 }
 0xbf0   :  { %8296 = vmatpush1.bf16.msra.mxu0 %v11044_v60  ;;  %8328 = vmatpush1.bf16.msra.mxu1 %v11048_v17 }
 0xbf1   :  { %8330 = vmatprep.subr.bf16.mxu0 %v10957_v13  ;;  %8362 = vmatprep.subr.bf16.mxu1 %v10959_v12 }
 0xca5   :  { %v3728_v0 = vpop.f32.mrb[22].mxu0  ;;  %v3799_v7 = vpop.f32.mrb[22].mxu1 }
 0xca6   :  { %v9159_v36 = vadd.f32 %v3728_v0, %v10826_v55  ;;  %v3730_v30 = vpop.f32.mrb[23].mxu0  ;;  %v3801_v14 = vpop.f32.mrb[23].mxu1  ;;  %v9175_v54 = vadd.f32 %v3799_v7, %v10838_v16 }
 0xca7   :  { %v9160_v9 = vadd.f32 %v3730_v30, %v10829_v41  ;;  %v9176_v46 = vadd.f32 %v3801_v14, %v10834_v2 }
 0xca8   :  { %v7267_v56 = vmul.f32 -1.442695, %v9159_v36 }
 0xca9   :  { %v7268_v8 = vmul.f32 -1.442695, %v9160_v9  ;;  %v7269_v44 = vmul.f32 -1.442695, %v9176_v46 }
 0xcaa   :  { %9503 = vpow2.f32 %v7267_v56 }
 0xcab   :  { %9505 = vpow2.f32 %v7268_v8 }
 0xcac   :  { %9507 = vpow2.f32 %v7269_v44 }
 0xcad   :  { %9509 = vtanh.f32 %v9175_v54 }
 0xcb4   :  { %v9504_v3 = vpop.eup %9503 }
 0xcb5   :  { %v9506_v19 = vpop.eup %9505  ;;  %v3811_v23 = vadd.f32 1.0, %v9504_v3 }
 0xcb6   :  { %v3817_v10 = vadd.f32 1.0, %v9506_v19  ;;  %v9508_v0 = vpop.eup %9507 }
 0xcb7   :  { %9511 = vrcp.f32 %v3811_v23  ;;  %v9510_v48 = vpop.eup %9509  ;;  %v3824_v56 = vadd.f32 1.0, %v9508_v0 }
 0xcb8   :  { %9513 = vrcp.f32 %v3817_v10 }
 0xcb9   :  { %9515 = vrcp.f32 %v3824_v56 }
 0xcc1   :  { %v9512_v30 = vpop.eup %9511 }
 0xcc2   :  { %v9514_v36 = vpop.eup %9513  ;;  %v3828_v9 = vmul.f32 %v9512_v30, %v9510_v48 }
 0xcc3   :  { %v3827_v8 = vmul.f32 %v9514_v36, %v10946_v1  ;;  %v9516_v46 = vpop.eup %9515 }
 0xcc5   :  { %v3829_v14 = vadd.f32 %v3828_v9, %v3827_v8 }
 0xcc7   :  { %9517 = vtanh.f32 %v3829_v14  ;;  %v11063_v7 = vsel %vm1484_vm11, %v3829_v14, %v10946_v1 }
 0xcd1   :  { %v9518_v19 = vpop.eup %9517 }
 0xcd2   :  { %v3831_v23 = vmul.f32 %v9518_v19, %v9516_v46 }
 0xcd4   :  { %v11068_v10 = vsel %vm1484_vm11, %v3831_v23, %v10951_v61 }
 0xcd5   :  { %3972 = vmatmul.mubr.f32.vlgmr.msra.gmra.mrb[24].mxu0 %v11068_v10  ;;  %4043 = vmatmul.mubr.f32.vlgmr.msra.gmra.mrb[24].mxu1 %v11068_v10 }
 0xcd6   :  { %8332 = vmatpush1.bf16.msra.mxu0 %v10961_v49  ;;  %8364 = vmatpush1.bf16.msra.mxu1 %v10964_v4 }
 0xcd7   :  { %8334 = vmatprep.subr.bf16.mxu0 %v10969_v59  ;;  %8366 = vmatprep.subr.bf16.mxu1 %v10971_v31 }
 0xcd8   :  { %4216 = vmatprep.mubr.f32.mxu0 %v11896_v57  ;;  %4287 = vmatprep.mubr.f32.mxu1 %v11896_v57 }
 0xcda   :  { %8336 = vmatpush1.bf16.msra.mxu0 %v10973_v29  ;;  %8368 = vmatpush1.bf16.msra.mxu1 %v10976_v25 }
 0xcdb   :  { %8338 = vmatprep.subr.bf16.mxu0 %v10981_v47  ;;  %8370 = vmatprep.subr.bf16.mxu1 %v10983_v63 }
 0xcde   :  { %8340 = vmatpush1.bf16.msra.mxu0 %v10985_v37  ;;  %8372 = vmatpush1.bf16.msra.mxu1 %v10988_v11 }
 0xcdf   :  { %8342 = vmatprep.subr.bf16.mxu0 %v10993_v21  ;;  %8374 = vmatprep.subr.bf16.mxu1 %v10995_v33 }
 0xce2   :  { %8344 = vmatpush1.bf16.msra.mxu0 %v10997_v5  ;;  %8376 = vmatpush1.bf16.msra.mxu1 %v11000_v62 }
 0xce3   :  { %8346 = vmatprep.subr.bf16.mxu0 %v11005_v27  ;;  %8378 = vmatprep.subr.bf16.mxu1 %v11007_v22 }
 0xce6   :  { %8348 = vmatpush1.bf16.msra.mxu0 %v11009_v50  ;;  %8380 = vmatpush1.bf16.msra.mxu1 %v11012_v18 }
 0xce7   :  { %8350 = vmatprep.subr.bf16.mxu0 %v11017_v24  ;;  %8382 = vmatprep.subr.bf16.mxu1 %v11019_v32 }
 0xcea   :  { %8352 = vmatpush1.bf16.msra.mxu0 %v11021_v34  ;;  %8384 = vmatpush1.bf16.msra.mxu1 %v11024_v52 }
 0xceb   :  { %8354 = vmatprep.subr.bf16.mxu0 %v11028_v40  ;;  %8386 = vmatprep.subr.bf16.mxu1 %v11030_v39 }
 0xcee   :  { %8356 = vmatpush1.bf16.msra.mxu0 %v11033_v53  ;;  %8388 = vmatpush1.bf16.msra.mxu1 %v11037_v20 }
 0xcef   :  { %8358 = vmatprep.subr.bf16.mxu0 %v11039_v42  ;;  %8390 = vmatprep.subr.bf16.mxu1 %v11041_v35 }
 0xcf2   :  { %8360 = vmatpush1.bf16.msra.mxu0 %v11044_v60  ;;  %8392 = vmatpush1.bf16.msra.mxu1 %v11048_v17 }
 0xcf3   :  { %8394 = vmatprep.subr.bf16.mxu0 %v10957_v13  ;;  %8426 = vmatprep.subr.bf16.mxu1 %v10959_v12 }
 0xda8   :  { %v3973_v48 = vpop.f32.mrb[24].mxu0  ;;  %v4044_v1 = vpop.f32.mrb[24].mxu1 }
 0xda9   :  { %v9161_v44 = vadd.f32 %v3973_v48, %v10826_v55  ;;  %v3975_v54 = vpop.f32.mrb[25].mxu0  ;;  %v4046_v3 = vpop.f32.mrb[25].mxu1  ;;  %v9177_v8 = vadd.f32 %v4044_v1, %v10838_v16 }
 0xdaa   :  { %v9162_v0 = vadd.f32 %v3975_v54, %v10829_v41  ;;  %v9178_v9 = vadd.f32 %v4046_v3, %v10834_v2 }
 0xdab   :  { %v7270_v30 = vmul.f32 -1.442695, %v9161_v44 }
 0xdac   :  { %v7271_v36 = vmul.f32 -1.442695, %v9162_v0  ;;  %v7272_v56 = vmul.f32 -1.442695, %v9178_v9 }
 0xdad   :  { %9519 = vpow2.f32 %v7270_v30 }
 0xdae   :  { %9521 = vpow2.f32 %v7271_v36 }
 0xdaf   :  { %9523 = vpow2.f32 %v7272_v56 }
 0xdb0   :  { %9525 = vtanh.f32 %v9177_v8 }
 0xdb7   :  { %v9520_v14 = vpop.eup %9519 }
 0xdb8   :  { %v9522_v46 = vpop.eup %9521  ;;  %v4056_v19 = vadd.f32 1.0, %v9520_v14 }
 0xdb9   :  { %v4062_v23 = vadd.f32 1.0, %v9522_v46  ;;  %v9524_v48 = vpop.eup %9523 }
 0xdba   :  { %9527 = vrcp.f32 %v4056_v19  ;;  %v9526_v38 = vpop.eup %9525  ;;  %v4069_v30 = vadd.f32 1.0, %v9524_v48 }
 0xdbb   :  { %9529 = vrcp.f32 %v4062_v23 }
 0xdbc   :  { %9531 = vrcp.f32 %v4069_v30 }
 0xdc4   :  { %v9528_v54 = vpop.eup %9527 }
 0xdc5   :  { %v9530_v44 = vpop.eup %9529  ;;  %v4073_v0 = vmul.f32 %v9528_v54, %v9526_v38 }
 0xdc6   :  { %v4072_v36 = vmul.f32 %v9530_v44, %v11063_v7  ;;  %v9532_v9 = vpop.eup %9531 }
 0xdc8   :  { %v4074_v3 = vadd.f32 %v4073_v0, %v4072_v36 }
 0xdca   :  { %9533 = vtanh.f32 %v4074_v3  ;;  %v11114_v1 = vsel %vm1737_vm12, %v4074_v3, %v11063_v7 }
 0xdd4   :  { %v9534_v56 = vpop.eup %9533 }
 0xdd5   :  { %v4076_v8 = vmul.f32 %v9534_v56, %v9532_v9 }
 0xdd7   :  { %v11119_v14 = vsel %vm1737_vm12, %v4076_v8, %v11068_v10 }
 0xdd8   :  { %4217 = vmatmul.mubr.f32.vlgmr.msra.gmra.mrb[26].mxu0 %v11119_v14  ;;  %4288 = vmatmul.mubr.f32.vlgmr.msra.gmra.mrb[26].mxu1 %v11119_v14 }
 0xdd9   :  { %8396 = vmatpush1.bf16.msra.mxu0 %v10961_v49  ;;  %8428 = vmatpush1.bf16.msra.mxu1 %v10964_v4 }
 0xdda   :  { %8398 = vmatprep.subr.bf16.mxu0 %v10969_v59  ;;  %8430 = vmatprep.subr.bf16.mxu1 %v10971_v31 }
 0xddb   :  { %4461 = vmatprep.mubr.f32.mxu0 %v11896_v57  ;;  %4532 = vmatprep.mubr.f32.mxu1 %v11896_v57 }
 0xddd   :  { %8400 = vmatpush1.bf16.msra.mxu0 %v10973_v29  ;;  %8432 = vmatpush1.bf16.msra.mxu1 %v10976_v25 }
 0xdde   :  { %8402 = vmatprep.subr.bf16.mxu0 %v10981_v47  ;;  %8434 = vmatprep.subr.bf16.mxu1 %v10983_v63 }
 0xde1   :  { %8404 = vmatpush1.bf16.msra.mxu0 %v10985_v37  ;;  %8436 = vmatpush1.bf16.msra.mxu1 %v10988_v11 }
 0xde2   :  { %8406 = vmatprep.subr.bf16.mxu0 %v10993_v21  ;;  %8438 = vmatprep.subr.bf16.mxu1 %v10995_v33 }
 0xde5   :  { %8408 = vmatpush1.bf16.msra.mxu0 %v10997_v5  ;;  %8440 = vmatpush1.bf16.msra.mxu1 %v11000_v62 }
 0xde6   :  { %8410 = vmatprep.subr.bf16.mxu0 %v11005_v27  ;;  %8442 = vmatprep.subr.bf16.mxu1 %v11007_v22 }
 0xde9   :  { %8412 = vmatpush1.bf16.msra.mxu0 %v11009_v50  ;;  %8444 = vmatpush1.bf16.msra.mxu1 %v11012_v18 }
 0xdea   :  { %8414 = vmatprep.subr.bf16.mxu0 %v11017_v24  ;;  %8446 = vmatprep.subr.bf16.mxu1 %v11019_v32 }
 0xded   :  { %8416 = vmatpush1.bf16.msra.mxu0 %v11021_v34  ;;  %8448 = vmatpush1.bf16.msra.mxu1 %v11024_v52 }
 0xdee   :  { %8418 = vmatprep.subr.bf16.mxu0 %v11028_v40  ;;  %8450 = vmatprep.subr.bf16.mxu1 %v11030_v39 }
 0xdf1   :  { %8420 = vmatpush1.bf16.msra.mxu0 %v11033_v53  ;;  %8452 = vmatpush1.bf16.msra.mxu1 %v11037_v20 }
 0xdf2   :  { %8422 = vmatprep.subr.bf16.mxu0 %v11039_v42  ;;  %8454 = vmatprep.subr.bf16.mxu1 %v11041_v35 }
 0xdf5   :  { %8424 = vmatpush1.bf16.msra.mxu0 %v11044_v60  ;;  %8456 = vmatpush1.bf16.msra.mxu1 %v11048_v17 }
 0xdf6   :  { %8458 = vmatprep.subr.bf16.mxu0 %v10957_v13  ;;  %8490 = vmatprep.subr.bf16.mxu1 %v10959_v12 }
 0xeab   :  { %v4218_v38 = vpop.f32.mrb[26].mxu0  ;;  %v4289_v7 = vpop.f32.mrb[26].mxu1 }
 0xeac   :  { %v9163_v46 = vadd.f32 %v4218_v38, %v10826_v55  ;;  %v4220_v19 = vpop.f32.mrb[27].mxu0  ;;  %v4291_v23 = vpop.f32.mrb[27].mxu1  ;;  %v9179_v36 = vadd.f32 %v4289_v7, %v10838_v16 }
 0xead   :  { %v9164_v48 = vadd.f32 %v4220_v19, %v10829_v41  ;;  %v9180_v0 = vadd.f32 %v4291_v23, %v10834_v2 }
 0xeae   :  { %v7273_v54 = vmul.f32 -1.442695, %v9163_v46 }
 0xeaf   :  { %v7274_v44 = vmul.f32 -1.442695, %v9164_v48  ;;  %v7275_v30 = vmul.f32 -1.442695, %v9180_v0 }
 0xeb0   :  { %9535 = vpow2.f32 %v7273_v54 }
 0xeb1   :  { %9537 = vpow2.f32 %v7274_v44 }
 0xeb2   :  { %9539 = vpow2.f32 %v7275_v30 }
 0xeb3   :  { %9541 = vtanh.f32 %v9179_v36 }
 0xeba   :  { %v9536_v13 = vpop.eup %9535 }
 0xebb   :  { %v9538_v3 = vpop.eup %9537  ;;  %v4301_v12 = vadd.f32 1.0, %v9536_v13  ;;  %v4829_v13 = vld [vmem:[#allocation13 + $0x20] sm:$0xff] }
 0xebc   :  { %v4307_v9 = vadd.f32 1.0, %v9538_v3  ;;  %v9540_v56 = vpop.eup %9539  ;;  %v4827_v3 = vld [vmem:[#allocation13 + $0x10] sm:$0xff] }
 0xebd   :  { %9543 = vrcp.f32 %v4301_v12  ;;  %v9542_v8 = vpop.eup %9541  ;;  %v4314_v48 = vadd.f32 1.0, %v9540_v56  ;;  %v4831_v12 = vld [vmem:[#allocation13 + $0x30] sm:$0xff] }
 0xebe   :  { %9545 = vrcp.f32 %v4307_v9  ;;  %v4834_v9 = vld [vmem:[#allocation13 + $0x48] sm:$0xff] }
 0xebf   :  { %9547 = vrcp.f32 %v4314_v48 }
 0xec7   :  { %v9544_v38 = vpop.eup %9543 }
 0xec8   :  { %v9546_v46 = vpop.eup %9545  ;;  %v4318_v19 = vmul.f32 %v9544_v38, %v9542_v8  ;;  %v4838_v8 = vld [vmem:[#allocation13 + $0x68] sm:$0xff]  ;;  %v4836_v38 = vld [vmem:[#allocation13 + $0x58] sm:$0xff] }
 0xec9   :  { %v4317_v54 = vmul.f32 %v9546_v46, %v11114_v1  ;;  %v9548_v44 = vpop.eup %9547  ;;  %v4840_v46 = vld [vmem:[#allocation13 + $0x78] sm:$0xff] }
 0xecb   :  { %v4319_v23 = vadd.f32 %v4318_v19, %v4317_v54 }
 0xecd   :  { %9549 = vtanh.f32 %v4319_v23  ;;  %v11165_v7 = vsel %vm1990_vm13, %v4319_v23, %v11114_v1  ;;  %v4825_v1 = vld [vmem:[#allocation13] sm:$0xff]  ;;  %v8555_v23 = vpack.c.bf16 %v4831_v12, %v4827_v3 }
 0xece   :  { %v8523_v54 = vpack.c.bf16 %v4829_v13, %v4825_v1  ;;  %v4860_v1 = vld [vmem:[#allocation13 + $0x118] sm:$0xff] }
 0xecf   :  { %v4864_v13 = vld [vmem:[#allocation13 + $0x138] sm:$0xff] }
 0xed7   :  { %v9550_v0 = vpop.eup %9549 }
 0xed8   :  { %v4321_v30 = vmul.f32 %v9550_v0, %v9548_v44  ;;  %v4833_v44 = vld [vmem:[#allocation13 + $0x40] sm:$0xff] }
 0xed9   :  { %v4837_v0 = vld [vmem:[#allocation13 + $0x60] sm:$0xff] }
 0xeda   :  { %v11170_v36 = vsel %vm1990_vm13, %v4321_v30, %v11119_v14  ;;  %v8525_v30 = vpack.c.bf16 %v4838_v8, %v4834_v9  ;;  %v4857_v9 = vld [vmem:[#allocation13 + $0x100] sm:$0xff] }
 0xedb   :  { %4462 = vmatmul.mubr.f32.vlgmr.msra.gmra.mrb[28].mxu0 %v11170_v36  ;;  %4533 = vmatmul.mubr.f32.vlgmr.msra.gmra.mrb[28].mxu1 %v11170_v36 }
 0xedc   :  { %8460 = vmatpush1.bf16.msra.mxu0 %v10961_v49  ;;  %8492 = vmatpush1.bf16.msra.mxu1 %v10964_v4  ;;  %v4826_v49 = vld [vmem:[#allocation13 + $0x8] sm:$0xff] }
 0xedd   :  { %8462 = vmatprep.subr.bf16.mxu0 %v10969_v59  ;;  %8494 = vmatprep.subr.bf16.mxu1 %v10971_v31  ;;  %v4830_v4 = vld [vmem:[#allocation13 + $0x28] sm:$0xff]  ;;  %v4828_v59 = vld [vmem:[#allocation13 + $0x18] sm:$0xff] }
 0xede   :  { %4706 = vmatprep.mubr.f32.mxu0 %v11896_v57  ;;  %4777 = vmatprep.mubr.f32.mxu1 %v11896_v57  ;;  %v8521_v31 = vpack.c.bf16 %v4830_v4, %v4826_v49  ;;  %v8557_v49 = vpack.c.bf16 %v4840_v46, %v4836_v38  ;;  %v4835_v4 = vld [vmem:[#allocation13 + $0x50] sm:$0xff]  ;;  %v8569_v38 = vpack.c.bf16 %v4864_v13, %v4860_v1 }
 0xedf   :  { %v4859_v46 = vld [vmem:[#allocation13 + $0x110] sm:$0xff] }
 0xee0   :  { %8464 = vmatpush1.bf16.msra.mxu0 %v10973_v29  ;;  %8496 = vmatpush1.bf16.msra.mxu1 %v10976_v25  ;;  %v4832_v29 = vld [vmem:[#allocation13 + $0x38] sm:$0xff]  ;;  %v4887_v1 = vld [vmem:[#allocation13 + $0x1f0] sm:$0xff] }
 0xee1   :  { %8466 = vmatprep.subr.bf16.mxu0 %v10981_v47  ;;  %8498 = vmatprep.subr.bf16.mxu1 %v10983_v63  ;;  %v8553_v25 = vpack.c.bf16 %v4832_v29, %v4828_v59  ;;  %v4842_v59 = vld [vmem:[#allocation13 + $0x88] sm:$0xff] }
 0xee2   :  { %v4846_v29 = vld [vmem:[#allocation13 + $0xa8] sm:$0xff] }
 0xee4   :  { %8468 = vmatpush1.bf16.msra.mxu0 %v10985_v37  ;;  %8500 = vmatpush1.bf16.msra.mxu1 %v10988_v11 }
 0xee5   :  { %8470 = vmatprep.subr.bf16.mxu0 %v10993_v21  ;;  %8502 = vmatprep.subr.bf16.mxu1 %v10995_v33 }
 0xee8   :  { %8472 = vmatpush1.bf16.msra.mxu0 %v10997_v5  ;;  %8504 = vmatpush1.bf16.msra.mxu1 %v11000_v62 }
 0xee9   :  { %8474 = vmatprep.subr.bf16.mxu0 %v11005_v27  ;;  %8506 = vmatprep.subr.bf16.mxu1 %v11007_v22 }
 0xeec   :  { %8476 = vmatpush1.bf16.msra.mxu0 %v11009_v50  ;;  %8508 = vmatpush1.bf16.msra.mxu1 %v11012_v18 }
 0xeed   :  { %8478 = vmatprep.subr.bf16.mxu0 %v11017_v24  ;;  %8510 = vmatprep.subr.bf16.mxu1 %v11019_v32 }
 0xef0   :  { %8480 = vmatpush1.bf16.msra.mxu0 %v11021_v34  ;;  %8512 = vmatpush1.bf16.msra.mxu1 %v11024_v52 }
 0xef1   :  { %8482 = vmatprep.subr.bf16.mxu0 %v11028_v40  ;;  %8514 = vmatprep.subr.bf16.mxu1 %v11030_v39 }
 0xef4   :  { %8484 = vmatpush1.bf16.msra.mxu0 %v11033_v53  ;;  %8516 = vmatpush1.bf16.msra.mxu1 %v11037_v20 }
 0xef5   :  { %8486 = vmatprep.subr.bf16.mxu0 %v11039_v42  ;;  %8518 = vmatprep.subr.bf16.mxu1 %v11041_v35 }
 0xef8   :  { %8488 = vmatpush1.bf16.msra.mxu0 %v11044_v60  ;;  %8520 = vmatpush1.bf16.msra.mxu1 %v11048_v17 }
 0xef9   :  { %8522 = vmatprep.subr.bf16.mxu0 %v8521_v31  ;;  %8554 = vmatprep.subr.bf16.mxu1 %v8553_v25  ;;  %v4844_v25 = vld [vmem:[#allocation13 + $0x98] sm:$0xff] }
 0xfae   :  { %v4463_v47 = vpop.f32.mrb[28].mxu0  ;;  %v4534_v63 = vpop.f32.mrb[28].mxu1 }
 0xfaf   :  { %v9165_v37 = vadd.f32 %v4463_v47, %v10826_v55  ;;  %v4465_v11 = vpop.f32.mrb[29].mxu0  ;;  %v4536_v21 = vpop.f32.mrb[29].mxu1  ;;  %v9181_v50 = vadd.f32 %v4534_v63, %v10838_v16  ;;  %v4848_v47 = vld [vmem:[#allocation13 + $0xb8] sm:$0xff]  ;;  %v8527_v63 = vpack.c.bf16 %v4837_v0, %v4833_v44 }
 0xfb0   :  { %v9166_v33 = vadd.f32 %v4465_v11, %v10829_v41  ;;  %v9182_v27 = vadd.f32 %v4536_v21, %v10834_v2  ;;  %v4841_v11 = vld [vmem:[#allocation13 + $0x80] sm:$0xff]  ;;  %v4872_v44 = vld [vmem:[#allocation13 + $0x178] sm:$0xff] }
 0xfb1   :  { %v7276_v5 = vmul.f32 -1.442695, %v9165_v37  ;;  %v4845_v21 = vld [vmem:[#allocation13 + $0xa0] sm:$0xff] }
 0xfb2   :  { %v7277_v62 = vmul.f32 -1.442695, %v9166_v33  ;;  %v7278_v22 = vmul.f32 -1.442695, %v9182_v27  ;;  %v8529_v33 = vpack.c.bf16 %v4846_v29, %v4842_v59  ;;  %v4847_v27 = vld [vmem:[#allocation13 + $0xb0] sm:$0xff] }
 0xfb3   :  { %9551 = vpow2.f32 %v7276_v5  ;;  %v8561_v5 = vpack.c.bf16 %v4848_v47, %v4844_v25  ;;  %v4867_v29 = vld [vmem:[#allocation13 + $0x150] sm:$0xff]  ;;  %v4874_v47 = vld [vmem:[#allocation13 + $0x188] sm:$0xff] }
 0xfb4   :  { %9553 = vpow2.f32 %v7277_v62  ;;  %v4843_v62 = vld [vmem:[#allocation13 + $0x90] sm:$0xff] }
 0xfb5   :  { %9555 = vpow2.f32 %v7278_v22  ;;  %v4850_v22 = vld [vmem:[#allocation13 + $0xc8] sm:$0xff]  ;;  %v4871_v25 = vld [vmem:[#allocation13 + $0x170] sm:$0xff] }
 0xfb6   :  { %9557 = vtanh.f32 %v9181_v50  ;;  %v4854_v50 = vld [vmem:[#allocation13 + $0xe8] sm:$0xff] }
 0xfbd   :  { %v9552_v18 = vpop.eup %9551 }
 0xfbe   :  { %v9554_v24 = vpop.eup %9553  ;;  %v4546_v32 = vadd.f32 1.0, %v9552_v18  ;;  %v4852_v18 = vld [vmem:[#allocation13 + $0xd8] sm:$0xff] }
 0xfbf   :  { %v4552_v34 = vadd.f32 1.0, %v9554_v24  ;;  %v9556_v52 = vpop.eup %9555  ;;  %v4856_v24 = vld [vmem:[#allocation13 + $0xf8] sm:$0xff] }
 0xfc0   :  { %9559 = vrcp.f32 %v4546_v32  ;;  %v9558_v40 = vpop.eup %9557  ;;  %v4559_v42 = vadd.f32 1.0, %v9556_v52  ;;  %v8531_v32 = vpack.c.bf16 %v4845_v21, %v4841_v11  ;;  %v4849_v52 = vld [vmem:[#allocation13 + $0xc0] sm:$0xff]  ;;  %v4880_v11 = vld [vmem:[#allocation13 + $0x1b8] sm:$0xff] }
 0xfc1   :  { %9561 = vrcp.f32 %v4552_v34  ;;  %v8563_v34 = vpack.c.bf16 %v4847_v27, %v4843_v62  ;;  %v4877_v62 = vld [vmem:[#allocation13 + $0x1a0] sm:$0xff] }
 0xfc2   :  { %9563 = vrcp.f32 %v4559_v42  ;;  %v4855_v42 = vld [vmem:[#allocation13 + $0xf0] sm:$0xff] }
 0xfca   :  { %v9560_v39 = vpop.eup %9559 }
 0xfcb   :  { %v9562_v53 = vpop.eup %9561  ;;  %v4563_v20 = vmul.f32 %v9560_v39, %v9558_v40  ;;  %v4853_v40 = vld [vmem:[#allocation13 + $0xe0] sm:$0xff]  ;;  %v8533_v39 = vpack.c.bf16 %v4854_v50, %v4850_v22  ;;  %v4875_v50 = vld [vmem:[#allocation13 + $0x190] sm:$0xff] }
 0xfcc   :  { %v4562_v35 = vmul.f32 %v9562_v53, %v11165_v7  ;;  %v9564_v56 = vpop.eup %9563  ;;  %v8565_v53 = vpack.c.bf16 %v4856_v24, %v4852_v18  ;;  %v8535_v3 = vpack.c.bf16 %v4853_v40, %v4849_v52  ;;  %v4879_v18 = vld [vmem:[#allocation13 + $0x1b0] sm:$0xff]  ;;  %v4882_v24 = vld [vmem:[#allocation13 + $0x1c8] sm:$0xff]  ;;  %v4888_v52 = vld [vmem:[#allocation13 + $0x1f8] sm:$0xff] }
 0xfce   :  { %v4564_v60 = vadd.f32 %v4563_v20, %v4562_v35  ;;  %v4851_v20 = vld [vmem:[#allocation13 + $0xd0] sm:$0xff]  ;;  %v4858_v35 = vld [vmem:[#allocation13 + $0x108] sm:$0xff] }
 0xfcf   :  { %v8567_v12 = vpack.c.bf16 %v4855_v42, %v4851_v20 }
 0xfd0   :  { %9565 = vtanh.f32 %v4564_v60  ;;  %v11214_v17 = vsel %vm2243_vm14, %v4564_v60, %v11165_v7  ;;  %v4839_v7 = vld [vmem:[#allocation13 + $0x70] sm:$0xff]  ;;  %v4862_v60 = vld [vmem:[#allocation13 + $0x128] sm:$0xff] }
 0xfd1   :  { %v8559_v37 = vpack.c.bf16 %v4839_v7, %v4835_v4  ;;  %v8537_v8 = vpack.c.bf16 %v4862_v60, %v4858_v35  ;;  %v4869_v4 = vld [vmem:[#allocation13 + $0x160] sm:$0xff]  ;;  %v4883_v60 = vld [vmem:[#allocation13 + $0x1d0] sm:$0xff] }
 0xfd2   :  { %v4885_v35 = vld [vmem:[#allocation13 + $0x1e0] sm:$0xff] }
 0xfda   :  { %v9566_v19 = vpop.eup %9565 }
 0xfdb   :  { %v4566_v48 = vmul.f32 %v9566_v19, %v9564_v56  ;;  %v4861_v56 = vld [vmem:[#allocation13 + $0x120] sm:$0xff]  ;;  %v4863_v19 = vld [vmem:[#allocation13 + $0x130] sm:$0xff] }
 0xfdc   :  { %v8539_v0 = vpack.c.bf16 %v4861_v56, %v4857_v9 }
 0xfdd   :  { %v11219_v31 = vsel %vm2243_vm14, %v4566_v48, %v11170_v36  ;;  %v4866_v48 = vld [vmem:[#allocation13 + $0x148] sm:$0xff] }
 0xfde   :  { %4707 = vmatmul.mubr.f32.vlgmr.msra.gmra.mrb[30].mxu0 %v11219_v31  ;;  %4778 = vmatmul.mubr.f32.vlgmr.msra.gmra.mrb[30].mxu1 %v11219_v31 }
 0xfdf   :  { %8524 = vmatpush1.bf16.msra.mxu0 %v8523_v54  ;;  %8556 = vmatpush1.bf16.msra.mxu1 %v8555_v23  ;;  %v4870_v54 = vld [vmem:[#allocation13 + $0x168] sm:$0xff]  ;;  %v4868_v23 = vld [vmem:[#allocation13 + $0x158] sm:$0xff] }
 0xfe0   :  { %8526 = vmatprep.subr.bf16.mxu0 %v8525_v30  ;;  %8558 = vmatprep.subr.bf16.mxu1 %v8557_v49  ;;  %v8571_v30 = vpack.c.bf16 %v4863_v19, %v4859_v46  ;;  %v4865_v49 = vld [vmem:[#allocation13 + $0x140] sm:$0xff]  ;;  %v8541_v7 = vpack.c.bf16 %v4870_v54, %v4866_v48  ;;  %v8573_v59 = vpack.c.bf16 %v4872_v44, %v4868_v23  ;;  %v5186_v19 = vld [vmem:[#allocation14 + $0x48] sm:$0xff]  ;;  %v5188_v54 = vld [vmem:[#allocation14 + $0x58] sm:$0xff] }
 0xfe1   :  { %4975 = vmatprep.mubr.f32.mxu0 %v11896_v57  ;;  %5088 = vmatprep.mubr.f32.mxu1 %v11896_v57  ;;  %v8543_v21 = vpack.c.bf16 %v4869_v4, %v4865_v49  ;;  %v5190_v48 = vld [vmem:[#allocation14 + $0x68] sm:$0xff]  ;;  %v5192_v44 = vld [vmem:[#allocation14 + $0x78] sm:$0xff] }
 0xfe2   :  { %v11269_v23 = vpack.c.bf16 %v5190_v48, %v5186_v19  ;;  %v11271_v49 = vpack.c.bf16 %v5192_v44, %v5188_v54  ;;  %v5218_v19 = vld [vmem:[#allocation14 + $0x148] sm:$0xff] }
 0xfe3   :  { %8528 = vmatpush1.bf16.msra.mxu0 %v8527_v63  ;;  %8560 = vmatpush1.bf16.msra.mxu1 %v8559_v37  ;;  %v4878_v63 = vld [vmem:[#allocation13 + $0x1a8] sm:$0xff]  ;;  %v4876_v37 = vld [vmem:[#allocation13 + $0x198] sm:$0xff] }
 0xfe4   :  { %8530 = vmatprep.subr.bf16.mxu0 %v8529_v33  ;;  %8562 = vmatprep.subr.bf16.mxu1 %v8561_v5  ;;  %v8575_v33 = vpack.c.bf16 %v4871_v25, %v4867_v29  ;;  %v4873_v5 = vld [vmem:[#allocation13 + $0x180] sm:$0xff]  ;;  %v8545_v27 = vpack.c.bf16 %v4878_v63, %v4874_v47  ;;  %v8577_v22 = vpack.c.bf16 %v4880_v11, %v4876_v37  ;;  %v5194_v25 = vld [vmem:[#allocation14 + $0x88] sm:$0xff]  ;;  %v5196_v63 = vld [vmem:[#allocation14 + $0x98] sm:$0xff] }
 0xfe5   :  { %v8547_v40 = vpack.c.bf16 %v4877_v62, %v4873_v5  ;;  %v5198_v47 = vld [vmem:[#allocation14 + $0xa8] sm:$0xff]  ;;  %v5200_v11 = vld [vmem:[#allocation14 + $0xb8] sm:$0xff] }
 0xfe6   :  { %v11281_v37 = vpack.c.bf16 %v5198_v47, %v5194_v25  ;;  %v11283_v5 = vpack.c.bf16 %v5200_v11, %v5196_v63  ;;  %v5222_v48 = vld [vmem:[#allocation14 + $0x168] sm:$0xff]  ;;  %v5221_v25 = vld [vmem:[#allocation14 + $0x160] sm:$0xff]  ;;  %v5219_v47 = vld [vmem:[#allocation14 + $0x150] sm:$0xff] }
 0xfe7   :  { %8532 = vmatpush1.bf16.msra.mxu0 %v8531_v32  ;;  %8564 = vmatpush1.bf16.msra.mxu1 %v8563_v34  ;;  %v4886_v32 = vld [vmem:[#allocation13 + $0x1e8] sm:$0xff]  ;;  %v4884_v34 = vld [vmem:[#allocation13 + $0x1d8] sm:$0xff]  ;;  %v11315_v44 = vpack.c.bf16 %v5222_v48, %v5218_v19  ;;  %v5223_v63 = vld [vmem:[#allocation14 + $0x170] sm:$0xff] }
 0xfe8   :  { %8534 = vmatprep.subr.bf16.mxu0 %v8533_v39  ;;  %8566 = vmatprep.subr.bf16.mxu1 %v8565_v53  ;;  %v8579_v39 = vpack.c.bf16 %v4879_v18, %v4875_v50  ;;  %v4881_v53 = vld [vmem:[#allocation13 + $0x1c0] sm:$0xff]  ;;  %v8549_v20 = vpack.c.bf16 %v4886_v32, %v4882_v24  ;;  %v8581_v42 = vpack.c.bf16 %v4888_v52, %v4884_v34  ;;  %v5202_v18 = vld [vmem:[#allocation14 + $0xc8] sm:$0xff]  ;;  %v5204_v32 = vld [vmem:[#allocation14 + $0xd8] sm:$0xff] }
 0xfe9   :  { %v8551_v13 = vpack.c.bf16 %v4885_v35, %v4881_v53  ;;  %v5206_v24 = vld [vmem:[#allocation14 + $0xe8] sm:$0xff]  ;;  %v5208_v52 = vld [vmem:[#allocation14 + $0xf8] sm:$0xff]  ;;  %v5207_v35 = vld [vmem:[#allocation14 + $0xf0] sm:$0xff] }
 0xfea   :  { %v11293_v34 = vpack.c.bf16 %v5206_v24, %v5202_v18  ;;  %v11295_v53 = vpack.c.bf16 %v5208_v52, %v5204_v32  ;;  %v5232_v24 = vld [vmem:[#allocation14 + $0x1b8] sm:$0xff]  ;;  %v5225_v32 = vld [vmem:[#allocation14 + $0x180] sm:$0xff] }
 0xfeb   :  { %8536 = vmatpush1.bf16.msra.mxu0 %v8535_v3  ;;  %8568 = vmatpush1.bf16.msra.mxu1 %v8567_v12  ;;  %v8583_v3 = vpack.c.bf16 %v4887_v1, %v4883_v60  ;;  %v5177_v12 = vld [vmem:[#allocation14] sm:$0xff]  ;;  %v5210_v60 = vld [vmem:[#allocation14 + $0x108] sm:$0xff] }
 0xfec   :  { %8538 = vmatprep.subr.bf16.mxu0 %v8537_v8  ;;  %8570 = vmatprep.subr.bf16.mxu1 %v8569_v38  ;;  %v5179_v8 = vld [vmem:[#allocation14 + $0x10] sm:$0xff]  ;;  %v5229_v52 = vld [vmem:[#allocation14 + $0x1a0] sm:$0xff] }
 0xfed   :  { %v5183_v38 = vld [vmem:[#allocation14 + $0x30] sm:$0xff] }
 0xfee   :  { %v11264_v46 = vpack.c.bf16 %v5183_v38, %v5179_v8  ;;  %v5215_v38 = vld [vmem:[#allocation14 + $0x130] sm:$0xff] }
 0xfef   :  { %8540 = vmatpush1.bf16.msra.mxu0 %v8539_v0  ;;  %8572 = vmatpush1.bf16.msra.mxu1 %v8571_v30  ;;  %v5185_v0 = vld [vmem:[#allocation14 + $0x40] sm:$0xff] }
 0xff0   :  { %8542 = vmatprep.subr.bf16.mxu0 %v8541_v7  ;;  %8574 = vmatprep.subr.bf16.mxu1 %v8573_v59  ;;  %v5189_v30 = vld [vmem:[#allocation14 + $0x60] sm:$0xff]  ;;  %v5187_v7 = vld [vmem:[#allocation14 + $0x50] sm:$0xff] }
 0xff1   :  { %v11273_v4 = vpack.c.bf16 %v5189_v30, %v5185_v0  ;;  %v5191_v59 = vld [vmem:[#allocation14 + $0x70] sm:$0xff]  ;;  %v5220_v0 = vld [vmem:[#allocation14 + $0x158] sm:$0xff] }
 0xff2   :  { %v11276_v29 = vpack.c.bf16 %v5191_v59, %v5187_v7  ;;  %v5224_v30 = vld [vmem:[#allocation14 + $0x178] sm:$0xff]  ;;  %v5217_v7 = vld [vmem:[#allocation14 + $0x140] sm:$0xff] }
 0xff3   :  { %8544 = vmatpush1.bf16.msra.mxu0 %v8543_v21  ;;  %8576 = vmatpush1.bf16.msra.mxu1 %v8575_v33  ;;  %v5193_v21 = vld [vmem:[#allocation14 + $0x80] sm:$0xff]  ;;  %v11317_v59 = vpack.c.bf16 %v5224_v30, %v5220_v0  ;;  %v11320_v11 = vpack.c.bf16 %v5221_v25, %v5217_v7  ;;  %v5235_v0 = vld [vmem:[#allocation14 + $0x1d0] sm:$0xff] }
 0xff4   :  { %8546 = vmatprep.subr.bf16.mxu0 %v8545_v27  ;;  %8578 = vmatprep.subr.bf16.mxu1 %v8577_v22  ;;  %v5197_v33 = vld [vmem:[#allocation14 + $0xa0] sm:$0xff]  ;;  %v5195_v27 = vld [vmem:[#allocation14 + $0x90] sm:$0xff] }
 0xff5   :  { %v11285_v62 = vpack.c.bf16 %v5197_v33, %v5193_v21  ;;  %v5199_v22 = vld [vmem:[#allocation14 + $0xb0] sm:$0xff]  ;;  %v5226_v21 = vld [vmem:[#allocation14 + $0x188] sm:$0xff] }
 0xff6   :  { %v11288_v50 = vpack.c.bf16 %v5199_v22, %v5195_v27  ;;  %v5230_v33 = vld [vmem:[#allocation14 + $0x1a8] sm:$0xff]  ;;  %v5228_v27 = vld [vmem:[#allocation14 + $0x198] sm:$0xff]  ;;  %v11324_v22 = vpack.c.bf16 %v5223_v63, %v5219_v47  ;;  %v5239_v30 = vld [vmem:[#allocation14 + $0x1f0] sm:$0xff] }
 0xff7   :  { %8548 = vmatpush1.bf16.msra.mxu0 %v8547_v40  ;;  %8580 = vmatpush1.bf16.msra.mxu1 %v8579_v39  ;;  %v5201_v40 = vld [vmem:[#allocation14 + $0xc0] sm:$0xff]  ;;  %v11326_v18 = vpack.c.bf16 %v5230_v33, %v5226_v21  ;;  %v11348_v7 = vpack.c.bf16 %v5239_v30, %v5235_v0 }
 0xff8   :  { %8550 = vmatprep.subr.bf16.mxu0 %v8549_v20  ;;  %8582 = vmatprep.subr.bf16.mxu1 %v8581_v42  ;;  %v5205_v39 = vld [vmem:[#allocation14 + $0xe0] sm:$0xff]  ;;  %v5203_v42 = vld [vmem:[#allocation14 + $0xd0] sm:$0xff] }
 0xff9   :  { %v11297_v20 = vpack.c.bf16 %v5205_v39, %v5201_v40  ;;  %v11300_v1 = vpack.c.bf16 %v5207_v35, %v5203_v42  ;;  %v11329_v40 = vpack.c.bf16 %v5232_v24, %v5228_v27  ;;  %v5227_v39 = vld [vmem:[#allocation14 + $0x190] sm:$0xff]  ;;  %v11332_v35 = vpack.c.bf16 %v5229_v52, %v5225_v32 }
 0xffa   :  { %v5231_v42 = vld [vmem:[#allocation14 + $0x1b0] sm:$0xff] }
 0xffb   :  { %8552 = vmatpush1.bf16.msra.mxu0 %v8551_v13  ;;  %8584 = vmatpush1.bf16.msra.mxu1 %v8583_v3  ;;  %v5214_v13 = vld [vmem:[#allocation14 + $0x128] sm:$0xff]  ;;  %v5212_v3 = vld [vmem:[#allocation14 + $0x118] sm:$0xff] }
 0xffe   :  { %7313 = vmatmul.mubr.msk.f32.vlgmr.msra.gmra.mrb[32].mxu0 %vm726_vm4, %v10844_v26  ;;  %7314 = vmatmul.mubr.msk.f32.vlgmr.msra.gmra.mrb[32].mxu1 %vm726_vm4, %v10844_v26  ;;  %v5178_v26 = vld [vmem:[#allocation14 + $0x8] sm:$0xff] }
 0xfff   :  { %4981 = vmatprep.mubr.f32.mxu0 %v11896_v57  ;;  %5094 = vmatprep.mubr.f32.mxu1 %v11896_v57 }
0x1002   :  { %4982 = vmatmul.mubr.f32.gmra.mrb[34].mxu0 %v10902_v6  ;;  %5095 = vmatmul.mubr.f32.gmra.mrb[34].mxu1 %v10902_v6  ;;  %v5182_v6 = vld [vmem:[#allocation14 + $0x28] sm:$0xff] }
0x1003   :  { %4987 = vmatprep.mubr.f32.mxu0 %v11896_v57  ;;  %5100 = vmatprep.mubr.f32.mxu1 %v11896_v57 }
0x1006   :  { %4988 = vmatmul.mubr.f32.gmra.mrb[36].mxu0 %v10951_v61  ;;  %5101 = vmatmul.mubr.f32.gmra.mrb[36].mxu1 %v10951_v61  ;;  %v5180_v61 = vld [vmem:[#allocation14 + $0x18] sm:$0xff] }
0x1007   :  { %4993 = vmatprep.mubr.f32.mxu0 %v11896_v57  ;;  %5106 = vmatprep.mubr.f32.mxu1 %v11896_v57 }
0x100a   :  { %4994 = vmatmul.mubr.f32.gmra.mrb[38].mxu0 %v11068_v10  ;;  %5107 = vmatmul.mubr.f32.gmra.mrb[38].mxu1 %v11068_v10  ;;  %v11257_v10 = vpack.c.bf16 %v5182_v6, %v5178_v26  ;;  %v5216_v26 = vld [vmem:[#allocation14 + $0x138] sm:$0xff]  ;;  %v11304_v6 = vpack.c.bf16 %v5214_v13, %v5210_v60  ;;  %v11336_v60 = vpack.c.bf16 %v5231_v42, %v5227_v39  ;;  %v5234_v13 = vld [vmem:[#allocation14 + $0x1c8] sm:$0xff] }
0x100b   :  { %4999 = vmatprep.mubr.f32.mxu0 %v11896_v57  ;;  %5112 = vmatprep.mubr.f32.mxu1 %v11896_v57 }
0x100c   :  { %8586 = vmatprep.subr.bf16.mxu0 %v11257_v10 }
0x100e   :  { %5000 = vmatmul.mubr.f32.gmra.mrb[40].mxu0 %v11119_v14  ;;  %5113 = vmatmul.mubr.f32.gmra.mrb[40].mxu1 %v11119_v14  ;;  %v5184_v14 = vld [vmem:[#allocation14 + $0x38] sm:$0xff] }
0x100f   :  { %5005 = vmatprep.mubr.f32.mxu0 %v11896_v57  ;;  %5118 = vmatprep.mubr.f32.mxu1 %v11896_v57  ;;  %v11259_v9 = vpack.c.bf16 %v5184_v14, %v5180_v61  ;;  %v11306_v61 = vpack.c.bf16 %v5216_v26, %v5212_v3  ;;  %v5209_v14 = vld [vmem:[#allocation14 + $0x100] sm:$0xff]  ;;  %v5238_v3 = vld [vmem:[#allocation14 + $0x1e8] sm:$0xff]  ;;  %v5236_v26 = vld [vmem:[#allocation14 + $0x1d8] sm:$0xff] }
0x1011   :  { %8618 = vmatprep.subr.bf16.mxu1 %v11259_v9 }
0x1012   :  { %5006 = vmatmul.mubr.f32.gmra.mrb[42].mxu0 %v11170_v36  ;;  %5119 = vmatmul.mubr.f32.gmra.mrb[42].mxu1 %v11170_v36  ;;  %v5181_v36 = vld [vmem:[#allocation14 + $0x20] sm:$0xff] }
0x1013   :  { %5011 = vmatprep.mubr.f32.mxu0 %v11896_v57  ;;  %5124 = vmatprep.mubr.f32.mxu1 %v11896_v57  ;;  %v11261_v56 = vpack.c.bf16 %v5181_v36, %v5177_v12  ;;  %v5213_v12 = vld [vmem:[#allocation14 + $0x120] sm:$0xff]  ;;  %v5211_v36 = vld [vmem:[#allocation14 + $0x110] sm:$0xff] }
0x1014   :  { %8620 = vmatpush1.bf16.msra.mxu1 %v11264_v46  ;;  %v11309_v8 = vpack.c.bf16 %v5213_v12, %v5209_v14  ;;  %v11313_v54 = vpack.c.bf16 %v5215_v38, %v5211_v36  ;;  %v11341_v14 = vpack.c.bf16 %v5238_v3, %v5234_v13  ;;  %v5240_v12 = vld [vmem:[#allocation14 + $0x1f8] sm:$0xff]  ;;  %v5233_v36 = vld [vmem:[#allocation14 + $0x1c0] sm:$0xff] }
0x1015   :  { %8588 = vmatpush1.bf16.msra.mxu0 %v11261_v56  ;;  %8622 = vmatprep.subr.bf16.mxu1 %v11271_v49  ;;  %v5237_v38 = vld [vmem:[#allocation14 + $0x1e0] sm:$0xff]  ;;  %v11343_v19 = vpack.c.bf16 %v5240_v12, %v5236_v26 }
0x1016   :  { %5012 = vmatmul.mubr.f32.gmra.mrb[44].mxu0 %v11219_v31  ;;  %5125 = vmatmul.mubr.f32.gmra.mrb[44].mxu1 %v11219_v31  ;;  %v11345_v48 = vpack.c.bf16 %v5237_v38, %v5233_v36 }
0x1017   :  { %5017 = vmatprep.mubr.f32.mxu0 %v11896_v57  ;;  %5130 = vmatprep.mubr.f32.mxu1 %v11896_v57 }
0x1018   :  { %8590 = vmatprep.subr.bf16.mxu0 %v11269_v23  ;;  %8624 = vmatpush1.bf16.msra.mxu1 %v11276_v29 }
0x1019   :  { %8592 = vmatpush1.bf16.msra.mxu0 %v11273_v4  ;;  %8626 = vmatprep.subr.bf16.mxu1 %v11283_v5 }
0x101a   :  { %8594 = vmatprep.subr.bf16.mxu0 %v11281_v37 }
0x101c   :  { %8628 = vmatpush1.bf16.msra.mxu1 %v11288_v50 }
0x101d   :  { %8596 = vmatpush1.bf16.msra.mxu0 %v11285_v62  ;;  %8630 = vmatprep.subr.bf16.mxu1 %v11295_v53 }
0x101e   :  { %8598 = vmatprep.subr.bf16.mxu0 %v11293_v34 }
0x1020   :  { %8632 = vmatpush1.bf16.msra.mxu1 %v11300_v1 }
0x1021   :  { %8600 = vmatpush1.bf16.msra.mxu0 %v11297_v20  ;;  %8634 = vmatprep.subr.bf16.mxu1 %v11306_v61 }
0x1022   :  { %8602 = vmatprep.subr.bf16.mxu0 %v11304_v6 }
0x1024   :  { %8636 = vmatpush1.bf16.msra.mxu1 %v11313_v54 }
0x1025   :  { %8604 = vmatpush1.bf16.msra.mxu0 %v11309_v8  ;;  %8638 = vmatprep.subr.bf16.mxu1 %v11317_v59 }
0x1026   :  { %8606 = vmatprep.subr.bf16.mxu0 %v11315_v44 }
0x1028   :  { %8640 = vmatpush1.bf16.msra.mxu1 %v11324_v22 }
0x1029   :  { %8608 = vmatpush1.bf16.msra.mxu0 %v11320_v11  ;;  %8642 = vmatprep.subr.bf16.mxu1 %v11329_v40 }
0x102a   :  { %8610 = vmatprep.subr.bf16.mxu0 %v11326_v18 }
0x102c   :  { %8644 = vmatpush1.bf16.msra.mxu1 %v11336_v60 }
0x102d   :  { %8612 = vmatpush1.bf16.msra.mxu0 %v11332_v35  ;;  %8646 = vmatprep.subr.bf16.mxu1 %v11343_v19 }
0x102e   :  { %8614 = vmatprep.subr.bf16.mxu0 %v11341_v14 }
0x1030   :  { %8648 = vmatpush1.bf16.msra.mxu1 %v11348_v7 }
0x1031   :  { %8616 = vmatpush1.bf16.msra.mxu0 %v11345_v48  ;;  %8682 = vmatprep.subr.bf16.mxu1 %v11259_v9 }
0x1032   :  { %8650 = vmatprep.subr.bf16.mxu0 %v11257_v10 }
0x10b1   :  { %v4708_v25 = vpop.f32.mrb[30].mxu0  ;;  %v4779_v47 = vpop.f32.mrb[30].mxu1 }
0x10b2   :  { %v9167_v63 = vadd.f32 %v4708_v25, %v10826_v55  ;;  %v4710_v21 = vpop.f32.mrb[31].mxu0  ;;  %v4781_v33 = vpop.f32.mrb[31].mxu1  ;;  %v9183_v42 = vadd.f32 %v4779_v47, %v10838_v16 }
0x10b3   :  { %v9168_v27 = vadd.f32 %v4710_v21, %v10829_v41  ;;  %v9184_v52 = vadd.f32 %v4781_v33, %v10834_v2  ;;  %v11897_v33 = vld [vmem:[#allocation20_spill] sm:$0xff] }
0x10b4   :  { %v7279_v24 = vmul.f32 -1.442695, %v9167_v63 }
0x10b5   :  { %v7280_v32 = vmul.f32 -1.442695, %v9168_v27  ;;  %v7281_v39 = vmul.f32 -1.442695, %v9184_v52 }
0x10b6   :  { %9567 = vpow2.f32 %v7279_v24 }
0x10b7   :  { %9569 = vpow2.f32 %v7280_v32 }
0x10b8   :  { %9571 = vpow2.f32 %v7281_v39 }
0x10b9   :  { %9573 = vtanh.f32 %v9183_v42 }
0x10c0   :  { %v9568_v13 = vpop.eup %9567 }
0x10c1   :  { %v9570_v3 = vpop.eup %9569  ;;  %v4791_v26 = vadd.f32 1.0, %v9568_v13 }
0x10c2   :  { %v4797_v12 = vadd.f32 1.0, %v9570_v3  ;;  %v9572_v55 = vpop.eup %9571 }
0x10c3   :  { %9575 = vrcp.f32 %v4791_v26  ;;  %v9574_v36 = vpop.eup %9573  ;;  %v4804_v30 = vadd.f32 1.0, %v9572_v55 }
0x10c4   :  { %9577 = vrcp.f32 %v4797_v12  ;;  %v11898_v12 = vld [vmem:[#allocation21_spill] sm:$0xff] }
0x10c5   :  { %9579 = vrcp.f32 %v4804_v30 }
0x10cd   :  { %v9576_v41 = vpop.eup %9575 }
0x10ce   :  { %v9578_v38 = vpop.eup %9577  ;;  %v4808_v0 = vmul.f32 %v9576_v41, %v9574_v36  ;;  %v11899_v36 = vld [vmem:[#allocation22_spill] sm:$0xff] }
0x10cf   :  { %v4807_v25 = vmul.f32 %v9578_v38, %v11214_v17  ;;  %v9580_v16 = vpop.eup %9579  ;;  %v4889_v17 = vld [vmem:[%s11875_s10] sm:$0xf] }
0x10d0   :  { %v11408_v27 = vrot.slane %v4889_v17, %v11897_v33  ;;  %v11413_v55 = vrot.slane %v4889_v17, %v11898_v12  ;;  %v11417_v41 = vrot.slane %v4889_v17, %v11899_v36 }
0x10d1   :  { %v4809_v2 = vadd.f32 %v4808_v0, %v4807_v25 }
0x10d3   :  { %9581 = vtanh.f32 %v4809_v2 }
0x10dd   :  { %v9582_v47 = vpop.eup %9581 }
0x10de   :  { %v4811_v63 = vmul.f32 %v9582_v47, %v9580_v16 }
0x10e0   :  { %v4812_v21 = vsel %vm2496_vm15, %v4811_v63, %v11219_v31  ;;  %v11405_v31 = vrot.slane %v4889_v17, %v10235_v45 }
0x10e1   :  { %5018 = vmatmul.mubr.f32.gmra.mrb[46].mxu0 %v4812_v21  ;;  %5131 = vmatmul.mubr.f32.gmra.mrb[46].mxu1 %v4812_v21 }
0x10e2   :  { %5305 = vmatprep.mubr.f32.mxu0 %v11896_v57  ;;  %5376 = vmatprep.mubr.f32.mxu1 %v11896_v57 }
0x10e5   :  { %5306 = vmatmul.mubr.f32.vlgmr.msra.gmra.mrb[32].mxu0 %v11896_v57  ;;  %5377 = vmatmul.mubr.f32.vlgmr.msra.gmra.mrb[32].mxu1 %v11896_v57 }
0x10e6   :  { %8652 = vmatpush1.bf16.msra.mxu0 %v11261_v56  ;;  %8684 = vmatpush1.bf16.msra.mxu1 %v11264_v46 }
0x10e7   :  { %8654 = vmatprep.subr.bf16.mxu0 %v11269_v23  ;;  %8686 = vmatprep.subr.bf16.mxu1 %v11271_v49 }
0x10e8   :  { %5550 = vmatprep.mubr.f32.mxu0 %v11896_v57  ;;  %5621 = vmatprep.mubr.f32.mxu1 %v11896_v57 }
0x10ea   :  { %8656 = vmatpush1.bf16.msra.mxu0 %v11273_v4  ;;  %8688 = vmatpush1.bf16.msra.mxu1 %v11276_v29 }
0x10eb   :  { %8658 = vmatprep.subr.bf16.mxu0 %v11281_v37  ;;  %8690 = vmatprep.subr.bf16.mxu1 %v11283_v5 }
0x10ee   :  { %8660 = vmatpush1.bf16.msra.mxu0 %v11285_v62  ;;  %8692 = vmatpush1.bf16.msra.mxu1 %v11288_v50 }
0x10ef   :  { %8662 = vmatprep.subr.bf16.mxu0 %v11293_v34  ;;  %8694 = vmatprep.subr.bf16.mxu1 %v11295_v53 }
0x10f2   :  { %8664 = vmatpush1.bf16.msra.mxu0 %v11297_v20  ;;  %8696 = vmatpush1.bf16.msra.mxu1 %v11300_v1 }
0x10f3   :  { %8666 = vmatprep.subr.bf16.mxu0 %v11304_v6  ;;  %8698 = vmatprep.subr.bf16.mxu1 %v11306_v61 }
0x10f6   :  { %8668 = vmatpush1.bf16.msra.mxu0 %v11309_v8  ;;  %8700 = vmatpush1.bf16.msra.mxu1 %v11313_v54 }
0x10f7   :  { %8670 = vmatprep.subr.bf16.mxu0 %v11315_v44  ;;  %8702 = vmatprep.subr.bf16.mxu1 %v11317_v59 }
0x10fa   :  { %8672 = vmatpush1.bf16.msra.mxu0 %v11320_v11  ;;  %8704 = vmatpush1.bf16.msra.mxu1 %v11324_v22 }
0x10fb   :  { %8674 = vmatprep.subr.bf16.mxu0 %v11326_v18  ;;  %8706 = vmatprep.subr.bf16.mxu1 %v11329_v40 }
0x10fe   :  { %8676 = vmatpush1.bf16.msra.mxu0 %v11332_v35  ;;  %8708 = vmatpush1.bf16.msra.mxu1 %v11336_v60 }
0x10ff   :  { %8678 = vmatprep.subr.bf16.mxu0 %v11341_v14  ;;  %8710 = vmatprep.subr.bf16.mxu1 %v11343_v19 }
0x1102   :  { %8680 = vmatpush1.bf16.msra.mxu0 %v11345_v48  ;;  %8712 = vmatpush1.bf16.msra.mxu1 %v11348_v7 }
0x1103   :  { %8714 = vmatprep.subr.bf16.mxu0 %v11257_v10  ;;  %8746 = vmatprep.subr.bf16.mxu1 %v11259_v9 }
0x11b8   :  { %v5307_v24 = vpop.f32.mrb[32].mxu0  ;;  %v5378_v32 = vpop.f32.mrb[32].mxu1 }
0x11b9   :  { %v9185_v52 = vadd.f32 %v5307_v24, %v11405_v31  ;;  %v5309_v39 = vpop.f32.mrb[33].mxu0  ;;  %v5380_v42 = vpop.f32.mrb[33].mxu1  ;;  %v9201_v0 = vadd.f32 %v5378_v32, %v11417_v41 }
0x11ba   :  { %v9186_v13 = vadd.f32 %v5309_v39, %v11408_v27  ;;  %v9202_v45 = vadd.f32 %v5380_v42, %v11413_v55 }
0x11bb   :  { %v7282_v3 = vmul.f32 -1.442695, %v9185_v52 }
0x11bc   :  { %v7283_v26 = vmul.f32 -1.442695, %v9186_v13  ;;  %v7284_v38 = vmul.f32 -1.442695, %v9202_v45 }
0x11bd   :  { %9583 = vpow2.f32 %v7282_v3 }
0x11be   :  { %9585 = vpow2.f32 %v7283_v26 }
0x11bf   :  { %9587 = vpow2.f32 %v7284_v38 }
0x11c0   :  { %9589 = vtanh.f32 %v9201_v0 }
0x11c7   :  { %v9584_v30 = vpop.eup %9583 }
0x11c8   :  { %v9586_v25 = vpop.eup %9585  ;;  %v5390_v2 = vadd.f32 1.0, %v9584_v30 }
0x11c9   :  { %v5396_v16 = vadd.f32 1.0, %v9586_v25  ;;  %v9588_v47 = vpop.eup %9587 }
0x11ca   :  { %9591 = vrcp.f32 %v5390_v2  ;;  %v9590_v63 = vpop.eup %9589  ;;  %v5403_v52 = vadd.f32 1.0, %v9588_v47 }
0x11cb   :  { %9593 = vrcp.f32 %v5396_v16 }
0x11cc   :  { %9595 = vrcp.f32 %v5403_v52 }
0x11d4   :  { %v9592_v21 = vpop.eup %9591 }
0x11d5   :  { %v9594_v33 = vpop.eup %9593  ;;  %v5407_v24 = vmul.f32 %v9592_v21, %v9590_v63 }
0x11d6   :  { %v5406_v39 = vmul.f32 0.0, %v9594_v33  ;;  %v9596_v32 = vpop.eup %9595 }
0x11d8   :  { %v11420_v17 = vadd.f32 %v5407_v24, %v5406_v39 }
0x11da   :  { %9597 = vtanh.f32 %v11420_v17  ;;  %v5412_v39 = vsel %vm726_vm4, %v11420_v17, 0.0 }
0x11e4   :  { %v9598_v42 = vpop.eup %9597 }
0x11e5   :  { %v11423_v13 = vmul.f32 %v9598_v42, %v9596_v32 }
0x11e7   :  { %7315 = vmatmul.mubr.msk.f32.vlgmr.msra.gmra.mrb[34].mxu0 %vm726_vm4, %v11423_v13  ;;  %7316 = vmatmul.mubr.msk.f32.vlgmr.msra.gmra.mrb[34].mxu1 %vm726_vm4, %v11423_v13 }
0x11e8   :  { %8716 = vmatpush1.bf16.msra.mxu0 %v11261_v56  ;;  %8748 = vmatpush1.bf16.msra.mxu1 %v11264_v46 }
0x11e9   :  { %8718 = vmatprep.subr.bf16.mxu0 %v11269_v23  ;;  %8750 = vmatprep.subr.bf16.mxu1 %v11271_v49 }
0x11ea   :  { %5795 = vmatprep.mubr.f32.mxu0 %v11896_v57  ;;  %5866 = vmatprep.mubr.f32.mxu1 %v11896_v57 }
0x11ec   :  { %8720 = vmatpush1.bf16.msra.mxu0 %v11273_v4  ;;  %8752 = vmatpush1.bf16.msra.mxu1 %v11276_v29 }
0x11ed   :  { %8722 = vmatprep.subr.bf16.mxu0 %v11281_v37  ;;  %8754 = vmatprep.subr.bf16.mxu1 %v11283_v5 }
0x11f0   :  { %8724 = vmatpush1.bf16.msra.mxu0 %v11285_v62  ;;  %8756 = vmatpush1.bf16.msra.mxu1 %v11288_v50 }
0x11f1   :  { %8726 = vmatprep.subr.bf16.mxu0 %v11293_v34  ;;  %8758 = vmatprep.subr.bf16.mxu1 %v11295_v53 }
0x11f4   :  { %8728 = vmatpush1.bf16.msra.mxu0 %v11297_v20  ;;  %8760 = vmatpush1.bf16.msra.mxu1 %v11300_v1 }
0x11f5   :  { %8730 = vmatprep.subr.bf16.mxu0 %v11304_v6  ;;  %8762 = vmatprep.subr.bf16.mxu1 %v11306_v61 }
0x11f8   :  { %8732 = vmatpush1.bf16.msra.mxu0 %v11309_v8  ;;  %8764 = vmatpush1.bf16.msra.mxu1 %v11313_v54 }
0x11f9   :  { %8734 = vmatprep.subr.bf16.mxu0 %v11315_v44  ;;  %8766 = vmatprep.subr.bf16.mxu1 %v11317_v59 }
0x11fc   :  { %8736 = vmatpush1.bf16.msra.mxu0 %v11320_v11  ;;  %8768 = vmatpush1.bf16.msra.mxu1 %v11324_v22 }
0x11fd   :  { %8738 = vmatprep.subr.bf16.mxu0 %v11326_v18  ;;  %8770 = vmatprep.subr.bf16.mxu1 %v11329_v40 }
0x1200   :  { %8740 = vmatpush1.bf16.msra.mxu0 %v11332_v35  ;;  %8772 = vmatpush1.bf16.msra.mxu1 %v11336_v60 }
0x1201   :  { %8742 = vmatprep.subr.bf16.mxu0 %v11341_v14  ;;  %8774 = vmatprep.subr.bf16.mxu1 %v11343_v19 }
0x1204   :  { %8744 = vmatpush1.bf16.msra.mxu0 %v11345_v48  ;;  %8776 = vmatpush1.bf16.msra.mxu1 %v11348_v7 }
0x1205   :  { %8778 = vmatprep.subr.bf16.mxu0 %v11257_v10  ;;  %8810 = vmatprep.subr.bf16.mxu1 %v11259_v9 }
0x12ba   :  { %v5552_v3 = vpop.f32.mrb[34].mxu0  ;;  %v5623_v26 = vpop.f32.mrb[34].mxu1 }
0x12bb   :  { %v9187_v12 = vadd.f32 %v5552_v3, %v11405_v31  ;;  %v5554_v45 = vpop.f32.mrb[35].mxu0  ;;  %v5625_v36 = vpop.f32.mrb[35].mxu1  ;;  %v9203_v16 = vadd.f32 %v5623_v26, %v11417_v41 }
0x12bc   :  { %v9188_v38 = vadd.f32 %v5554_v45, %v11408_v27  ;;  %v9204_v25 = vadd.f32 %v5625_v36, %v11413_v55 }
0x12bd   :  { %v7285_v0 = vmul.f32 -1.442695, %v9187_v12 }
0x12be   :  { %v7286_v30 = vmul.f32 -1.442695, %v9188_v38  ;;  %v7287_v2 = vmul.f32 -1.442695, %v9204_v25 }
0x12bf   :  { %9599 = vpow2.f32 %v7285_v0 }
0x12c0   :  { %9601 = vpow2.f32 %v7286_v30  ;;  %v5411_v30 = vsel %vm726_vm4, %v11423_v13, 0.0  ;;  %v6160_v13 = vld [vmem:[#allocation14 + $0x18] sm:$0xff] }
0x12c1   :  { %9603 = vpow2.f32 %v7287_v2  ;;  %v6164_v2 = vld [vmem:[#allocation14 + $0x38] sm:$0xff] }
0x12c2   :  { %9605 = vtanh.f32 %v9203_v16  ;;  %v6157_v16 = vld [vmem:[#allocation14] sm:$0xff] }
0x12c9   :  { %v9600_v10 = vpop.eup %9599 }
0x12ca   :  { %v9602_v47 = vpop.eup %9601  ;;  %v5635_v9 = vadd.f32 1.0, %v9600_v10  ;;  %v6161_v10 = vld [vmem:[#allocation14 + $0x20] sm:$0xff] }
0x12cb   :  { %v5641_v63 = vadd.f32 1.0, %v9602_v47  ;;  %v9604_v21 = vpop.eup %9603  ;;  %v11538_v47 = vpack.c.bf16 %v6164_v2, %v6160_v13 }
0x12cc   :  { %9607 = vrcp.f32 %v5635_v9  ;;  %v9606_v33 = vpop.eup %9605  ;;  %v5648_v42 = vadd.f32 1.0, %v9604_v21  ;;  %v11540_v9 = vpack.c.bf16 %v6161_v10, %v6157_v16  ;;  %v6163_v21 = vld [vmem:[#allocation14 + $0x30] sm:$0xff] }
0x12cd   :  { %9609 = vrcp.f32 %v5641_v63  ;;  %v6159_v63 = vld [vmem:[#allocation14 + $0x10] sm:$0xff] }
0x12ce   :  { %9611 = vrcp.f32 %v5648_v42  ;;  %v6172_v42 = vld [vmem:[#allocation14 + $0x78] sm:$0xff]  ;;  %v6191_v16 = vld [vmem:[#allocation14 + $0x110] sm:$0xff] }
0x12cf   :  { %v6195_v10 = vld [vmem:[#allocation14 + $0x130] sm:$0xff] }
0x12d6   :  { %v9608_v24 = vpop.eup %9607 }
0x12d7   :  { %v9610_v52 = vpop.eup %9609  ;;  %v5652_v32 = vmul.f32 %v9608_v24, %v9606_v33  ;;  %v11543_v33 = vpack.c.bf16 %v6163_v21, %v6159_v63  ;;  %v6166_v24 = vld [vmem:[#allocation14 + $0x48] sm:$0xff]  ;;  %v11591_v21 = vpack.c.bf16 %v6195_v10, %v6191_v16  ;;  %v6215_v10 = vld [vmem:[#allocation14 + $0x1d0] sm:$0xff] }
0x12d8   :  { %v5651_v3 = vmul.f32 %v9610_v52, %v5412_v39  ;;  %v9612_v36 = vpop.eup %9611  ;;  %v6170_v52 = vld [vmem:[#allocation14 + $0x68] sm:$0xff] }
0x12d9   :  { %v6198_v63 = vld [vmem:[#allocation14 + $0x148] sm:$0xff] }
0x12da   :  { %v5653_v26 = vadd.f32 %v5652_v32, %v5651_v3  ;;  %v11548_v32 = vpack.c.bf16 %v6170_v52, %v6166_v24  ;;  %v6165_v3 = vld [vmem:[#allocation14 + $0x40] sm:$0xff]  ;;  %v6202_v24 = vld [vmem:[#allocation14 + $0x168] sm:$0xff]  ;;  %v6200_v52 = vld [vmem:[#allocation14 + $0x158] sm:$0xff] }
0x12dc   :  { %9613 = vtanh.f32 %v5653_v26  ;;  %v11474_v45 = vsel %vm978_vm9, %v5653_v26, %v5412_v39  ;;  %v6168_v39 = vld [vmem:[#allocation14 + $0x58] sm:$0xff]  ;;  %v6169_v26 = vld [vmem:[#allocation14 + $0x60] sm:$0xff] }
0x12dd   :  { %v11550_v12 = vpack.c.bf16 %v6172_v42, %v6168_v39  ;;  %v6204_v39 = vld [vmem:[#allocation14 + $0x178] sm:$0xff]  ;;  %v11595_v42 = vpack.c.bf16 %v6202_v24, %v6198_v63  ;;  %v6219_v63 = vld [vmem:[#allocation14 + $0x1f0] sm:$0xff] }
0x12e6   :  { %v9614_v38 = vpop.eup %9613 }
0x12e7   :  { %v5655_v0 = vmul.f32 %v9614_v38, %v9612_v36  ;;  %v6167_v36 = vld [vmem:[#allocation14 + $0x50] sm:$0xff] }
0x12e8   :  { %v6171_v38 = vld [vmem:[#allocation14 + $0x70] sm:$0xff] }
0x12e9   :  { %v11481_v17 = vsel %vm978_vm9, %v5655_v0, %v5411_v30  ;;  %v11555_v0 = vpack.c.bf16 %v6171_v38, %v6167_v36  ;;  %v6174_v30 = vld [vmem:[#allocation14 + $0x88] sm:$0xff]  ;;  %v6201_v36 = vld [vmem:[#allocation14 + $0x160] sm:$0xff]  ;;  %v6199_v38 = vld [vmem:[#allocation14 + $0x150] sm:$0xff] }
0x12ea   :  { %5796 = vmatmul.mubr.f32.vlgmr.msra.gmra.mrb[36].mxu0 %v11481_v17  ;;  %5867 = vmatmul.mubr.f32.vlgmr.msra.gmra.mrb[36].mxu1 %v11481_v17 }
0x12eb   :  { %8780 = vmatpush1.bf16.msra.mxu0 %v11261_v56  ;;  %8812 = vmatpush1.bf16.msra.mxu1 %v11264_v46 }
0x12ec   :  { %8782 = vmatprep.subr.bf16.mxu0 %v11269_v23  ;;  %8814 = vmatprep.subr.bf16.mxu1 %v11271_v49 }
0x12ed   :  { %6040 = vmatprep.mubr.f32.mxu0 %v11896_v57  ;;  %6111 = vmatprep.mubr.f32.mxu1 %v11896_v57 }
0x12ef   :  { %8784 = vmatpush1.bf16.msra.mxu0 %v11273_v4  ;;  %8816 = vmatpush1.bf16.msra.mxu1 %v11276_v29 }
0x12f0   :  { %8786 = vmatprep.subr.bf16.mxu0 %v11281_v37  ;;  %8818 = vmatprep.subr.bf16.mxu1 %v11283_v5 }
0x12f3   :  { %8788 = vmatpush1.bf16.msra.mxu0 %v11285_v62  ;;  %8820 = vmatpush1.bf16.msra.mxu1 %v11288_v50 }
0x12f4   :  { %8790 = vmatprep.subr.bf16.mxu0 %v11293_v34  ;;  %8822 = vmatprep.subr.bf16.mxu1 %v11295_v53 }
0x12f7   :  { %8792 = vmatpush1.bf16.msra.mxu0 %v11297_v20  ;;  %8824 = vmatpush1.bf16.msra.mxu1 %v11300_v1 }
0x12f8   :  { %8794 = vmatprep.subr.bf16.mxu0 %v11304_v6  ;;  %8826 = vmatprep.subr.bf16.mxu1 %v11306_v61 }
0x12fb   :  { %8796 = vmatpush1.bf16.msra.mxu0 %v11309_v8  ;;  %8828 = vmatpush1.bf16.msra.mxu1 %v11313_v54 }
0x12fc   :  { %8798 = vmatprep.subr.bf16.mxu0 %v11315_v44  ;;  %8830 = vmatprep.subr.bf16.mxu1 %v11317_v59 }
0x12ff   :  { %8800 = vmatpush1.bf16.msra.mxu0 %v11320_v11  ;;  %8832 = vmatpush1.bf16.msra.mxu1 %v11324_v22 }
0x1300   :  { %8802 = vmatprep.subr.bf16.mxu0 %v11326_v18  ;;  %8834 = vmatprep.subr.bf16.mxu1 %v11329_v40  ;;  %v6194_v18 = vld [vmem:[#allocation14 + $0x128] sm:$0xff] }
0x1303   :  { %8804 = vmatpush1.bf16.msra.mxu0 %v11332_v35  ;;  %8836 = vmatpush1.bf16.msra.mxu1 %v11336_v60 }
0x1304   :  { %8806 = vmatprep.subr.bf16.mxu0 %v11341_v14  ;;  %8838 = vmatprep.subr.bf16.mxu1 %v11343_v19 }
0x1307   :  { %8808 = vmatpush1.bf16.msra.mxu0 %v11345_v48  ;;  %8840 = vmatpush1.bf16.msra.mxu1 %v11348_v7  ;;  %v6158_v48 = vld [vmem:[#allocation14 + $0x8] sm:$0xff] }
0x1308   :  { %v6162_v7 = vld [vmem:[#allocation14 + $0x28] sm:$0xff]  ;;  %8874 = vmatprep.subr.bf16.mxu1 %v11538_v47 }
0x1309   :  { %v11536_v25 = vpack.c.bf16 %v6162_v7, %v6158_v48  ;;  %v6189_v48 = vld [vmem:[#allocation14 + $0x100] sm:$0xff] }
0x130a   :  { %v6193_v7 = vld [vmem:[#allocation14 + $0x120] sm:$0xff] }
0x130b   :  { %8842 = vmatprep.subr.bf16.mxu0 %v11536_v25  ;;  %v11588_v2 = vpack.c.bf16 %v6193_v7, %v6189_v48  ;;  %v6213_v48 = vld [vmem:[#allocation14 + $0x1c0] sm:$0xff] }
0x130c   :  { %v6217_v7 = vld [vmem:[#allocation14 + $0x1e0] sm:$0xff] }
0x130d   :  { %v11623_v24 = vpack.c.bf16 %v6217_v7, %v6213_v48 }
0x13bd   :  { %v5797_v43 = vpop.f32.mrb[36].mxu0  ;;  %v5868_v56 = vpop.f32.mrb[36].mxu1 }
0x13be   :  { %v9189_v46 = vadd.f32 %v5797_v43, %v11405_v31  ;;  %v5799_v23 = vpop.f32.mrb[37].mxu0  ;;  %v5870_v49 = vpop.f32.mrb[37].mxu1  ;;  %v9205_v50 = vadd.f32 %v5868_v56, %v11417_v41  ;;  %v6176_v43 = vld [vmem:[#allocation14 + $0x98] sm:$0xff] }
0x13bf   :  { %v9190_v4 = vadd.f32 %v5799_v23, %v11408_v27  ;;  %v9206_v5 = vadd.f32 %v5870_v49, %v11413_v55  ;;  %v6173_v23 = vld [vmem:[#allocation14 + $0x80] sm:$0xff] }
0x13c0   :  { %v7288_v29 = vmul.f32 -1.442695, %v9189_v46  ;;  %v6180_v46 = vld [vmem:[#allocation14 + $0xb8] sm:$0xff]  ;;  %v6177_v49 = vld [vmem:[#allocation14 + $0xa0] sm:$0xff] }
0x13c1   :  { %v7289_v37 = vmul.f32 -1.442695, %v9190_v4  ;;  %v7290_v62 = vmul.f32 -1.442695, %v9206_v5  ;;  %v11562_v4 = vpack.c.bf16 %v6180_v46, %v6176_v43  ;;  %v6179_v5 = vld [vmem:[#allocation14 + $0xb0] sm:$0xff]  ;;  %v6206_v43 = vld [vmem:[#allocation14 + $0x188] sm:$0xff] }
0x13c2   :  { %9615 = vpow2.f32 %v7288_v29  ;;  %v11564_v29 = vpack.c.bf16 %v6177_v49, %v6173_v23  ;;  %v6210_v46 = vld [vmem:[#allocation14 + $0x1a8] sm:$0xff] }
0x13c3   :  { %9617 = vpow2.f32 %v7289_v37  ;;  %v6175_v37 = vld [vmem:[#allocation14 + $0x90] sm:$0xff]  ;;  %v11606_v49 = vpack.c.bf16 %v6210_v46, %v6206_v43 }
0x13c4   :  { %9619 = vpow2.f32 %v7290_v62  ;;  %v11567_v62 = vpack.c.bf16 %v6179_v5, %v6175_v37  ;;  %v6208_v37 = vld [vmem:[#allocation14 + $0x198] sm:$0xff] }
0x13c5   :  { %9621 = vtanh.f32 %v9205_v50  ;;  %v6182_v50 = vld [vmem:[#allocation14 + $0xc8] sm:$0xff]  ;;  %v6212_v5 = vld [vmem:[#allocation14 + $0x1b8] sm:$0xff] }
0x13cc   :  { %v9616_v34 = vpop.eup %9615 }
0x13cd   :  { %v9618_v53 = vpop.eup %9617  ;;  %v5880_v20 = vadd.f32 1.0, %v9616_v34  ;;  %v6186_v34 = vld [vmem:[#allocation14 + $0xe8] sm:$0xff] }
0x13ce   :  { %v5886_v1 = vadd.f32 1.0, %v9618_v53  ;;  %v9620_v6 = vpop.eup %9619  ;;  %v6184_v53 = vld [vmem:[#allocation14 + $0xd8] sm:$0xff] }
0x13cf   :  { %9623 = vrcp.f32 %v5880_v20  ;;  %v9622_v61 = vpop.eup %9621  ;;  %v5893_v59 = vadd.f32 1.0, %v9620_v6  ;;  %v11572_v20 = vpack.c.bf16 %v6186_v34, %v6182_v50  ;;  %v6181_v6 = vld [vmem:[#allocation14 + $0xc0] sm:$0xff]  ;;  %v11608_v34 = vpack.c.bf16 %v6212_v5, %v6208_v37 }
0x13d0   :  { %9625 = vrcp.f32 %v5886_v1  ;;  %v6188_v1 = vld [vmem:[#allocation14 + $0xf8] sm:$0xff]  ;;  %v6205_v50 = vld [vmem:[#allocation14 + $0x180] sm:$0xff] }
0x13d1   :  { %9627 = vrcp.f32 %v5893_v59  ;;  %v6187_v59 = vld [vmem:[#allocation14 + $0xf0] sm:$0xff] }
0x13d9   :  { %v9624_v8 = vpop.eup %9623 }
0x13da   :  { %v9626_v54 = vpop.eup %9625  ;;  %v5897_v44 = vmul.f32 %v9624_v8, %v9622_v61  ;;  %v6185_v61 = vld [vmem:[#allocation14 + $0xe0] sm:$0xff]  ;;  %v11574_v8 = vpack.c.bf16 %v6188_v1, %v6184_v53  ;;  %v6207_v1 = vld [vmem:[#allocation14 + $0x190] sm:$0xff] }
0x13db   :  { %v5896_v11 = vmul.f32 %v9626_v54, %v11474_v45  ;;  %v9628_v35 = vpop.eup %9627  ;;  %v11576_v54 = vpack.c.bf16 %v6185_v61, %v6181_v6  ;;  %v6209_v53 = vld [vmem:[#allocation14 + $0x1a0] sm:$0xff]  ;;  %v6211_v6 = vld [vmem:[#allocation14 + $0x1b0] sm:$0xff] }
0x13dc   :  { %v11611_v61 = vpack.c.bf16 %v6209_v53, %v6205_v50 }
0x13dd   :  { %v5898_v22 = vadd.f32 %v5897_v44, %v5896_v11  ;;  %v6183_v44 = vld [vmem:[#allocation14 + $0xd0] sm:$0xff] }
0x13de   :  { %v11579_v11 = vpack.c.bf16 %v6187_v59, %v6183_v44  ;;  %v6214_v44 = vld [vmem:[#allocation14 + $0x1c8] sm:$0xff] }
0x13df   :  { %9629 = vtanh.f32 %v5898_v22  ;;  %v11525_v40 = vsel %vm1231_vm10, %v5898_v22, %v11474_v45  ;;  %v11552_v45 = vpack.c.bf16 %v6169_v26, %v6165_v3  ;;  %v6190_v22 = vld [vmem:[#allocation14 + $0x108] sm:$0xff]  ;;  %v11597_v3 = vpack.c.bf16 %v6204_v39, %v6200_v52  ;;  %v6197_v26 = vld [vmem:[#allocation14 + $0x140] sm:$0xff] }
0x13e0   :  { %v6218_v59 = vld [vmem:[#allocation14 + $0x1e8] sm:$0xff]  ;;  %v11627_v52 = vpack.c.bf16 %v6219_v63, %v6215_v10 }
0x13e9   :  { %v9630_v60 = vpop.eup %9629 }
0x13ea   :  { %v5900_v14 = vmul.f32 %v9630_v60, %v9628_v35  ;;  %v6192_v35 = vld [vmem:[#allocation14 + $0x118] sm:$0xff]  ;;  %v11584_v60 = vpack.c.bf16 %v6194_v18, %v6190_v22  ;;  %v11615_v18 = vpack.c.bf16 %v6211_v6, %v6207_v1 }
0x13eb   :  { %v6216_v22 = vld [vmem:[#allocation14 + $0x1d8] sm:$0xff] }
0x13ec   :  { %v11530_v19 = vsel %vm1231_vm10, %v5900_v14, %v11481_v17  ;;  %v6178_v17 = vld [vmem:[#allocation14 + $0xa8] sm:$0xff]  ;;  %v6196_v14 = vld [vmem:[#allocation14 + $0x138] sm:$0xff] }
0x13ed   :  { %6041 = vmatmul.mubr.f32.vlgmr.msra.gmra.mrb[38].mxu0 %v11530_v19  ;;  %6112 = vmatmul.mubr.f32.vlgmr.msra.gmra.mrb[38].mxu1 %v11530_v19  ;;  %v11560_v56 = vpack.c.bf16 %v6178_v17, %v6174_v30  ;;  %v11586_v13 = vpack.c.bf16 %v6196_v14, %v6192_v35  ;;  %v11600_v30 = vpack.c.bf16 %v6201_v36, %v6197_v26  ;;  %v6203_v17 = vld [vmem:[#allocation14 + $0x170] sm:$0xff]  ;;  %v6220_v14 = vld [vmem:[#allocation14 + $0x1f8] sm:$0xff] }
0x13ee   :  { %6285 = vmatprep.mubr.f32.mxu0 %v11896_v57  ;;  %6356 = vmatprep.mubr.f32.mxu1 %v11896_v57  ;;  %v11604_v23 = vpack.c.bf16 %v6203_v17, %v6199_v38  ;;  %v11617_v35 = vpack.c.bf16 %v6218_v59, %v6214_v44  ;;  %v11620_v16 = vpack.c.bf16 %v6220_v14, %v6216_v22 }
0x13ef   :  { %8844 = vmatpush1.bf16.msra.mxu0 %v11540_v9  ;;  %8876 = vmatpush1.bf16.msra.mxu1 %v11543_v33 }
0x13f0   :  { %8846 = vmatprep.subr.bf16.mxu0 %v11548_v32  ;;  %8878 = vmatprep.subr.bf16.mxu1 %v11550_v12 }
0x13f3   :  { %8848 = vmatpush1.bf16.msra.mxu0 %v11552_v45  ;;  %8880 = vmatpush1.bf16.msra.mxu1 %v11555_v0 }
0x13f4   :  { %8850 = vmatprep.subr.bf16.mxu0 %v11560_v56  ;;  %8882 = vmatprep.subr.bf16.mxu1 %v11562_v4 }
0x13f7   :  { %8852 = vmatpush1.bf16.msra.mxu0 %v11564_v29  ;;  %8884 = vmatpush1.bf16.msra.mxu1 %v11567_v62 }
0x13f8   :  { %8854 = vmatprep.subr.bf16.mxu0 %v11572_v20  ;;  %8886 = vmatprep.subr.bf16.mxu1 %v11574_v8 }
0x13fb   :  { %8856 = vmatpush1.bf16.msra.mxu0 %v11576_v54  ;;  %8888 = vmatpush1.bf16.msra.mxu1 %v11579_v11 }
0x13fc   :  { %8858 = vmatprep.subr.bf16.mxu0 %v11584_v60  ;;  %8890 = vmatprep.subr.bf16.mxu1 %v11586_v13 }
0x13ff   :  { %8860 = vmatpush1.bf16.msra.mxu0 %v11588_v2  ;;  %8892 = vmatpush1.bf16.msra.mxu1 %v11591_v21 }
0x1400   :  { %8862 = vmatprep.subr.bf16.mxu0 %v11595_v42  ;;  %8894 = vmatprep.subr.bf16.mxu1 %v11597_v3 }
0x1403   :  { %8864 = vmatpush1.bf16.msra.mxu0 %v11600_v30  ;;  %8896 = vmatpush1.bf16.msra.mxu1 %v11604_v23 }
0x1404   :  { %8866 = vmatprep.subr.bf16.mxu0 %v11606_v49  ;;  %8898 = vmatprep.subr.bf16.mxu1 %v11608_v34 }
0x1407   :  { %8868 = vmatpush1.bf16.msra.mxu0 %v11611_v61  ;;  %8900 = vmatpush1.bf16.msra.mxu1 %v11615_v18 }
0x1408   :  { %8870 = vmatprep.subr.bf16.mxu0 %v11617_v35  ;;  %8902 = vmatprep.subr.bf16.mxu1 %v11620_v16 }
0x140b   :  { %8872 = vmatpush1.bf16.msra.mxu0 %v11623_v24  ;;  %8904 = vmatpush1.bf16.msra.mxu1 %v11627_v52 }
0x140c   :  { %8906 = vmatprep.subr.bf16.mxu0 %v11536_v25  ;;  %8938 = vmatprep.subr.bf16.mxu1 %v11538_v47 }
0x14c0   :  { %v6042_v39 = vpop.f32.mrb[38].mxu0  ;;  %v6113_v26 = vpop.f32.mrb[38].mxu1 }
0x14c1   :  { %v9191_v36 = vadd.f32 %v6042_v39, %v11405_v31  ;;  %v6044_v38 = vpop.f32.mrb[39].mxu0  ;;  %v6115_v17 = vpop.f32.mrb[39].mxu1  ;;  %v9207_v53 = vadd.f32 %v6113_v26, %v11417_v41 }
0x14c2   :  { %v9192_v43 = vadd.f32 %v6044_v38, %v11408_v27  ;;  %v9208_v5 = vadd.f32 %v6115_v17, %v11413_v55 }
0x14c3   :  { %v7291_v46 = vmul.f32 -1.442695, %v9191_v36 }
0x14c4   :  { %v7292_v37 = vmul.f32 -1.442695, %v9192_v43  ;;  %v7293_v50 = vmul.f32 -1.442695, %v9208_v5 }
0x14c5   :  { %9631 = vpow2.f32 %v7291_v46 }
0x14c6   :  { %9633 = vpow2.f32 %v7292_v37 }
0x14c7   :  { %9635 = vpow2.f32 %v7293_v50 }
0x14c8   :  { %9637 = vtanh.f32 %v9207_v53 }
0x14cf   :  { %v9632_v1 = vpop.eup %9631 }
0x14d0   :  { %v9634_v6 = vpop.eup %9633  ;;  %v6125_v44 = vadd.f32 1.0, %v9632_v1 }
0x14d1   :  { %v6131_v59 = vadd.f32 1.0, %v9634_v6  ;;  %v9636_v22 = vpop.eup %9635 }
0x14d2   :  { %9639 = vrcp.f32 %v6125_v44  ;;  %v9638_v14 = vpop.eup %9637  ;;  %v6138_v63 = vadd.f32 1.0, %v9636_v22 }
0x14d3   :  { %9641 = vrcp.f32 %v6131_v59 }
0x14d4   :  { %9643 = vrcp.f32 %v6138_v63 }
0x14dc   :  { %v9640_v48 = vpop.eup %9639 }
0x14dd   :  { %v9642_v7 = vpop.eup %9641  ;;  %v6142_v10 = vmul.f32 %v9640_v48, %v9638_v14 }
0x14de   :  { %v6141_v39 = vmul.f32 %v9642_v7, %v11525_v40  ;;  %v9644_v17 = vpop.eup %9643 }
0x14e0   :  { %v6143_v36 = vadd.f32 %v6142_v10, %v6141_v39 }
0x14e2   :  { %9645 = vtanh.f32 %v6143_v36  ;;  %v11642_v38 = vsel %vm1484_vm11, %v6143_v36, %v11525_v40 }
0x14ec   :  { %v9646_v43 = vpop.eup %9645 }
0x14ed   :  { %v6145_v46 = vmul.f32 %v9646_v43, %v9644_v17 }
0x14ef   :  { %v11647_v37 = vsel %vm1484_vm11, %v6145_v46, %v11530_v19 }
0x14f0   :  { %6286 = vmatmul.mubr.f32.vlgmr.msra.gmra.mrb[40].mxu0 %v11647_v37  ;;  %6357 = vmatmul.mubr.f32.vlgmr.msra.gmra.mrb[40].mxu1 %v11647_v37 }
0x14f1   :  { %8908 = vmatpush1.bf16.msra.mxu0 %v11540_v9  ;;  %8940 = vmatpush1.bf16.msra.mxu1 %v11543_v33 }
0x14f2   :  { %8910 = vmatprep.subr.bf16.mxu0 %v11548_v32  ;;  %8942 = vmatprep.subr.bf16.mxu1 %v11550_v12 }
0x14f3   :  { %6530 = vmatprep.mubr.f32.mxu0 %v11896_v57  ;;  %6601 = vmatprep.mubr.f32.mxu1 %v11896_v57 }
0x14f5   :  { %8912 = vmatpush1.bf16.msra.mxu0 %v11552_v45  ;;  %8944 = vmatpush1.bf16.msra.mxu1 %v11555_v0 }
0x14f6   :  { %8914 = vmatprep.subr.bf16.mxu0 %v11560_v56  ;;  %8946 = vmatprep.subr.bf16.mxu1 %v11562_v4 }
0x14f9   :  { %8916 = vmatpush1.bf16.msra.mxu0 %v11564_v29  ;;  %8948 = vmatpush1.bf16.msra.mxu1 %v11567_v62 }
0x14fa   :  { %8918 = vmatprep.subr.bf16.mxu0 %v11572_v20  ;;  %8950 = vmatprep.subr.bf16.mxu1 %v11574_v8 }
0x14fd   :  { %8920 = vmatpush1.bf16.msra.mxu0 %v11576_v54  ;;  %8952 = vmatpush1.bf16.msra.mxu1 %v11579_v11 }
0x14fe   :  { %8922 = vmatprep.subr.bf16.mxu0 %v11584_v60  ;;  %8954 = vmatprep.subr.bf16.mxu1 %v11586_v13 }
0x1501   :  { %8924 = vmatpush1.bf16.msra.mxu0 %v11588_v2  ;;  %8956 = vmatpush1.bf16.msra.mxu1 %v11591_v21 }
0x1502   :  { %8926 = vmatprep.subr.bf16.mxu0 %v11595_v42  ;;  %8958 = vmatprep.subr.bf16.mxu1 %v11597_v3 }
0x1505   :  { %8928 = vmatpush1.bf16.msra.mxu0 %v11600_v30  ;;  %8960 = vmatpush1.bf16.msra.mxu1 %v11604_v23 }
0x1506   :  { %8930 = vmatprep.subr.bf16.mxu0 %v11606_v49  ;;  %8962 = vmatprep.subr.bf16.mxu1 %v11608_v34 }
0x1509   :  { %8932 = vmatpush1.bf16.msra.mxu0 %v11611_v61  ;;  %8964 = vmatpush1.bf16.msra.mxu1 %v11615_v18 }
0x150a   :  { %8934 = vmatprep.subr.bf16.mxu0 %v11617_v35  ;;  %8966 = vmatprep.subr.bf16.mxu1 %v11620_v16 }
0x150d   :  { %8936 = vmatpush1.bf16.msra.mxu0 %v11623_v24  ;;  %8968 = vmatpush1.bf16.msra.mxu1 %v11627_v52 }
0x150e   :  { %8970 = vmatprep.subr.bf16.mxu0 %v11536_v25  ;;  %9002 = vmatprep.subr.bf16.mxu1 %v11538_v47 }
0x15c3   :  { %v6287_v40 = vpop.f32.mrb[40].mxu0  ;;  %v6358_v19 = vpop.f32.mrb[40].mxu1 }
0x15c4   :  { %v9193_v5 = vadd.f32 %v6287_v40, %v11405_v31  ;;  %v6289_v50 = vpop.f32.mrb[41].mxu0  ;;  %v6360_v53 = vpop.f32.mrb[41].mxu1  ;;  %v9209_v14 = vadd.f32 %v6358_v19, %v11417_v41 }
0x15c5   :  { %v9194_v1 = vadd.f32 %v6289_v50, %v11408_v27  ;;  %v9210_v59 = vadd.f32 %v6360_v53, %v11413_v55 }
0x15c6   :  { %v7294_v6 = vmul.f32 -1.442695, %v9193_v5 }
0x15c7   :  { %v7295_v44 = vmul.f32 -1.442695, %v9194_v1  ;;  %v7296_v22 = vmul.f32 -1.442695, %v9210_v59 }
0x15c8   :  { %9647 = vpow2.f32 %v7294_v6 }
0x15c9   :  { %9649 = vpow2.f32 %v7295_v44 }
0x15ca   :  { %9651 = vpow2.f32 %v7296_v22 }
0x15cb   :  { %9653 = vtanh.f32 %v9209_v14 }
0x15d2   :  { %v9648_v48 = vpop.eup %9647 }
0x15d3   :  { %v9650_v7 = vpop.eup %9649  ;;  %v6370_v10 = vadd.f32 1.0, %v9648_v48 }
0x15d4   :  { %v6376_v63 = vadd.f32 1.0, %v9650_v7  ;;  %v9652_v39 = vpop.eup %9651 }
0x15d5   :  { %9655 = vrcp.f32 %v6370_v10  ;;  %v9654_v36 = vpop.eup %9653  ;;  %v6383_v46 = vadd.f32 1.0, %v9652_v39 }
0x15d6   :  { %9657 = vrcp.f32 %v6376_v63 }
0x15d7   :  { %9659 = vrcp.f32 %v6383_v46 }
0x15df   :  { %v9656_v26 = vpop.eup %9655 }
0x15e0   :  { %v9658_v17 = vpop.eup %9657  ;;  %v6387_v43 = vmul.f32 %v9656_v26, %v9654_v36 }
0x15e1   :  { %v6386_v40 = vmul.f32 %v9658_v17, %v11642_v38  ;;  %v9660_v50 = vpop.eup %9659 }
0x15e3   :  { %v6388_v5 = vadd.f32 %v6387_v43, %v6386_v40 }
0x15e5   :  { %9661 = vtanh.f32 %v6388_v5  ;;  %v11693_v19 = vsel %vm1737_vm12, %v6388_v5, %v11642_v38 }
0x15ef   :  { %v9662_v53 = vpop.eup %9661 }
0x15f0   :  { %v6390_v1 = vmul.f32 %v9662_v53, %v9660_v50 }
0x15f2   :  { %v11698_v6 = vsel %vm1737_vm12, %v6390_v1, %v11647_v37 }
0x15f3   :  { %6531 = vmatmul.mubr.f32.vlgmr.msra.gmra.mrb[42].mxu0 %v11698_v6  ;;  %6602 = vmatmul.mubr.f32.vlgmr.msra.gmra.mrb[42].mxu1 %v11698_v6 }
0x15f4   :  { %8972 = vmatpush1.bf16.msra.mxu0 %v11540_v9  ;;  %9004 = vmatpush1.bf16.msra.mxu1 %v11543_v33 }
0x15f5   :  { %8974 = vmatprep.subr.bf16.mxu0 %v11548_v32  ;;  %9006 = vmatprep.subr.bf16.mxu1 %v11550_v12 }
0x15f6   :  { %6775 = vmatprep.mubr.f32.mxu0 %v11896_v57  ;;  %6846 = vmatprep.mubr.f32.mxu1 %v11896_v57 }
0x15f8   :  { %8976 = vmatpush1.bf16.msra.mxu0 %v11552_v45  ;;  %9008 = vmatpush1.bf16.msra.mxu1 %v11555_v0 }
0x15f9   :  { %8978 = vmatprep.subr.bf16.mxu0 %v11560_v56  ;;  %9010 = vmatprep.subr.bf16.mxu1 %v11562_v4 }
0x15fc   :  { %8980 = vmatpush1.bf16.msra.mxu0 %v11564_v29  ;;  %9012 = vmatpush1.bf16.msra.mxu1 %v11567_v62 }
0x15fd   :  { %8982 = vmatprep.subr.bf16.mxu0 %v11572_v20  ;;  %9014 = vmatprep.subr.bf16.mxu1 %v11574_v8 }
0x1600   :  { %8984 = vmatpush1.bf16.msra.mxu0 %v11576_v54  ;;  %9016 = vmatpush1.bf16.msra.mxu1 %v11579_v11 }
0x1601   :  { %8986 = vmatprep.subr.bf16.mxu0 %v11584_v60  ;;  %9018 = vmatprep.subr.bf16.mxu1 %v11586_v13 }
0x1604   :  { %8988 = vmatpush1.bf16.msra.mxu0 %v11588_v2  ;;  %9020 = vmatpush1.bf16.msra.mxu1 %v11591_v21 }
0x1605   :  { %8990 = vmatprep.subr.bf16.mxu0 %v11595_v42  ;;  %9022 = vmatprep.subr.bf16.mxu1 %v11597_v3 }
0x1608   :  { %8992 = vmatpush1.bf16.msra.mxu0 %v11600_v30  ;;  %9024 = vmatpush1.bf16.msra.mxu1 %v11604_v23 }
0x1609   :  { %8994 = vmatprep.subr.bf16.mxu0 %v11606_v49  ;;  %9026 = vmatprep.subr.bf16.mxu1 %v11608_v34 }
0x160c   :  { %8996 = vmatpush1.bf16.msra.mxu0 %v11611_v61  ;;  %9028 = vmatpush1.bf16.msra.mxu1 %v11615_v18 }
0x160d   :  { %8998 = vmatprep.subr.bf16.mxu0 %v11617_v35  ;;  %9030 = vmatprep.subr.bf16.mxu1 %v11620_v16 }
0x1610   :  { %9000 = vmatpush1.bf16.msra.mxu0 %v11623_v24  ;;  %9032 = vmatpush1.bf16.msra.mxu1 %v11627_v52 }
0x1611   :  { %9034 = vmatprep.subr.bf16.mxu0 %v11536_v25  ;;  %9066 = vmatprep.subr.bf16.mxu1 %v11538_v47 }
0x16c6   :  { %v6532_v28 = vpop.f32.mrb[42].mxu0  ;;  %v6603_v38 = vpop.f32.mrb[42].mxu1 }
0x16c7   :  { %v9195_v37 = vadd.f32 %v6532_v28, %v11405_v31  ;;  %v6534_v44 = vpop.f32.mrb[43].mxu0  ;;  %v6605_v59 = vpop.f32.mrb[43].mxu1  ;;  %v9211_v63 = vadd.f32 %v6603_v38, %v11417_v41 }
0x16c8   :  { %v9196_v22 = vadd.f32 %v6534_v44, %v11408_v27  ;;  %v9212_v7 = vadd.f32 %v6605_v59, %v11413_v55 }
0x16c9   :  { %v7297_v14 = vmul.f32 -1.442695, %v9195_v37 }
0x16ca   :  { %v7298_v48 = vmul.f32 -1.442695, %v9196_v22  ;;  %v7299_v10 = vmul.f32 -1.442695, %v9212_v7  ;;  %v7136_v22 = vld [vmem:[%s11876_s11 + $0x20] sm:$0xff]  ;;  %v7138_v7 = vld [vmem:[%s11876_s11 + $0x30] sm:$0xff] }
0x16cb   :  { %9663 = vpow2.f32 %v7297_v14  ;;  %v7137_v14 = vld [vmem:[%s11876_s11 + $0x28] sm:$0xff] }
0x16cc   :  { %9665 = vpow2.f32 %v7298_v48  ;;  %v9104_v48 = vpack.c.bf16 %v7137_v14, %v7136_v22 }
0x16cd   :  { %9667 = vpow2.f32 %v7299_v10  ;;  %v7139_v10 = vld [vmem:[%s11876_s11 + $0x38] sm:$0xff] }
0x16ce   :  { %9669 = vtanh.f32 %v9211_v63  ;;  %v9107_v63 = vpack.c.bf16 %v7139_v10, %v7138_v7 }
0x16d5   :  { %v9664_v25 = vpop.eup %9663 }
0x16d6   :  { %v9666_v39 = vpop.eup %9665  ;;  %v6615_v47 = vadd.f32 1.0, %v9664_v25  ;;  %v7140_v25 = vld [vmem:[%s11876_s11 + $0x40] sm:$0xff] }
0x16d7   :  { %v6621_v36 = vadd.f32 1.0, %v9666_v39  ;;  %v9668_v26 = vpop.eup %9667  ;;  %v7141_v39 = vld [vmem:[%s11876_s11 + $0x48] sm:$0xff] }
0x16d8   :  { %9671 = vrcp.f32 %v6615_v47  ;;  %v9670_v17 = vpop.eup %9669  ;;  %v6628_v5 = vadd.f32 1.0, %v9668_v26  ;;  %v9110_v47 = vpack.c.bf16 %v7141_v39, %v7140_v25  ;;  %v7143_v26 = vld [vmem:[%s11876_s11 + $0x58] sm:$0xff] }
0x16d9   :  { %9673 = vrcp.f32 %v6621_v36  ;;  %v7142_v36 = vld [vmem:[%s11876_s11 + $0x50] sm:$0xff] }
0x16da   :  { %9675 = vrcp.f32 %v6628_v5  ;;  %v7146_v5 = vld [vmem:[%s11876_s11 + $0x70] sm:$0xff] }
0x16e2   :  { %v9672_v43 = vpop.eup %9671 }
0x16e3   :  { %v9674_v46 = vpop.eup %9673  ;;  %v6632_v40 = vmul.f32 %v9672_v43, %v9670_v17  ;;  %v9113_v17 = vpack.c.bf16 %v7143_v26, %v7142_v36  ;;  %v7144_v43 = vld [vmem:[%s11876_s11 + $0x60] sm:$0xff] }
0x16e4   :  { %v6631_v50 = vmul.f32 %v9674_v46, %v11693_v19  ;;  %v9676_v28 = vpop.eup %9675  ;;  %v7145_v46 = vld [vmem:[%s11876_s11 + $0x68] sm:$0xff] }
0x16e6   :  { %v6633_v53 = vadd.f32 %v6632_v40, %v6631_v50  ;;  %v9116_v40 = vpack.c.bf16 %v7145_v46, %v7144_v43  ;;  %v7147_v50 = vld [vmem:[%s11876_s11 + $0x78] sm:$0xff] }
0x16e8   :  { %9677 = vtanh.f32 %v6633_v53  ;;  %v11744_v1 = vsel %vm1990_vm13, %v6633_v53, %v11693_v19  ;;  %v9861_v19 = vmov 0.0|0.0   ;;  %v9119_v53 = vpack.c.bf16 %v7147_v50, %v7146_v5 }
0x16f2   :  { %v9678_v38 = vpop.eup %9677 }
0x16f3   :  { %v6635_v37 = vmul.f32 %v9678_v38, %v9676_v28 }
0x16f5   :  { %v11749_v44 = vsel %vm1990_vm13, %v6635_v37, %v11698_v6  ;;  %v7135_v6 = vld [vmem:[%s11876_s11 + $0x18] sm:$0xff] }
0x16f6   :  { %6776 = vmatmul.mubr.f32.vlgmr.msra.gmra.mrb[44].mxu0 %v11749_v44  ;;  %6847 = vmatmul.mubr.f32.vlgmr.msra.gmra.mrb[44].mxu1 %v11749_v44  ;;  %v9101_v59 = vpack.c.bf16 %v7135_v6, %v7134_v15 }
0x16f7   :  { %9036 = vmatpush1.bf16.msra.mxu0 %v11540_v9  ;;  %9068 = vmatpush1.bf16.msra.mxu1 %v11543_v33 }
0x16f8   :  { %9038 = vmatprep.subr.bf16.mxu0 %v11548_v32  ;;  %9070 = vmatprep.subr.bf16.mxu1 %v11550_v12 }
0x16f9   :  { %7020 = vmatprep.mubr.f32.mxu0 %v11896_v57  ;;  %7091 = vmatprep.mubr.f32.mxu1 %v11896_v57 }
0x16fb   :  { %9040 = vmatpush1.bf16.msra.mxu0 %v11552_v45  ;;  %9072 = vmatpush1.bf16.msra.mxu1 %v11555_v0 }
0x16fc   :  { %9042 = vmatprep.subr.bf16.mxu0 %v11560_v56  ;;  %9074 = vmatprep.subr.bf16.mxu1 %v11562_v4 }
0x16ff   :  { %9044 = vmatpush1.bf16.msra.mxu0 %v11564_v29  ;;  %9076 = vmatpush1.bf16.msra.mxu1 %v11567_v62 }
0x1700   :  { %9046 = vmatprep.subr.bf16.mxu0 %v11572_v20  ;;  %9078 = vmatprep.subr.bf16.mxu1 %v11574_v8 }
0x1703   :  { %9048 = vmatpush1.bf16.msra.mxu0 %v11576_v54  ;;  %9080 = vmatpush1.bf16.msra.mxu1 %v11579_v11 }
0x1704   :  { %9050 = vmatprep.subr.bf16.mxu0 %v11584_v60  ;;  %9082 = vmatprep.subr.bf16.mxu1 %v11586_v13 }
0x1707   :  { %9052 = vmatpush1.bf16.msra.mxu0 %v11588_v2  ;;  %9084 = vmatpush1.bf16.msra.mxu1 %v11591_v21 }
0x1708   :  { %9054 = vmatprep.subr.bf16.mxu0 %v11595_v42  ;;  %9086 = vmatprep.subr.bf16.mxu1 %v11597_v3 }
0x170b   :  { %9056 = vmatpush1.bf16.msra.mxu0 %v11600_v30  ;;  %9088 = vmatpush1.bf16.msra.mxu1 %v11604_v23 }
0x170c   :  { %9058 = vmatprep.subr.bf16.mxu0 %v11606_v49  ;;  %9090 = vmatprep.subr.bf16.mxu1 %v11608_v34 }
0x170f   :  { %9060 = vmatpush1.bf16.msra.mxu0 %v11611_v61  ;;  %9092 = vmatpush1.bf16.msra.mxu1 %v11615_v18 }
0x1710   :  { %9062 = vmatprep.subr.bf16.mxu0 %v11617_v35  ;;  %9094 = vmatprep.subr.bf16.mxu1 %v11620_v16  ;;  %v7132_v16 = vld [vmem:[%s11876_s11] sm:$0xff] }
0x1713   :  { %9064 = vmatpush1.bf16.msra.mxu0 %v11623_v24  ;;  %9096 = vmatpush1.bf16.msra.mxu1 %v11627_v52  ;;  %v7133_v24 = vld [vmem:[%s11876_s11 + $0x8] sm:$0xff] }
0x1714   :  { %v9098_v52 = vpack.c.bf16 %v7133_v24, %v7132_v16  ;;  %9097 = vmatprep.subr.bf16.mxu0 %v9861_v19 }
0x17c9   :  { %v6777_v51 = vpop.f32.mrb[44].mxu0  ;;  %v6848_v9 = vpop.f32.mrb[44].mxu1 }
0x17ca   :  { %v9197_v33 = vadd.f32 %v6777_v51, %v11405_v31  ;;  %v6779_v32 = vpop.f32.mrb[45].mxu0  ;;  %v6850_v12 = vpop.f32.mrb[45].mxu1  ;;  %v9213_v62 = vadd.f32 %v6848_v9, %v11417_v41 }
0x17cb   :  { %v9198_v45 = vadd.f32 %v6779_v32, %v11408_v27  ;;  %v9214_v4 = vadd.f32 %v6850_v12, %v11413_v55 }
0x17cc   :  { %v7300_v0 = vmul.f32 -1.442695, %v9197_v33 }
0x17cd   :  { %v7301_v56 = vmul.f32 -1.442695, %v9198_v45  ;;  %v7302_v29 = vmul.f32 -1.442695, %v9214_v4 }
0x17ce   :  { %9679 = vpow2.f32 %v7300_v0 }
0x17cf   :  { %9681 = vpow2.f32 %v7301_v56 }
0x17d0   :  { %9683 = vpow2.f32 %v7302_v29 }
0x17d1   :  { %9685 = vtanh.f32 %v9213_v62 }
0x17d8   :  { %v9680_v20 = vpop.eup %9679 }
0x17d9   :  { %v9682_v8 = vpop.eup %9681  ;;  %v6860_v54 = vadd.f32 1.0, %v9680_v20 }
0x17da   :  { %v6866_v11 = vadd.f32 1.0, %v9682_v8  ;;  %v9684_v60 = vpop.eup %9683 }
0x17db   :  { %9687 = vrcp.f32 %v6860_v54  ;;  %v9686_v13 = vpop.eup %9685  ;;  %v6873_v3 = vadd.f32 1.0, %v9684_v60 }
0x17dc   :  { %9689 = vrcp.f32 %v6866_v11 }
0x17dd   :  { %9691 = vrcp.f32 %v6873_v3 }
0x17e5   :  { %v9688_v2 = vpop.eup %9687 }
0x17e6   :  { %v9690_v21 = vpop.eup %9689  ;;  %v6877_v42 = vmul.f32 %v9688_v2, %v9686_v13  ;;  %v7306_v2 = vld [vmem:[%s11877_s12] ss:$0 sm:$0xff] }
0x17e7   :  { %v6876_v30 = vmul.f32 %v9690_v21, %v11744_v1  ;;  %v9692_v34 = vpop.eup %9691 }
0x17e9   :  { %v6878_v23 = vadd.f32 %v6877_v42, %v6876_v30 }
0x17eb   :  { %9693 = vtanh.f32 %v6878_v23  ;;  %v11793_v49 = vsel %vm2243_vm14, %v6878_v23, %v11744_v1 }
0x17f5   :  { %v9694_v61 = vpop.eup %9693 }
0x17f6   :  { %v6880_v18 = vmul.f32 %v9694_v61, %v9692_v34 }
0x17f8   :  { %v11798_v35 = vsel %vm2243_vm14, %v6880_v18, %v11749_v44 }
0x17f9   :  { %7021 = vmatmul.mubr.f32.vlgmr.msra.gmra.mrb[46].mxu0 %v11798_v35  ;;  %7092 = vmatmul.mubr.f32.vlgmr.msra.gmra.mrb[46].mxu1 %v11798_v35 }
0x17fa   :  { %9099 = vmatpush3.bf16.msra.mxu0 %v9098_v52  ;;  %7366 = vmatprep.mubr.msk.f32.mxu0 %vm9862_vm0, %v11896_v57 }
0x17fb   :  { %9100 = vmatprep.subr.bf16.mxu0 %v9861_v19 }
0x17fe   :  { %9102 = vmatpush3.bf16.msra.mxu0 %v9101_v59 }
0x17ff   :  { %9103 = vmatprep.subr.bf16.mxu0 %v9861_v19 }
0x1802   :  { %9105 = vmatpush3.bf16.msra.mxu0 %v9104_v48 }
0x1803   :  { %9106 = vmatprep.subr.bf16.mxu0 %v9861_v19 }
0x1806   :  { %9108 = vmatpush3.bf16.msra.mxu0 %v9107_v63 }
0x1807   :  { %9109 = vmatprep.subr.bf16.mxu0 %v9861_v19 }
0x180a   :  { %9111 = vmatpush3.bf16.msra.mxu0 %v9110_v47 }
0x180b   :  { %9112 = vmatprep.subr.bf16.mxu0 %v9861_v19 }
0x180e   :  { %9114 = vmatpush3.bf16.msra.mxu0 %v9113_v17 }
0x180f   :  { %9115 = vmatprep.subr.bf16.mxu0 %v9861_v19 }
0x1812   :  { %9117 = vmatpush3.bf16.msra.mxu0 %v9116_v40 }
0x1813   :  { %9118 = vmatprep.subr.bf16.mxu0 %v9861_v19 }
0x1816   :  { %9120 = vmatpush3.bf16.msra.mxu0 %v9119_v53 }
0x18cc   :  { %v7022_v1 = vpop.f32.mrb[46].mxu0  ;;  %v7093_v28 = vpop.f32.mrb[46].mxu1 }
0x18cd   :  { %v9199_v38 = vadd.f32 %v7022_v1, %v11405_v31  ;;  %v7024_v57 = vpop.f32.mrb[47].mxu0  ;;  %v7095_v37 = vpop.f32.mrb[47].mxu1  ;;  %v9215_v12 = vadd.f32 %v7093_v28, %v11417_v41 }
0x18ce   :  { %v9200_v44 = vadd.f32 %v7024_v57, %v11408_v27  ;;  %v9216_v33 = vadd.f32 %v7095_v37, %v11413_v55 }
0x18cf   :  { %v7303_v51 = vmul.f32 -1.442695, %v9199_v38 }
0x18d0   :  { %v7304_v9 = vmul.f32 -1.442695, %v9200_v44  ;;  %v7305_v32 = vmul.f32 -1.442695, %v9216_v33 }
0x18d1   :  { %9695 = vpow2.f32 %v7303_v51 }
0x18d2   :  { %9697 = vpow2.f32 %v7304_v9 }
0x18d3   :  { %9699 = vpow2.f32 %v7305_v32 }
0x18d4   :  { %9701 = vtanh.f32 %v9215_v12 }
0x18db   :  { %v9696_v45 = vpop.eup %9695 }
0x18dc   :  { %v9698_v0 = vpop.eup %9697  ;;  %v7105_v56 = vadd.f32 1.0, %v9696_v45 }
0x18dd   :  { %v7111_v4 = vadd.f32 1.0, %v9698_v0  ;;  %v9700_v31 = vpop.eup %9699 }
0x18de   :  { %9703 = vrcp.f32 %v7105_v56  ;;  %v9702_v29 = vpop.eup %9701  ;;  %v7118_v8 = vadd.f32 1.0, %v9700_v31 }
0x18df   :  { %9705 = vrcp.f32 %v7111_v4 }
0x18e0   :  { %9707 = vrcp.f32 %v7118_v8 }
0x18e8   :  { %v9704_v27 = vpop.eup %9703 }
0x18e9   :  { %v9706_v62 = vpop.eup %9705  ;;  %v7122_v20 = vmul.f32 %v9704_v27, %v9702_v29 }
0x18ea   :  { %v7121_v54 = vmul.f32 %v9706_v62, %v11793_v49  ;;  %v9708_v41 = vpop.eup %9707 }
0x18ec   :  { %v7123_v55 = vadd.f32 %v7122_v20, %v7121_v54 }
0x18ee   :  { %9709 = vtanh.f32 %v7123_v55 }
0x18f8   :  { %v9710_v11 = vpop.eup %9709 }
0x18f9   :  { %v7125_v60 = vmul.f32 %v9710_v11, %v9708_v41 }
0x18fb   :  { %v7126_v13 = vsel %vm2496_vm15, %v7125_v60, %v11798_v35 }
0x18fc   :  { %7367 = vmatmul.mubr.f32.vlgmr.msra.gmra.mrb[48].mxu0 %v7126_v13 }
0x19cf   :  { %v7221_v21 = vpop.f32.mrb[48].mxu0 }
0x19d0   :  { %v7222_v42 = vadd.f32 %v7306_v2, %v7221_v21  ;;  %v7368_v3 = vpop.f32.mrb[49].mxu0 }
0x19d2   :  { %7225 = vst [vmem:[%s11878_s13] sm:$0xff] %v7222_v42 }
0x19d3   :  { %7230 = vsyncpa [#allocation7], 1 }
0x19d4   :  { %7231 = vsyncpa [#allocation9], 1 }
0x19d5   :  { %7232 = vsyncpa [#allocation12], 1 }
0x19d6   :  { %7233 = vsyncpa [#allocation15], 1 }

</bundles_post_ra>
